<compile_context>
chip_gen: v7x
topology: tpu7x:2x2x1
jax: 0.10.0
libtpu: 0.0.40
codegen_flags: <defaults>
</compile_context>

<pallas_src>
import functools

import jax
import jax.numpy as jnp
from jax import lax
from jax.experimental import pallas as pl
from jax.experimental.pallas import tpu as pltpu

NEG_SLOPE = 0.2
BN_EPS = 1e-5


def _round_up(x, m):
    return (x + m - 1) // m * m


# ---------------------------------------------------------------------------
# Kernel 1: layer-0 conv (im2col matmul) with fused bias + LeakyReLU.
# Grid over M only ("parallel" -> megacore); K and N are full-extent blocks.
# ---------------------------------------------------------------------------
def _conv_bias_lrelu_kernel(a_ref, b_ref, bias_ref, o_ref, *, neg_slope):
    y = jnp.dot(a_ref[...], b_ref[...], preferred_element_type=jnp.float32)
    y = y + bias_ref[...]                         # per-output-channel bias
    o_ref[...] = jnp.where(y >= 0, y, neg_slope * y)


def conv_bias_lrelu_matmul(a, b, bias, *, neg_slope=NEG_SLOPE):
    """LeakyReLU(A @ B + bias[None, :]); A/B bf16 operands, f32 accumulation."""
    M, K = a.shape
    K2, N = b.shape
    assert K == K2
    tm = M
    for cand in (512, 256, 128):
        if M % cand == 0 and M // cand >= 2:      # >=2 blocks for v7x megacore
            tm = cand
            break
    return pl.pallas_call(
        functools.partial(_conv_bias_lrelu_kernel, neg_slope=neg_slope),
        out_shape=jax.ShapeDtypeStruct((M, N), jnp.float32),
        grid=(M // tm,),
        in_specs=[pl.BlockSpec((tm, K), lambda i: (i, 0)),
                  pl.BlockSpec((K, N), lambda i: (0, 0)),
                  pl.BlockSpec((1, N), lambda i: (0, 0))],
        out_specs=pl.BlockSpec((tm, N), lambda i: (i, 0)),
        compiler_params=pltpu.CompilerParams(
            dimension_semantics=("parallel",)),
    )(a, b, bias.reshape(1, N).astype(jnp.float32))


# ---------------------------------------------------------------------------
# Kernel 2: conv (im2col matmul) with fused BatchNorm (training-mode batch
# statistics) + LeakyReLU.  The (Mp, N) output block is resident in VMEM
# across the K ("arbitrary") grid axis and accumulated directly in o_ref; the
# last K step computes the per-channel mean / biased variance over the true M
# rows (padded rows of A are exactly zero, so plain sums are exact) and
# applies gamma/beta + LeakyReLU in place before writeback.
# ---------------------------------------------------------------------------
def _conv_bn_lrelu_kernel(a_ref, b_ref, gamma_ref, beta_ref, o_ref, *,
                          inv_m, eps, neg_slope):
    k = pl.program_id(0)

    @pl.when(k == 0)
    def _():
        o_ref[...] = jnp.zeros_like(o_ref)

    o_ref[...] += jnp.dot(a_ref[...], b_ref[...],
                          preferred_element_type=jnp.float32)

    @pl.when(k == pl.num_programs(0) - 1)
    def _():
        x = o_ref[...]
        s1 = jnp.sum(x, axis=0, keepdims=True)
        s2 = jnp.sum(x * x, axis=0, keepdims=True)
        mean = s1 * inv_m
        var = jnp.maximum(s2 * inv_m - mean * mean, 0.0)   # biased var (PyTorch fwd)
        y = (x - mean) * lax.rsqrt(var + eps) * gamma_ref[...] + beta_ref[...]
        o_ref[...] = jnp.where(y >= 0, y, neg_slope * y)   # LeakyReLU(0.2)


def conv_bn_lrelu_matmul(a, b, gamma, beta, *, eps=BN_EPS,
                         neg_slope=NEG_SLOPE, max_tk=2048):
    M, K = a.shape
    K2, N = b.shape
    assert K == K2
    Mp = _round_up(M, 8)
    if Mp != M:
        a = jnp.pad(a, ((0, Mp - M), (0, 0)))     # exact zero rows -> zero conv rows
    tk = K
    for cand in (max_tk, 1024, 512, 256, 128):
        if cand <= K and K % cand == 0:
            tk = cand
            break
    out = pl.pallas_call(
        functools.partial(_conv_bn_lrelu_kernel, inv_m=1.0 / M,
                          eps=eps, neg_slope=neg_slope),
        out_shape=jax.ShapeDtypeStruct((Mp, N), jnp.float32),
        grid=(K // tk,),
        in_specs=[pl.BlockSpec((Mp, tk), lambda k: (0, k)),
                  pl.BlockSpec((tk, N), lambda k: (k, 0)),
                  pl.BlockSpec((1, N), lambda k: (0, 0)),
                  pl.BlockSpec((1, N), lambda k: (0, 0))],
        out_specs=pl.BlockSpec((Mp, N), lambda k: (0, 0)),
        compiler_params=pltpu.CompilerParams(
            dimension_semantics=("arbitrary",)),
    )(a, b, gamma.reshape(1, N).astype(jnp.float32),
      beta.reshape(1, N).astype(jnp.float32))
    return out[:M] if Mp != M else out


# ---------------------------------------------------------------------------
# Kernel 3: final conv (out_channels == 1) as a lane-axis multiply-reduce
# (VPU + XLU) instead of a 1-column MXU matmul; K is consumed in static
# 2048-lane chunks to bound vreg pressure.
# ---------------------------------------------------------------------------
def _final_conv_kernel(a_ref, w_ref, bias_ref, o_ref, *, k_chunk):
    M, K = a_ref.shape
    acc = jnp.zeros((M, 1), jnp.float32)
    for off in range(0, K, k_chunk):              # static, unrolled
        a = a_ref[:, off:off + k_chunk].astype(jnp.float32)
        w = w_ref[:, off:off + k_chunk].astype(jnp.float32)
        acc = acc + jnp.sum(a * w, axis=1, keepdims=True)
    o_ref[...] = acc + bias_ref[...]


def final_conv_matmul(a, w_row, bias, *, k_chunk=2048):
    M, K = a.shape
    if K % k_chunk != 0:
        k_chunk = K
    return pl.pallas_call(
        functools.partial(_final_conv_kernel, k_chunk=k_chunk),
        out_shape=jax.ShapeDtypeStruct((M, 1), jnp.float32),
        grid=(1,),
        in_specs=[pl.BlockSpec((M, K), lambda i: (0, 0)),
                  pl.BlockSpec((1, K), lambda i: (0, 0)),
                  pl.BlockSpec((1, 1), lambda i: (0, 0))],
        out_specs=pl.BlockSpec((M, 1), lambda i: (0, 0)),
    )(a, w_row, jnp.reshape(bias, (1, 1)).astype(jnp.float32))


# ---------------------------------------------------------------------------
# Glue (plain JAX, fused by XLA): reflect pad + im2col + weight reshape.
# TODO(synk): im2col is still materialized by XLA; pulling the strided (p,q)
# windows straight from the NHWC tensor inside the kernel (extra K grid axes
# with strided index maps / manual DMA) would remove one more HBM round trip.
# ---------------------------------------------------------------------------
def _im2col(x, kh, kw, stride):
    N, H, W, C = x.shape
    Ho = (H - kh) // stride + 1
    Wo = (W - kw) // stride + 1
    cols = []
    for p in range(kh):
        for q in range(kw):
            cols.append(x[:, p:p + stride * Ho:stride,
                          q:q + stride * Wo:stride, :])
    col = jnp.stack(cols, axis=3)                 # (N, Ho, Wo, kh*kw, C)
    return col.reshape(N * Ho * Wo, kh * kw * C), Ho, Wo


def _prep_operands(x_nhwc, w_oihw, *, stride, pad):
    """Reflect-pad + im2col; both matmul operands cast to bf16."""
    if pad > 0:
        x_nhwc = jnp.pad(x_nhwc, ((0, 0), (pad, pad), (pad, pad), (0, 0)),
                         mode="reflect")          # padding_mode='reflect'
    O, I, kh, kw = w_oihw.shape
    a, Ho, Wo = _im2col(x_nhwc.astype(jnp.bfloat16), kh, kw, stride)
    b = jnp.transpose(w_oihw, (2, 3, 1, 0)).reshape(kh * kw * I, O)
    return a, b.astype(jnp.bfloat16), Ho, Wo, O


# ---------------------------------------------------------------------------
# Discriminator forward (accepts NCHW like the PyTorch module)
# ---------------------------------------------------------------------------
def discriminator_forward(params, x_nchw, y_nchw, features=(64, 128, 256, 512)):
    h = jnp.concatenate([x_nchw, y_nchw], axis=1)          # cat along channels
    h = jnp.transpose(h, (0, 2, 3, 1))                     # NCHW -> NHWC
    batch = h.shape[0]

    # initial: Conv(k4,s2,p1 reflect, bias) + LeakyReLU(0.2)
    a, b, Ho, Wo, O = _prep_operands(h, params["w0"], stride=2, pad=1)
    h = conv_bias_lrelu_matmul(a, b, params["b0"]).reshape(batch, Ho, Wo, O)

    # CNN blocks: Conv(k4, stride, p0, no bias) + BN(batch stats) + LeakyReLU
    n = len(features)
    for idx in range(1, n):
        stride = 1 if idx == n - 1 else 2
        a, b, Ho, Wo, O = _prep_operands(h, params[f"w{idx}"],
                                         stride=stride, pad=0)
        h = conv_bn_lrelu_matmul(a, b, params[f"g{idx}"], params[f"be{idx}"]
                                 ).reshape(batch, Ho, Wo, O)

    # final: Conv(->1, k4, s1, p1 reflect, bias), no activation
    a, b, Ho, Wo, O = _prep_operands(h, params["w_out"], stride=1, pad=1)
    h = final_conv_matmul(a, jnp.reshape(b, (1, -1)), params["b_out"]
                          ).reshape(batch, Ho, Wo, O)
    return jnp.transpose(h, (0, 3, 1, 2))                  # NHWC -> NCHW


def init_params(key, in_channels=3, features=(64, 128, 256, 512)):
    keys = jax.random.split(key, 4 + len(features))
    params = {}

    def conv_w(k, o, i):
        return jax.random.normal(k, (o, i, 4, 4), jnp.float32) * 0.05

    params["w0"] = conv_w(keys[0], features[0], in_channels * 2)
    params["b0"] = jax.random.normal(keys[1], (features[0],), jnp.float32) * 0.05
    for idx in range(1, len(features)):
        params[f"w{idx}"] = conv_w(keys[1 + idx], features[idx], features[idx - 1])
        params[f"g{idx}"] = jnp.ones((features[idx],), jnp.float32)    # BN gamma
        params[f"be{idx}"] = jnp.zeros((features[idx],), jnp.float32)  # BN beta
    params["w_out"] = conv_w(keys[-2], 1, features[-1])
    params["b_out"] = jax.random.normal(keys[-1], (1,), jnp.float32) * 0.05
    return params


# ---------------------------------------------------------------------------
# Pure-JAX reference.  It mirrors the kernel's numeric policy (bf16 conv
# operands, f32 accumulation, f32 BN/activation) so the comparison isolates
# implementation bugs rather than bf16 operand rounding.
# ---------------------------------------------------------------------------
def _ref_conv(x, w_oihw, stride, pad, bias):
    if pad > 0:
        x = jnp.pad(x, ((0, 0), (pad, pad), (pad, pad), (0, 0)), mode="reflect")
    w_hwio = jnp.transpose(w_oihw, (2, 3, 1, 0))
    y = lax.conv_general_dilated(
        x.astype(jnp.bfloat16), w_hwio.astype(jnp.bfloat16),
        (stride, stride), "VALID",
        dimension_numbers=("NHWC", "HWIO", "NHWC"),
        preferred_element_type=jnp.float32)
    return y if bias is None else y + bias


def _lrelu(x):
    return jnp.where(x >= 0, x, NEG_SLOPE * x)


def reference_forward(params, x, y, features=(64, 128, 256, 512)):
    h = jnp.transpose(jnp.concatenate([x, y], axis=1), (0, 2, 3, 1))
    h = _lrelu(_ref_conv(h, params["w0"], 2, 1, params["b0"]))
    n = len(features)
    for idx in range(1, n):
        s = 1 if idx == n - 1 else 2
        h = _ref_conv(h, params[f"w{idx}"], s, 0, None)
        mean = jnp.mean(h, axis=(0, 1, 2), keepdims=True)
        var = jnp.mean((h - mean) ** 2, axis=(0, 1, 2), keepdims=True)
        h = _lrelu((h - mean) * lax.rsqrt(var + BN_EPS)
                   * params[f"g{idx}"] + params[f"be{idx}"])
    h = _ref_conv(h, params["w_out"], 1, 1, params["b_out"])
    return jnp.transpose(h, (0, 3, 1, 2))


if __name__ == "__main__":
    key = jax.random.PRNGKey(0)
    kx, ky, kp = jax.random.split(key, 3)

    B, CIN, H, W = 2, 3, 64, 64
    FEATURES = (64, 128, 256, 512)

    x = jax.random.normal(kx, (B, CIN, H, W), jnp.float32)
    y = jax.random.normal(ky, (B, CIN, H, W), jnp.float32)
    params = init_params(kp, in_channels=CIN, features=FEATURES)

    fwd = jax.jit(functools.partial(discriminator_forward, features=FEATURES))
    out = jax.block_until_ready(fwd(params, x, y))

    # Expected PatchGAN spatial trace: 64 -> 32 -> 15 -> 6 -> 3 -> 2
    assert out.shape == (B, 1, 2, 2), out.shape

    ref = reference_forward(params, x, y, features=FEATURES)
    err = float(jnp.max(jnp.abs(out - ref)))
    assert jnp.allclose(out, ref, atol=1e-2, rtol=1e-2), f"max|err|={err}"

    print("KERNEL_OK")
</pallas_src>

<mosaic_0001>
module attributes {stable_mosaic.version = 11 : i64} {
  func.func @_conv_bias_lrelu_kernel(%arg0: i32, %arg1: memref<512x96xbf16, #tpu.memory_space<vmem>>, %arg2: memref<96x64xbf16, #tpu.memory_space<vmem>>, %arg3: memref<1x64xf32, #tpu.memory_space<vmem>>, %arg4: memref<512x64xf32, #tpu.memory_space<vmem>>) attributes {dimension_semantics = [#tpu.dimension_semantics<parallel>], iteration_bounds = array<i64: 4>, scalar_prefetch = 0 : i64, scratch_operands = 0 : i64, tpu.core_type = #tpu.core_type<tc>, window_params = [{transform_indices = @transform_0, window_bounds = array<i64: 512, 96>}, {pipeline_mode = #tpu.pipeline_mode<synchronous>, transform_indices = @transform_1, window_bounds = array<i64: 96, 64>}, {pipeline_mode = #tpu.pipeline_mode<synchronous>, transform_indices = @transform_2, window_bounds = array<i64: 1, 64>}, {transform_indices = @transform_3, window_bounds = array<i64: 512, 64>}]} {
    %c0 = arith.constant 0 : index
    %c0_0 = arith.constant 0 : index
    %0 = vector.load %arg1[%c0, %c0_0] : memref<512x96xbf16, #tpu.memory_space<vmem>>, vector<512x96xbf16>
    %c0_1 = arith.constant 0 : index
    %c0_2 = arith.constant 0 : index
    %1 = vector.load %arg2[%c0_1, %c0_2] : memref<96x64xbf16, #tpu.memory_space<vmem>>, vector<96x64xbf16>
    %cst = arith.constant dense<0.000000e+00> : vector<512x64xf32>
    %2 = tpu.matmul %0, %1, %cst {dimension_numbers = #tpu.dot_dimension_numbers<[1], [0], [0], [1], [0, 0, 1, 1], [], []>} : vector<512x96xbf16>, vector<96x64xbf16>, vector<512x64xf32> -> vector<512x64xf32>
    %c0_3 = arith.constant 0 : index
    %c0_4 = arith.constant 0 : index
    %3 = vector.load %arg3[%c0_3, %c0_4] : memref<1x64xf32, #tpu.memory_space<vmem>>, vector<1x64xf32>
    %4 = vector.broadcast %3 : vector<1x64xf32> to vector<512x64xf32>
    %5 = arith.addf %2, %4 : vector<512x64xf32>
    %cst_5 = arith.constant 0.000000e+00 : f32
    %6 = vector.broadcast %cst_5 : f32 to vector<512x64xf32>
    %7 = arith.cmpf oge, %5, %6 : vector<512x64xf32>
    %cst_6 = arith.constant 2.000000e-01 : f32
    %8 = vector.broadcast %cst_6 : f32 to vector<512x64xf32>
    %9 = arith.mulf %8, %5 : vector<512x64xf32>
    %10 = arith.select %7, %5, %9 : vector<512x64xi1>, vector<512x64xf32>
    %c0_7 = arith.constant 0 : index
    %c0_8 = arith.constant 0 : index
    %11 = vector.load %arg4[%c0_7, %c0_8] : memref<512x64xf32, #tpu.memory_space<vmem>>, vector<512x64xf32>
    tpu.vector_store %arg4[%c0_7, %c0_8], %10 {strides = array<i32>} : memref<512x64xf32, #tpu.memory_space<vmem>>, vector<512x64xf32>,
    return
  }
  func.func @transform_0(%arg0: i32) -> (i32, i32) {
    %c0_i32 = arith.constant 0 : i32
    %c0_i32_0 = arith.constant 0 : i32
    return %arg0, %c0_i32 : i32, i32
  }
  func.func @transform_1(%arg0: i32) -> (i32, i32) {
    %c0_i32 = arith.constant 0 : i32
    %c0_i32_0 = arith.constant 0 : i32
    %c0_i32_1 = arith.constant 0 : i32
    return %c0_i32, %c0_i32_0 : i32, i32
  }
  func.func @transform_2(%arg0: i32) -> (i32, i32) {
    %c0_i32 = arith.constant 0 : i32
    %c0_i32_0 = arith.constant 0 : i32
    %c0_i32_1 = arith.constant 0 : i32
    return %c0_i32, %c0_i32_0 : i32, i32
  }
  func.func @transform_3(%arg0: i32) -> (i32, i32) {
    %c0_i32 = arith.constant 0 : i32
    %c0_i32_0 = arith.constant 0 : i32
    return %arg0, %c0_i32 : i32, i32
  }
}

module attributes {stable_mosaic.version = 11 : i64} {
  func.func @_conv_bn_lrelu_kernel(%arg0: i32, %arg1: memref<456x1024xbf16, #tpu.memory_space<vmem>>, %arg2: memref<1024x128xbf16, #tpu.memory_space<vmem>>, %arg3: memref<1x128xf32, #tpu.memory_space<vmem>>, %arg4: memref<1x128xf32, #tpu.memory_space<vmem>>, %arg5: memref<456x128xf32, #tpu.memory_space<vmem>>) attributes {dimension_semantics = [#tpu.dimension_semantics<arbitrary>], iteration_bounds = array<i64: 1>, scalar_prefetch = 0 : i64, scratch_operands = 0 : i64, tpu.core_type = #tpu.core_type<tc>, window_params = [{transform_indices = @transform_0, window_bounds = array<i64: 456, 1024>}, {transform_indices = @transform_1, window_bounds = array<i64: 1024, 128>}, {pipeline_mode = #tpu.pipeline_mode<synchronous>, transform_indices = @transform_2, window_bounds = array<i64: 1, 128>}, {pipeline_mode = #tpu.pipeline_mode<synchronous>, transform_indices = @transform_3, window_bounds = array<i64: 1, 128>}, {pipeline_mode = #tpu.pipeline_mode<synchronous>, transform_indices = @transform_4, window_bounds = array<i64: 456, 128>}]} {
    %c0_i32 = arith.constant 0 : i32
    %0 = arith.cmpi eq, %arg0, %c0_i32 : i32
    %1 = arith.extui %0 : i1 to i32
    %c0_i32_0 = arith.constant 0 : i32
    %2 = arith.cmpi ne, %1, %c0_i32_0 : i32
    scf.if %2 {
      %cst_10 = arith.constant 0.000000e+00 : f32
      %12 = vector.broadcast %cst_10 : f32 to vector<456x128xf32>
      %c0_11 = arith.constant 0 : index
      %c0_12 = arith.constant 0 : index
      %13 = vector.load %arg5[%c0_11, %c0_12] : memref<456x128xf32, #tpu.memory_space<vmem>>, vector<456x128xf32>
      tpu.vector_store %arg5[%c0_11, %c0_12], %12 {strides = array<i32>} : memref<456x128xf32, #tpu.memory_space<vmem>>, vector<456x128xf32>,
    } else {
    }
    %c0 = arith.constant 0 : index
    %c0_1 = arith.constant 0 : index
    %3 = vector.load %arg5[%c0, %c0_1] : memref<456x128xf32, #tpu.memory_space<vmem>>, vector<456x128xf32>
    %c0_2 = arith.constant 0 : index
    %c0_3 = arith.constant 0 : index
    %4 = vector.load %arg1[%c0_2, %c0_3] : memref<456x1024xbf16, #tpu.memory_space<vmem>>, vector<456x1024xbf16>
    %c0_4 = arith.constant 0 : index
    %c0_5 = arith.constant 0 : index
    %5 = vector.load %arg2[%c0_4, %c0_5] : memref<1024x128xbf16, #tpu.memory_space<vmem>>, vector<1024x128xbf16>
    %cst = arith.constant dense<0.000000e+00> : vector<456x128xf32>
    %6 = tpu.matmul %4, %5, %cst {dimension_numbers = #tpu.dot_dimension_numbers<[1], [0], [0], [1], [0, 0, 1, 1], [], []>} : vector<456x1024xbf16>, vector<1024x128xbf16>, vector<456x128xf32> -> vector<456x128xf32>
    %7 = arith.addf %3, %6 : vector<456x128xf32>
    %c0_6 = arith.constant 0 : index
    %c0_7 = arith.constant 0 : index
    %8 = vector.load %arg5[%c0_6, %c0_7] : memref<456x128xf32, #tpu.memory_space<vmem>>, vector<456x128xf32>
    tpu.vector_store %arg5[%c0_6, %c0_7], %7 {strides = array<i32>} : memref<456x128xf32, #tpu.memory_space<vmem>>, vector<456x128xf32>,
    %c0_i32_8 = arith.constant 0 : i32
    %9 = arith.cmpi eq, %arg0, %c0_i32_8 : i32
    %10 = arith.extui %9 : i1 to i32
    %c0_i32_9 = arith.constant 0 : i32
    %11 = arith.cmpi ne, %10, %c0_i32_9 : i32
    scf.if %11 {
      %c0_10 = arith.constant 0 : index
      %c0_11 = arith.constant 0 : index
      %12 = vector.load %arg5[%c0_10, %c0_11] : memref<456x128xf32, #tpu.memory_space<vmem>>, vector<456x128xf32>
      %cst_12 = arith.constant dense<0.000000e+00> : vector<128xf32>
      %13 = vector.multi_reduction <add>, %12, %cst_12 [0] : vector<456x128xf32> to vector<128xf32>
      %14 = vector.shape_cast %13 : vector<128xf32> to vector<1x128xf32>
      %15 = arith.mulf %12, %12 : vector<456x128xf32>
      %cst_13 = arith.constant dense<0.000000e+00> : vector<128xf32>
      %16 = vector.multi_reduction <add>, %15, %cst_13 [0] : vector<456x128xf32> to vector<128xf32>
      %17 = vector.shape_cast %16 : vector<128xf32> to vector<1x128xf32>
      %cst_14 = arith.constant 0.00222222228 : f32
      %18 = vector.broadcast %cst_14 : f32 to vector<1x128xf32>
      %19 = arith.mulf %14, %18 : vector<1x128xf32>
      %cst_15 = arith.constant 0.00222222228 : f32
      %20 = vector.broadcast %cst_15 : f32 to vector<1x128xf32>
      %21 = arith.mulf %17, %20 : vector<1x128xf32>
      %22 = arith.mulf %19, %19 : vector<1x128xf32>
      %23 = arith.subf %21, %22 : vector<1x128xf32>
      %cst_16 = arith.constant 0.000000e+00 : f32
      %24 = vector.broadcast %cst_16 : f32 to vector<1x128xf32>
      %25 = arith.maximumf %23, %24 : vector<1x128xf32>
      %26 = vector.broadcast %19 : vector<1x128xf32> to vector<456x128xf32>
      %27 = arith.subf %12, %26 : vector<456x128xf32>
      %cst_17 = arith.constant 9.99999974E-6 : f32
      %28 = vector.broadcast %cst_17 : f32 to vector<1x128xf32>
      %29 = arith.addf %25, %28 : vector<1x128xf32>
      %30 = math.rsqrt %29 : vector<1x128xf32>
      %31 = vector.broadcast %30 : vector<1x128xf32> to vector<456x128xf32>
      %32 = arith.mulf %27, %31 : vector<456x128xf32>
      %c0_18 = arith.constant 0 : index
      %c0_19 = arith.constant 0 : index
      %33 = vector.load %arg3[%c0_18, %c0_19] : memref<1x128xf32, #tpu.memory_space<vmem>>, vector<1x128xf32>
      %34 = vector.broadcast %33 : vector<1x128xf32> to vector<456x128xf32>
      %35 = arith.mulf %32, %34 : vector<456x128xf32>
      %c0_20 = arith.constant 0 : index
      %c0_21 = arith.constant 0 : index
      %36 = vector.load %arg4[%c0_20, %c0_21] : memref<1x128xf32, #tpu.memory_space<vmem>>, vector<1x128xf32>
      %37 = vector.broadcast %36 : vector<1x128xf32> to vector<456x128xf32>
      %38 = arith.addf %35, %37 : vector<456x128xf32>
      %cst_22 = arith.constant 0.000000e+00 : f32
      %39 = vector.broadcast %cst_22 : f32 to vector<456x128xf32>
      %40 = arith.cmpf oge, %38, %39 : vector<456x128xf32>
      %cst_23 = arith.constant 2.000000e-01 : f32
      %41 = vector.broadcast %cst_23 : f32 to vector<456x128xf32>
      %42 = arith.mulf %41, %38 : vector<456x128xf32>
      %43 = arith.select %40, %38, %42 : vector<456x128xi1>, vector<456x128xf32>
      %c0_24 = arith.constant 0 : index
      %c0_25 = arith.constant 0 : index
      %44 = vector.load %arg5[%c0_24, %c0_25] : memref<456x128xf32, #tpu.memory_space<vmem>>, vector<456x128xf32>
      tpu.vector_store %arg5[%c0_24, %c0_25], %43 {strides = array<i32>} : memref<456x128xf32, #tpu.memory_space<vmem>>, vector<456x128xf32>,
    } else {
    }
    return
  }
  func.func @transform_0(%arg0: i32) -> (i32, i32) {
    %c0_i32 = arith.constant 0 : i32
    %c0_i32_0 = arith.constant 0 : i32
    return %c0_i32, %arg0 : i32, i32
  }
  func.func @transform_1(%arg0: i32) -> (i32, i32) {
    %c0_i32 = arith.constant 0 : i32
    %c0_i32_0 = arith.constant 0 : i32
    return %arg0, %c0_i32 : i32, i32
  }
  func.func @transform_2(%arg0: i32) -> (i32, i32) {
    %c0_i32 = arith.constant 0 : i32
    %c0_i32_0 = arith.constant 0 : i32
    %c0_i32_1 = arith.constant 0 : i32
    return %c0_i32, %c0_i32_0 : i32, i32
  }
  func.func @transform_3(%arg0: i32) -> (i32, i32) {
    %c0_i32 = arith.constant 0 : i32
    %c0_i32_0 = arith.constant 0 : i32
    %c0_i32_1 = arith.constant 0 : i32
    return %c0_i32, %c0_i32_0 : i32, i32
  }
  func.func @transform_4(%arg0: i32) -> (i32, i32) {
    %c0_i32 = arith.constant 0 : i32
    %c0_i32_0 = arith.constant 0 : i32
    %c0_i32_1 = arith.constant 0 : i32
    return %c0_i32, %c0_i32_0 : i32, i32
  }
}

module attributes {stable_mosaic.version = 11 : i64} {
  func.func @_conv_bn_lrelu_kernel(%arg0: i32, %arg1: memref<72x2048xbf16, #tpu.memory_space<vmem>>, %arg2: memref<2048x256xbf16, #tpu.memory_space<vmem>>, %arg3: memref<1x256xf32, #tpu.memory_space<vmem>>, %arg4: memref<1x256xf32, #tpu.memory_space<vmem>>, %arg5: memref<72x256xf32, #tpu.memory_space<vmem>>) attributes {dimension_semantics = [#tpu.dimension_semantics<arbitrary>], iteration_bounds = array<i64: 1>, scalar_prefetch = 0 : i64, scratch_operands = 0 : i64, tpu.core_type = #tpu.core_type<tc>, window_params = [{transform_indices = @transform_0, window_bounds = array<i64: 72, 2048>}, {transform_indices = @transform_1, window_bounds = array<i64: 2048, 256>}, {pipeline_mode = #tpu.pipeline_mode<synchronous>, transform_indices = @transform_2, window_bounds = array<i64: 1, 256>}, {pipeline_mode = #tpu.pipeline_mode<synchronous>, transform_indices = @transform_3, window_bounds = array<i64: 1, 256>}, {pipeline_mode = #tpu.pipeline_mode<synchronous>, transform_indices = @transform_4, window_bounds = array<i64: 72, 256>}]} {
    %c0_i32 = arith.constant 0 : i32
    %0 = arith.cmpi eq, %arg0, %c0_i32 : i32
    %1 = arith.extui %0 : i1 to i32
    %c0_i32_0 = arith.constant 0 : i32
    %2 = arith.cmpi ne, %1, %c0_i32_0 : i32
    scf.if %2 {
      %cst_10 = arith.constant 0.000000e+00 : f32
      %12 = vector.broadcast %cst_10 : f32 to vector<72x256xf32>
      %c0_11 = arith.constant 0 : index
      %c0_12 = arith.constant 0 : index
      %13 = vector.load %arg5[%c0_11, %c0_12] : memref<72x256xf32, #tpu.memory_space<vmem>>, vector<72x256xf32>
      tpu.vector_store %arg5[%c0_11, %c0_12], %12 {strides = array<i32>} : memref<72x256xf32, #tpu.memory_space<vmem>>, vector<72x256xf32>,
    } else {
    }
    %c0 = arith.constant 0 : index
    %c0_1 = arith.constant 0 : index
    %3 = vector.load %arg5[%c0, %c0_1] : memref<72x256xf32, #tpu.memory_space<vmem>>, vector<72x256xf32>
    %c0_2 = arith.constant 0 : index
    %c0_3 = arith.constant 0 : index
    %4 = vector.load %arg1[%c0_2, %c0_3] : memref<72x2048xbf16, #tpu.memory_space<vmem>>, vector<72x2048xbf16>
    %c0_4 = arith.constant 0 : index
    %c0_5 = arith.constant 0 : index
    %5 = vector.load %arg2[%c0_4, %c0_5] : memref<2048x256xbf16, #tpu.memory_space<vmem>>, vector<2048x256xbf16>
    %cst = arith.constant dense<0.000000e+00> : vector<72x256xf32>
    %6 = tpu.matmul %4, %5, %cst {dimension_numbers = #tpu.dot_dimension_numbers<[1], [0], [0], [1], [0, 0, 1, 1], [], []>} : vector<72x2048xbf16>, vector<2048x256xbf16>, vector<72x256xf32> -> vector<72x256xf32>
    %7 = arith.addf %3, %6 : vector<72x256xf32>
    %c0_6 = arith.constant 0 : index
    %c0_7 = arith.constant 0 : index
    %8 = vector.load %arg5[%c0_6, %c0_7] : memref<72x256xf32, #tpu.memory_space<vmem>>, vector<72x256xf32>
    tpu.vector_store %arg5[%c0_6, %c0_7], %7 {strides = array<i32>} : memref<72x256xf32, #tpu.memory_space<vmem>>, vector<72x256xf32>,
    %c0_i32_8 = arith.constant 0 : i32
    %9 = arith.cmpi eq, %arg0, %c0_i32_8 : i32
    %10 = arith.extui %9 : i1 to i32
    %c0_i32_9 = arith.constant 0 : i32
    %11 = arith.cmpi ne, %10, %c0_i32_9 : i32
    scf.if %11 {
      %c0_10 = arith.constant 0 : index
      %c0_11 = arith.constant 0 : index
      %12 = vector.load %arg5[%c0_10, %c0_11] : memref<72x256xf32, #tpu.memory_space<vmem>>, vector<72x256xf32>
      %cst_12 = arith.constant dense<0.000000e+00> : vector<256xf32>
      %13 = vector.multi_reduction <add>, %12, %cst_12 [0] : vector<72x256xf32> to vector<256xf32>
      %14 = vector.shape_cast %13 : vector<256xf32> to vector<1x256xf32>
      %15 = arith.mulf %12, %12 : vector<72x256xf32>
      %cst_13 = arith.constant dense<0.000000e+00> : vector<256xf32>
      %16 = vector.multi_reduction <add>, %15, %cst_13 [0] : vector<72x256xf32> to vector<256xf32>
      %17 = vector.shape_cast %16 : vector<256xf32> to vector<1x256xf32>
      %cst_14 = arith.constant 0.013888889 : f32
      %18 = vector.broadcast %cst_14 : f32 to vector<1x256xf32>
      %19 = arith.mulf %14, %18 : vector<1x256xf32>
      %cst_15 = arith.constant 0.013888889 : f32
      %20 = vector.broadcast %cst_15 : f32 to vector<1x256xf32>
      %21 = arith.mulf %17, %20 : vector<1x256xf32>
      %22 = arith.mulf %19, %19 : vector<1x256xf32>
      %23 = arith.subf %21, %22 : vector<1x256xf32>
      %cst_16 = arith.constant 0.000000e+00 : f32
      %24 = vector.broadcast %cst_16 : f32 to vector<1x256xf32>
      %25 = arith.maximumf %23, %24 : vector<1x256xf32>
      %26 = vector.broadcast %19 : vector<1x256xf32> to vector<72x256xf32>
      %27 = arith.subf %12, %26 : vector<72x256xf32>
      %cst_17 = arith.constant 9.99999974E-6 : f32
      %28 = vector.broadcast %cst_17 : f32 to vector<1x256xf32>
      %29 = arith.addf %25, %28 : vector<1x256xf32>
      %30 = math.rsqrt %29 : vector<1x256xf32>
      %31 = vector.broadcast %30 : vector<1x256xf32> to vector<72x256xf32>
      %32 = arith.mulf %27, %31 : vector<72x256xf32>
      %c0_18 = arith.constant 0 : index
      %c0_19 = arith.constant 0 : index
      %33 = vector.load %arg3[%c0_18, %c0_19] : memref<1x256xf32, #tpu.memory_space<vmem>>, vector<1x256xf32>
      %34 = vector.broadcast %33 : vector<1x256xf32> to vector<72x256xf32>
      %35 = arith.mulf %32, %34 : vector<72x256xf32>
      %c0_20 = arith.constant 0 : index
      %c0_21 = arith.constant 0 : index
      %36 = vector.load %arg4[%c0_20, %c0_21] : memref<1x256xf32, #tpu.memory_space<vmem>>, vector<1x256xf32>
      %37 = vector.broadcast %36 : vector<1x256xf32> to vector<72x256xf32>
      %38 = arith.addf %35, %37 : vector<72x256xf32>
      %cst_22 = arith.constant 0.000000e+00 : f32
      %39 = vector.broadcast %cst_22 : f32 to vector<72x256xf32>
      %40 = arith.cmpf oge, %38, %39 : vector<72x256xf32>
      %cst_23 = arith.constant 2.000000e-01 : f32
      %41 = vector.broadcast %cst_23 : f32 to vector<72x256xf32>
      %42 = arith.mulf %41, %38 : vector<72x256xf32>
      %43 = arith.select %40, %38, %42 : vector<72x256xi1>, vector<72x256xf32>
      %c0_24 = arith.constant 0 : index
      %c0_25 = arith.constant 0 : index
      %44 = vector.load %arg5[%c0_24, %c0_25] : memref<72x256xf32, #tpu.memory_space<vmem>>, vector<72x256xf32>
      tpu.vector_store %arg5[%c0_24, %c0_25], %43 {strides = array<i32>} : memref<72x256xf32, #tpu.memory_space<vmem>>, vector<72x256xf32>,
    } else {
    }
    return
  }
  func.func @transform_0(%arg0: i32) -> (i32, i32) {
    %c0_i32 = arith.constant 0 : i32
    %c0_i32_0 = arith.constant 0 : i32
    return %c0_i32, %arg0 : i32, i32
  }
  func.func @transform_1(%arg0: i32) -> (i32, i32) {
    %c0_i32 = arith.constant 0 : i32
    %c0_i32_0 = arith.constant 0 : i32
    return %arg0, %c0_i32 : i32, i32
  }
  func.func @transform_2(%arg0: i32) -> (i32, i32) {
    %c0_i32 = arith.constant 0 : i32
    %c0_i32_0 = arith.constant 0 : i32
    %c0_i32_1 = arith.constant 0 : i32
    return %c0_i32, %c0_i32_0 : i32, i32
  }
  func.func @transform_3(%arg0: i32) -> (i32, i32) {
    %c0_i32 = arith.constant 0 : i32
    %c0_i32_0 = arith.constant 0 : i32
    %c0_i32_1 = arith.constant 0 : i32
    return %c0_i32, %c0_i32_0 : i32, i32
  }
  func.func @transform_4(%arg0: i32) -> (i32, i32) {
    %c0_i32 = arith.constant 0 : i32
    %c0_i32_0 = arith.constant 0 : i32
    %c0_i32_1 = arith.constant 0 : i32
    return %c0_i32, %c0_i32_0 : i32, i32
  }
}

module attributes {stable_mosaic.version = 11 : i64} {
  func.func @_conv_bn_lrelu_kernel(%arg0: i32, %arg1: memref<24x2048xbf16, #tpu.memory_space<vmem>>, %arg2: memref<2048x512xbf16, #tpu.memory_space<vmem>>, %arg3: memref<1x512xf32, #tpu.memory_space<vmem>>, %arg4: memref<1x512xf32, #tpu.memory_space<vmem>>, %arg5: memref<24x512xf32, #tpu.memory_space<vmem>>) attributes {dimension_semantics = [#tpu.dimension_semantics<arbitrary>], iteration_bounds = array<i64: 2>, scalar_prefetch = 0 : i64, scratch_operands = 0 : i64, tpu.core_type = #tpu.core_type<tc>, window_params = [{transform_indices = @transform_0, window_bounds = array<i64: 24, 2048>}, {transform_indices = @transform_1, window_bounds = array<i64: 2048, 512>}, {pipeline_mode = #tpu.pipeline_mode<synchronous>, transform_indices = @transform_2, window_bounds = array<i64: 1, 512>}, {pipeline_mode = #tpu.pipeline_mode<synchronous>, transform_indices = @transform_3, window_bounds = array<i64: 1, 512>}, {pipeline_mode = #tpu.pipeline_mode<synchronous>, transform_indices = @transform_4, window_bounds = array<i64: 24, 512>}]} {
    %c0_i32 = arith.constant 0 : i32
    %0 = arith.cmpi eq, %arg0, %c0_i32 : i32
    %1 = arith.extui %0 : i1 to i32
    %c0_i32_0 = arith.constant 0 : i32
    %2 = arith.cmpi ne, %1, %c0_i32_0 : i32
    scf.if %2 {
      %cst_9 = arith.constant 0.000000e+00 : f32
      %12 = vector.broadcast %cst_9 : f32 to vector<24x512xf32>
      %c0_10 = arith.constant 0 : index
      %c0_11 = arith.constant 0 : index
      %13 = vector.load %arg5[%c0_10, %c0_11] : memref<24x512xf32, #tpu.memory_space<vmem>>, vector<24x512xf32>
      tpu.vector_store %arg5[%c0_10, %c0_11], %12 {strides = array<i32>} : memref<24x512xf32, #tpu.memory_space<vmem>>, vector<24x512xf32>,
    } else {
    }
    %c0 = arith.constant 0 : index
    %c0_1 = arith.constant 0 : index
    %3 = vector.load %arg5[%c0, %c0_1] : memref<24x512xf32, #tpu.memory_space<vmem>>, vector<24x512xf32>
    %c0_2 = arith.constant 0 : index
    %c0_3 = arith.constant 0 : index
    %4 = vector.load %arg1[%c0_2, %c0_3] : memref<24x2048xbf16, #tpu.memory_space<vmem>>, vector<24x2048xbf16>
    %c0_4 = arith.constant 0 : index
    %c0_5 = arith.constant 0 : index
    %5 = vector.load %arg2[%c0_4, %c0_5] : memref<2048x512xbf16, #tpu.memory_space<vmem>>, vector<2048x512xbf16>
    %cst = arith.constant dense<0.000000e+00> : vector<24x512xf32>
    %6 = tpu.matmul %4, %5, %cst {dimension_numbers = #tpu.dot_dimension_numbers<[1], [0], [0], [1], [0, 0, 1, 1], [], []>} : vector<24x2048xbf16>, vector<2048x512xbf16>, vector<24x512xf32> -> vector<24x512xf32>
    %7 = arith.addf %3, %6 : vector<24x512xf32>
    %c0_6 = arith.constant 0 : index
    %c0_7 = arith.constant 0 : index
    %8 = vector.load %arg5[%c0_6, %c0_7] : memref<24x512xf32, #tpu.memory_space<vmem>>, vector<24x512xf32>
    tpu.vector_store %arg5[%c0_6, %c0_7], %7 {strides = array<i32>} : memref<24x512xf32, #tpu.memory_space<vmem>>, vector<24x512xf32>,
    %c1_i32 = arith.constant 1 : i32
    %9 = arith.cmpi eq, %arg0, %c1_i32 : i32
    %10 = arith.extui %9 : i1 to i32
    %c0_i32_8 = arith.constant 0 : i32
    %11 = arith.cmpi ne, %10, %c0_i32_8 : i32
    scf.if %11 {
      %c0_9 = arith.constant 0 : index
      %c0_10 = arith.constant 0 : index
      %12 = vector.load %arg5[%c0_9, %c0_10] : memref<24x512xf32, #tpu.memory_space<vmem>>, vector<24x512xf32>
      %cst_11 = arith.constant dense<0.000000e+00> : vector<512xf32>
      %13 = vector.multi_reduction <add>, %12, %cst_11 [0] : vector<24x512xf32> to vector<512xf32>
      %14 = vector.shape_cast %13 : vector<512xf32> to vector<1x512xf32>
      %15 = arith.mulf %12, %12 : vector<24x512xf32>
      %cst_12 = arith.constant dense<0.000000e+00> : vector<512xf32>
      %16 = vector.multi_reduction <add>, %15, %cst_12 [0] : vector<24x512xf32> to vector<512xf32>
      %17 = vector.shape_cast %16 : vector<512xf32> to vector<1x512xf32>
      %cst_13 = arith.constant 0.055555556 : f32
      %18 = vector.broadcast %cst_13 : f32 to vector<1x512xf32>
      %19 = arith.mulf %14, %18 : vector<1x512xf32>
      %cst_14 = arith.constant 0.055555556 : f32
      %20 = vector.broadcast %cst_14 : f32 to vector<1x512xf32>
      %21 = arith.mulf %17, %20 : vector<1x512xf32>
      %22 = arith.mulf %19, %19 : vector<1x512xf32>
      %23 = arith.subf %21, %22 : vector<1x512xf32>
      %cst_15 = arith.constant 0.000000e+00 : f32
      %24 = vector.broadcast %cst_15 : f32 to vector<1x512xf32>
      %25 = arith.maximumf %23, %24 : vector<1x512xf32>
      %26 = vector.broadcast %19 : vector<1x512xf32> to vector<24x512xf32>
      %27 = arith.subf %12, %26 : vector<24x512xf32>
      %cst_16 = arith.constant 9.99999974E-6 : f32
      %28 = vector.broadcast %cst_16 : f32 to vector<1x512xf32>
      %29 = arith.addf %25, %28 : vector<1x512xf32>
      %30 = math.rsqrt %29 : vector<1x512xf32>
      %31 = vector.broadcast %30 : vector<1x512xf32> to vector<24x512xf32>
      %32 = arith.mulf %27, %31 : vector<24x512xf32>
      %c0_17 = arith.constant 0 : index
      %c0_18 = arith.constant 0 : index
      %33 = vector.load %arg3[%c0_17, %c0_18] : memref<1x512xf32, #tpu.memory_space<vmem>>, vector<1x512xf32>
      %34 = vector.broadcast %33 : vector<1x512xf32> to vector<24x512xf32>
      %35 = arith.mulf %32, %34 : vector<24x512xf32>
      %c0_19 = arith.constant 0 : index
      %c0_20 = arith.constant 0 : index
      %36 = vector.load %arg4[%c0_19, %c0_20] : memref<1x512xf32, #tpu.memory_space<vmem>>, vector<1x512xf32>
      %37 = vector.broadcast %36 : vector<1x512xf32> to vector<24x512xf32>
      %38 = arith.addf %35, %37 : vector<24x512xf32>
      %cst_21 = arith.constant 0.000000e+00 : f32
      %39 = vector.broadcast %cst_21 : f32 to vector<24x512xf32>
      %40 = arith.cmpf oge, %38, %39 : vector<24x512xf32>
      %cst_22 = arith.constant 2.000000e-01 : f32
      %41 = vector.broadcast %cst_22 : f32 to vector<24x512xf32>
      %42 = arith.mulf %41, %38 : vector<24x512xf32>
      %43 = arith.select %40, %38, %42 : vector<24x512xi1>, vector<24x512xf32>
      %c0_23 = arith.constant 0 : index
      %c0_24 = arith.constant 0 : index
      %44 = vector.load %arg5[%c0_23, %c0_24] : memref<24x512xf32, #tpu.memory_space<vmem>>, vector<24x512xf32>
      tpu.vector_store %arg5[%c0_23, %c0_24], %43 {strides = array<i32>} : memref<24x512xf32, #tpu.memory_space<vmem>>, vector<24x512xf32>,
    } else {
    }
    return
  }
  func.func @transform_0(%arg0: i32) -> (i32, i32) {
    %c0_i32 = arith.constant 0 : i32
    %c0_i32_0 = arith.constant 0 : i32
    return %c0_i32, %arg0 : i32, i32
  }
  func.func @transform_1(%arg0: i32) -> (i32, i32) {
    %c0_i32 = arith.constant 0 : i32
    %c0_i32_0 = arith.constant 0 : i32
    return %arg0, %c0_i32 : i32, i32
  }
  func.func @transform_2(%arg0: i32) -> (i32, i32) {
    %c0_i32 = arith.constant 0 : i32
    %c0_i32_0 = arith.constant 0 : i32
    %c0_i32_1 = arith.constant 0 : i32
    return %c0_i32, %c0_i32_0 : i32, i32
  }
  func.func @transform_3(%arg0: i32) -> (i32, i32) {
    %c0_i32 = arith.constant 0 : i32
    %c0_i32_0 = arith.constant 0 : i32
    %c0_i32_1 = arith.constant 0 : i32
    return %c0_i32, %c0_i32_0 : i32, i32
  }
  func.func @transform_4(%arg0: i32) -> (i32, i32) {
    %c0_i32 = arith.constant 0 : i32
    %c0_i32_0 = arith.constant 0 : i32
    %c0_i32_1 = arith.constant 0 : i32
    return %c0_i32, %c0_i32_0 : i32, i32
  }
}

module attributes {stable_mosaic.version = 11 : i64} {
  func.func @_final_conv_kernel(%arg0: i32, %arg1: memref<8x8192xbf16, #tpu.memory_space<vmem>>, %arg2: memref<1x8192xbf16, #tpu.memory_space<vmem>>, %arg3: memref<1x1xf32, #tpu.memory_space<vmem>>, %arg4: memref<8x1xf32, #tpu.memory_space<vmem>>) attributes {dimension_semantics = [#tpu.dimension_semantics<arbitrary>], iteration_bounds = array<i64: 1>, scalar_prefetch = 0 : i64, scratch_operands = 0 : i64, tpu.core_type = #tpu.core_type<tc>, window_params = [{pipeline_mode = #tpu.pipeline_mode<synchronous>, transform_indices = @transform_0, window_bounds = array<i64: 8, 8192>}, {pipeline_mode = #tpu.pipeline_mode<synchronous>, transform_indices = @transform_1, window_bounds = array<i64: 1, 8192>}, {pipeline_mode = #tpu.pipeline_mode<synchronous>, transform_indices = @transform_2, window_bounds = array<i64: 1, 1>}, {pipeline_mode = #tpu.pipeline_mode<synchronous>, transform_indices = @transform_3, window_bounds = array<i64: 8, 1>}]} {
    %cst = arith.constant 0.000000e+00 : f32
    %0 = vector.broadcast %cst : f32 to vector<8x1xf32>
    %c0 = arith.constant 0 : index
    %c0_0 = arith.constant 0 : index
    %1 = vector.load %arg1[%c0, %c0_0] : memref<8x8192xbf16, #tpu.memory_space<vmem>>, vector<8x2048xbf16>
    %2 = arith.extf %1 : vector<8x2048xbf16> to vector<8x2048xf32>
    %c0_1 = arith.constant 0 : index
    %c0_2 = arith.constant 0 : index
    %3 = vector.load %arg2[%c0_1, %c0_2] : memref<1x8192xbf16, #tpu.memory_space<vmem>>, vector<1x2048xbf16>
    %4 = arith.extf %3 : vector<1x2048xbf16> to vector<1x2048xf32>
    %5 = vector.broadcast %4 : vector<1x2048xf32> to vector<8x2048xf32>
    %6 = arith.mulf %2, %5 : vector<8x2048xf32>
    %cst_3 = arith.constant dense<0.000000e+00> : vector<8xf32>
    %7 = vector.multi_reduction <add>, %6, %cst_3 [1] : vector<8x2048xf32> to vector<8xf32>
    %8 = vector.shape_cast %7 : vector<8xf32> to vector<8x1xf32>
    %9 = arith.addf %0, %8 : vector<8x1xf32>
    %c0_4 = arith.constant 0 : index
    %c2048 = arith.constant 2048 : index
    %10 = vector.load %arg1[%c0_4, %c2048] : memref<8x8192xbf16, #tpu.memory_space<vmem>>, vector<8x2048xbf16>
    %11 = arith.extf %10 : vector<8x2048xbf16> to vector<8x2048xf32>
    %c0_5 = arith.constant 0 : index
    %c2048_6 = arith.constant 2048 : index
    %12 = vector.load %arg2[%c0_5, %c2048_6] : memref<1x8192xbf16, #tpu.memory_space<vmem>>, vector<1x2048xbf16>
    %13 = arith.extf %12 : vector<1x2048xbf16> to vector<1x2048xf32>
    %14 = vector.broadcast %13 : vector<1x2048xf32> to vector<8x2048xf32>
    %15 = arith.mulf %11, %14 : vector<8x2048xf32>
    %cst_7 = arith.constant dense<0.000000e+00> : vector<8xf32>
    %16 = vector.multi_reduction <add>, %15, %cst_7 [1] : vector<8x2048xf32> to vector<8xf32>
    %17 = vector.shape_cast %16 : vector<8xf32> to vector<8x1xf32>
    %18 = arith.addf %9, %17 : vector<8x1xf32>
    %c0_8 = arith.constant 0 : index
    %c4096 = arith.constant 4096 : index
    %19 = vector.load %arg1[%c0_8, %c4096] : memref<8x8192xbf16, #tpu.memory_space<vmem>>, vector<8x2048xbf16>
    %20 = arith.extf %19 : vector<8x2048xbf16> to vector<8x2048xf32>
    %c0_9 = arith.constant 0 : index
    %c4096_10 = arith.constant 4096 : index
    %21 = vector.load %arg2[%c0_9, %c4096_10] : memref<1x8192xbf16, #tpu.memory_space<vmem>>, vector<1x2048xbf16>
    %22 = arith.extf %21 : vector<1x2048xbf16> to vector<1x2048xf32>
    %23 = vector.broadcast %22 : vector<1x2048xf32> to vector<8x2048xf32>
    %24 = arith.mulf %20, %23 : vector<8x2048xf32>
    %cst_11 = arith.constant dense<0.000000e+00> : vector<8xf32>
    %25 = vector.multi_reduction <add>, %24, %cst_11 [1] : vector<8x2048xf32> to vector<8xf32>
    %26 = vector.shape_cast %25 : vector<8xf32> to vector<8x1xf32>
    %27 = arith.addf %18, %26 : vector<8x1xf32>
    %c0_12 = arith.constant 0 : index
    %c6144 = arith.constant 6144 : index
    %28 = vector.load %arg1[%c0_12, %c6144] : memref<8x8192xbf16, #tpu.memory_space<vmem>>, vector<8x2048xbf16>
    %29 = arith.extf %28 : vector<8x2048xbf16> to vector<8x2048xf32>
    %c0_13 = arith.constant 0 : index
    %c6144_14 = arith.constant 6144 : index
    %30 = vector.load %arg2[%c0_13, %c6144_14] : memref<1x8192xbf16, #tpu.memory_space<vmem>>, vector<1x2048xbf16>
    %31 = arith.extf %30 : vector<1x2048xbf16> to vector<1x2048xf32>
    %32 = vector.broadcast %31 : vector<1x2048xf32> to vector<8x2048xf32>
    %33 = arith.mulf %29, %32 : vector<8x2048xf32>
    %cst_15 = arith.constant dense<0.000000e+00> : vector<8xf32>
    %34 = vector.multi_reduction <add>, %33, %cst_15 [1] : vector<8x2048xf32> to vector<8xf32>
    %35 = vector.shape_cast %34 : vector<8xf32> to vector<8x1xf32>
    %36 = arith.addf %27, %35 : vector<8x1xf32>
    %c0_16 = arith.constant 0 : index
    %c0_17 = arith.constant 0 : index
    %37 = vector.load %arg3[%c0_16, %c0_17] : memref<1x1xf32, #tpu.memory_space<vmem>>, vector<1x1xf32>
    %38 = vector.broadcast %37 : vector<1x1xf32> to vector<8x1xf32>
    %39 = arith.addf %36, %38 : vector<8x1xf32>
    %c0_18 = arith.constant 0 : index
    %c0_19 = arith.constant 0 : index
    %40 = vector.load %arg4[%c0_18, %c0_19] : memref<8x1xf32, #tpu.memory_space<vmem>>, vector<8x1xf32>
    tpu.vector_store %arg4[%c0_18, %c0_19], %39 {strides = array<i32>} : memref<8x1xf32, #tpu.memory_space<vmem>>, vector<8x1xf32>,
    return
  }
  func.func @transform_0(%arg0: i32) -> (i32, i32) {
    %c0_i32 = arith.constant 0 : i32
    %c0_i32_0 = arith.constant 0 : i32
    %c0_i32_1 = arith.constant 0 : i32
    return %c0_i32, %c0_i32_0 : i32, i32
  }
  func.func @transform_1(%arg0: i32) -> (i32, i32) {
    %c0_i32 = arith.constant 0 : i32
    %c0_i32_0 = arith.constant 0 : i32
    %c0_i32_1 = arith.constant 0 : i32
    return %c0_i32, %c0_i32_0 : i32, i32
  }
  func.func @transform_2(%arg0: i32) -> (i32, i32) {
    %c0_i32 = arith.constant 0 : i32
    %c0_i32_0 = arith.constant 0 : i32
    %c0_i32_1 = arith.constant 0 : i32
    return %c0_i32, %c0_i32_0 : i32, i32
  }
  func.func @transform_3(%arg0: i32) -> (i32, i32) {
    %c0_i32 = arith.constant 0 : i32
    %c0_i32_0 = arith.constant 0 : i32
    %c0_i32_1 = arith.constant 0 : i32
    return %c0_i32, %c0_i32_0 : i32, i32
  }
}

</mosaic_0001>

<bundles_post_ra>
// kernel: discriminator_forward.5
= control target key start
LH: loop header
LB: loop body
LE: loop exit
PB: predicated region body
PF: predicated region fallthrough
CT: control target
= control target key end

     0   :  { %s1435_s12 = smov 0   ;;  %s1739_s0 = inlined_call_operand.vmem [shape: bf16[2048,96], index: 0, kind: input, shape index: {}]   ;;  %s1740_s1 = inlined_call_operand.vmem [shape: bf16[96,64], index: 1, kind: input, shape index: {}]   ;;  %s1741_s2 = inlined_call_operand.vmem [shape: f32[1,64], index: 2, kind: input, shape index: {}]   ;;  %s1742_s3 = inlined_call_operand.vmem [shape: f32[2048,64], index: 3, kind: output, shape index: {}]  }
   0x1 LB: > { %s1153_s13 = sadd.s32 4294967295, %s1413_s12   ;;  %p1157_p0 = scmp.ge.s32.totalorder %s1413_s12, 1  ;;  %s1413_s12 = sphi %s1435_s12, %s13_s12  }
   0x2   : > { %p138_p1 = scmp.lt.s32.totalorder %s1413_s12, 5 }
   0x4   : > { %p139_p2 = pnand %p1157_p0, %p138_p1 }
   0x5   : > { %v1369_v0 = vld [vmem:[%s1740_s1] sm:$0xff] (!%p139_p2)   ;;  %s1158_s16 = sshll.u32 (!%p139_p2), %s1153_s13, 6  ;;  %v1370_v1 = vld [vmem:[%s1740_s1 + $0x8] sm:$0xff] (!%p139_p2)   ;;  %v1371_v2 = vld [vmem:[%s1740_s1 + $0x10] sm:$0xff] (!%p139_p2)   ;;  %vm454_vm0 = vcmask (!%p139_p2), 785408   ;;  %vm1032_vm1 = vcmask (!%p139_p2), 523264  }
   0x6   : > { %142 = sbr.rel (%p139_p2) target bundleno = 311 (0x137), region = 32  ;;  %p163_p3 = scmp.lt.s32.totalorder (!%p139_p2), %s1158_s16, 255  ;;  %1273 = vmatprep.subr.bf16.mxu0 (!%p139_p2), %v1369_v0  ;;  %1349 = vmatprep.subr.bf16.mxu1 (!%p139_p2), %v1369_v0  ;;  %v1372_v3 = vld [vmem:[%s1740_s1 + $0x18] sm:$0xff] (!%p139_p2)   ;;  %v1373_v6 = vld [vmem:[%s1740_s1 + $0x20] sm:$0xff] (!%p139_p2)   ;;  %v1374_v7 = vld [vmem:[%s1740_s1 + $0x28] sm:$0xff] (!%p139_p2)  }
   0x7   : > { %1274 = vmatpush3.bf16.msra.mxu0 (!%p139_p2), %v1369_v0  ;;  %1355 = vmatpush3.bf16.msra.mxu1 (!%p139_p2), %v1369_v0  ;;  %v1536_v38 = vld [vmem:[%s1741_s2] ss:$0 sm:$0xff] (!%p139_p2) }
   0x8   : > { %1275 = vmatprep.subr.bf16.mxu0 (!%p139_p2), %v1370_v1  ;;  %1350 = vmatprep.subr.bf16.mxu1 (!%p139_p2), %v1370_v1 }
   0xb   : > { %1276 = vmatpush3.bf16.msra.mxu0 (!%p139_p2), %v1370_v1  ;;  %1356 = vmatpush3.bf16.msra.mxu1 (!%p139_p2), %v1370_v1 }
   0xc   : > { %1277 = vmatprep.subr.bf16.mxu0 (!%p139_p2), %v1371_v2  ;;  %1351 = vmatprep.subr.bf16.mxu1 (!%p139_p2), %v1371_v2 }
   0xd   : > { %s1744_s16 = smov (!%p163_p3, %s1158_s16), 255 }
   0xe   : > { %s1159_s21 = sshll.u32 %s1744_s16, 2  ;;  %s1161_s6 = sshll.u32 %s1744_s16, 3 }
   0xf   : > { %s1461_s26 = scalar_lea.vmem %s1739_s0, %s1159_s21  ;;  %1278 = vmatpush3.bf16.msra.mxu0 %v1371_v2  ;;  %1357 = vmatpush3.bf16.msra.mxu1 %v1371_v2  ;;  %s1546_s9 = scalar_lea.vmem %s1742_s3, %s1161_s6 }
  0x10   : > { %v1375_v4 = vld [vmem:[%s1461_s26] sm:$0xff]   ;;  %1279 = vmatprep.subr.bf16.mxu0 %v1372_v3  ;;  %1352 = vmatprep.subr.bf16.mxu1 %v1372_v3  ;;  %v1377_v8 = vld [vmem:[%s1461_s26 + $0x8] sm:$0xff]   ;;  %v1379_v10 = vld [vmem:[%s1461_s26 + $0x10] sm:$0xff]  }
  0x11   : > { %v1376_v5 = vld [vmem:[%s1461_s26 + $0x80] sm:$0xff]   ;;  %1285 = vmatprep.mubr.msk.bf16.mxu0 %vm454_vm0, %v1375_v4  ;;  %v1378_v9 = vld [vmem:[%s1461_s26 + $0x88] sm:$0xff]   ;;  %v1380_v11 = vld [vmem:[%s1461_s26 + $0x90] sm:$0xff]  }
  0x12   : > { %1317 = vmatprep.mubr.msk.bf16.mxu1 %vm454_vm0, %v1376_v5  ;;  %v1381_v12 = vld [vmem:[%s1461_s26 + $0x18] sm:$0xff]   ;;  %v1383_v14 = vld [vmem:[%s1461_s26 + $0x20] sm:$0xff]   ;;  %v1385_v16 = vld [vmem:[%s1461_s26 + $0x28] sm:$0xff]  }
  0x13   : > { %1280 = vmatpush3.bf16.msra.mxu0 %v1372_v3  ;;  %1358 = vmatpush3.bf16.msra.mxu1 %v1372_v3  ;;  %v1382_v13 = vld [vmem:[%s1461_s26 + $0x98] sm:$0xff]   ;;  %v1384_v15 = vld [vmem:[%s1461_s26 + $0xa0] sm:$0xff]   ;;  %v1386_v17 = vld [vmem:[%s1461_s26 + $0xa8] sm:$0xff]  }
  0x14   : > { %1281 = vmatprep.subr.bf16.mxu0 %v1373_v6  ;;  %1353 = vmatprep.subr.bf16.mxu1 %v1373_v6  ;;  %v1387_v18 = vld [vmem:[%s1461_s26 + $0x30] sm:$0xff]   ;;  %v1389_v20 = vld [vmem:[%s1461_s26 + $0x38] sm:$0xff]   ;;  %v1391_v22 = vld [vmem:[%s1461_s26 + $0x40] sm:$0xff]  }
  0x15   : > { %v1388_v19 = vld [vmem:[%s1461_s26 + $0xb0] sm:$0xff]   ;;  %v1390_v21 = vld [vmem:[%s1461_s26 + $0xb8] sm:$0xff]   ;;  %v1392_v23 = vld [vmem:[%s1461_s26 + $0xc0] sm:$0xff]  }
  0x16   : > { %v1393_v24 = vld [vmem:[%s1461_s26 + $0x48] sm:$0xff]   ;;  %v1395_v26 = vld [vmem:[%s1461_s26 + $0x50] sm:$0xff]   ;;  %v1397_v28 = vld [vmem:[%s1461_s26 + $0x58] sm:$0xff]  }
  0x17   : > { %1282 = vmatpush3.bf16.msra.mxu0 %v1373_v6  ;;  %1359 = vmatpush3.bf16.msra.mxu1 %v1373_v6  ;;  %v1394_v25 = vld [vmem:[%s1461_s26 + $0xc8] sm:$0xff]   ;;  %v1396_v27 = vld [vmem:[%s1461_s26 + $0xd0] sm:$0xff]   ;;  %v1398_v29 = vld [vmem:[%s1461_s26 + $0xd8] sm:$0xff]  }
  0x18   : > { %1283 = vmatprep.subr.bf16.mxu0 %v1374_v7  ;;  %1354 = vmatprep.subr.bf16.mxu1 %v1374_v7  ;;  %v1399_v30 = vld [vmem:[%s1461_s26 + $0x60] sm:$0xff]   ;;  %v1401_v32 = vld [vmem:[%s1461_s26 + $0x68] sm:$0xff]   ;;  %v1403_v34 = vld [vmem:[%s1461_s26 + $0x70] sm:$0xff]  }
  0x19   : > { %v1400_v31 = vld [vmem:[%s1461_s26 + $0xe0] sm:$0xff]   ;;  %v1402_v33 = vld [vmem:[%s1461_s26 + $0xe8] sm:$0xff]   ;;  %v1404_v35 = vld [vmem:[%s1461_s26 + $0xf0] sm:$0xff]  }
  0x1a   : > { %v1405_v36 = vld [vmem:[%s1461_s26 + $0x78] sm:$0xff]  }
  0x1b   : > { %1284 = vmatpush3.bf16.msra.mxu0 %v1374_v7  ;;  %1360 = vmatpush3.bf16.msra.mxu1 %v1374_v7  ;;  %v1406_v37 = vld [vmem:[%s1461_s26 + $0xf8] sm:$0xff]  }
  0x1e   : > { %1286 = vmatmul.mubr.msk.bf16.vlgmr.msra.gmra.mrb[0].mxu0 %vm454_vm0, %v1377_v8  ;;  %1318 = vmatmul.mubr.msk.bf16.vlgmr.msra.gmra.mrb[0].mxu1 %vm454_vm0, %v1378_v9 }
  0x1f   : > { %1289 = vmatprep.mubr.msk.bf16.mxu0 %vm454_vm0, %v1379_v10  ;;  %1321 = vmatprep.mubr.msk.bf16.mxu1 %vm454_vm0, %v1380_v11 }
  0x26   : > { %1290 = vmatmul.mubr.msk.bf16.gmra.mrb[4].mxu0 %vm454_vm0, %v1381_v12  ;;  %1322 = vmatmul.mubr.msk.bf16.gmra.mrb[4].mxu1 %vm454_vm0, %v1382_v13 }
  0x27   : > { %1293 = vmatprep.mubr.msk.bf16.mxu0 %vm454_vm0, %v1383_v14  ;;  %1325 = vmatprep.mubr.msk.bf16.mxu1 %vm454_vm0, %v1384_v15 }
  0x2e   : > { %1294 = vmatmul.mubr.msk.bf16.gmra.mrb[8].mxu0 %vm454_vm0, %v1385_v16  ;;  %1326 = vmatmul.mubr.msk.bf16.gmra.mrb[8].mxu1 %vm454_vm0, %v1386_v17 }
  0x2f   : > { %1297 = vmatprep.mubr.msk.bf16.mxu0 %vm454_vm0, %v1387_v18  ;;  %1329 = vmatprep.mubr.msk.bf16.mxu1 %vm454_vm0, %v1388_v19 }
  0x36   : > { %1298 = vmatmul.mubr.msk.bf16.gmra.mrb[12].mxu0 %vm454_vm0, %v1389_v20  ;;  %1330 = vmatmul.mubr.msk.bf16.gmra.mrb[12].mxu1 %vm454_vm0, %v1390_v21 }
  0x37   : > { %1301 = vmatprep.mubr.msk.bf16.mxu0 %vm454_vm0, %v1391_v22  ;;  %1333 = vmatprep.mubr.msk.bf16.mxu1 %vm454_vm0, %v1392_v23 }
  0x3e   : > { %1302 = vmatmul.mubr.msk.bf16.gmra.mrb[16].mxu0 %vm454_vm0, %v1393_v24  ;;  %1334 = vmatmul.mubr.msk.bf16.gmra.mrb[16].mxu1 %vm454_vm0, %v1394_v25 }
  0x3f   : > { %1305 = vmatprep.mubr.msk.bf16.mxu0 %vm454_vm0, %v1395_v26  ;;  %1337 = vmatprep.mubr.msk.bf16.mxu1 %vm454_vm0, %v1396_v27 }
  0x46   : > { %1306 = vmatmul.mubr.msk.bf16.gmra.mrb[20].mxu0 %vm454_vm0, %v1397_v28  ;;  %1338 = vmatmul.mubr.msk.bf16.gmra.mrb[20].mxu1 %vm454_vm0, %v1398_v29 }
  0x47   : > { %1309 = vmatprep.mubr.msk.bf16.mxu0 %vm454_vm0, %v1399_v30  ;;  %1341 = vmatprep.mubr.msk.bf16.mxu1 %vm454_vm0, %v1400_v31 }
  0x4e   : > { %1310 = vmatmul.mubr.msk.bf16.gmra.mrb[24].mxu0 %vm454_vm0, %v1401_v32  ;;  %1342 = vmatmul.mubr.msk.bf16.gmra.mrb[24].mxu1 %vm454_vm0, %v1402_v33 }
  0x4f   : > { %1313 = vmatprep.mubr.msk.bf16.mxu0 %vm454_vm0, %v1403_v34  ;;  %1345 = vmatprep.mubr.msk.bf16.mxu1 %vm454_vm0, %v1404_v35 }
  0x56   : > { %1314 = vmatmul.mubr.msk.bf16.gmra.mrb[28].mxu0 %vm454_vm0, %v1405_v36  ;;  %1346 = vmatmul.mubr.msk.bf16.gmra.mrb[28].mxu1 %vm454_vm0, %v1406_v37 }
  0xf1   : > { %v1287_v39 = vpop.f32.mrb[0].mxu0  ;;  %v1319_v40 = vpop.f32.mrb[0].mxu1 }
  0xf2   : > { %v594_v41 = vadd.f32 %v1287_v39, %v1536_v38  ;;  %v722_v42 = vadd.f32 %v1319_v40, %v1536_v38  ;;  %v585_v43 = vpop.f32.mrb[1].mxu0  ;;  %v713_v44 = vpop.f32.mrb[1].mxu1 }
  0xf3   : > { %v586_v45 = vadd.f32 %v1536_v38, %v585_v43  ;;  %v714_v46 = vadd.f32 %v1536_v38, %v713_v44  ;;  %v1288_v47 = vpop.f32.mrb[2].mxu0  ;;  %v1320_v48 = vpop.f32.mrb[2].mxu1 }
  0xf4   : > { %vm842_vm2 = vcmp.ge.f32.partialorder %v594_v41, 0.0  ;;  %v906_v49 = vmul.f32 0.2, %v594_v41  ;;  %vm874_vm3 = vcmp.ge.f32.partialorder %v722_v42, 0.0  ;;  %v938_v50 = vmul.f32 0.2, %v722_v42 }
  0xf5   : > { %vm840_vm4 = vcmp.ge.f32.partialorder %v586_v45, 0.0  ;;  %v904_v51 = vmul.f32 0.2, %v586_v45  ;;  %vm872_vm5 = vcmp.ge.f32.partialorder %v714_v46, 0.0  ;;  %v936_v52 = vmul.f32 0.2, %v714_v46 }
  0xf6   : > { %v970_v53 = vsel %vm842_vm2, %v594_v41, %v906_v49  ;;  %v1002_v54 = vsel %vm874_vm3, %v722_v42, %v938_v50  ;;  %v597_v55 = vadd.f32 %v1288_v47, %v1536_v38  ;;  %v725_v56 = vadd.f32 %v1320_v48, %v1536_v38  ;;  %v588_v57 = vpop.f32.mrb[3].mxu0  ;;  %v716_v58 = vpop.f32.mrb[3].mxu1 }
  0xf7   : > { %1035 = vst.msk [vmem:[%s1546_s9 + $0x10] sm:$0xff] %vm1032_vm1, %v970_v53  ;;  %1067 = vst.msk [vmem:[%s1546_s9 + $0x110] sm:$0xff] %vm1032_vm1, %v1002_v54  ;;  %v968_v59 = vsel %vm840_vm4, %v586_v45, %v904_v51  ;;  %v1000_v60 = vsel %vm872_vm5, %v714_v46, %v936_v52  ;;  %v589_v61 = vadd.f32 %v1536_v38, %v588_v57 }
  0xf8   : > { %v717_v62 = vadd.f32 %v1536_v38, %v716_v58  ;;  %1033 = vst.msk [vmem:[%s1546_s9] sm:$0xff] %vm1032_vm1, %v968_v59  ;;  %1065 = vst.msk [vmem:[%s1546_s9 + $0x100] sm:$0xff] %vm1032_vm1, %v1000_v60  ;;  %vm843_vm6 = vcmp.ge.f32.partialorder %v597_v55, 0.0  ;;  %v907_v63 = vmul.f32 0.2, %v597_v55  ;;  %vm875_vm7 = vcmp.ge.f32.partialorder %v725_v56, 0.0 }
  0xf9   : > { %v939_v0 = vmul.f32 0.2, %v725_v56  ;;  %vm841_vm8 = vcmp.ge.f32.partialorder %v589_v61, 0.0  ;;  %v905_v1 = vmul.f32 0.2, %v589_v61  ;;  %v1291_v5 = vpop.f32.mrb[4].mxu0 }
  0xfa   : > { %vm873_vm9 = vcmp.ge.f32.partialorder %v717_v62, 0.0  ;;  %v937_v2 = vmul.f32 0.2, %v717_v62  ;;  %v971_v3 = vsel %vm843_vm6, %v597_v55, %v907_v63  ;;  %v1323_v6 = vpop.f32.mrb[4].mxu1  ;;  %v610_v9 = vadd.f32 %v1291_v5, %v1536_v38  ;;  %v601_v11 = vpop.f32.mrb[5].mxu0 }
  0xfb   : > { %v1003_v4 = vsel %vm875_vm7, %v725_v56, %v939_v0  ;;  %1036 = vst.msk [vmem:[%s1546_s9 + $0x18] sm:$0xff] %vm1032_vm1, %v971_v3  ;;  %v969_v7 = vsel %vm841_vm8, %v589_v61, %v905_v1  ;;  %v738_v10 = vadd.f32 %v1323_v6, %v1536_v38  ;;  %v729_v12 = vpop.f32.mrb[5].mxu1  ;;  %v602_v13 = vadd.f32 %v1536_v38, %v601_v11  ;;  %v1292_v15 = vpop.f32.mrb[6].mxu0 }
  0xfc   : > { %1068 = vst.msk [vmem:[%s1546_s9 + $0x118] sm:$0xff] %vm1032_vm1, %v1003_v4  ;;  %v1001_v8 = vsel %vm873_vm9, %v717_v62, %v937_v2  ;;  %1034 = vst.msk [vmem:[%s1546_s9 + $0x8] sm:$0xff] %vm1032_vm1, %v969_v7  ;;  %v730_v14 = vadd.f32 %v1536_v38, %v729_v12  ;;  %v1324_v16 = vpop.f32.mrb[6].mxu1  ;;  %vm846_vm10 = vcmp.ge.f32.partialorder %v610_v9, 0.0  ;;  %v910_v17 = vmul.f32 0.2, %v610_v9 }
  0xfd   : > { %1066 = vst.msk [vmem:[%s1546_s9 + $0x108] sm:$0xff] %vm1032_vm1, %v1001_v8  ;;  %vm878_vm11 = vcmp.ge.f32.partialorder %v738_v10, 0.0  ;;  %v942_v18 = vmul.f32 0.2, %v738_v10  ;;  %vm844_vm12 = vcmp.ge.f32.partialorder %v602_v13, 0.0  ;;  %v613_v23 = vadd.f32 %v1292_v15, %v1536_v38  ;;  %v604_v25 = vpop.f32.mrb[7].mxu0 }
  0xfe   : > { %v908_v19 = vmul.f32 0.2, %v602_v13  ;;  %vm876_vm13 = vcmp.ge.f32.partialorder %v730_v14, 0.0  ;;  %v940_v20 = vmul.f32 0.2, %v730_v14  ;;  %v974_v21 = vsel %vm846_vm10, %v610_v9, %v910_v17  ;;  %v732_v26 = vpop.f32.mrb[7].mxu1 }
  0xff   : > { %v1006_v22 = vsel %vm878_vm11, %v738_v10, %v942_v18  ;;  %v741_v24 = vadd.f32 %v1324_v16, %v1536_v38  ;;  %1039 = vst.msk [vmem:[%s1546_s9 + $0x30] sm:$0xff] %vm1032_vm1, %v974_v21  ;;  %v605_v29 = vadd.f32 %v1536_v38, %v604_v25  ;;  %v733_v30 = vadd.f32 %v1536_v38, %v732_v26 }
 0x100   : > { %1071 = vst.msk [vmem:[%s1546_s9 + $0x130] sm:$0xff] %vm1032_vm1, %v1006_v22  ;;  %v972_v27 = vsel %vm844_vm12, %v602_v13, %v908_v19  ;;  %v1004_v28 = vsel %vm876_vm13, %v730_v14, %v940_v20  ;;  %vm847_vm14 = vcmp.ge.f32.partialorder %v613_v23, 0.0  ;;  %v911_v31 = vmul.f32 0.2, %v613_v23 }
 0x101   : > { %1037 = vst.msk [vmem:[%s1546_s9 + $0x20] sm:$0xff] %vm1032_vm1, %v972_v27  ;;  %1069 = vst.msk [vmem:[%s1546_s9 + $0x120] sm:$0xff] %vm1032_vm1, %v1004_v28  ;;  %vm879_vm15 = vcmp.ge.f32.partialorder %v741_v24, 0.0  ;;  %v943_v32 = vmul.f32 0.2, %v741_v24  ;;  %vm845_vm0 = vcmp.ge.f32.partialorder %v605_v29, 0.0 }
 0x102   : > { %v909_v33 = vmul.f32 0.2, %v605_v29  ;;  %vm877_vm2 = vcmp.ge.f32.partialorder %v733_v30, 0.0  ;;  %v941_v34 = vmul.f32 0.2, %v733_v30  ;;  %v975_v35 = vsel %vm847_vm14, %v613_v23, %v911_v31  ;;  %v1295_v37 = vpop.f32.mrb[8].mxu0 }
 0x103   : > { %v1007_v36 = vsel %vm879_vm15, %v741_v24, %v943_v32  ;;  %v1327_v39 = vpop.f32.mrb[8].mxu1  ;;  %1040 = vst.msk [vmem:[%s1546_s9 + $0x38] sm:$0xff] %vm1032_vm1, %v975_v35  ;;  %v626_v42 = vadd.f32 %v1295_v37, %v1536_v38  ;;  %v617_v44 = vpop.f32.mrb[9].mxu0 }
 0x104   : > { %1072 = vst.msk [vmem:[%s1546_s9 + $0x138] sm:$0xff] %vm1032_vm1, %v1007_v36  ;;  %v973_v40 = vsel %vm845_vm0, %v605_v29, %v909_v33  ;;  %v1005_v41 = vsel %vm877_vm2, %v733_v30, %v941_v34  ;;  %v754_v43 = vadd.f32 %v1327_v39, %v1536_v38  ;;  %v745_v45 = vpop.f32.mrb[9].mxu1  ;;  %v618_v46 = vadd.f32 %v1536_v38, %v617_v44  ;;  %v1296_v48 = vpop.f32.mrb[10].mxu0 }
 0x105   : > { %1038 = vst.msk [vmem:[%s1546_s9 + $0x28] sm:$0xff] %vm1032_vm1, %v973_v40  ;;  %1070 = vst.msk [vmem:[%s1546_s9 + $0x128] sm:$0xff] %vm1032_vm1, %v1005_v41  ;;  %v746_v47 = vadd.f32 %v1536_v38, %v745_v45  ;;  %v1328_v49 = vpop.f32.mrb[10].mxu1  ;;  %vm850_vm3 = vcmp.ge.f32.partialorder %v626_v42, 0.0  ;;  %v914_v50 = vmul.f32 0.2, %v626_v42  ;;  %v629_v56 = vadd.f32 %v1296_v48, %v1536_v38 }
 0x106   : > { %vm882_vm4 = vcmp.ge.f32.partialorder %v754_v43, 0.0  ;;  %v946_v51 = vmul.f32 0.2, %v754_v43  ;;  %vm848_vm5 = vcmp.ge.f32.partialorder %v618_v46, 0.0  ;;  %v912_v52 = vmul.f32 0.2, %v618_v46 }
 0x107   : > { %vm880_vm6 = vcmp.ge.f32.partialorder %v746_v47, 0.0  ;;  %v944_v53 = vmul.f32 0.2, %v746_v47  ;;  %v978_v54 = vsel %vm850_vm3, %v626_v42, %v914_v50  ;;  %v757_v57 = vadd.f32 %v1328_v49, %v1536_v38  ;;  %v620_v58 = vpop.f32.mrb[11].mxu0  ;;  %v748_v59 = vpop.f32.mrb[11].mxu1 }
 0x108   : > { %v1010_v55 = vsel %vm882_vm4, %v754_v43, %v946_v51  ;;  %1043 = vst.msk [vmem:[%s1546_s9 + $0x50] sm:$0xff] %vm1032_vm1, %v978_v54  ;;  %v976_v60 = vsel %vm848_vm5, %v618_v46, %v912_v52  ;;  %v621_v62 = vadd.f32 %v1536_v38, %v620_v58  ;;  %v749_v63 = vadd.f32 %v1536_v38, %v748_v59 }
 0x109   : > { %1075 = vst.msk [vmem:[%s1546_s9 + $0x150] sm:$0xff] %vm1032_vm1, %v1010_v55  ;;  %v1008_v61 = vsel %vm880_vm6, %v746_v47, %v944_v53  ;;  %v1299_v0 = vpop.f32.mrb[12].mxu0  ;;  %v1331_v1 = vpop.f32.mrb[12].mxu1  ;;  %1041 = vst.msk [vmem:[%s1546_s9 + $0x40] sm:$0xff] %vm1032_vm1, %v976_v60  ;;  %vm851_vm7 = vcmp.ge.f32.partialorder %v629_v56, 0.0  ;;  %vm883_vm8 = vcmp.ge.f32.partialorder %v757_v57, 0.0 }
 0x10a   : > { %1073 = vst.msk [vmem:[%s1546_s9 + $0x140] sm:$0xff] %vm1032_vm1, %v1008_v61  ;;  %v915_v2 = vmul.f32 0.2, %v629_v56  ;;  %v947_v3 = vmul.f32 0.2, %v757_v57  ;;  %vm849_vm9 = vcmp.ge.f32.partialorder %v621_v62, 0.0  ;;  %v642_v8 = vadd.f32 %v1299_v0, %v1536_v38 }
 0x10b   : > { %v913_v4 = vmul.f32 0.2, %v621_v62  ;;  %vm881_vm10 = vcmp.ge.f32.partialorder %v749_v63, 0.0  ;;  %v945_v5 = vmul.f32 0.2, %v749_v63  ;;  %v770_v9 = vadd.f32 %v1331_v1, %v1536_v38  ;;  %v633_v10 = vpop.f32.mrb[13].mxu0 }
 0x10c   : > { %v979_v6 = vsel %vm851_vm7, %v629_v56, %v915_v2  ;;  %v1011_v7 = vsel %vm883_vm8, %v757_v57, %v947_v3  ;;  %v761_v11 = vpop.f32.mrb[13].mxu1  ;;  %v634_v14 = vadd.f32 %v1536_v38, %v633_v10  ;;  %v1300_v16 = vpop.f32.mrb[14].mxu0  ;;  %vm854_vm11 = vcmp.ge.f32.partialorder %v642_v8, 0.0 }
 0x10d   : > { %1044 = vst.msk [vmem:[%s1546_s9 + $0x58] sm:$0xff] %vm1032_vm1, %v979_v6  ;;  %1076 = vst.msk [vmem:[%s1546_s9 + $0x158] sm:$0xff] %vm1032_vm1, %v1011_v7  ;;  %v977_v12 = vsel %vm849_vm9, %v621_v62, %v913_v4  ;;  %v1009_v13 = vsel %vm881_vm10, %v749_v63, %v945_v5  ;;  %v762_v15 = vadd.f32 %v1536_v38, %v761_v11  ;;  %v1332_v17 = vpop.f32.mrb[14].mxu1  ;;  %v918_v18 = vmul.f32 0.2, %v642_v8  ;;  %v636_v26 = vpop.f32.mrb[15].mxu0 }
 0x10e   : > { %1042 = vst.msk [vmem:[%s1546_s9 + $0x48] sm:$0xff] %vm1032_vm1, %v977_v12  ;;  %1074 = vst.msk [vmem:[%s1546_s9 + $0x148] sm:$0xff] %vm1032_vm1, %v1009_v13  ;;  %vm886_vm12 = vcmp.ge.f32.partialorder %v770_v9, 0.0  ;;  %v950_v19 = vmul.f32 0.2, %v770_v9  ;;  %vm852_vm13 = vcmp.ge.f32.partialorder %v634_v14, 0.0  ;;  %v645_v24 = vadd.f32 %v1300_v16, %v1536_v38 }
 0x10f   : > { %v916_v20 = vmul.f32 0.2, %v634_v14  ;;  %vm884_vm14 = vcmp.ge.f32.partialorder %v762_v15, 0.0  ;;  %v948_v21 = vmul.f32 0.2, %v762_v15  ;;  %v982_v22 = vsel %vm854_vm11, %v642_v8, %v918_v18  ;;  %v764_v27 = vpop.f32.mrb[15].mxu1 }
 0x110   : > { %v1014_v23 = vsel %vm886_vm12, %v770_v9, %v950_v19  ;;  %v773_v25 = vadd.f32 %v1332_v17, %v1536_v38  ;;  %1047 = vst.msk [vmem:[%s1546_s9 + $0x70] sm:$0xff] %vm1032_vm1, %v982_v22  ;;  %v637_v30 = vadd.f32 %v1536_v38, %v636_v26  ;;  %v765_v31 = vadd.f32 %v1536_v38, %v764_v27 }
 0x111   : > { %1079 = vst.msk [vmem:[%s1546_s9 + $0x170] sm:$0xff] %vm1032_vm1, %v1014_v23  ;;  %v980_v28 = vsel %vm852_vm13, %v634_v14, %v916_v20  ;;  %v1012_v29 = vsel %vm884_vm14, %v762_v15, %v948_v21  ;;  %v1303_v32 = vpop.f32.mrb[16].mxu0  ;;  %v1335_v33 = vpop.f32.mrb[16].mxu1  ;;  %vm855_vm15 = vcmp.ge.f32.partialorder %v645_v24, 0.0  ;;  %v919_v34 = vmul.f32 0.2, %v645_v24 }
 0x112   : > { %1045 = vst.msk [vmem:[%s1546_s9 + $0x60] sm:$0xff] %vm1032_vm1, %v980_v28  ;;  %1077 = vst.msk [vmem:[%s1546_s9 + $0x160] sm:$0xff] %vm1032_vm1, %v1012_v29  ;;  %vm887_vm0 = vcmp.ge.f32.partialorder %v773_v25, 0.0  ;;  %v951_v35 = vmul.f32 0.2, %v773_v25  ;;  %vm853_vm2 = vcmp.ge.f32.partialorder %v637_v30, 0.0  ;;  %v658_v41 = vadd.f32 %v1303_v32, %v1536_v38 }
 0x113   : > { %v917_v36 = vmul.f32 0.2, %v637_v30  ;;  %vm885_vm3 = vcmp.ge.f32.partialorder %v765_v31, 0.0  ;;  %v949_v37 = vmul.f32 0.2, %v765_v31  ;;  %v983_v39 = vsel %vm855_vm15, %v645_v24, %v919_v34  ;;  %v649_v43 = vpop.f32.mrb[17].mxu0 }
 0x114   : > { %v1015_v40 = vsel %vm887_vm0, %v773_v25, %v951_v35  ;;  %v786_v42 = vadd.f32 %v1335_v33, %v1536_v38  ;;  %v777_v44 = vpop.f32.mrb[17].mxu1  ;;  %1048 = vst.msk [vmem:[%s1546_s9 + $0x78] sm:$0xff] %vm1032_vm1, %v983_v39  ;;  %v650_v47 = vadd.f32 %v1536_v38, %v649_v43  ;;  %v1304_v49 = vpop.f32.mrb[18].mxu0  ;;  %vm858_vm4 = vcmp.ge.f32.partialorder %v658_v41, 0.0 }
 0x115   : > { %1080 = vst.msk [vmem:[%s1546_s9 + $0x178] sm:$0xff] %vm1032_vm1, %v1015_v40  ;;  %v981_v45 = vsel %vm853_vm2, %v637_v30, %v917_v36  ;;  %v1013_v46 = vsel %vm885_vm3, %v765_v31, %v949_v37  ;;  %v778_v48 = vadd.f32 %v1536_v38, %v777_v44  ;;  %v1336_v50 = vpop.f32.mrb[18].mxu1  ;;  %v922_v51 = vmul.f32 0.2, %v658_v41  ;;  %v652_v59 = vpop.f32.mrb[19].mxu0 }
 0x116   : > { %1046 = vst.msk [vmem:[%s1546_s9 + $0x68] sm:$0xff] %vm1032_vm1, %v981_v45  ;;  %1078 = vst.msk [vmem:[%s1546_s9 + $0x168] sm:$0xff] %vm1032_vm1, %v1013_v46  ;;  %vm890_vm5 = vcmp.ge.f32.partialorder %v786_v42, 0.0  ;;  %v954_v52 = vmul.f32 0.2, %v786_v42  ;;  %vm856_vm6 = vcmp.ge.f32.partialorder %v650_v47, 0.0  ;;  %v661_v57 = vadd.f32 %v1304_v49, %v1536_v38 }
 0x117   : > { %v920_v53 = vmul.f32 0.2, %v650_v47  ;;  %vm888_vm7 = vcmp.ge.f32.partialorder %v778_v48, 0.0  ;;  %v952_v54 = vmul.f32 0.2, %v778_v48  ;;  %v986_v55 = vsel %vm858_vm4, %v658_v41, %v922_v51  ;;  %v780_v60 = vpop.f32.mrb[19].mxu1 }
 0x118   : > { %v1018_v56 = vsel %vm890_vm5, %v786_v42, %v954_v52  ;;  %v789_v58 = vadd.f32 %v1336_v50, %v1536_v38  ;;  %1051 = vst.msk [vmem:[%s1546_s9 + $0x90] sm:$0xff] %vm1032_vm1, %v986_v55  ;;  %v653_v63 = vadd.f32 %v1536_v38, %v652_v59  ;;  %v781_v0 = vadd.f32 %v1536_v38, %v780_v60 }
 0x119   : > { %1083 = vst.msk [vmem:[%s1546_s9 + $0x190] sm:$0xff] %vm1032_vm1, %v1018_v56  ;;  %v984_v61 = vsel %vm856_vm6, %v650_v47, %v920_v53  ;;  %v1016_v62 = vsel %vm888_vm7, %v778_v48, %v952_v54  ;;  %v1307_v1 = vpop.f32.mrb[20].mxu0  ;;  %v1339_v2 = vpop.f32.mrb[20].mxu1  ;;  %vm859_vm8 = vcmp.ge.f32.partialorder %v661_v57, 0.0  ;;  %v923_v3 = vmul.f32 0.2, %v661_v57 }
 0x11a   : > { %1049 = vst.msk [vmem:[%s1546_s9 + $0x80] sm:$0xff] %vm1032_vm1, %v984_v61  ;;  %1081 = vst.msk [vmem:[%s1546_s9 + $0x180] sm:$0xff] %vm1032_vm1, %v1016_v62  ;;  %vm891_vm9 = vcmp.ge.f32.partialorder %v789_v58, 0.0  ;;  %v955_v4 = vmul.f32 0.2, %v789_v58  ;;  %vm857_vm10 = vcmp.ge.f32.partialorder %v653_v63, 0.0  ;;  %v674_v9 = vadd.f32 %v1307_v1, %v1536_v38 }
 0x11b   : > { %v921_v5 = vmul.f32 0.2, %v653_v63  ;;  %vm889_vm11 = vcmp.ge.f32.partialorder %v781_v0, 0.0  ;;  %v953_v6 = vmul.f32 0.2, %v781_v0  ;;  %v987_v7 = vsel %vm859_vm8, %v661_v57, %v923_v3  ;;  %v665_v11 = vpop.f32.mrb[21].mxu0 }
 0x11c   : > { %v1019_v8 = vsel %vm891_vm9, %v789_v58, %v955_v4  ;;  %v802_v10 = vadd.f32 %v1339_v2, %v1536_v38  ;;  %v793_v12 = vpop.f32.mrb[21].mxu1  ;;  %1052 = vst.msk [vmem:[%s1546_s9 + $0x98] sm:$0xff] %vm1032_vm1, %v987_v7  ;;  %v666_v15 = vadd.f32 %v1536_v38, %v665_v11  ;;  %v1308_v17 = vpop.f32.mrb[22].mxu0  ;;  %vm862_vm12 = vcmp.ge.f32.partialorder %v674_v9, 0.0 }
 0x11d   : > { %1084 = vst.msk [vmem:[%s1546_s9 + $0x198] sm:$0xff] %vm1032_vm1, %v1019_v8  ;;  %v985_v13 = vsel %vm857_vm10, %v653_v63, %v921_v5  ;;  %v1017_v14 = vsel %vm889_vm11, %v781_v0, %v953_v6  ;;  %v794_v16 = vadd.f32 %v1536_v38, %v793_v12  ;;  %v1340_v18 = vpop.f32.mrb[22].mxu1  ;;  %v926_v19 = vmul.f32 0.2, %v674_v9  ;;  %v668_v27 = vpop.f32.mrb[23].mxu0 }
 0x11e   : > { %1050 = vst.msk [vmem:[%s1546_s9 + $0x88] sm:$0xff] %vm1032_vm1, %v985_v13  ;;  %1082 = vst.msk [vmem:[%s1546_s9 + $0x188] sm:$0xff] %vm1032_vm1, %v1017_v14  ;;  %vm894_vm13 = vcmp.ge.f32.partialorder %v802_v10, 0.0  ;;  %v958_v20 = vmul.f32 0.2, %v802_v10  ;;  %vm860_vm14 = vcmp.ge.f32.partialorder %v666_v15, 0.0  ;;  %v677_v25 = vadd.f32 %v1308_v17, %v1536_v38 }
 0x11f   : > { %v924_v21 = vmul.f32 0.2, %v666_v15  ;;  %vm892_vm15 = vcmp.ge.f32.partialorder %v794_v16, 0.0  ;;  %v956_v22 = vmul.f32 0.2, %v794_v16  ;;  %v990_v23 = vsel %vm862_vm12, %v674_v9, %v926_v19  ;;  %v796_v28 = vpop.f32.mrb[23].mxu1 }
 0x120   : > { %v1022_v24 = vsel %vm894_vm13, %v802_v10, %v958_v20  ;;  %v805_v26 = vadd.f32 %v1340_v18, %v1536_v38  ;;  %1055 = vst.msk [vmem:[%s1546_s9 + $0xb0] sm:$0xff] %vm1032_vm1, %v990_v23  ;;  %v669_v31 = vadd.f32 %v1536_v38, %v668_v27  ;;  %v797_v32 = vadd.f32 %v1536_v38, %v796_v28 }
 0x121   : > { %1087 = vst.msk [vmem:[%s1546_s9 + $0x1b0] sm:$0xff] %vm1032_vm1, %v1022_v24  ;;  %v988_v29 = vsel %vm860_vm14, %v666_v15, %v924_v21  ;;  %v1020_v30 = vsel %vm892_vm15, %v794_v16, %v956_v22  ;;  %v1311_v33 = vpop.f32.mrb[24].mxu0  ;;  %v1343_v34 = vpop.f32.mrb[24].mxu1  ;;  %vm863_vm0 = vcmp.ge.f32.partialorder %v677_v25, 0.0  ;;  %v927_v35 = vmul.f32 0.2, %v677_v25 }
 0x122   : > { %1053 = vst.msk [vmem:[%s1546_s9 + $0xa0] sm:$0xff] %vm1032_vm1, %v988_v29  ;;  %1085 = vst.msk [vmem:[%s1546_s9 + $0x1a0] sm:$0xff] %vm1032_vm1, %v1020_v30  ;;  %vm895_vm2 = vcmp.ge.f32.partialorder %v805_v26, 0.0  ;;  %v959_v36 = vmul.f32 0.2, %v805_v26  ;;  %vm861_vm3 = vcmp.ge.f32.partialorder %v669_v31, 0.0  ;;  %v690_v42 = vadd.f32 %v1311_v33, %v1536_v38 }
 0x123   : > { %v925_v37 = vmul.f32 0.2, %v669_v31  ;;  %vm893_vm4 = vcmp.ge.f32.partialorder %v797_v32, 0.0  ;;  %v957_v39 = vmul.f32 0.2, %v797_v32  ;;  %v991_v40 = vsel %vm863_vm0, %v677_v25, %v927_v35  ;;  %v681_v44 = vpop.f32.mrb[25].mxu0 }
 0x124   : > { %v1023_v41 = vsel %vm895_vm2, %v805_v26, %v959_v36  ;;  %v818_v43 = vadd.f32 %v1343_v34, %v1536_v38  ;;  %v809_v45 = vpop.f32.mrb[25].mxu1  ;;  %1056 = vst.msk [vmem:[%s1546_s9 + $0xb8] sm:$0xff] %vm1032_vm1, %v991_v40  ;;  %v682_v48 = vadd.f32 %v1536_v38, %v681_v44  ;;  %v1312_v50 = vpop.f32.mrb[26].mxu0  ;;  %vm866_vm5 = vcmp.ge.f32.partialorder %v690_v42, 0.0 }
 0x125   : > { %1088 = vst.msk [vmem:[%s1546_s9 + $0x1b8] sm:$0xff] %vm1032_vm1, %v1023_v41  ;;  %v989_v46 = vsel %vm861_vm3, %v669_v31, %v925_v37  ;;  %v1021_v47 = vsel %vm893_vm4, %v797_v32, %v957_v39  ;;  %v810_v49 = vadd.f32 %v1536_v38, %v809_v45  ;;  %v1344_v51 = vpop.f32.mrb[26].mxu1  ;;  %v930_v52 = vmul.f32 0.2, %v690_v42  ;;  %v684_v60 = vpop.f32.mrb[27].mxu0 }
 0x126   : > { %1054 = vst.msk [vmem:[%s1546_s9 + $0xa8] sm:$0xff] %vm1032_vm1, %v989_v46  ;;  %1086 = vst.msk [vmem:[%s1546_s9 + $0x1a8] sm:$0xff] %vm1032_vm1, %v1021_v47  ;;  %vm898_vm6 = vcmp.ge.f32.partialorder %v818_v43, 0.0  ;;  %v962_v53 = vmul.f32 0.2, %v818_v43  ;;  %vm864_vm7 = vcmp.ge.f32.partialorder %v682_v48, 0.0  ;;  %v693_v58 = vadd.f32 %v1312_v50, %v1536_v38 }
 0x127   : > { %v928_v54 = vmul.f32 0.2, %v682_v48  ;;  %vm896_vm8 = vcmp.ge.f32.partialorder %v810_v49, 0.0  ;;  %v960_v55 = vmul.f32 0.2, %v810_v49  ;;  %v994_v56 = vsel %vm866_vm5, %v690_v42, %v930_v52  ;;  %v812_v61 = vpop.f32.mrb[27].mxu1 }
 0x128   : > { %v1026_v57 = vsel %vm898_vm6, %v818_v43, %v962_v53  ;;  %v821_v59 = vadd.f32 %v1344_v51, %v1536_v38  ;;  %1059 = vst.msk [vmem:[%s1546_s9 + $0xd0] sm:$0xff] %vm1032_vm1, %v994_v56  ;;  %v685_v0 = vadd.f32 %v1536_v38, %v684_v60  ;;  %v813_v1 = vadd.f32 %v1536_v38, %v812_v61 }
 0x129   : > { %1091 = vst.msk [vmem:[%s1546_s9 + $0x1d0] sm:$0xff] %vm1032_vm1, %v1026_v57  ;;  %v992_v62 = vsel %vm864_vm7, %v682_v48, %v928_v54  ;;  %v1024_v63 = vsel %vm896_vm8, %v810_v49, %v960_v55  ;;  %v1315_v2 = vpop.f32.mrb[28].mxu0  ;;  %v1347_v3 = vpop.f32.mrb[28].mxu1  ;;  %vm867_vm9 = vcmp.ge.f32.partialorder %v693_v58, 0.0  ;;  %v931_v4 = vmul.f32 0.2, %v693_v58 }
 0x12a   : > { %1057 = vst.msk [vmem:[%s1546_s9 + $0xc0] sm:$0xff] %vm1032_vm1, %v992_v62  ;;  %1089 = vst.msk [vmem:[%s1546_s9 + $0x1c0] sm:$0xff] %vm1032_vm1, %v1024_v63  ;;  %vm899_vm10 = vcmp.ge.f32.partialorder %v821_v59, 0.0  ;;  %v963_v5 = vmul.f32 0.2, %v821_v59  ;;  %vm865_vm11 = vcmp.ge.f32.partialorder %v685_v0, 0.0  ;;  %v706_v10 = vadd.f32 %v1315_v2, %v1536_v38 }
 0x12b   : > { %v929_v6 = vmul.f32 0.2, %v685_v0  ;;  %vm897_vm12 = vcmp.ge.f32.partialorder %v813_v1, 0.0  ;;  %v961_v7 = vmul.f32 0.2, %v813_v1  ;;  %v995_v8 = vsel %vm867_vm9, %v693_v58, %v931_v4  ;;  %v697_v12 = vpop.f32.mrb[29].mxu0 }
 0x12c   : > { %v1027_v9 = vsel %vm899_vm10, %v821_v59, %v963_v5  ;;  %v834_v11 = vadd.f32 %v1347_v3, %v1536_v38  ;;  %v825_v13 = vpop.f32.mrb[29].mxu1  ;;  %1060 = vst.msk [vmem:[%s1546_s9 + $0xd8] sm:$0xff] %vm1032_vm1, %v995_v8  ;;  %v698_v16 = vadd.f32 %v1536_v38, %v697_v12  ;;  %v1316_v18 = vpop.f32.mrb[30].mxu0  ;;  %vm870_vm13 = vcmp.ge.f32.partialorder %v706_v10, 0.0 }
 0x12d   : > { %1092 = vst.msk [vmem:[%s1546_s9 + $0x1d8] sm:$0xff] %vm1032_vm1, %v1027_v9  ;;  %v993_v14 = vsel %vm865_vm11, %v685_v0, %v929_v6  ;;  %v1025_v15 = vsel %vm897_vm12, %v813_v1, %v961_v7  ;;  %v826_v17 = vadd.f32 %v1536_v38, %v825_v13  ;;  %v1348_v19 = vpop.f32.mrb[30].mxu1  ;;  %v934_v20 = vmul.f32 0.2, %v706_v10  ;;  %v700_v28 = vpop.f32.mrb[31].mxu0 }
 0x12e   : > { %1058 = vst.msk [vmem:[%s1546_s9 + $0xc8] sm:$0xff] %vm1032_vm1, %v993_v14  ;;  %1090 = vst.msk [vmem:[%s1546_s9 + $0x1c8] sm:$0xff] %vm1032_vm1, %v1025_v15  ;;  %vm902_vm14 = vcmp.ge.f32.partialorder %v834_v11, 0.0  ;;  %v966_v21 = vmul.f32 0.2, %v834_v11  ;;  %vm868_vm15 = vcmp.ge.f32.partialorder %v698_v16, 0.0  ;;  %v709_v26 = vadd.f32 %v1316_v18, %v1536_v38 }
 0x12f   : > { %v932_v22 = vmul.f32 0.2, %v698_v16  ;;  %vm900_vm0 = vcmp.ge.f32.partialorder %v826_v17, 0.0  ;;  %v964_v23 = vmul.f32 0.2, %v826_v17  ;;  %v998_v24 = vsel %vm870_vm13, %v706_v10, %v934_v20  ;;  %v828_v29 = vpop.f32.mrb[31].mxu1 }
 0x130   : > { %v1030_v25 = vsel %vm902_vm14, %v834_v11, %v966_v21  ;;  %v837_v27 = vadd.f32 %v1348_v19, %v1536_v38  ;;  %1063 = vst.msk [vmem:[%s1546_s9 + $0xf0] sm:$0xff] %vm1032_vm1, %v998_v24  ;;  %v701_v32 = vadd.f32 %v1536_v38, %v700_v28  ;;  %v829_v33 = vadd.f32 %v1536_v38, %v828_v29 }
 0x131   : > { %1095 = vst.msk [vmem:[%s1546_s9 + $0x1f0] sm:$0xff] %vm1032_vm1, %v1030_v25  ;;  %v996_v30 = vsel %vm868_vm15, %v698_v16, %v932_v22  ;;  %v1028_v31 = vsel %vm900_vm0, %v826_v17, %v964_v23  ;;  %vm871_vm2 = vcmp.ge.f32.partialorder %v709_v26, 0.0  ;;  %v935_v34 = vmul.f32 0.2, %v709_v26 }
 0x132   : > { %1061 = vst.msk [vmem:[%s1546_s9 + $0xe0] sm:$0xff] %vm1032_vm1, %v996_v30  ;;  %1093 = vst.msk [vmem:[%s1546_s9 + $0x1e0] sm:$0xff] %vm1032_vm1, %v1028_v31  ;;  %vm903_vm3 = vcmp.ge.f32.partialorder %v837_v27, 0.0  ;;  %v967_v35 = vmul.f32 0.2, %v837_v27  ;;  %vm869_vm4 = vcmp.ge.f32.partialorder %v701_v32, 0.0 }
 0x133   : > { %v933_v36 = vmul.f32 0.2, %v701_v32  ;;  %vm901_vm5 = vcmp.ge.f32.partialorder %v829_v33, 0.0  ;;  %v965_v37 = vmul.f32 0.2, %v829_v33  ;;  %v999_v39 = vsel %vm871_vm2, %v709_v26, %v935_v34 }
 0x134   : > { %v1031_v40 = vsel %vm903_vm3, %v837_v27, %v967_v35  ;;  %1064 = vst.msk [vmem:[%s1546_s9 + $0xf8] sm:$0xff] %vm1032_vm1, %v999_v39 }
 0x135   : > { %1096 = vst.msk [vmem:[%s1546_s9 + $0x1f8] sm:$0xff] %vm1032_vm1, %v1031_v40  ;;  %v997_v38 = vsel %vm869_vm4, %v701_v32, %v933_v36  ;;  %v1029_v41 = vsel %vm901_vm5, %v829_v33, %v965_v37 }
 0x136   : > { %1062 = vst.msk [vmem:[%s1546_s9 + $0xe8] sm:$0xff] %vm1032_vm1, %v997_v38  ;;  %1094 = vst.msk [vmem:[%s1546_s9 + $0x1e8] sm:$0xff] %vm1032_vm1, %v1029_v41 }
 0x137 PF: > { %s13_s12 = sadd.s32 1, %s1413_s12  }
 0x138   : > { %p10_p4 = scmp.ge.s32.totalorder %s13_s12, 6  }
 0x13a   :  { %12 = sbr.rel (!%p10_p4) target bundleno = 1 (0x1), region = 62 }

// kernel: discriminator_forward.6
= control target key start
LH: loop header
LB: loop body
LE: loop exit
PB: predicated region body
PF: predicated region fallthrough
CT: control target
= control target key end

     0   :  { %v4290_v0 = vmov 0   ;;  %s6654_s1 = inlined_call_operand.vmem [shape: bf16[1024,128], index: 1, kind: input, shape index: {}]   ;;  %s6655_s0 = inlined_call_operand.vmem [shape: bf16[456,1024], index: 0, kind: input, shape index: {}]   ;;  %s6656_s2 = inlined_call_operand.vmem [shape: f32[1,128], index: 2, kind: input, shape index: {}]   ;;  %s6657_s3 = inlined_call_operand.vmem [shape: f32[1,128], index: 3, kind: input, shape index: {}]   ;;  %s6658_s4 = inlined_call_operand.vmem [shape: f32[456,128], index: 4, kind: output, shape index: {}]  }
   0x1   :  { %2024 = vmatprep.subr.bf16.mxu0 %v4290_v0  ;;  %2288 = vmatprep.subr.bf16.mxu1 %v4290_v0  ;;  %v4216_v1 = vld [vmem:[%s6654_s1] sm:$0xff]   ;;  %v4218_v3 = vld [vmem:[%s6654_s1 + $0x8] sm:$0xff]   ;;  %v4220_v5 = vld [vmem:[%s6654_s1 + $0x10] sm:$0xff]  }
   0x2   :  { %v4217_v2 = vld [vmem:[%s6654_s1 + $0x80] sm:$0xff]   ;;  %2025 = vmatpush1.bf16.msra.mxu0 %v4216_v1  ;;  %v4219_v4 = vld [vmem:[%s6654_s1 + $0x88] sm:$0xff]   ;;  %v4221_v6 = vld [vmem:[%s6654_s1 + $0x90] sm:$0xff]  }
   0x3   :  { %2289 = vmatpush1.bf16.msra.mxu1 %v4217_v2  ;;  %2026 = vmatprep.subr.bf16.mxu0 %v4290_v0  ;;  %v4222_v7 = vld [vmem:[%s6654_s1 + $0x18] sm:$0xff]   ;;  %v4224_v9 = vld [vmem:[%s6654_s1 + $0x20] sm:$0xff]   ;;  %v4226_v11 = vld [vmem:[%s6654_s1 + $0x28] sm:$0xff]  }
   0x4   :  { %2290 = vmatprep.subr.bf16.mxu1 %v4290_v0  ;;  %v4223_v8 = vld [vmem:[%s6654_s1 + $0x98] sm:$0xff]   ;;  %v4225_v10 = vld [vmem:[%s6654_s1 + $0xa0] sm:$0xff]   ;;  %v4227_v12 = vld [vmem:[%s6654_s1 + $0xa8] sm:$0xff]  }
   0x5   :  { %v4228_v13 = vld [vmem:[%s6654_s1 + $0x30] sm:$0xff]   ;;  %v4230_v15 = vld [vmem:[%s6654_s1 + $0x38] sm:$0xff]   ;;  %v4232_v17 = vld [vmem:[%s6654_s1 + $0x40] sm:$0xff]  }
   0x6   :  { %2027 = vmatpush1.bf16.msra.mxu0 %v4218_v3  ;;  %v4229_v14 = vld [vmem:[%s6654_s1 + $0xb0] sm:$0xff]   ;;  %v4231_v16 = vld [vmem:[%s6654_s1 + $0xb8] sm:$0xff]   ;;  %v4233_v18 = vld [vmem:[%s6654_s1 + $0xc0] sm:$0xff]  }
   0x7   :  { %2291 = vmatpush1.bf16.msra.mxu1 %v4219_v4  ;;  %2028 = vmatprep.subr.bf16.mxu0 %v4290_v0  ;;  %v4391_v19 = vld [vmem:[%s6655_s0] sm:$0xff]  ;;  %v4401_v21 = vld [vmem:[%s6655_s0 + $0x8] sm:$0xff]  ;;  %v4236_v27 = vld [vmem:[%s6654_s1 + $0x50] sm:$0xff]  }
   0x8   :  { %2292 = vmatprep.subr.bf16.mxu1 %v4290_v0  ;;  %v4396_v20 = vld [vmem:[%s6655_s0 + $0x20] sm:$0xff]  ;;  %v141_v23 = vld [vmem:[%s6655_s0 + $0x28] sm:$0xff]  ;;  %v4237_v28 = vld [vmem:[%s6654_s1 + $0xd0] sm:$0xff]  }
   0x9   :  { %v3917_v22 = vcombine.high %v4391_v19, %v4396_v20  ;;  %v4234_v24 = vld [vmem:[%s6654_s1 + $0x48] sm:$0xff]   ;;  %v3919_v25 = vcombine.high %v4401_v21, %v141_v23  ;;  %v4238_v29 = vld [vmem:[%s6654_s1 + $0x58] sm:$0xff]   ;;  %v4240_v31 = vld [vmem:[%s6654_s1 + $0x60] sm:$0xff]   ;;  %v3916_v42 = vcombine.low %v4391_v19, %v4396_v20  ;;  %v3918_v44 = vcombine.low %v4401_v21, %v141_v23 }
   0xa   :  { %2029 = vmatpush1.bf16.msra.mxu0 %v4220_v5  ;;  %v4235_v26 = vld [vmem:[%s6654_s1 + $0xc8] sm:$0xff]   ;;  %v4239_v30 = vld [vmem:[%s6654_s1 + $0xd8] sm:$0xff]   ;;  %v4241_v32 = vld [vmem:[%s6654_s1 + $0xe0] sm:$0xff]  }
   0xb   :  { %2293 = vmatpush1.bf16.msra.mxu1 %v4221_v6  ;;  %2030 = vmatprep.subr.bf16.mxu0 %v4290_v0  ;;  %v4242_v33 = vld [vmem:[%s6654_s1 + $0x68] sm:$0xff]   ;;  %v4244_v35 = vld [vmem:[%s6654_s1 + $0x70] sm:$0xff]   ;;  %v4246_v37 = vld [vmem:[%s6654_s1 + $0x78] sm:$0xff]  }
   0xc   :  { %2294 = vmatprep.subr.bf16.mxu1 %v4290_v0  ;;  %2056 = vmatprep.mubr.bf16.mxu0 %v3917_v22  ;;  %v4243_v34 = vld [vmem:[%s6654_s1 + $0xe8] sm:$0xff]   ;;  %v4245_v36 = vld [vmem:[%s6654_s1 + $0xf0] sm:$0xff]   ;;  %v4247_v38 = vld [vmem:[%s6654_s1 + $0xf8] sm:$0xff]  }
   0xd   :  { %2320 = vmatprep.mubr.bf16.mxu1 %v3919_v25  ;;  %v144_v39 = vld [vmem:[%s6655_s0 + $0x40] sm:$0xff]  ;;  %v145_v41 = vld [vmem:[%s6655_s0 + $0x48] sm:$0xff]  ;;  %v4252_v59 = vld [vmem:[%s6654_s1 + $0x110] sm:$0xff]  }
   0xe   :  { %2031 = vmatpush1.bf16.msra.mxu0 %v4222_v7  ;;  %v148_v40 = vld [vmem:[%s6655_s0 + $0x60] sm:$0xff]  ;;  %v149_v43 = vld [vmem:[%s6655_s0 + $0x68] sm:$0xff]  ;;  %v4253_v60 = vld [vmem:[%s6654_s1 + $0x190] sm:$0xff]  }
   0xf   :  { %2295 = vmatpush1.bf16.msra.mxu1 %v4223_v8  ;;  %2032 = vmatprep.subr.bf16.mxu0 %v4290_v0  ;;  %v4248_v45 = vld [vmem:[%s6654_s1 + $0x100] sm:$0xff]   ;;  %v3925_v47 = vcombine.high %v144_v39, %v148_v40  ;;  %v3927_v48 = vcombine.high %v145_v41, %v149_v43  ;;  %v4250_v50 = vld [vmem:[%s6654_s1 + $0x108] sm:$0xff]   ;;  %v3924_v55 = vcombine.low %v144_v39, %v148_v40  ;;  %v4254_v63 = vld [vmem:[%s6654_s1 + $0x118] sm:$0xff]  }
  0x10   :  { %2296 = vmatprep.subr.bf16.mxu1 %v4290_v0  ;;  %v4249_v46 = vld [vmem:[%s6654_s1 + $0x180] sm:$0xff]   ;;  %v153_v52 = vld [vmem:[%s6655_s0 + $0x88] sm:$0xff]  ;;  %v3926_v56 = vcombine.low %v145_v41, %v149_v43  ;;  %v4255_v3 = vld [vmem:[%s6654_s1 + $0x198] sm:$0xff]  }
  0x11   :  { %v152_v49 = vld [vmem:[%s6655_s0 + $0x80] sm:$0xff]  ;;  %v4251_v53 = vld [vmem:[%s6654_s1 + $0x188] sm:$0xff]   ;;  %v4260_v20 = vld [vmem:[%s6654_s1 + $0x130] sm:$0xff]  }
  0x12   :  { %2033 = vmatpush1.bf16.msra.mxu0 %v4224_v9  ;;  %v156_v51 = vld [vmem:[%s6655_s0 + $0xa0] sm:$0xff]  ;;  %v157_v54 = vld [vmem:[%s6655_s0 + $0xa8] sm:$0xff]  ;;  %v4261_v21 = vld [vmem:[%s6654_s1 + $0x1b0] sm:$0xff]  }
  0x13   :  { %2297 = vmatpush1.bf16.msra.mxu1 %v4225_v10  ;;  %2034 = vmatprep.subr.bf16.mxu0 %v4290_v0  ;;  %v3933_v57 = vcombine.high %v152_v49, %v156_v51  ;;  %v3935_v58 = vcombine.high %v153_v52, %v157_v54  ;;  %v160_v61 = vld [vmem:[%s6655_s0 + $0xc0] sm:$0xff]  ;;  %v161_v1 = vld [vmem:[%s6655_s0 + $0xc8] sm:$0xff]  ;;  %v3932_v4 = vcombine.low %v152_v49, %v156_v51  ;;  %v4271_v51 = vld [vmem:[%s6654_s1 + $0x1d8] sm:$0xff]  }
  0x14   :  { %2298 = vmatprep.subr.bf16.mxu1 %v4290_v0  ;;  %v164_v62 = vld [vmem:[%s6655_s0 + $0xe0] sm:$0xff]  ;;  %v165_v2 = vld [vmem:[%s6655_s0 + $0xe8] sm:$0xff]  ;;  %v3934_v6 = vcombine.low %v153_v52, %v157_v54 }
  0x15   :  { %v4256_v5 = vld [vmem:[%s6654_s1 + $0x120] sm:$0xff]   ;;  %v3941_v7 = vcombine.high %v160_v61, %v164_v62  ;;  %v3943_v9 = vcombine.high %v161_v1, %v165_v2  ;;  %v177_v25 = vld [vmem:[%s6655_s0 + $0x148] sm:$0xff] }
  0x16   :  { %2035 = vmatpush1.bf16.msra.mxu0 %v4226_v11  ;;  %v4257_v8 = vld [vmem:[%s6654_s1 + $0x1a0] sm:$0xff]   ;;  %v4267_v39 = vld [vmem:[%s6654_s1 + $0x1c8] sm:$0xff]  }
  0x17   :  { %2299 = vmatpush1.bf16.msra.mxu1 %v4227_v12  ;;  %2036 = vmatprep.subr.bf16.mxu0 %v4290_v0  ;;  %v168_v10 = vld [vmem:[%s6655_s0 + $0x100] sm:$0xff]  ;;  %v169_v12 = vld [vmem:[%s6655_s0 + $0x108] sm:$0xff] }
  0x18   :  { %2300 = vmatprep.subr.bf16.mxu1 %v4290_v0  ;;  %v172_v11 = vld [vmem:[%s6655_s0 + $0x120] sm:$0xff]  ;;  %v193_v49 = vld [vmem:[%s6655_s0 + $0x1c8] sm:$0xff] }
  0x19   :  { %v176_v22 = vld [vmem:[%s6655_s0 + $0x140] sm:$0xff] }
  0x1a   :  { %2037 = vmatpush1.bf16.msra.mxu0 %v4228_v13  ;;  %v173_v13 = vld [vmem:[%s6655_s0 + $0x128] sm:$0xff]  ;;  %v180_v23 = vld [vmem:[%s6655_s0 + $0x160] sm:$0xff] }
  0x1b   :  { %2301 = vmatpush1.bf16.msra.mxu1 %v4229_v14  ;;  %2038 = vmatprep.subr.bf16.mxu0 %v4290_v0  ;;  %v4258_v14 = vld [vmem:[%s6654_s1 + $0x128] sm:$0xff]   ;;  %v3951_v19 = vcombine.high %v169_v12, %v173_v13  ;;  %v3956_v40 = vcombine.low %v176_v22, %v180_v23 }
  0x1c   :  { %2302 = vmatprep.subr.bf16.mxu1 %v4290_v0 }
  0x1e   :  { %2039 = vmatpush1.bf16.msra.mxu0 %v4230_v15  ;;  %v4259_v15 = vld [vmem:[%s6654_s1 + $0x1a8] sm:$0xff]  }
  0x1f   :  { %2303 = vmatpush1.bf16.msra.mxu1 %v4231_v16  ;;  %2040 = vmatprep.subr.bf16.mxu0 %v4290_v0  ;;  %v3940_v16 = vcombine.low %v160_v61, %v164_v62  ;;  %v205_v61 = vld [vmem:[%s6655_s0 + $0x228] sm:$0xff] }
  0x20   :  { %2304 = vmatprep.subr.bf16.mxu1 %v4290_v0 }
  0x22   :  { %2041 = vmatpush1.bf16.msra.mxu0 %v4232_v17  ;;  %v3942_v17 = vcombine.low %v161_v1, %v165_v2 }
  0x23   :  { %2305 = vmatpush1.bf16.msra.mxu1 %v4233_v18  ;;  %2042 = vmatprep.subr.bf16.mxu0 %v4290_v0  ;;  %v3949_v18 = vcombine.high %v168_v10, %v172_v11 }
  0x24   :  { %2306 = vmatprep.subr.bf16.mxu1 %v4290_v0 }
  0x26   :  { %2043 = vmatpush1.bf16.msra.mxu0 %v4234_v24  ;;  %v4262_v24 = vld [vmem:[%s6654_s1 + $0x138] sm:$0xff]  }
  0x27   :  { %2307 = vmatpush1.bf16.msra.mxu1 %v4235_v26  ;;  %2044 = vmatprep.subr.bf16.mxu0 %v4290_v0  ;;  %v181_v26 = vld [vmem:[%s6655_s0 + $0x168] sm:$0xff] }
  0x28   :  { %2308 = vmatprep.subr.bf16.mxu1 %v4290_v0  ;;  %v3958_v41 = vcombine.low %v177_v25, %v181_v26 }
  0x2a   :  { %2045 = vmatpush1.bf16.msra.mxu0 %v4236_v27  ;;  %v4263_v27 = vld [vmem:[%s6654_s1 + $0x1b8] sm:$0xff]  }
  0x2b   :  { %2309 = vmatpush1.bf16.msra.mxu1 %v4237_v28  ;;  %2046 = vmatprep.subr.bf16.mxu0 %v4290_v0  ;;  %v3948_v28 = vcombine.low %v168_v10, %v172_v11 }
  0x2c   :  { %2310 = vmatprep.subr.bf16.mxu1 %v4290_v0 }
  0x2e   :  { %2047 = vmatpush1.bf16.msra.mxu0 %v4238_v29  ;;  %v3950_v29 = vcombine.low %v169_v12, %v173_v13  ;;  %v4275_v12 = vld [vmem:[%s6654_s1 + $0x1e8] sm:$0xff]   ;;  %v216_v13 = vld [vmem:[%s6655_s0 + $0x280] sm:$0xff] }
  0x2f   :  { %2311 = vmatpush1.bf16.msra.mxu1 %v4239_v30  ;;  %2048 = vmatprep.subr.bf16.mxu0 %v4290_v0  ;;  %v3957_v30 = vcombine.high %v176_v22, %v180_v23  ;;  %v4277_v22 = vld [vmem:[%s6654_s1 + $0x1f0] sm:$0xff]   ;;  %v224_v23 = vld [vmem:[%s6655_s0 + $0x2c0] sm:$0xff] }
  0x30   :  { %2312 = vmatprep.subr.bf16.mxu1 %v4290_v0 }
  0x32   :  { %2049 = vmatpush1.bf16.msra.mxu0 %v4240_v31  ;;  %v3959_v31 = vcombine.high %v177_v25, %v181_v26  ;;  %v225_v25 = vld [vmem:[%s6655_s0 + $0x2c8] sm:$0xff] }
  0x33   :  { %2313 = vmatpush1.bf16.msra.mxu1 %v4241_v32  ;;  %2050 = vmatprep.subr.bf16.mxu0 %v4290_v0  ;;  %v4264_v32 = vld [vmem:[%s6654_s1 + $0x140] sm:$0xff]   ;;  %v229_v26 = vld [vmem:[%s6655_s0 + $0x2e8] sm:$0xff] }
  0x34   :  { %2314 = vmatprep.subr.bf16.mxu1 %v4290_v0 }
  0x36   :  { %2051 = vmatpush1.bf16.msra.mxu0 %v4242_v33  ;;  %v4265_v33 = vld [vmem:[%s6654_s1 + $0x1c0] sm:$0xff]  }
  0x37   :  { %2315 = vmatpush1.bf16.msra.mxu1 %v4243_v34  ;;  %2052 = vmatprep.subr.bf16.mxu0 %v4290_v0  ;;  %v184_v34 = vld [vmem:[%s6655_s0 + $0x180] sm:$0xff] }
  0x38   :  { %2316 = vmatprep.subr.bf16.mxu1 %v4290_v0 }
  0x3a   :  { %2053 = vmatpush1.bf16.msra.mxu0 %v4244_v35  ;;  %v188_v35 = vld [vmem:[%s6655_s0 + $0x1a0] sm:$0xff] }
  0x3b   :  { %2317 = vmatpush1.bf16.msra.mxu1 %v4245_v36  ;;  %2054 = vmatprep.subr.bf16.mxu0 %v4290_v0  ;;  %v4266_v36 = vld [vmem:[%s6654_s1 + $0x148] sm:$0xff]   ;;  %v3964_v52 = vcombine.low %v184_v34, %v188_v35 }
  0x3c   :  { %2318 = vmatprep.subr.bf16.mxu1 %v4290_v0 }
  0x3e   :  { %2055 = vmatpush1.bf16.msra.mxu0 %v4246_v37  ;;  %v185_v37 = vld [vmem:[%s6655_s0 + $0x188] sm:$0xff] }
  0x3f   :  { %2319 = vmatpush1.bf16.msra.mxu1 %v4247_v38  ;;  %2552 = vmatprep.subr.bf16.mxu0 %v4290_v0  ;;  %v189_v38 = vld [vmem:[%s6655_s0 + $0x1a8] sm:$0xff] }
  0x40   :  { %2816 = vmatprep.subr.bf16.mxu1 %v4290_v0  ;;  %v3967_v43 = vcombine.high %v185_v37, %v189_v38 }
  0x41   :  { %2057 = vmatmul.mubr.bf16.vlgmr.msra.gmra.mrb[0].mxu0 %v3916_v42  ;;  %v3965_v42 = vcombine.high %v184_v34, %v188_v35  ;;  %v4006_v35 = vcombine.low %v225_v25, %v229_v26 }
  0x42   :  { %2321 = vmatmul.mubr.bf16.vlgmr.msra.gmra.mrb[0].mxu1 %v3918_v44  ;;  %2553 = vmatpush1.bf16.msra.mxu0 %v4248_v45  ;;  %v4268_v44 = vld [vmem:[%s6654_s1 + $0x150] sm:$0xff]  }
  0x43   :  { %2817 = vmatpush1.bf16.msra.mxu1 %v4249_v46  ;;  %2064 = vmatprep.mubr.bf16.mxu0 %v3925_v47  ;;  %v4269_v45 = vld [vmem:[%s6654_s1 + $0x1d0] sm:$0xff]   ;;  %v192_v46 = vld [vmem:[%s6655_s0 + $0x1c0] sm:$0xff] }
  0x44   :  { %2328 = vmatprep.mubr.bf16.mxu1 %v3927_v48  ;;  %2554 = vmatprep.subr.bf16.mxu0 %v4290_v0  ;;  %v196_v47 = vld [vmem:[%s6655_s0 + $0x1e0] sm:$0xff]  ;;  %v4270_v48 = vld [vmem:[%s6654_s1 + $0x158] sm:$0xff]  }
  0x45   :  { %2818 = vmatprep.subr.bf16.mxu1 %v4290_v0  ;;  %v3973_v54 = vcombine.high %v192_v46, %v196_v47  ;;  %v3972_v62 = vcombine.low %v192_v46, %v196_v47  ;;  %v4279_v47 = vld [vmem:[%s6654_s1 + $0x1f8] sm:$0xff]  }
  0x46   :  { %2555 = vmatpush1.bf16.msra.mxu0 %v4250_v50  ;;  %v197_v50 = vld [vmem:[%s6655_s0 + $0x1e8] sm:$0xff] }
  0x47   :  { %2819 = vmatpush1.bf16.msra.mxu1 %v4251_v53  ;;  %2556 = vmatprep.subr.bf16.mxu0 %v4290_v0  ;;  %v3966_v53 = vcombine.low %v185_v37, %v189_v38  ;;  %v240_v38 = vld [vmem:[%s6655_s0 + $0x340] sm:$0xff] }
  0x48   :  { %2820 = vmatprep.subr.bf16.mxu1 %v4290_v0 }
  0x49   :  { %2065 = vmatmul.mubr.bf16.gmra.mrb[4].mxu0 %v3924_v55  ;;  %v3975_v55 = vcombine.high %v193_v49, %v197_v50 }
  0x4a   :  { %2329 = vmatmul.mubr.bf16.gmra.mrb[4].mxu1 %v3926_v56  ;;  %2072 = vmatprep.mubr.bf16.mxu0 %v3933_v57  ;;  %v4272_v56 = vld [vmem:[%s6654_s1 + $0x160] sm:$0xff]  }
  0x4b   :  { %2336 = vmatprep.mubr.bf16.mxu1 %v3935_v58  ;;  %2557 = vmatpush1.bf16.msra.mxu0 %v4252_v59  ;;  %v4273_v57 = vld [vmem:[%s6654_s1 + $0x1e0] sm:$0xff]  }
  0x4c   :  { %2821 = vmatpush1.bf16.msra.mxu1 %v4253_v60  ;;  %2558 = vmatprep.subr.bf16.mxu0 %v4290_v0  ;;  %v200_v58 = vld [vmem:[%s6655_s0 + $0x200] sm:$0xff]  ;;  %v201_v60 = vld [vmem:[%s6655_s0 + $0x208] sm:$0xff] }
  0x4d   :  { %2822 = vmatprep.subr.bf16.mxu1 %v4290_v0  ;;  %v204_v59 = vld [vmem:[%s6655_s0 + $0x220] sm:$0xff]  ;;  %v3983_v2 = vcombine.high %v201_v60, %v205_v61 }
  0x4e   :  { %v3981_v1 = vcombine.high %v200_v58, %v204_v59 }
  0x4f   :  { %2559 = vmatpush1.bf16.msra.mxu0 %v4254_v63  ;;  %v3974_v63 = vcombine.low %v193_v49, %v197_v50  ;;  %v252_v49 = vld [vmem:[%s6655_s0 + $0x3a0] sm:$0xff]  ;;  %v249_v50 = vld [vmem:[%s6655_s0 + $0x388] sm:$0xff] }
  0x50   :  { %2823 = vmatpush1.bf16.msra.mxu1 %v4255_v3  ;;  %2560 = vmatprep.subr.bf16.mxu0 %v4290_v0  ;;  %v4274_v3 = vld [vmem:[%s6654_s1 + $0x168] sm:$0xff]  }
  0x51   :  { %2073 = vmatmul.mubr.bf16.gmra.mrb[8].mxu0 %v3932_v4  ;;  %2824 = vmatprep.subr.bf16.mxu1 %v4290_v0  ;;  %v208_v4 = vld [vmem:[%s6655_s0 + $0x240] sm:$0xff] }
  0x52   :  { %2337 = vmatmul.mubr.bf16.gmra.mrb[8].mxu1 %v3934_v6  ;;  %2080 = vmatprep.mubr.bf16.mxu0 %v3941_v7  ;;  %v209_v6 = vld [vmem:[%s6655_s0 + $0x248] sm:$0xff] }
  0x53   :  { %2344 = vmatprep.mubr.bf16.mxu1 %v3943_v9  ;;  %2561 = vmatpush1.bf16.msra.mxu0 %v4256_v5  ;;  %v212_v5 = vld [vmem:[%s6655_s0 + $0x260] sm:$0xff]  ;;  %v213_v7 = vld [vmem:[%s6655_s0 + $0x268] sm:$0xff]  ;;  %v3982_v9 = vcombine.low %v201_v60, %v205_v61 }
  0x54   :  { %2825 = vmatpush1.bf16.msra.mxu1 %v4257_v8  ;;  %2562 = vmatprep.subr.bf16.mxu0 %v4290_v0  ;;  %v3980_v8 = vcombine.low %v200_v58, %v204_v59  ;;  %v3989_v10 = vcombine.high %v208_v4, %v212_v5  ;;  %v3991_v11 = vcombine.high %v209_v6, %v213_v7  ;;  %v257_v58 = vld [vmem:[%s6655_s0 + $0x3c8] sm:$0xff] }
  0x55   :  { %2826 = vmatprep.subr.bf16.mxu1 %v4290_v0  ;;  %v261_v59 = vld [vmem:[%s6655_s0 + $0x3e8] sm:$0xff] }
  0x57   :  { %2563 = vmatpush1.bf16.msra.mxu0 %v4258_v14  ;;  %v220_v14 = vld [vmem:[%s6655_s0 + $0x2a0] sm:$0xff] }
  0x58   :  { %2827 = vmatpush1.bf16.msra.mxu1 %v4259_v15  ;;  %2564 = vmatprep.subr.bf16.mxu0 %v4290_v0  ;;  %v217_v15 = vld [vmem:[%s6655_s0 + $0x288] sm:$0xff] }
  0x59   :  { %2081 = vmatmul.mubr.bf16.gmra.mrb[12].mxu0 %v3940_v16  ;;  %2828 = vmatprep.subr.bf16.mxu1 %v4290_v0  ;;  %v221_v16 = vld [vmem:[%s6655_s0 + $0x2a8] sm:$0xff] }
  0x5a   :  { %2345 = vmatmul.mubr.bf16.gmra.mrb[12].mxu1 %v3942_v17  ;;  %2088 = vmatprep.mubr.bf16.mxu0 %v3949_v18  ;;  %v3988_v17 = vcombine.low %v208_v4, %v212_v5  ;;  %v3990_v18 = vcombine.low %v209_v6, %v213_v7  ;;  %v269_v4 = vld [vmem:[%s6655_s0 + $0x428] sm:$0xff]  ;;  %v4038_v6 = vcombine.low %v257_v58, %v261_v59 }
  0x5b   :  { %2352 = vmatprep.mubr.bf16.mxu1 %v3951_v19  ;;  %2565 = vmatpush1.bf16.msra.mxu0 %v4260_v20  ;;  %v3997_v19 = vcombine.high %v216_v13, %v220_v14  ;;  %v3999_v20 = vcombine.high %v217_v15, %v221_v16 }
  0x5c   :  { %2829 = vmatpush1.bf16.msra.mxu1 %v4261_v21  ;;  %2566 = vmatprep.subr.bf16.mxu0 %v4290_v0  ;;  %v4276_v21 = vld [vmem:[%s6654_s1 + $0x170] sm:$0xff]  }
  0x5d   :  { %2830 = vmatprep.subr.bf16.mxu1 %v4290_v0 }
  0x5f   :  { %2567 = vmatpush1.bf16.msra.mxu0 %v4262_v24  ;;  %v228_v24 = vld [vmem:[%s6655_s0 + $0x2e0] sm:$0xff] }
  0x60   :  { %2831 = vmatpush1.bf16.msra.mxu1 %v4263_v27  ;;  %2568 = vmatprep.subr.bf16.mxu0 %v4290_v0  ;;  %v3996_v27 = vcombine.low %v216_v13, %v220_v14  ;;  %v4004_v34 = vcombine.low %v224_v23, %v228_v24 }
  0x61   :  { %2089 = vmatmul.mubr.bf16.gmra.mrb[16].mxu0 %v3948_v28  ;;  %2832 = vmatprep.subr.bf16.mxu1 %v4290_v0  ;;  %v3998_v28 = vcombine.low %v217_v15, %v221_v16 }
  0x62   :  { %2353 = vmatmul.mubr.bf16.gmra.mrb[16].mxu1 %v3950_v29  ;;  %2096 = vmatprep.mubr.bf16.mxu0 %v3957_v30  ;;  %v4005_v29 = vcombine.high %v224_v23, %v228_v24  ;;  %v4007_v30 = vcombine.high %v225_v25, %v229_v26  ;;  %v288_v25 = vld [vmem:[%s6655_s0 + $0x4c0] sm:$0xff] }
  0x63   :  { %2360 = vmatprep.mubr.bf16.mxu1 %v3959_v31  ;;  %2569 = vmatpush1.bf16.msra.mxu0 %v4264_v32  ;;  %v232_v31 = vld [vmem:[%s6655_s0 + $0x300] sm:$0xff] }
  0x64   :  { %2833 = vmatpush1.bf16.msra.mxu1 %v4265_v33  ;;  %2570 = vmatprep.subr.bf16.mxu0 %v4290_v0  ;;  %v236_v32 = vld [vmem:[%s6655_s0 + $0x320] sm:$0xff]  ;;  %v233_v33 = vld [vmem:[%s6655_s0 + $0x308] sm:$0xff] }
  0x65   :  { %2834 = vmatprep.subr.bf16.mxu1 %v4290_v0  ;;  %v292_v26 = vld [vmem:[%s6655_s0 + $0x4e0] sm:$0xff] }
  0x67   :  { %2571 = vmatpush1.bf16.msra.mxu0 %v4266_v36  ;;  %v4013_v36 = vcombine.high %v232_v31, %v236_v32 }
  0x68   :  { %2835 = vmatpush1.bf16.msra.mxu1 %v4267_v39  ;;  %2572 = vmatprep.subr.bf16.mxu0 %v4290_v0  ;;  %v244_v39 = vld [vmem:[%s6655_s0 + $0x360] sm:$0xff] }
  0x69   :  { %2097 = vmatmul.mubr.bf16.gmra.mrb[20].mxu0 %v3956_v40  ;;  %2836 = vmatprep.subr.bf16.mxu1 %v4290_v0  ;;  %v241_v40 = vld [vmem:[%s6655_s0 + $0x348] sm:$0xff] }
  0x6a   :  { %2361 = vmatmul.mubr.bf16.gmra.mrb[20].mxu1 %v3958_v41  ;;  %2104 = vmatprep.mubr.bf16.mxu0 %v3965_v42  ;;  %v245_v41 = vld [vmem:[%s6655_s0 + $0x368] sm:$0xff]  ;;  %v4012_v42 = vcombine.low %v232_v31, %v236_v32  ;;  %v4069_v31 = vcombine.high %v288_v25, %v292_v26 }
  0x6b   :  { %2368 = vmatprep.mubr.bf16.mxu1 %v3967_v43  ;;  %2573 = vmatpush1.bf16.msra.mxu0 %v4268_v44  ;;  %v4021_v44 = vcombine.high %v240_v38, %v244_v39  ;;  %v4023_v46 = vcombine.high %v241_v40, %v245_v41 }
  0x6c   :  { %2837 = vmatpush1.bf16.msra.mxu1 %v4269_v45  ;;  %2574 = vmatprep.subr.bf16.mxu0 %v4290_v0  ;;  %v4278_v45 = vld [vmem:[%s6654_s1 + $0x178] sm:$0xff]  }
  0x6d   :  { %2838 = vmatprep.subr.bf16.mxu1 %v4290_v0 }
  0x6f   :  { %2575 = vmatpush1.bf16.msra.mxu0 %v4270_v48  ;;  %v248_v48 = vld [vmem:[%s6655_s0 + $0x380] sm:$0xff] }
  0x70   :  { %2839 = vmatpush1.bf16.msra.mxu1 %v4271_v51  ;;  %2576 = vmatprep.subr.bf16.mxu0 %v4290_v0  ;;  %v253_v51 = vld [vmem:[%s6655_s0 + $0x3a8] sm:$0xff]  ;;  %v4028_v60 = vcombine.low %v248_v48, %v252_v49 }
  0x71   :  { %2105 = vmatmul.mubr.bf16.gmra.mrb[24].mxu0 %v3964_v52  ;;  %2840 = vmatprep.subr.bf16.mxu1 %v4290_v0  ;;  %v4020_v52 = vcombine.low %v240_v38, %v244_v39  ;;  %v4030_v61 = vcombine.low %v249_v50, %v253_v51 }
  0x72   :  { %2369 = vmatmul.mubr.bf16.gmra.mrb[24].mxu1 %v3966_v53  ;;  %2112 = vmatprep.mubr.bf16.mxu0 %v3973_v54  ;;  %v4022_v53 = vcombine.low %v241_v40, %v245_v41  ;;  %v4029_v54 = vcombine.high %v248_v48, %v252_v49  ;;  %v304_v40 = vld [vmem:[%s6655_s0 + $0x540] sm:$0xff] }
  0x73   :  { %2376 = vmatprep.mubr.bf16.mxu1 %v3975_v55  ;;  %2577 = vmatpush1.bf16.msra.mxu0 %v4272_v56  ;;  %v4031_v55 = vcombine.high %v249_v50, %v253_v51  ;;  %v256_v56 = vld [vmem:[%s6655_s0 + $0x3c0] sm:$0xff]  ;;  %v313_v50 = vld [vmem:[%s6655_s0 + $0x588] sm:$0xff] }
  0x74   :  { %2841 = vmatpush1.bf16.msra.mxu1 %v4273_v57  ;;  %2578 = vmatprep.subr.bf16.mxu0 %v4290_v0  ;;  %v260_v57 = vld [vmem:[%s6655_s0 + $0x3e0] sm:$0xff]  ;;  %v317_v51 = vld [vmem:[%s6655_s0 + $0x5a8] sm:$0xff] }
  0x75   :  { %2842 = vmatprep.subr.bf16.mxu1 %v4290_v0  ;;  %v4036_v5 = vcombine.low %v256_v56, %v260_v57  ;;  %v308_v41 = vld [vmem:[%s6655_s0 + $0x560] sm:$0xff] }
  0x76   :  { %v312_v48 = vld [vmem:[%s6655_s0 + $0x580] sm:$0xff] }
  0x77   :  { %2579 = vmatpush1.bf16.msra.mxu0 %v4274_v3  ;;  %v265_v3 = vld [vmem:[%s6655_s0 + $0x408] sm:$0xff]  ;;  %v316_v49 = vld [vmem:[%s6655_s0 + $0x5a0] sm:$0xff] }
  0x78   :  { %2580 = vmatprep.subr.bf16.mxu0 %v4290_v0  ;;  %2843 = vmatpush1.bf16.msra.mxu1 %v4275_v12  ;;  %v277_v12 = vld [vmem:[%s6655_s0 + $0x468] sm:$0xff]  ;;  %v4046_v14 = vcombine.low %v265_v3, %v269_v4 }
  0x79   :  { %2113 = vmatmul.mubr.bf16.gmra.mrb[28].mxu0 %v3972_v62  ;;  %2844 = vmatprep.subr.bf16.mxu1 %v4290_v0  ;;  %v4037_v62 = vcombine.high %v256_v56, %v260_v57  ;;  %v320_v56 = vld [vmem:[%s6655_s0 + $0x5c0] sm:$0xff] }
  0x7a   :  { %2377 = vmatmul.mubr.bf16.gmra.mrb[28].mxu1 %v3974_v63  ;;  %2120 = vmatprep.mubr.bf16.mxu0 %v3981_v1  ;;  %v4039_v63 = vcombine.high %v257_v58, %v261_v59  ;;  %v264_v1 = vld [vmem:[%s6655_s0 + $0x400] sm:$0xff]  ;;  %v321_v58 = vld [vmem:[%s6655_s0 + $0x5c8] sm:$0xff] }
  0x7b   :  { %2384 = vmatprep.mubr.bf16.mxu1 %v3983_v2  ;;  %2581 = vmatpush1.bf16.msra.mxu0 %v4276_v21  ;;  %v268_v2 = vld [vmem:[%s6655_s0 + $0x420] sm:$0xff]  ;;  %v325_v59 = vld [vmem:[%s6655_s0 + $0x5e8] sm:$0xff] }
  0x7c   :  { %2845 = vmatpush1.bf16.msra.mxu1 %v4277_v22  ;;  %2582 = vmatprep.subr.bf16.mxu0 %v4290_v0  ;;  %v4045_v7 = vcombine.high %v264_v1, %v268_v2  ;;  %v4044_v13 = vcombine.low %v264_v1, %v268_v2  ;;  %v324_v57 = vld [vmem:[%s6655_s0 + $0x5e0] sm:$0xff] }
  0x7d   :  { %2846 = vmatprep.subr.bf16.mxu1 %v4290_v0  ;;  %v237_v0 = vld [vmem:[%s6655_s0 + $0x328] sm:$0xff]  ;;  %v328_v1 = vld [vmem:[%s6655_s0 + $0x600] sm:$0xff] }
  0x7e   :  { %v4015_v37 = vcombine.high %v233_v33, %v237_v0  ;;  %v4014_v43 = vcombine.low %v233_v33, %v237_v0  ;;  %v296_v33 = vld [vmem:[%s6655_s0 + $0x500] sm:$0xff] }
  0x7f   :  { %2583 = vmatpush1.bf16.msra.mxu0 %v4278_v45  ;;  %v300_v0 = vld [vmem:[%s6655_s0 + $0x520] sm:$0xff] }
  0x80   :  { %2847 = vmatpush1.bf16.msra.mxu1 %v4279_v47  ;;  %v4077_v38 = vcombine.high %v296_v33, %v300_v0  ;;  %v332_v2 = vld [vmem:[%s6655_s0 + $0x620] sm:$0xff] }
  0x81   :  { %2121 = vmatmul.mubr.bf16.gmra.mrb[32].mxu0 %v3980_v8  ;;  %v4047_v8 = vcombine.high %v265_v3, %v269_v4  ;;  %v329_v3 = vld [vmem:[%s6655_s0 + $0x608] sm:$0xff] }
  0x82   :  { %2385 = vmatmul.mubr.bf16.gmra.mrb[32].mxu1 %v3982_v9  ;;  %2128 = vmatprep.mubr.bf16.mxu0 %v3989_v10  ;;  %v272_v9 = vld [vmem:[%s6655_s0 + $0x440] sm:$0xff]  ;;  %v333_v4 = vld [vmem:[%s6655_s0 + $0x628] sm:$0xff] }
  0x83   :  { %2392 = vmatprep.mubr.bf16.mxu1 %v3991_v11  ;;  %v276_v10 = vld [vmem:[%s6655_s0 + $0x460] sm:$0xff]  ;;  %v273_v11 = vld [vmem:[%s6655_s0 + $0x448] sm:$0xff] }
  0x84   :  { %v4053_v15 = vcombine.high %v272_v9, %v276_v10  ;;  %v4055_v16 = vcombine.high %v273_v11, %v277_v12  ;;  %v4052_v21 = vcombine.low %v272_v9, %v276_v10  ;;  %v4054_v22 = vcombine.low %v273_v11, %v277_v12  ;;  %v336_v9 = vld [vmem:[%s6655_s0 + $0x640] sm:$0xff]  ;;  %v337_v11 = vld [vmem:[%s6655_s0 + $0x648] sm:$0xff] }
  0x85   :  { %v340_v10 = vld [vmem:[%s6655_s0 + $0x660] sm:$0xff]  ;;  %v341_v12 = vld [vmem:[%s6655_s0 + $0x668] sm:$0xff] }
  0x89   :  { %2129 = vmatmul.mubr.bf16.gmra.mrb[36].mxu0 %v3988_v17  ;;  %v280_v17 = vld [vmem:[%s6655_s0 + $0x480] sm:$0xff] }
  0x8a   :  { %2393 = vmatmul.mubr.bf16.gmra.mrb[36].mxu1 %v3990_v18  ;;  %2136 = vmatprep.mubr.bf16.mxu0 %v3997_v19  ;;  %v284_v18 = vld [vmem:[%s6655_s0 + $0x4a0] sm:$0xff]  ;;  %v281_v19 = vld [vmem:[%s6655_s0 + $0x488] sm:$0xff] }
  0x8b   :  { %2400 = vmatprep.mubr.bf16.mxu1 %v3999_v20  ;;  %v285_v20 = vld [vmem:[%s6655_s0 + $0x4a8] sm:$0xff]  ;;  %v4061_v23 = vcombine.high %v280_v17, %v284_v18 }
  0x8c   :  { %v4063_v24 = vcombine.high %v281_v19, %v285_v20 }
  0x91   :  { %2137 = vmatmul.mubr.bf16.gmra.mrb[40].mxu0 %v3996_v27  ;;  %v289_v27 = vld [vmem:[%s6655_s0 + $0x4c8] sm:$0xff] }
  0x92   :  { %2401 = vmatmul.mubr.bf16.gmra.mrb[40].mxu1 %v3998_v28  ;;  %2144 = vmatprep.mubr.bf16.mxu0 %v4005_v29  ;;  %v293_v28 = vld [vmem:[%s6655_s0 + $0x4e8] sm:$0xff]  ;;  %v4060_v29 = vcombine.low %v280_v17, %v284_v18  ;;  %v344_v17 = vld [vmem:[%s6655_s0 + $0x680] sm:$0xff] }
  0x93   :  { %2408 = vmatprep.mubr.bf16.mxu1 %v4007_v30  ;;  %v4062_v30 = vcombine.low %v281_v19, %v285_v20  ;;  %v4071_v32 = vcombine.high %v289_v27, %v293_v28  ;;  %v348_v18 = vld [vmem:[%s6655_s0 + $0x6a0] sm:$0xff]  ;;  %v345_v19 = vld [vmem:[%s6655_s0 + $0x688] sm:$0xff] }
  0x94   :  { %v349_v20 = vld [vmem:[%s6655_s0 + $0x6a8] sm:$0xff] }
  0x99   :  { %2145 = vmatmul.mubr.bf16.gmra.mrb[44].mxu0 %v4004_v34  ;;  %v297_v34 = vld [vmem:[%s6655_s0 + $0x508] sm:$0xff] }
  0x9a   :  { %2409 = vmatmul.mubr.bf16.gmra.mrb[44].mxu1 %v4006_v35  ;;  %2152 = vmatprep.mubr.bf16.mxu0 %v4013_v36  ;;  %v301_v35 = vld [vmem:[%s6655_s0 + $0x528] sm:$0xff]  ;;  %v4068_v36 = vcombine.low %v288_v25, %v292_v26  ;;  %v352_v25 = vld [vmem:[%s6655_s0 + $0x6c0] sm:$0xff] }
  0x9b   :  { %2416 = vmatprep.mubr.bf16.mxu1 %v4015_v37  ;;  %v4070_v37 = vcombine.low %v289_v27, %v293_v28  ;;  %v4079_v39 = vcombine.high %v297_v34, %v301_v35  ;;  %v4078_v45 = vcombine.low %v297_v34, %v301_v35  ;;  %v356_v26 = vld [vmem:[%s6655_s0 + $0x6e0] sm:$0xff]  ;;  %v353_v27 = vld [vmem:[%s6655_s0 + $0x6c8] sm:$0xff] }
  0x9c   :  { %v357_v28 = vld [vmem:[%s6655_s0 + $0x6e8] sm:$0xff] }
  0x9d   :  { %v361_v34 = vld [vmem:[%s6655_s0 + $0x708] sm:$0xff] }
  0xa1   :  { %2153 = vmatmul.mubr.bf16.gmra.mrb[48].mxu0 %v4012_v42  ;;  %v305_v42 = vld [vmem:[%s6655_s0 + $0x548] sm:$0xff] }
  0xa2   :  { %2417 = vmatmul.mubr.bf16.gmra.mrb[48].mxu1 %v4014_v43  ;;  %2160 = vmatprep.mubr.bf16.mxu0 %v4021_v44  ;;  %v309_v43 = vld [vmem:[%s6655_s0 + $0x568] sm:$0xff]  ;;  %v4076_v44 = vcombine.low %v296_v33, %v300_v0  ;;  %v360_v33 = vld [vmem:[%s6655_s0 + $0x700] sm:$0xff] }
  0xa3   :  { %2424 = vmatprep.mubr.bf16.mxu1 %v4023_v46  ;;  %v4085_v46 = vcombine.high %v304_v40, %v308_v41  ;;  %v4087_v47 = vcombine.high %v305_v42, %v309_v43 }
  0xa9   :  { %2161 = vmatmul.mubr.bf16.gmra.mrb[52].mxu0 %v4020_v52  ;;  %v4084_v52 = vcombine.low %v304_v40, %v308_v41  ;;  %v4134_v41 = vcombine.low %v353_v27, %v357_v28 }
  0xaa   :  { %2425 = vmatmul.mubr.bf16.gmra.mrb[52].mxu1 %v4022_v53  ;;  %2168 = vmatprep.mubr.bf16.mxu0 %v4029_v54  ;;  %v4086_v53 = vcombine.low %v305_v42, %v309_v43  ;;  %v4093_v54 = vcombine.high %v312_v48, %v316_v49  ;;  %v4141_v42 = vcombine.high %v360_v33, %v360_v33 }
  0xab   :  { %2432 = vmatprep.mubr.bf16.mxu1 %v4031_v55  ;;  %v4095_v55 = vcombine.high %v313_v50, %v317_v51 }
  0xb1   :  { %2169 = vmatmul.mubr.bf16.gmra.mrb[56].mxu0 %v4028_v60  ;;  %v4092_v60 = vcombine.low %v312_v48, %v316_v49  ;;  %v138_v48 = vld [vmem:[%s6655_s0 + $0x10] sm:$0xff] }
  0xb2   :  { %2433 = vmatmul.mubr.bf16.gmra.mrb[56].mxu1 %v4030_v61  ;;  %2176 = vmatprep.mubr.bf16.mxu0 %v4037_v62  ;;  %v4094_v61 = vcombine.low %v313_v50, %v317_v51  ;;  %v4101_v62 = vcombine.high %v320_v56, %v324_v57  ;;  %v142_v49 = vld [vmem:[%s6655_s0 + $0x30] sm:$0xff]  ;;  %v139_v51 = vld [vmem:[%s6655_s0 + $0x18] sm:$0xff] }
  0xb3   :  { %2440 = vmatprep.mubr.bf16.mxu1 %v4039_v63  ;;  %v4103_v63 = vcombine.high %v321_v58, %v325_v59 }
  0xb9   :  { %2177 = vmatmul.mubr.bf16.gmra.mrb[60].mxu0 %v4036_v5  ;;  %v4100_v5 = vcombine.low %v320_v56, %v324_v57 }
  0xba   :  { %2441 = vmatmul.mubr.bf16.gmra.mrb[60].mxu1 %v4038_v6  ;;  %2184 = vmatprep.mubr.bf16.mxu0 %v4045_v7  ;;  %v4102_v6 = vcombine.low %v321_v58, %v325_v59  ;;  %v4109_v7 = vcombine.high %v328_v1, %v332_v2  ;;  %v4142_v59 = vcombine.low %v361_v34, %v361_v34 }
  0xbb   :  { %2448 = vmatprep.mubr.bf16.mxu1 %v4047_v8  ;;  %v4111_v8 = vcombine.high %v329_v3, %v333_v4 }
  0xc1   :  { %2185 = vmatmul.mubr.bf16.gmra.mrb[64].mxu0 %v4044_v13  ;;  %v4108_v13 = vcombine.low %v328_v1, %v332_v2 }
  0xc2   :  { %2449 = vmatmul.mubr.bf16.gmra.mrb[64].mxu1 %v4046_v14  ;;  %2192 = vmatprep.mubr.bf16.mxu0 %v4053_v15  ;;  %v4110_v14 = vcombine.low %v329_v3, %v333_v4  ;;  %v4117_v15 = vcombine.high %v336_v9, %v340_v10  ;;  %v146_v3 = vld [vmem:[%s6655_s0 + $0x50] sm:$0xff] }
  0xc3   :  { %2456 = vmatprep.mubr.bf16.mxu1 %v4055_v16  ;;  %v4119_v16 = vcombine.high %v337_v11, %v341_v12  ;;  %v150_v4 = vld [vmem:[%s6655_s0 + $0x70] sm:$0xff] }
  0xc9   :  { %2193 = vmatmul.mubr.bf16.gmra.mrb[68].mxu0 %v4052_v21  ;;  %v4116_v21 = vcombine.low %v336_v9, %v340_v10  ;;  %v3920_v10 = vcombine.low %v138_v48, %v142_v49 }
  0xca   :  { %2457 = vmatmul.mubr.bf16.gmra.mrb[68].mxu1 %v4054_v22  ;;  %2200 = vmatprep.mubr.bf16.mxu0 %v4061_v23  ;;  %v4118_v22 = vcombine.low %v337_v11, %v341_v12  ;;  %v4125_v23 = vcombine.high %v344_v17, %v348_v18 }
  0xcb   :  { %2464 = vmatprep.mubr.bf16.mxu1 %v4063_v24  ;;  %v4127_v24 = vcombine.high %v345_v19, %v349_v20 }
  0xd1   :  { %2201 = vmatmul.mubr.bf16.gmra.mrb[72].mxu0 %v4060_v29  ;;  %v4124_v29 = vcombine.low %v344_v17, %v348_v18 }
  0xd2   :  { %2465 = vmatmul.mubr.bf16.gmra.mrb[72].mxu1 %v4062_v30  ;;  %2208 = vmatprep.mubr.bf16.mxu0 %v4069_v31  ;;  %v4126_v30 = vcombine.low %v345_v19, %v349_v20  ;;  %v4133_v31 = vcombine.high %v352_v25, %v356_v26 }
  0xd3   :  { %2472 = vmatprep.mubr.bf16.mxu1 %v4071_v32  ;;  %v4135_v32 = vcombine.high %v353_v27, %v357_v28  ;;  %v3928_v28 = vcombine.low %v146_v3, %v150_v4 }
  0xd9   :  { %2209 = vmatmul.mubr.bf16.gmra.mrb[76].mxu0 %v4068_v36 }
  0xda   :  { %2473 = vmatmul.mubr.bf16.gmra.mrb[76].mxu1 %v4070_v37  ;;  %2216 = vmatprep.mubr.bf16.mxu0 %v4077_v38  ;;  %v4132_v37 = vcombine.low %v352_v25, %v356_v26  ;;  %v159_v25 = vld [vmem:[%s6655_s0 + $0xb8] sm:$0xff] }
  0xdb   :  { %2480 = vmatprep.mubr.bf16.mxu1 %v4079_v39 }
  0xe1   :  { %2217 = vmatmul.mubr.bf16.gmra.mrb[80].mxu0 %v4076_v44 }
  0xe2   :  { %2481 = vmatmul.mubr.bf16.gmra.mrb[80].mxu1 %v4078_v45  ;;  %2224 = vmatprep.mubr.bf16.mxu0 %v4085_v46  ;;  %v4143_v45 = vcombine.high %v361_v34, %v361_v34 }
  0xe3   :  { %2488 = vmatprep.mubr.bf16.mxu1 %v4087_v47 }
  0xe9   :  { %2225 = vmatmul.mubr.bf16.gmra.mrb[84].mxu0 %v4084_v52  ;;  %v143_v52 = vld [vmem:[%s6655_s0 + $0x38] sm:$0xff] }
  0xea   :  { %2489 = vmatmul.mubr.bf16.gmra.mrb[84].mxu1 %v4086_v53  ;;  %2232 = vmatprep.mubr.bf16.mxu0 %v4093_v54 }
  0xeb   :  { %2496 = vmatprep.mubr.bf16.mxu1 %v4095_v55  ;;  %v4140_v55 = vcombine.low %v360_v33, %v360_v33 }
  0xf1   :  { %2233 = vmatmul.mubr.bf16.gmra.mrb[88].mxu0 %v4092_v60  ;;  %v3921_v60 = vcombine.high %v138_v48, %v142_v49 }
  0xf2   :  { %2497 = vmatmul.mubr.bf16.gmra.mrb[88].mxu1 %v4094_v61  ;;  %2240 = vmatprep.mubr.bf16.mxu0 %v4101_v62 }
  0xf3   :  { %2504 = vmatprep.mubr.bf16.mxu1 %v4103_v63  ;;  %v3923_v63 = vcombine.high %v139_v51, %v143_v52 }
  0xf9   :  { %2241 = vmatmul.mubr.bf16.gmra.mrb[92].mxu0 %v4100_v5 }
  0xfa   :  { %2505 = vmatmul.mubr.bf16.gmra.mrb[92].mxu1 %v4102_v6  ;;  %2248 = vmatprep.mubr.bf16.mxu0 %v4109_v7  ;;  %v147_v6 = vld [vmem:[%s6655_s0 + $0x58] sm:$0xff] }
  0xfb   :  { %2512 = vmatprep.mubr.bf16.mxu1 %v4111_v8  ;;  %v151_v7 = vld [vmem:[%s6655_s0 + $0x78] sm:$0xff] }
  0xfc   :  { %v3931_v18 = vcombine.high %v147_v6, %v151_v7 }
 0x101   :  { %2249 = vmatmul.mubr.bf16.gmra.mrb[96].mxu0 %v4108_v13 }
 0x102   :  { %2513 = vmatmul.mubr.bf16.gmra.mrb[96].mxu1 %v4110_v14  ;;  %2256 = vmatprep.mubr.bf16.mxu0 %v4117_v15  ;;  %v3922_v14 = vcombine.low %v139_v51, %v143_v52  ;;  %v3929_v15 = vcombine.high %v146_v3, %v150_v4 }
 0x103   :  { %2520 = vmatprep.mubr.bf16.mxu1 %v4119_v16 }
 0x109   :  { %2257 = vmatmul.mubr.bf16.gmra.mrb[100].mxu0 %v4116_v21  ;;  %v154_v21 = vld [vmem:[%s6655_s0 + $0x90] sm:$0xff] }
 0x10a   :  { %2521 = vmatmul.mubr.bf16.gmra.mrb[100].mxu1 %v4118_v22  ;;  %2264 = vmatprep.mubr.bf16.mxu0 %v4125_v23  ;;  %v158_v22 = vld [vmem:[%s6655_s0 + $0xb0] sm:$0xff] }
 0x10b   :  { %2528 = vmatprep.mubr.bf16.mxu1 %v4127_v24  ;;  %v155_v24 = vld [vmem:[%s6655_s0 + $0x98] sm:$0xff]  ;;  %v3937_v33 = vcombine.high %v154_v21, %v158_v22 }
 0x10c   :  { %v3938_v51 = vcombine.low %v155_v24, %v159_v25 }
 0x111   :  { %2265 = vmatmul.mubr.bf16.gmra.mrb[104].mxu0 %v4124_v29 }
 0x112   :  { %2529 = vmatmul.mubr.bf16.gmra.mrb[104].mxu1 %v4126_v30  ;;  %2272 = vmatprep.mubr.bf16.mxu0 %v4133_v31 }
 0x113   :  { %2536 = vmatprep.mubr.bf16.mxu1 %v4135_v32  ;;  %v3930_v32 = vcombine.low %v147_v6, %v151_v7 }
 0x114   :  { %v2058_v0 = vpop.f32.mrb[0].mxu0 }
 0x115   :  { %v2322_v35 = vpop.f32.mrb[0].mxu1  ;;  %v2060_v36 = vpop.f32.mrb[1].mxu0 }
 0x116   :  { %v4926_v38 = vadd.f32 %v2322_v35, %v2058_v0  ;;  %v2324_v39 = vpop.f32.mrb[1].mxu1  ;;  %v2061_v40 = vpop.f32.mrb[2].mxu0  ;;  %v3939_v35 = vcombine.high %v155_v24, %v159_v25 }
 0x117   :  { %v2325_v43 = vpop.f32.mrb[2].mxu1  ;;  %v2063_v44 = vpop.f32.mrb[3].mxu0  ;;  %v162_v39 = vld [vmem:[%s6655_s0 + $0xd0] sm:$0xff] }
 0x118   :  { %v4928_v46 = vadd.f32 %v2325_v43, %v2061_v40  ;;  %v2327_v47 = vpop.f32.mrb[3].mxu1  ;;  %v166_v40 = vld [vmem:[%s6655_s0 + $0xf0] sm:$0xff]  ;;  %v167_v43 = vld [vmem:[%s6655_s0 + $0xf8] sm:$0xff] }
 0x119   :  { %2273 = vmatmul.mubr.bf16.gmra.mrb[108].mxu0 %v4132_v37  ;;  %v3936_v47 = vcombine.low %v154_v21, %v158_v22  ;;  %v3945_v52 = vcombine.high %v162_v39, %v166_v40  ;;  %v3944_v4 = vcombine.low %v162_v39, %v166_v40  ;;  %v183_v21 = vld [vmem:[%s6655_s0 + $0x178] sm:$0xff] }
 0x11a   :  { %2537 = vmatmul.mubr.bf16.gmra.mrb[108].mxu1 %v4134_v41  ;;  %2280 = vmatprep.mubr.bf16.mxu0 %v4141_v42  ;;  %v163_v42 = vld [vmem:[%s6655_s0 + $0xd8] sm:$0xff] }
 0x11b   :  { %2544 = vmatprep.mubr.bf16.mxu1 %v4143_v45  ;;  %v187_v40 = vld [vmem:[%s6655_s0 + $0x198] sm:$0xff] }
 0x11c   :  { %v2066_v50 = vpop.f32.mrb[4].mxu0 }
 0x11d   :  { %v2330_v53 = vpop.f32.mrb[4].mxu1  ;;  %v2068_v54 = vpop.f32.mrb[5].mxu0 }
 0x11e   :  { %v4942_v56 = vadd.f32 %v2330_v53, %v2066_v50  ;;  %v2332_v57 = vpop.f32.mrb[5].mxu1  ;;  %v2069_v58 = vpop.f32.mrb[6].mxu0 }
 0x11f   :  { %v2333_v61 = vpop.f32.mrb[6].mxu1  ;;  %v2071_v62 = vpop.f32.mrb[7].mxu0 }
 0x120   :  { %v4944_v1 = vadd.f32 %v2333_v61, %v2069_v58  ;;  %v2335_v2 = vpop.f32.mrb[7].mxu1  ;;  %v171_v62 = vld [vmem:[%s6655_s0 + $0x118] sm:$0xff] }
 0x121   :  { %2281 = vmatmul.mubr.bf16.gmra.mrb[112].mxu0 %v4140_v55  ;;  %v3947_v55 = vcombine.high %v163_v42, %v167_v43 }
 0x122   :  { %2545 = vmatmul.mubr.bf16.gmra.mrb[112].mxu1 %v4142_v59  ;;  %2584 = vmatprep.mubr.bf16.mxu0 %v3921_v60  ;;  %v170_v59 = vld [vmem:[%s6655_s0 + $0x110] sm:$0xff] }
 0x123   :  { %2848 = vmatprep.mubr.bf16.mxu1 %v3923_v63  ;;  %v174_v60 = vld [vmem:[%s6655_s0 + $0x130] sm:$0xff]  ;;  %v175_v63 = vld [vmem:[%s6655_s0 + $0x138] sm:$0xff] }
 0x124   :  { %v2074_v5 = vpop.f32.mrb[8].mxu0  ;;  %v3952_v24 = vcombine.low %v170_v59, %v174_v60 }
 0x125   :  { %v2338_v8 = vpop.f32.mrb[8].mxu1  ;;  %v2076_v9 = vpop.f32.mrb[9].mxu0 }
 0x126   :  { %v4958_v11 = vadd.f32 %v2338_v8, %v2074_v5  ;;  %v2340_v12 = vpop.f32.mrb[9].mxu1  ;;  %v2077_v13 = vpop.f32.mrb[10].mxu0  ;;  %v3946_v8 = vcombine.low %v163_v42, %v167_v43  ;;  %v3953_v9 = vcombine.high %v170_v59, %v174_v60  ;;  %v194_v59 = vld [vmem:[%s6655_s0 + $0x1d0] sm:$0xff] }
 0x127   :  { %v2341_v16 = vpop.f32.mrb[10].mxu1  ;;  %v2079_v17 = vpop.f32.mrb[11].mxu0  ;;  %v198_v60 = vld [vmem:[%s6655_s0 + $0x1f0] sm:$0xff] }
 0x128   :  { %v4960_v19 = vadd.f32 %v2341_v16, %v2077_v13  ;;  %v2343_v20 = vpop.f32.mrb[11].mxu1  ;;  %v3955_v13 = vcombine.high %v171_v62, %v175_v63  ;;  %v178_v16 = vld [vmem:[%s6655_s0 + $0x150] sm:$0xff] }
 0x129   :  { %2585 = vmatmul.mubr.bf16.vlgmr.msra.gmra.mrb[116].mxu0 %v3920_v10  ;;  %v182_v17 = vld [vmem:[%s6655_s0 + $0x170] sm:$0xff]  ;;  %v179_v20 = vld [vmem:[%s6655_s0 + $0x158] sm:$0xff] }
 0x12a   :  { %2849 = vmatmul.mubr.bf16.vlgmr.msra.gmra.mrb[116].mxu1 %v3922_v14  ;;  %2592 = vmatprep.mubr.bf16.mxu0 %v3929_v15 }
 0x12b   :  { %2856 = vmatprep.mubr.bf16.mxu1 %v3931_v18 }
 0x12c   :  { %v2082_v23 = vpop.f32.mrb[12].mxu0 }
 0x12d   :  { %v2346_v26 = vpop.f32.mrb[12].mxu1  ;;  %v2084_v27 = vpop.f32.mrb[13].mxu0 }
 0x12e   :  { %v4974_v29 = vadd.f32 %v2346_v26, %v2082_v23  ;;  %v2348_v30 = vpop.f32.mrb[13].mxu1  ;;  %v2085_v31 = vpop.f32.mrb[14].mxu0 }
 0x12f   :  { %v2349_v0 = vpop.f32.mrb[14].mxu1  ;;  %v2087_v34 = vpop.f32.mrb[15].mxu0  ;;  %v3961_v30 = vcombine.high %v178_v16, %v182_v17 }
 0x130   :  { %v4976_v36 = vadd.f32 %v2349_v0, %v2085_v31  ;;  %v2351_v37 = vpop.f32.mrb[15].mxu1 }
 0x131   :  { %2593 = vmatmul.mubr.bf16.gmra.mrb[120].mxu0 %v3928_v28  ;;  %v3954_v28 = vcombine.low %v171_v62, %v175_v63  ;;  %v190_v37 = vld [vmem:[%s6655_s0 + $0x1b0] sm:$0xff]  ;;  %v195_v62 = vld [vmem:[%s6655_s0 + $0x1d8] sm:$0xff] }
 0x132   :  { %2857 = vmatmul.mubr.bf16.gmra.mrb[120].mxu1 %v3930_v32  ;;  %2600 = vmatprep.mubr.bf16.mxu0 %v3937_v33  ;;  %v3963_v33 = vcombine.high %v179_v20, %v183_v21  ;;  %v199_v63 = vld [vmem:[%s6655_s0 + $0x1f8] sm:$0xff] }
 0x133   :  { %2864 = vmatprep.mubr.bf16.mxu1 %v3939_v35  ;;  %v186_v35 = vld [vmem:[%s6655_s0 + $0x190] sm:$0xff] }
 0x134   :  { %v2090_v41 = vpop.f32.mrb[16].mxu0 }
 0x135   :  { %v2354_v44 = vpop.f32.mrb[16].mxu1  ;;  %v2092_v45 = vpop.f32.mrb[17].mxu0 }
 0x136   :  { %v4990_v48 = vadd.f32 %v2354_v44, %v2090_v41  ;;  %v2356_v49 = vpop.f32.mrb[17].mxu1  ;;  %v2093_v50 = vpop.f32.mrb[18].mxu0  ;;  %v191_v41 = vld [vmem:[%s6655_s0 + $0x1b8] sm:$0xff]  ;;  %v3960_v44 = vcombine.low %v178_v16, %v182_v17 }
 0x137   :  { %v2357_v53 = vpop.f32.mrb[18].mxu1  ;;  %v2095_v54 = vpop.f32.mrb[19].mxu0 }
 0x138   :  { %v4992_v57 = vadd.f32 %v2357_v53, %v2093_v50  ;;  %v2359_v58 = vpop.f32.mrb[19].mxu1  ;;  %v3962_v50 = vcombine.low %v179_v20, %v183_v21  ;;  %v3971_v54 = vcombine.high %v187_v40, %v191_v41  ;;  %v206_v20 = vld [vmem:[%s6655_s0 + $0x230] sm:$0xff] }
 0x139   :  { %2601 = vmatmul.mubr.bf16.gmra.mrb[124].mxu0 %v3936_v47 }
 0x13a   :  { %2865 = vmatmul.mubr.bf16.gmra.mrb[124].mxu1 %v3938_v51  ;;  %2608 = vmatprep.mubr.bf16.mxu0 %v3945_v52  ;;  %v3969_v51 = vcombine.high %v186_v35, %v190_v37 }
 0x13b   :  { %2872 = vmatprep.mubr.bf16.mxu1 %v3947_v55 }
 0x13c   :  { %v2098_v61 = vpop.f32.mrb[20].mxu0 }
 0x13d   :  { %v2362_v2 = vpop.f32.mrb[20].mxu1  ;;  %v2100_v3 = vpop.f32.mrb[21].mxu0 }
 0x13e   :  { %v5006_v5 = vadd.f32 %v2362_v2, %v2098_v61  ;;  %v2364_v6 = vpop.f32.mrb[21].mxu1  ;;  %v2101_v7 = vpop.f32.mrb[22].mxu0 }
 0x13f   :  { %v2365_v10 = vpop.f32.mrb[22].mxu1  ;;  %v2103_v12 = vpop.f32.mrb[23].mxu0 }
 0x140   :  { %v5008_v14 = vadd.f32 %v2365_v10, %v2101_v7  ;;  %v2367_v15 = vpop.f32.mrb[23].mxu1  ;;  %v3977_v10 = vcombine.high %v194_v59, %v198_v60 }
 0x141   :  { %2609 = vmatmul.mubr.bf16.gmra.mrb[128].mxu0 %v3944_v4  ;;  %v3968_v4 = vcombine.low %v186_v35, %v190_v37  ;;  %v3979_v15 = vcombine.high %v195_v62, %v199_v63 }
 0x142   :  { %2873 = vmatmul.mubr.bf16.gmra.mrb[128].mxu1 %v3946_v8  ;;  %2616 = vmatprep.mubr.bf16.mxu0 %v3953_v9  ;;  %v3970_v9 = vcombine.low %v187_v40, %v191_v41  ;;  %v210_v41 = vld [vmem:[%s6655_s0 + $0x250] sm:$0xff] }
 0x143   :  { %2880 = vmatprep.mubr.bf16.mxu1 %v3955_v13 }
 0x144   :  { %v2106_v18 = vpop.f32.mrb[24].mxu0 }
 0x145   :  { %v2370_v22 = vpop.f32.mrb[24].mxu1  ;;  %v2108_v23 = vpop.f32.mrb[25].mxu0 }
 0x146   :  { %v5022_v25 = vadd.f32 %v2370_v22, %v2106_v18  ;;  %v2372_v26 = vpop.f32.mrb[25].mxu1  ;;  %v2109_v27 = vpop.f32.mrb[26].mxu0  ;;  %v202_v18 = vld [vmem:[%s6655_s0 + $0x210] sm:$0xff]  ;;  %v203_v22 = vld [vmem:[%s6655_s0 + $0x218] sm:$0xff] }
 0x147   :  { %v2373_v31 = vpop.f32.mrb[26].mxu1  ;;  %v2111_v32 = vpop.f32.mrb[27].mxu0  ;;  %v207_v23 = vld [vmem:[%s6655_s0 + $0x238] sm:$0xff] }
 0x148   :  { %v5024_v0 = vadd.f32 %v2373_v31, %v2109_v27  ;;  %v2375_v34 = vpop.f32.mrb[27].mxu1  ;;  %v3976_v27 = vcombine.low %v194_v59, %v198_v60  ;;  %v3978_v32 = vcombine.low %v195_v62, %v199_v63  ;;  %v3987_v37 = vcombine.high %v203_v22, %v207_v23 }
 0x149   :  { %2617 = vmatmul.mubr.bf16.gmra.mrb[132].mxu0 %v3952_v24 }
 0x14a   :  { %2881 = vmatmul.mubr.bf16.gmra.mrb[132].mxu1 %v3954_v28  ;;  %2624 = vmatprep.mubr.bf16.mxu0 %v3961_v30 }
 0x14b   :  { %2888 = vmatprep.mubr.bf16.mxu1 %v3963_v33  ;;  %v3985_v33 = vcombine.high %v202_v18, %v206_v20 }
 0x14c   :  { %v2114_v39 = vpop.f32.mrb[28].mxu0 }
 0x14d   :  { %v2378_v42 = vpop.f32.mrb[28].mxu1  ;;  %v2116_v43 = vpop.f32.mrb[29].mxu0 }
 0x14e   :  { %v5038_v45 = vadd.f32 %v2378_v42, %v2114_v39  ;;  %v2380_v47 = vpop.f32.mrb[29].mxu1  ;;  %v2117_v49 = vpop.f32.mrb[30].mxu0  ;;  %v214_v42 = vld [vmem:[%s6655_s0 + $0x270] sm:$0xff] }
 0x14f   :  { %v2381_v52 = vpop.f32.mrb[30].mxu1  ;;  %v2119_v53 = vpop.f32.mrb[31].mxu0  ;;  %v215_v47 = vld [vmem:[%s6655_s0 + $0x278] sm:$0xff]  ;;  %v3993_v59 = vcombine.high %v210_v41, %v214_v42 }
 0x150   :  { %v5040_v55 = vadd.f32 %v2381_v52, %v2117_v49  ;;  %v2383_v58 = vpop.f32.mrb[31].mxu1 }
 0x151   :  { %2625 = vmatmul.mubr.bf16.gmra.mrb[136].mxu0 %v3960_v44  ;;  %v211_v44 = vld [vmem:[%s6655_s0 + $0x258] sm:$0xff]  ;;  %v3986_v58 = vcombine.low %v203_v22, %v207_v23 }
 0x152   :  { %2889 = vmatmul.mubr.bf16.gmra.mrb[136].mxu1 %v3962_v50  ;;  %2632 = vmatprep.mubr.bf16.mxu0 %v3969_v51  ;;  %v3984_v51 = vcombine.low %v202_v18, %v206_v20  ;;  %v3995_v62 = vcombine.high %v211_v44, %v215_v47  ;;  %v3994_v20 = vcombine.low %v211_v44, %v215_v47 }
 0x153   :  { %2896 = vmatprep.mubr.bf16.mxu1 %v3971_v54 }
 0x154   :  { %v2122_v61 = vpop.f32.mrb[32].mxu0 }
 0x155   :  { %v2386_v2 = vpop.f32.mrb[32].mxu1  ;;  %v2124_v3 = vpop.f32.mrb[33].mxu0 }
 0x156   :  { %v5054_v6 = vadd.f32 %v2386_v2, %v2122_v61  ;;  %v2388_v7 = vpop.f32.mrb[33].mxu1  ;;  %v2125_v8 = vpop.f32.mrb[34].mxu0  ;;  %v218_v3 = vld [vmem:[%s6655_s0 + $0x290] sm:$0xff] }
 0x157   :  { %v2389_v12 = vpop.f32.mrb[34].mxu1  ;;  %v2127_v13 = vpop.f32.mrb[35].mxu0 }
 0x158   :  { %v5056_v16 = vadd.f32 %v2389_v12, %v2125_v8  ;;  %v2391_v17 = vpop.f32.mrb[35].mxu1  ;;  %v219_v8 = vld [vmem:[%s6655_s0 + $0x298] sm:$0xff]  ;;  %v3992_v13 = vcombine.low %v210_v41, %v214_v42 }
 0x159   :  { %2633 = vmatmul.mubr.bf16.gmra.mrb[140].mxu0 %v3968_v4  ;;  %v222_v4 = vld [vmem:[%s6655_s0 + $0x2b0] sm:$0xff] }
 0x15a   :  { %2897 = vmatmul.mubr.bf16.gmra.mrb[140].mxu1 %v3970_v9  ;;  %2640 = vmatprep.mubr.bf16.mxu0 %v3977_v10  ;;  %v223_v9 = vld [vmem:[%s6655_s0 + $0x2b8] sm:$0xff] }
 0x15b   :  { %2904 = vmatprep.mubr.bf16.mxu1 %v3979_v15  ;;  %v4002_v44 = vcombine.low %v219_v8, %v223_v9 }
 0x15c   :  { %v2130_v21 = vpop.f32.mrb[36].mxu0 }
 0x15d   :  { %v2394_v24 = vpop.f32.mrb[36].mxu1  ;;  %v2132_v26 = vpop.f32.mrb[37].mxu0 }
 0x15e   :  { %v5070_v28 = vadd.f32 %v2394_v24, %v2130_v21  ;;  %v2396_v30 = vpop.f32.mrb[37].mxu1  ;;  %v2133_v31 = vpop.f32.mrb[38].mxu0  ;;  %v4001_v21 = vcombine.high %v218_v3, %v222_v4  ;;  %v4003_v24 = vcombine.high %v219_v8, %v223_v9 }
 0x15f   :  { %v2397_v34 = vpop.f32.mrb[38].mxu1  ;;  %v2135_v35 = vpop.f32.mrb[39].mxu0  ;;  %v226_v30 = vld [vmem:[%s6655_s0 + $0x2d0] sm:$0xff] }
 0x160   :  { %v5072_v39 = vadd.f32 %v2397_v34, %v2133_v31  ;;  %v2399_v40 = vpop.f32.mrb[39].mxu1  ;;  %v230_v31 = vld [vmem:[%s6655_s0 + $0x2f0] sm:$0xff]  ;;  %v231_v34 = vld [vmem:[%s6655_s0 + $0x2f8] sm:$0xff] }
 0x161   :  { %2641 = vmatmul.mubr.bf16.gmra.mrb[144].mxu0 %v3976_v27  ;;  %v4000_v40 = vcombine.low %v218_v3, %v222_v4  ;;  %v4009_v47 = vcombine.high %v226_v30, %v230_v31  ;;  %v4008_v4 = vcombine.low %v226_v30, %v230_v31  ;;  %v247_v30 = vld [vmem:[%s6655_s0 + $0x378] sm:$0xff] }
 0x162   :  { %2905 = vmatmul.mubr.bf16.gmra.mrb[144].mxu1 %v3978_v32  ;;  %2648 = vmatprep.mubr.bf16.mxu0 %v3985_v33  ;;  %v227_v33 = vld [vmem:[%s6655_s0 + $0x2d8] sm:$0xff] }
 0x163   :  { %2912 = vmatprep.mubr.bf16.mxu1 %v3987_v37 }
 0x164   :  { %v2138_v43 = vpop.f32.mrb[40].mxu0 }
 0x165   :  { %v2402_v49 = vpop.f32.mrb[40].mxu1  ;;  %v2140_v50 = vpop.f32.mrb[41].mxu0 }
 0x166   :  { %v5086_v52 = vadd.f32 %v2402_v49, %v2138_v43  ;;  %v2404_v53 = vpop.f32.mrb[41].mxu1  ;;  %v2141_v54 = vpop.f32.mrb[42].mxu0 }
 0x167   :  { %v2405_v60 = vpop.f32.mrb[42].mxu1  ;;  %v2143_v61 = vpop.f32.mrb[43].mxu0 }
 0x168   :  { %v5088_v63 = vadd.f32 %v2405_v60, %v2141_v54  ;;  %v2407_v2 = vpop.f32.mrb[43].mxu1  ;;  %v235_v61 = vld [vmem:[%s6655_s0 + $0x318] sm:$0xff] }
 0x169   :  { %2649 = vmatmul.mubr.bf16.gmra.mrb[148].mxu0 %v3984_v51  ;;  %v4011_v51 = vcombine.high %v227_v33, %v231_v34 }
 0x16a   :  { %2913 = vmatmul.mubr.bf16.gmra.mrb[148].mxu1 %v3986_v58  ;;  %2656 = vmatprep.mubr.bf16.mxu0 %v3993_v59  ;;  %v234_v58 = vld [vmem:[%s6655_s0 + $0x310] sm:$0xff] }
 0x16b   :  { %2920 = vmatprep.mubr.bf16.mxu1 %v3995_v62  ;;  %v238_v59 = vld [vmem:[%s6655_s0 + $0x330] sm:$0xff]  ;;  %v239_v62 = vld [vmem:[%s6655_s0 + $0x338] sm:$0xff] }
 0x16c   :  { %v2146_v7 = vpop.f32.mrb[44].mxu0 }
 0x16d   :  { %v2410_v10 = vpop.f32.mrb[44].mxu1  ;;  %v2148_v12 = vpop.f32.mrb[45].mxu0 }
 0x16e   :  { %v5102_v15 = vadd.f32 %v2410_v10, %v2146_v7  ;;  %v2412_v17 = vpop.f32.mrb[45].mxu1  ;;  %v2149_v18 = vpop.f32.mrb[46].mxu0  ;;  %v4010_v10 = vcombine.low %v227_v33, %v231_v34  ;;  %v4017_v12 = vcombine.high %v234_v58, %v238_v59  ;;  %v4016_v33 = vcombine.low %v234_v58, %v238_v59  ;;  %v251_v59 = vld [vmem:[%s6655_s0 + $0x398] sm:$0xff] }
 0x16f   :  { %v2413_v22 = vpop.f32.mrb[46].mxu1  ;;  %v2151_v23 = vpop.f32.mrb[47].mxu0 }
 0x170   :  { %v5104_v26 = vadd.f32 %v2413_v22, %v2149_v18  ;;  %v2415_v27 = vpop.f32.mrb[47].mxu1  ;;  %v4019_v18 = vcombine.high %v235_v61, %v239_v62  ;;  %v242_v22 = vld [vmem:[%s6655_s0 + $0x350] sm:$0xff] }
 0x171   :  { %2657 = vmatmul.mubr.bf16.gmra.mrb[152].mxu0 %v3992_v13  ;;  %v246_v23 = vld [vmem:[%s6655_s0 + $0x370] sm:$0xff]  ;;  %v243_v27 = vld [vmem:[%s6655_s0 + $0x358] sm:$0xff] }
 0x172   :  { %2921 = vmatmul.mubr.bf16.gmra.mrb[152].mxu1 %v3994_v20  ;;  %2664 = vmatprep.mubr.bf16.mxu0 %v4001_v21 }
 0x173   :  { %2928 = vmatprep.mubr.bf16.mxu1 %v4003_v24 }
 0x174   :  { %v2154_v32 = vpop.f32.mrb[48].mxu0 }
 0x175   :  { %v2418_v35 = vpop.f32.mrb[48].mxu1  ;;  %v2156_v37 = vpop.f32.mrb[49].mxu0 }
 0x176   :  { %v5118_v41 = vadd.f32 %v2418_v35, %v2154_v32  ;;  %v2420_v42 = vpop.f32.mrb[49].mxu1  ;;  %v2157_v43 = vpop.f32.mrb[50].mxu0 }
 0x177   :  { %v2421_v49 = vpop.f32.mrb[50].mxu1  ;;  %v2159_v50 = vpop.f32.mrb[51].mxu0  ;;  %v4025_v42 = vcombine.high %v242_v22, %v246_v23 }
 0x178   :  { %v5120_v53 = vadd.f32 %v2421_v49, %v2157_v43  ;;  %v2423_v54 = vpop.f32.mrb[51].mxu1 }
 0x179   :  { %2665 = vmatmul.mubr.bf16.gmra.mrb[156].mxu0 %v4000_v40  ;;  %v4018_v40 = vcombine.low %v235_v61, %v239_v62  ;;  %v254_v54 = vld [vmem:[%s6655_s0 + $0x3b0] sm:$0xff] }
 0x17a   :  { %2929 = vmatmul.mubr.bf16.gmra.mrb[156].mxu1 %v4002_v44  ;;  %2672 = vmatprep.mubr.bf16.mxu0 %v4009_v47  ;;  %v4027_v47 = vcombine.high %v243_v27, %v247_v30 }
 0x17b   :  { %2936 = vmatprep.mubr.bf16.mxu1 %v4011_v51  ;;  %v250_v51 = vld [vmem:[%s6655_s0 + $0x390] sm:$0xff] }
 0x17c   :  { %v2162_v60 = vpop.f32.mrb[52].mxu0 }
 0x17d   :  { %v2426_v2 = vpop.f32.mrb[52].mxu1  ;;  %v2164_v3 = vpop.f32.mrb[53].mxu0 }
 0x17e   :  { %v5134_v7 = vadd.f32 %v2426_v2, %v2162_v60  ;;  %v2428_v8 = vpop.f32.mrb[53].mxu1  ;;  %v2165_v9 = vpop.f32.mrb[54].mxu0  ;;  %v255_v60 = vld [vmem:[%s6655_s0 + $0x3b8] sm:$0xff]  ;;  %v4024_v2 = vcombine.low %v242_v22, %v246_v23  ;;  %v258_v22 = vld [vmem:[%s6655_s0 + $0x3d0] sm:$0xff] }
 0x17f   :  { %v2429_v13 = vpop.f32.mrb[54].mxu1  ;;  %v2167_v17 = vpop.f32.mrb[55].mxu0  ;;  %v262_v23 = vld [vmem:[%s6655_s0 + $0x3f0] sm:$0xff] }
 0x180   :  { %v5136_v20 = vadd.f32 %v2429_v13, %v2165_v9  ;;  %v2431_v21 = vpop.f32.mrb[55].mxu1  ;;  %v4026_v9 = vcombine.low %v243_v27, %v247_v30  ;;  %v4035_v17 = vcombine.high %v251_v59, %v255_v60  ;;  %v259_v27 = vld [vmem:[%s6655_s0 + $0x3d8] sm:$0xff] }
 0x181   :  { %2673 = vmatmul.mubr.bf16.gmra.mrb[160].mxu0 %v4008_v4  ;;  %v263_v30 = vld [vmem:[%s6655_s0 + $0x3f8] sm:$0xff] }
 0x182   :  { %2937 = vmatmul.mubr.bf16.gmra.mrb[160].mxu1 %v4010_v10  ;;  %2680 = vmatprep.mubr.bf16.mxu0 %v4017_v12  ;;  %v4033_v10 = vcombine.high %v250_v51, %v254_v54 }
 0x183   :  { %2944 = vmatprep.mubr.bf16.mxu1 %v4019_v18 }
 0x184   :  { %v2170_v24 = vpop.f32.mrb[56].mxu0 }
 0x185   :  { %v2434_v31 = vpop.f32.mrb[56].mxu1  ;;  %v2172_v32 = vpop.f32.mrb[57].mxu0 }
 0x186   :  { %v5150_v34 = vadd.f32 %v2434_v31, %v2170_v24  ;;  %v2436_v35 = vpop.f32.mrb[57].mxu1  ;;  %v2173_v37 = vpop.f32.mrb[58].mxu0 }
 0x187   :  { %v2437_v43 = vpop.f32.mrb[58].mxu1  ;;  %v2175_v44 = vpop.f32.mrb[59].mxu0 }
 0x188   :  { %v5152_v49 = vadd.f32 %v2437_v43, %v2173_v37  ;;  %v2439_v50 = vpop.f32.mrb[59].mxu1  ;;  %v4041_v43 = vcombine.high %v258_v22, %v262_v23 }
 0x189   :  { %2681 = vmatmul.mubr.bf16.gmra.mrb[164].mxu0 %v4016_v33  ;;  %v4032_v33 = vcombine.low %v250_v51, %v254_v54  ;;  %v4043_v50 = vcombine.high %v259_v27, %v263_v30  ;;  %v266_v51 = vld [vmem:[%s6655_s0 + $0x410] sm:$0xff] }
 0x18a   :  { %2945 = vmatmul.mubr.bf16.gmra.mrb[164].mxu1 %v4018_v40  ;;  %2688 = vmatprep.mubr.bf16.mxu0 %v4025_v42  ;;  %v4034_v42 = vcombine.low %v251_v59, %v255_v60  ;;  %v270_v54 = vld [vmem:[%s6655_s0 + $0x430] sm:$0xff]  ;;  %v267_v60 = vld [vmem:[%s6655_s0 + $0x418] sm:$0xff] }
 0x18b   :  { %2952 = vmatprep.mubr.bf16.mxu1 %v4027_v47 }
 0x18c   :  { %v2178_v58 = vpop.f32.mrb[60].mxu0 }
 0x18d   :  { %v2442_v61 = vpop.f32.mrb[60].mxu1  ;;  %v2180_v62 = vpop.f32.mrb[61].mxu0 }
 0x18e   :  { %v5166_v3 = vadd.f32 %v2442_v61, %v2178_v58  ;;  %v2444_v4 = vpop.f32.mrb[61].mxu1  ;;  %v2181_v8 = vpop.f32.mrb[62].mxu0  ;;  %v271_v62 = vld [vmem:[%s6655_s0 + $0x438] sm:$0xff] }
 0x18f   :  { %v2445_v12 = vpop.f32.mrb[62].mxu1  ;;  %v2183_v13 = vpop.f32.mrb[63].mxu0 }
 0x190   :  { %v5168_v18 = vadd.f32 %v2445_v12, %v2181_v8  ;;  %v2447_v21 = vpop.f32.mrb[63].mxu1  ;;  %v4040_v8 = vcombine.low %v258_v22, %v262_v23  ;;  %v4042_v13 = vcombine.low %v259_v27, %v263_v30  ;;  %v274_v22 = vld [vmem:[%s6655_s0 + $0x450] sm:$0xff]  ;;  %v275_v30 = vld [vmem:[%s6655_s0 + $0x458] sm:$0xff] }
 0x191   :  { %2689 = vmatmul.mubr.bf16.gmra.mrb[168].mxu0 %v4024_v2  ;;  %v278_v23 = vld [vmem:[%s6655_s0 + $0x470] sm:$0xff] }
 0x192   :  { %2953 = vmatmul.mubr.bf16.gmra.mrb[168].mxu1 %v4026_v9  ;;  %2696 = vmatprep.mubr.bf16.mxu0 %v4033_v10 }
 0x193   :  { %2960 = vmatprep.mubr.bf16.mxu1 %v4035_v17  ;;  %v4049_v17 = vcombine.high %v266_v51, %v270_v54 }
 0x194   :  { %v2186_v24 = vpop.f32.mrb[64].mxu0 }
 0x195   :  { %v2450_v31 = vpop.f32.mrb[64].mxu1  ;;  %v2188_v32 = vpop.f32.mrb[65].mxu0 }
 0x196   :  { %v5182_v35 = vadd.f32 %v2450_v31, %v2186_v24  ;;  %v2452_v37 = vpop.f32.mrb[65].mxu1  ;;  %v2189_v40 = vpop.f32.mrb[66].mxu0  ;;  %v4051_v31 = vcombine.high %v267_v60, %v271_v62 }
 0x197   :  { %v2453_v44 = vpop.f32.mrb[66].mxu1  ;;  %v2191_v47 = vpop.f32.mrb[67].mxu0  ;;  %v279_v37 = vld [vmem:[%s6655_s0 + $0x478] sm:$0xff] }
 0x198   :  { %v5184_v58 = vadd.f32 %v2453_v44, %v2189_v40  ;;  %v2455_v61 = vpop.f32.mrb[67].mxu1 }
 0x199   :  { %2697 = vmatmul.mubr.bf16.gmra.mrb[172].mxu0 %v4032_v33  ;;  %v4050_v61 = vcombine.low %v267_v60, %v271_v62  ;;  %v283_v62 = vld [vmem:[%s6655_s0 + $0x498] sm:$0xff] }
 0x19a   :  { %2961 = vmatmul.mubr.bf16.gmra.mrb[172].mxu1 %v4034_v42  ;;  %2704 = vmatprep.mubr.bf16.mxu0 %v4041_v43  ;;  %v4048_v43 = vcombine.low %v266_v51, %v270_v54  ;;  %v282_v51 = vld [vmem:[%s6655_s0 + $0x490] sm:$0xff] }
 0x19b   :  { %2968 = vmatprep.mubr.bf16.mxu1 %v4043_v50  ;;  %v286_v54 = vld [vmem:[%s6655_s0 + $0x4b0] sm:$0xff] }
 0x19c   :  { %v2194_v59 = vpop.f32.mrb[68].mxu0 }
 0x19d   :  { %v2458_v2 = vpop.f32.mrb[68].mxu1  ;;  %v2196_v4 = vpop.f32.mrb[69].mxu0 }
 0x19e   :  { %v5198_v9 = vadd.f32 %v2458_v2, %v2194_v59  ;;  %v2460_v10 = vpop.f32.mrb[69].mxu1  ;;  %v2197_v12 = vpop.f32.mrb[70].mxu0  ;;  %v4057_v59 = vcombine.high %v274_v22, %v278_v23 }
 0x19f   :  { %v2461_v21 = vpop.f32.mrb[70].mxu1  ;;  %v2199_v24 = vpop.f32.mrb[71].mxu0 }
 0x1a0   :  { %v5200_v32 = vadd.f32 %v2461_v21, %v2197_v12  ;;  %v2463_v33 = vpop.f32.mrb[71].mxu1  ;;  %v4056_v24 = vcombine.low %v274_v22, %v278_v23  ;;  %v290_v22 = vld [vmem:[%s6655_s0 + $0x4d0] sm:$0xff] }
 0x1a1   :  { %2705 = vmatmul.mubr.bf16.gmra.mrb[176].mxu0 %v4040_v8  ;;  %v4059_v8 = vcombine.high %v275_v30, %v279_v37  ;;  %v294_v23 = vld [vmem:[%s6655_s0 + $0x4f0] sm:$0xff] }
 0x1a2   :  { %2969 = vmatmul.mubr.bf16.gmra.mrb[176].mxu1 %v4042_v13  ;;  %2712 = vmatprep.mubr.bf16.mxu0 %v4049_v17  ;;  %v287_v13 = vld [vmem:[%s6655_s0 + $0x4b8] sm:$0xff] }
 0x1a3   :  { %2976 = vmatprep.mubr.bf16.mxu1 %v4051_v31 }
 0x1a4   :  { %v2202_v27 = vpop.f32.mrb[72].mxu0 }
 0x1a5   :  { %v2466_v40 = vpop.f32.mrb[72].mxu1  ;;  %v2204_v42 = vpop.f32.mrb[73].mxu0 }
 0x1a6   :  { %v5214_v44 = vadd.f32 %v2466_v40, %v2202_v27  ;;  %v2468_v47 = vpop.f32.mrb[73].mxu1  ;;  %v2205_v50 = vpop.f32.mrb[74].mxu0  ;;  %v4058_v40 = vcombine.low %v275_v30, %v279_v37  ;;  %v4065_v42 = vcombine.high %v282_v51, %v286_v54  ;;  %v291_v37 = vld [vmem:[%s6655_s0 + $0x4d8] sm:$0xff] }
 0x1a7   :  { %v2469_v2 = vpop.f32.mrb[74].mxu1  ;;  %v2207_v4 = vpop.f32.mrb[75].mxu0 }
 0x1a8   :  { %v5216_v10 = vadd.f32 %v2469_v2, %v2205_v50  ;;  %v2471_v12 = vpop.f32.mrb[75].mxu1  ;;  %v4067_v50 = vcombine.high %v283_v62, %v287_v13  ;;  %v295_v2 = vld [vmem:[%s6655_s0 + $0x4f8] sm:$0xff] }
 0x1a9   :  { %2713 = vmatmul.mubr.bf16.gmra.mrb[180].mxu0 %v4048_v43  ;;  %v4064_v12 = vcombine.low %v282_v51, %v286_v54  ;;  %v298_v51 = vld [vmem:[%s6655_s0 + $0x510] sm:$0xff] }
 0x1aa   :  { %2977 = vmatmul.mubr.bf16.gmra.mrb[180].mxu1 %v4050_v61  ;;  %2720 = vmatprep.mubr.bf16.mxu0 %v4057_v59  ;;  %v302_v54 = vld [vmem:[%s6655_s0 + $0x530] sm:$0xff] }
 0x1ab   :  { %2984 = vmatprep.mubr.bf16.mxu1 %v4059_v8 }
 0x1ac   :  { %v2210_v60 = vpop.f32.mrb[76].mxu0 }
 0x1ad   :  { %v2474_v17 = vpop.f32.mrb[76].mxu1  ;;  %v2212_v21 = vpop.f32.mrb[77].mxu0 }
 0x1ae   :  { %v5230_v31 = vadd.f32 %v2474_v17, %v2210_v60  ;;  %v2476_v33 = vpop.f32.mrb[77].mxu1  ;;  %v2213_v27 = vpop.f32.mrb[78].mxu0 }
 0x1af   :  { %v2477_v43 = vpop.f32.mrb[78].mxu1  ;;  %v2215_v47 = vpop.f32.mrb[79].mxu0  ;;  %v4073_v33 = vcombine.high %v290_v22, %v294_v23 }
 0x1b0   :  { %v5232_v61 = vadd.f32 %v2477_v43, %v2213_v27  ;;  %v2479_v59 = vpop.f32.mrb[79].mxu1 }
 0x1b1   :  { %2721 = vmatmul.mubr.bf16.gmra.mrb[184].mxu0 %v4056_v24  ;;  %v4066_v24 = vcombine.low %v283_v62, %v287_v13  ;;  %v299_v13 = vld [vmem:[%s6655_s0 + $0x518] sm:$0xff] }
 0x1b2   :  { %2985 = vmatmul.mubr.bf16.gmra.mrb[184].mxu1 %v4058_v40  ;;  %2728 = vmatprep.mubr.bf16.mxu0 %v4065_v42  ;;  %v4075_v42 = vcombine.high %v291_v37, %v295_v2 }
 0x1b3   :  { %2992 = vmatprep.mubr.bf16.mxu1 %v4067_v50  ;;  %v303_v50 = vld [vmem:[%s6655_s0 + $0x538] sm:$0xff] }
 0x1b4   :  { %v2218_v30 = vpop.f32.mrb[80].mxu0 }
 0x1b5   :  { %v2482_v4 = vpop.f32.mrb[80].mxu1  ;;  %v2220_v8 = vpop.f32.mrb[81].mxu0 }
 0x1b6   :  { %v5246_v60 = vadd.f32 %v2482_v4, %v2218_v30  ;;  %v2484_v17 = vpop.f32.mrb[81].mxu1  ;;  %v2221_v21 = vpop.f32.mrb[82].mxu0  ;;  %v4072_v4 = vcombine.low %v290_v22, %v294_v23  ;;  %v306_v22 = vld [vmem:[%s6655_s0 + $0x550] sm:$0xff] }
 0x1b7   :  { %v2485_v27 = vpop.f32.mrb[82].mxu1  ;;  %v2223_v40 = vpop.f32.mrb[83].mxu0  ;;  %v310_v23 = vld [vmem:[%s6655_s0 + $0x570] sm:$0xff] }
 0x1b8   :  { %v5248_v43 = vadd.f32 %v2485_v27, %v2221_v21  ;;  %v2487_v47 = vpop.f32.mrb[83].mxu1  ;;  %v4074_v21 = vcombine.low %v291_v37, %v295_v2  ;;  %v4083_v40 = vcombine.high %v299_v13, %v303_v50  ;;  %v307_v2 = vld [vmem:[%s6655_s0 + $0x558] sm:$0xff] }
 0x1b9   :  { %2729 = vmatmul.mubr.bf16.gmra.mrb[188].mxu0 %v4064_v12 }
 0x1ba   :  { %2993 = vmatmul.mubr.bf16.gmra.mrb[188].mxu1 %v4066_v24  ;;  %2736 = vmatprep.mubr.bf16.mxu0 %v4073_v33  ;;  %v4081_v24 = vcombine.high %v298_v51, %v302_v54 }
 0x1bb   :  { %3000 = vmatprep.mubr.bf16.mxu1 %v4075_v42 }
 0x1bc   :  { %v2226_v62 = vpop.f32.mrb[84].mxu0 }
 0x1bd   :  { %v2490_v59 = vpop.f32.mrb[84].mxu1  ;;  %v2228_v30 = vpop.f32.mrb[85].mxu0 }
 0x1be   :  { %v5262_v8 = vadd.f32 %v2490_v59, %v2226_v62  ;;  %v2492_v12 = vpop.f32.mrb[85].mxu1  ;;  %v2229_v17 = vpop.f32.mrb[86].mxu0  ;;  %v311_v62 = vld [vmem:[%s6655_s0 + $0x578] sm:$0xff] }
 0x1bf   :  { %v2493_v33 = vpop.f32.mrb[86].mxu1  ;;  %v2231_v27 = vpop.f32.mrb[87].mxu0 }
 0x1c0   :  { %6711 = vst [vmem:[#allocation2_spill] sm:$0xff] %v5262_v8  ;;  %v5264_v42 = vadd.f32 %v2493_v33, %v2229_v17  ;;  %v2495_v47 = vpop.f32.mrb[87].mxu1  ;;  %v4089_v33 = vcombine.high %v306_v22, %v310_v23 }
 0x1c1   :  { %2737 = vmatmul.mubr.bf16.gmra.mrb[192].mxu0 %v4072_v4  ;;  %v4080_v4 = vcombine.low %v298_v51, %v302_v54  ;;  %v4091_v47 = vcombine.high %v307_v2, %v311_v62  ;;  %v314_v51 = vld [vmem:[%s6655_s0 + $0x590] sm:$0xff] }
 0x1c2   :  { %6712 = vst [vmem:[#allocation3_spill] sm:$0xff] %v5264_v42  ;;  %3001 = vmatmul.mubr.bf16.gmra.mrb[192].mxu1 %v4074_v21  ;;  %2744 = vmatprep.mubr.bf16.mxu0 %v4081_v24  ;;  %v4082_v24 = vcombine.low %v299_v13, %v303_v50  ;;  %v318_v54 = vld [vmem:[%s6655_s0 + $0x5b0] sm:$0xff]  ;;  %v315_v50 = vld [vmem:[%s6655_s0 + $0x598] sm:$0xff] }
 0x1c3   :  { %3008 = vmatprep.mubr.bf16.mxu1 %v4083_v40 }
 0x1c4   :  { %v2234_v37 = vpop.f32.mrb[88].mxu0 }
 0x1c5   :  { %v2498_v59 = vpop.f32.mrb[88].mxu1  ;;  %v2236_v30 = vpop.f32.mrb[89].mxu0 }
 0x1c6   :  { %v5278_v12 = vadd.f32 %v2498_v59, %v2234_v37  ;;  %v2500_v17 = vpop.f32.mrb[89].mxu1  ;;  %v2237_v21 = vpop.f32.mrb[90].mxu0  ;;  %v4088_v30 = vcombine.low %v306_v22, %v310_v23  ;;  %v322_v22 = vld [vmem:[%s6655_s0 + $0x5d0] sm:$0xff] }
 0x1c7   :  { %v2501_v27 = vpop.f32.mrb[90].mxu1  ;;  %v2239_v40 = vpop.f32.mrb[91].mxu0  ;;  %v326_v23 = vld [vmem:[%s6655_s0 + $0x5f0] sm:$0xff] }
 0x1c8   :  { %6713 = vst [vmem:[#allocation4_spill] sm:$0xff] %v5278_v12  ;;  %v5280_v42 = vadd.f32 %v2501_v27, %v2237_v21  ;;  %v2503_v8 = vpop.f32.mrb[91].mxu1 }
 0x1c9   :  { %2745 = vmatmul.mubr.bf16.gmra.mrb[196].mxu0 %v4080_v4  ;;  %v319_v8 = vld [vmem:[%s6655_s0 + $0x5b8] sm:$0xff] }
 0x1ca   :  { %6714 = vst [vmem:[#allocation5_spill] sm:$0xff] %v5280_v42  ;;  %3009 = vmatmul.mubr.bf16.gmra.mrb[196].mxu1 %v4082_v24  ;;  %2752 = vmatprep.mubr.bf16.mxu0 %v4089_v33  ;;  %v4090_v24 = vcombine.low %v307_v2, %v311_v62  ;;  %v4097_v33 = vcombine.high %v314_v51, %v318_v54  ;;  %v323_v62 = vld [vmem:[%s6655_s0 + $0x5d8] sm:$0xff] }
 0x1cb   :  { %3016 = vmatprep.mubr.bf16.mxu1 %v4091_v47  ;;  %v4099_v47 = vcombine.high %v315_v50, %v319_v8 }
 0x1cc   :  { %v2242_v13 = vpop.f32.mrb[92].mxu0 }
 0x1cd   :  { %v2506_v37 = vpop.f32.mrb[92].mxu1  ;;  %v2244_v59 = vpop.f32.mrb[93].mxu0 }
 0x1ce   :  { %v5294_v4 = vadd.f32 %v2506_v37, %v2242_v13  ;;  %v2508_v17 = vpop.f32.mrb[93].mxu1  ;;  %v2245_v21 = vpop.f32.mrb[94].mxu0  ;;  %v4096_v59 = vcombine.low %v314_v51, %v318_v54  ;;  %v330_v51 = vld [vmem:[%s6655_s0 + $0x610] sm:$0xff] }
 0x1cf   :  { %v2509_v27 = vpop.f32.mrb[94].mxu1  ;;  %v2247_v40 = vpop.f32.mrb[95].mxu0  ;;  %v334_v54 = vld [vmem:[%s6655_s0 + $0x630] sm:$0xff] }
 0x1d0   :  { %6715 = vst [vmem:[#allocation6_spill] sm:$0xff] %v5294_v4  ;;  %v5296_v42 = vadd.f32 %v2509_v27, %v2245_v21  ;;  %v2511_v12 = vpop.f32.mrb[95].mxu1 }
 0x1d1   :  { %2753 = vmatmul.mubr.bf16.gmra.mrb[200].mxu0 %v4088_v30  ;;  %v327_v12 = vld [vmem:[%s6655_s0 + $0x5f8] sm:$0xff] }
 0x1d2   :  { %6716 = vst [vmem:[#allocation7_spill] sm:$0xff] %v5296_v42  ;;  %3017 = vmatmul.mubr.bf16.gmra.mrb[200].mxu1 %v4090_v24  ;;  %2760 = vmatprep.mubr.bf16.mxu0 %v4097_v33  ;;  %v4098_v24 = vcombine.low %v315_v50, %v319_v8  ;;  %v4105_v33 = vcombine.high %v322_v22, %v326_v23  ;;  %v331_v8 = vld [vmem:[%s6655_s0 + $0x618] sm:$0xff] }
 0x1d3   :  { %3024 = vmatprep.mubr.bf16.mxu1 %v4099_v47  ;;  %v4107_v47 = vcombine.high %v323_v62, %v327_v12 }
 0x1d4   :  { %v2250_v2 = vpop.f32.mrb[96].mxu0 }
 0x1d5   :  { %v2514_v13 = vpop.f32.mrb[96].mxu1  ;;  %v2252_v37 = vpop.f32.mrb[97].mxu0 }
 0x1d6   :  { %v5310_v30 = vadd.f32 %v2514_v13, %v2250_v2  ;;  %v2516_v17 = vpop.f32.mrb[97].mxu1  ;;  %v2253_v21 = vpop.f32.mrb[98].mxu0  ;;  %v4104_v37 = vcombine.low %v322_v22, %v326_v23  ;;  %v338_v22 = vld [vmem:[%s6655_s0 + $0x650] sm:$0xff] }
 0x1d7   :  { %v2517_v27 = vpop.f32.mrb[98].mxu1  ;;  %v2255_v40 = vpop.f32.mrb[99].mxu0  ;;  %v342_v23 = vld [vmem:[%s6655_s0 + $0x670] sm:$0xff] }
 0x1d8   :  { %6717 = vst [vmem:[#allocation8_spill] sm:$0xff] %v5310_v30  ;;  %v5312_v42 = vadd.f32 %v2517_v27, %v2253_v21  ;;  %v2519_v4 = vpop.f32.mrb[99].mxu1 }
 0x1d9   :  { %2761 = vmatmul.mubr.bf16.gmra.mrb[204].mxu0 %v4096_v59  ;;  %v335_v4 = vld [vmem:[%s6655_s0 + $0x638] sm:$0xff] }
 0x1da   :  { %6718 = vst [vmem:[#allocation9_spill] sm:$0xff] %v5312_v42  ;;  %3025 = vmatmul.mubr.bf16.gmra.mrb[204].mxu1 %v4098_v24  ;;  %2768 = vmatprep.mubr.bf16.mxu0 %v4105_v33  ;;  %v4106_v24 = vcombine.low %v323_v62, %v327_v12  ;;  %v4113_v33 = vcombine.high %v330_v51, %v334_v54  ;;  %v339_v12 = vld [vmem:[%s6655_s0 + $0x658] sm:$0xff] }
 0x1db   :  { %3032 = vmatprep.mubr.bf16.mxu1 %v4107_v47  ;;  %v4115_v47 = vcombine.high %v331_v8, %v335_v4 }
 0x1dc   :  { %v2258_v50 = vpop.f32.mrb[100].mxu0 }
 0x1dd   :  { %v2522_v2 = vpop.f32.mrb[100].mxu1  ;;  %v2260_v13 = vpop.f32.mrb[101].mxu0 }
 0x1de   :  { %v5326_v59 = vadd.f32 %v2522_v2, %v2258_v50  ;;  %v2524_v17 = vpop.f32.mrb[101].mxu1  ;;  %v2261_v21 = vpop.f32.mrb[102].mxu0  ;;  %v4112_v13 = vcombine.low %v330_v51, %v334_v54  ;;  %v346_v51 = vld [vmem:[%s6655_s0 + $0x690] sm:$0xff] }
 0x1df   :  { %v2525_v27 = vpop.f32.mrb[102].mxu1  ;;  %v2263_v40 = vpop.f32.mrb[103].mxu0  ;;  %v350_v54 = vld [vmem:[%s6655_s0 + $0x6b0] sm:$0xff] }
 0x1e0   :  { %6719 = vst [vmem:[#allocation10_spill] sm:$0xff] %v5326_v59  ;;  %v5328_v42 = vadd.f32 %v2525_v27, %v2261_v21  ;;  %v2527_v30 = vpop.f32.mrb[103].mxu1 }
 0x1e1   :  { %2769 = vmatmul.mubr.bf16.gmra.mrb[208].mxu0 %v4104_v37  ;;  %v343_v30 = vld [vmem:[%s6655_s0 + $0x678] sm:$0xff] }
 0x1e2   :  { %6720 = vst [vmem:[#allocation11_spill] sm:$0xff] %v5328_v42  ;;  %3033 = vmatmul.mubr.bf16.gmra.mrb[208].mxu1 %v4106_v24  ;;  %2776 = vmatprep.mubr.bf16.mxu0 %v4113_v33  ;;  %v4114_v24 = vcombine.low %v331_v8, %v335_v4  ;;  %v4121_v33 = vcombine.high %v338_v22, %v342_v23  ;;  %v347_v4 = vld [vmem:[%s6655_s0 + $0x698] sm:$0xff] }
 0x1e3   :  { %3040 = vmatprep.mubr.bf16.mxu1 %v4115_v47  ;;  %v4123_v47 = vcombine.high %v339_v12, %v343_v30 }
 0x1e4   :  { %v2266_v62 = vpop.f32.mrb[104].mxu0 }
 0x1e5   :  { %v2530_v50 = vpop.f32.mrb[104].mxu1  ;;  %v2268_v2 = vpop.f32.mrb[105].mxu0 }
 0x1e6   :  { %v5342_v37 = vadd.f32 %v2530_v50, %v2266_v62  ;;  %v2532_v17 = vpop.f32.mrb[105].mxu1  ;;  %v2269_v21 = vpop.f32.mrb[106].mxu0  ;;  %v4120_v2 = vcombine.low %v338_v22, %v342_v23  ;;  %v354_v22 = vld [vmem:[%s6655_s0 + $0x6d0] sm:$0xff] }
 0x1e7   :  { %v2533_v27 = vpop.f32.mrb[106].mxu1  ;;  %v2271_v40 = vpop.f32.mrb[107].mxu0  ;;  %v358_v23 = vld [vmem:[%s6655_s0 + $0x6f0] sm:$0xff] }
 0x1e8   :  { %6721 = vst [vmem:[#allocation12_spill] sm:$0xff] %v5342_v37  ;;  %v5344_v42 = vadd.f32 %v2533_v27, %v2269_v21  ;;  %v2535_v59 = vpop.f32.mrb[107].mxu1 }
 0x1e9   :  { %2777 = vmatmul.mubr.bf16.gmra.mrb[212].mxu0 %v4112_v13  ;;  %v351_v59 = vld [vmem:[%s6655_s0 + $0x6b8] sm:$0xff] }
 0x1ea   :  { %6722 = vst [vmem:[#allocation13_spill] sm:$0xff] %v5344_v42  ;;  %3041 = vmatmul.mubr.bf16.gmra.mrb[212].mxu1 %v4114_v24  ;;  %2784 = vmatprep.mubr.bf16.mxu0 %v4121_v33  ;;  %v4122_v24 = vcombine.low %v339_v12, %v343_v30  ;;  %v4129_v33 = vcombine.high %v346_v51, %v350_v54  ;;  %v355_v30 = vld [vmem:[%s6655_s0 + $0x6d8] sm:$0xff] }
 0x1eb   :  { %3048 = vmatprep.mubr.bf16.mxu1 %v4123_v47  ;;  %v4131_v47 = vcombine.high %v347_v4, %v351_v59 }
 0x1ec   :  { %v2274_v8 = vpop.f32.mrb[108].mxu0 }
 0x1ed   :  { %v2538_v62 = vpop.f32.mrb[108].mxu1  ;;  %v2276_v50 = vpop.f32.mrb[109].mxu0 }
 0x1ee   :  { %v5358_v13 = vadd.f32 %v2538_v62, %v2274_v8  ;;  %v2540_v17 = vpop.f32.mrb[109].mxu1  ;;  %v2277_v21 = vpop.f32.mrb[110].mxu0  ;;  %v4128_v50 = vcombine.low %v346_v51, %v350_v54  ;;  %v363_v51 = vld [vmem:[%s6655_s0 + $0x718] sm:$0xff] }
 0x1ef   :  { %v2541_v27 = vpop.f32.mrb[110].mxu1  ;;  %v2279_v40 = vpop.f32.mrb[111].mxu0 }
 0x1f0   :  { %6723 = vst [vmem:[#allocation14_spill] sm:$0xff] %v5358_v13  ;;  %v5360_v42 = vadd.f32 %v2541_v27, %v2277_v21  ;;  %v2543_v37 = vpop.f32.mrb[111].mxu1  ;;  %v362_v13 = vld [vmem:[%s6655_s0 + $0x710] sm:$0xff] }
 0x1f1   :  { %2785 = vmatmul.mubr.bf16.gmra.mrb[216].mxu0 %v4120_v2  ;;  %v359_v37 = vld [vmem:[%s6655_s0 + $0x6f8] sm:$0xff] }
 0x1f2   :  { %6724 = vst [vmem:[#allocation15_spill] sm:$0xff] %v5360_v42  ;;  %3049 = vmatmul.mubr.bf16.gmra.mrb[216].mxu1 %v4122_v24  ;;  %2792 = vmatprep.mubr.bf16.mxu0 %v4129_v33  ;;  %v4130_v24 = vcombine.low %v347_v4, %v351_v59  ;;  %v4137_v33 = vcombine.high %v354_v22, %v358_v23 }
 0x1f3   :  { %3056 = vmatprep.mubr.bf16.mxu1 %v4131_v47  ;;  %v4139_v47 = vcombine.high %v355_v30, %v359_v37 }
 0x1f4   :  { %v2282_v12 = vpop.f32.mrb[112].mxu0 }
 0x1f5   :  { %v2546_v8 = vpop.f32.mrb[112].mxu1  ;;  %v2284_v62 = vpop.f32.mrb[113].mxu0 }
 0x1f6   :  { %v5374_v2 = vadd.f32 %v2546_v8, %v2282_v12  ;;  %v2548_v17 = vpop.f32.mrb[113].mxu1  ;;  %v2285_v21 = vpop.f32.mrb[114].mxu0  ;;  %v4136_v12 = vcombine.low %v354_v22, %v358_v23 }
 0x1f7   :  { %v2549_v27 = vpop.f32.mrb[114].mxu1  ;;  %v2286_v40 = vpop.f32.mrb[115].mxu0  ;;  %v4145_v17 = vcombine.high %v362_v13, %v362_v13 }
 0x1f8   :  { %6725 = vst [vmem:[#allocation16_spill] sm:$0xff] %v5374_v2  ;;  %v2550_v42 = vpop.f32.mrb[115].mxu1  ;;  %v4147_v40 = vcombine.high %v363_v51, %v363_v51 }
 0x1f9   :  { %2793 = vmatmul.mubr.bf16.gmra.mrb[220].mxu0 %v4128_v50  ;;  %v4138_v50 = vcombine.low %v355_v30, %v359_v37  ;;  %v4144_v37 = vcombine.low %v362_v13, %v362_v13 }
 0x1fa   :  { %3057 = vmatmul.mubr.bf16.gmra.mrb[220].mxu1 %v4130_v24  ;;  %2800 = vmatprep.mubr.bf16.mxu0 %v4137_v33 }
 0x1fb   :  { %3064 = vmatprep.mubr.bf16.mxu1 %v4139_v47 }
 0x1fc   :  { %v2586_v62 = vpop.f32.mrb[116].mxu0 }
 0x1fd   :  { %v2587_v54 = vadd.f32 %v2586_v62, %v4926_v38  ;;  %v2850_v4 = vpop.f32.mrb[116].mxu1  ;;  %v2588_v59 = vpop.f32.mrb[117].mxu0 }
 0x1fe   :  { %v2852_v8 = vpop.f32.mrb[117].mxu1  ;;  %v2589_v42 = vpop.f32.mrb[118].mxu0 }
 0x1ff   :  { %v5383_v21 = vadd.f32 %v2850_v4, %v2587_v54  ;;  %v2590_v24 = vadd.f32 %v2589_v42, %v4928_v46  ;;  %v2853_v33 = vpop.f32.mrb[118].mxu1  ;;  %v2591_v27 = vpop.f32.mrb[119].mxu0  ;;  %v4146_v4 = vcombine.low %v363_v51, %v363_v51 }
 0x200   :  { %v2855_v47 = vpop.f32.mrb[119].mxu1 }
 0x201   :  { %v5386_v2 = vadd.f32 %v2853_v33, %v2590_v24  ;;  %2801 = vmatmul.mubr.bf16.gmra.mrb[224].mxu0 %v4136_v12 }
 0x202   :  { %3065 = vmatmul.mubr.bf16.gmra.mrb[224].mxu1 %v4138_v50  ;;  %2808 = vmatprep.mubr.bf16.mxu0 %v4145_v17 }
 0x203   :  { %3072 = vmatprep.mubr.bf16.mxu1 %v4147_v40 }
 0x204   :  { %v2594_v38 = vpop.f32.mrb[120].mxu0 }
 0x205   :  { %v2595_v22 = vadd.f32 %v2594_v38, %v4942_v56  ;;  %v2858_v23 = vpop.f32.mrb[120].mxu1  ;;  %v2596_v30 = vpop.f32.mrb[121].mxu0 }
 0x206   :  { %v2860_v62 = vpop.f32.mrb[121].mxu1  ;;  %v2597_v54 = vpop.f32.mrb[122].mxu0 }
 0x207   :  { %v5389_v46 = vadd.f32 %v2858_v23, %v2595_v22  ;;  %v2598_v59 = vadd.f32 %v2597_v54, %v4944_v1  ;;  %v2861_v8 = vpop.f32.mrb[122].mxu1  ;;  %v2599_v42 = vpop.f32.mrb[123].mxu0 }
 0x208   :  { %v2863_v24 = vpop.f32.mrb[123].mxu1 }
 0x209   :  { %v5392_v12 = vadd.f32 %v2861_v8, %v2598_v59  ;;  %2809 = vmatmul.mubr.bf16.gmra.mrb[228].mxu0 %v4144_v37 }
 0x20a   :  { %3073 = vmatmul.mubr.bf16.gmra.mrb[228].mxu1 %v4146_v4 }
 0x20c   :  { %v2602_v50 = vpop.f32.mrb[124].mxu0 }
 0x20d   :  { %v2603_v56 = vadd.f32 %v2602_v50, %v4958_v11  ;;  %v2866_v17 = vpop.f32.mrb[124].mxu1  ;;  %v2604_v33 = vpop.f32.mrb[125].mxu0 }
 0x20e   :  { %v2868_v13 = vpop.f32.mrb[125].mxu1  ;;  %v2605_v27 = vpop.f32.mrb[126].mxu0 }
 0x20f   :  { %v5395_v40 = vadd.f32 %v2866_v17, %v2603_v56  ;;  %v2606_v51 = vadd.f32 %v2605_v27, %v4960_v19  ;;  %v2869_v47 = vpop.f32.mrb[126].mxu1  ;;  %v2607_v1 = vpop.f32.mrb[127].mxu0 }
 0x210   :  { %v2871_v38 = vpop.f32.mrb[127].mxu1 }
 0x211   :  { %v5398_v22 = vadd.f32 %v2869_v47, %v2606_v51 }
 0x214   :  { %v2610_v23 = vpop.f32.mrb[128].mxu0 }
 0x215   :  { %v2611_v30 = vadd.f32 %v2610_v23, %v4974_v29  ;;  %v2874_v37 = vpop.f32.mrb[128].mxu1  ;;  %v2612_v62 = vpop.f32.mrb[129].mxu0 }
 0x216   :  { %v2876_v54 = vpop.f32.mrb[129].mxu1  ;;  %v2613_v11 = vpop.f32.mrb[130].mxu0 }
 0x217   :  { %v5401_v4 = vadd.f32 %v2874_v37, %v2611_v30  ;;  %v2614_v59 = vadd.f32 %v2613_v11, %v4976_v36  ;;  %v2877_v8 = vpop.f32.mrb[130].mxu1  ;;  %v2615_v42 = vpop.f32.mrb[131].mxu0 }
 0x218   :  { %v2879_v24 = vpop.f32.mrb[131].mxu1 }
 0x219   :  { %v5404_v19 = vadd.f32 %v2877_v8, %v2614_v59 }
 0x21c   :  { %v2618_v50 = vpop.f32.mrb[132].mxu0 }
 0x21d   :  { %v2619_v56 = vadd.f32 %v2618_v50, %v4990_v48  ;;  %v2882_v17 = vpop.f32.mrb[132].mxu1  ;;  %v2620_v33 = vpop.f32.mrb[133].mxu0 }
 0x21e   :  { %v2884_v13 = vpop.f32.mrb[133].mxu1  ;;  %v2621_v29 = vpop.f32.mrb[134].mxu0 }
 0x21f   :  { %v5407_v27 = vadd.f32 %v2882_v17, %v2619_v56  ;;  %v2622_v51 = vadd.f32 %v2621_v29, %v4992_v57  ;;  %v2885_v47 = vpop.f32.mrb[134].mxu1  ;;  %v2623_v1 = vpop.f32.mrb[135].mxu0 }
 0x220   :  { %v2887_v38 = vpop.f32.mrb[135].mxu1 }
 0x221   :  { %v5410_v36 = vadd.f32 %v2885_v47, %v2622_v51 }
 0x224   :  { %v2626_v23 = vpop.f32.mrb[136].mxu0 }
 0x225   :  { %v2627_v30 = vadd.f32 %v2626_v23, %v5006_v5  ;;  %v2890_v37 = vpop.f32.mrb[136].mxu1  ;;  %v2628_v62 = vpop.f32.mrb[137].mxu0 }
 0x226   :  { %v2892_v54 = vpop.f32.mrb[137].mxu1  ;;  %v2629_v48 = vpop.f32.mrb[138].mxu0 }
 0x227   :  { %v5413_v11 = vadd.f32 %v2890_v37, %v2627_v30  ;;  %v2630_v59 = vadd.f32 %v2629_v48, %v5008_v14  ;;  %v2893_v8 = vpop.f32.mrb[138].mxu1  ;;  %v2631_v42 = vpop.f32.mrb[139].mxu0  ;;  %v3317_v30 = vmul.f32 %v5386_v2, %v5386_v2  ;;  %v3316_v54 = vmul.f32 %v5383_v21, %v5383_v21 }
 0x228   :  { %v2895_v24 = vpop.f32.mrb[139].mxu1  ;;  %v3254_v48 = vadd.f32 %v5386_v2, %v5383_v21 }
 0x229   :  { %v5416_v57 = vadd.f32 %v2893_v8, %v2630_v59  ;;  %v3318_v8 = vmul.f32 %v5389_v46, %v5389_v46 }
 0x22c   :  { %v2634_v50 = vpop.f32.mrb[140].mxu0 }
 0x22d   :  { %v2635_v56 = vadd.f32 %v2634_v50, %v5022_v25  ;;  %v2898_v17 = vpop.f32.mrb[140].mxu1  ;;  %v2636_v33 = vpop.f32.mrb[141].mxu0 }
 0x22e   :  { %v2900_v13 = vpop.f32.mrb[141].mxu1  ;;  %v2637_v5 = vpop.f32.mrb[142].mxu0  ;;  %v3373_v33 = vadd.f32 %v3317_v30, %v3316_v54 }
 0x22f   :  { %v5419_v29 = vadd.f32 %v2898_v17, %v2635_v56  ;;  %v2638_v51 = vadd.f32 %v2637_v5, %v5024_v0  ;;  %v2901_v47 = vpop.f32.mrb[142].mxu1  ;;  %v2639_v1 = vpop.f32.mrb[143].mxu0 }
 0x230   :  { %v2903_v38 = vpop.f32.mrb[143].mxu1  ;;  %v3374_v5 = vadd.f32 %v3373_v33, %v3318_v8 }
 0x231   :  { %v5422_v14 = vadd.f32 %v2901_v47, %v2638_v51  ;;  %v3319_v51 = vmul.f32 %v5392_v12, %v5392_v12  ;;  %v3320_v38 = vmul.f32 %v5395_v40, %v5395_v40 }
 0x233   :  { %v3375_v54 = vadd.f32 %v3374_v5, %v3319_v51 }
 0x234   :  { %v2642_v23 = vpop.f32.mrb[144].mxu0 }
 0x235   :  { %v2643_v37 = vadd.f32 %v2642_v23, %v5038_v45  ;;  %v2906_v25 = vpop.f32.mrb[144].mxu1  ;;  %v2644_v62 = vpop.f32.mrb[145].mxu0  ;;  %v3255_v45 = vadd.f32 %v3254_v48, %v5389_v46 }
 0x236   :  { %v2908_v0 = vpop.f32.mrb[145].mxu1  ;;  %v2645_v59 = vpop.f32.mrb[146].mxu0 }
 0x237   :  { %v5433_v42 = vadd.f32 %v2906_v25, %v2643_v37  ;;  %v2646_v24 = vadd.f32 %v2645_v59, %v5040_v55  ;;  %v2909_v50 = vpop.f32.mrb[146].mxu1  ;;  %v2647_v56 = vpop.f32.mrb[147].mxu0  ;;  %v3256_v47 = vadd.f32 %v3255_v45, %v5392_v12 }
 0x238   :  { %v2911_v17 = vpop.f32.mrb[147].mxu1  ;;  %v3321_v56 = vmul.f32 %v5398_v22, %v5398_v22 }
 0x239   :  { %v5437_v13 = vadd.f32 %v2909_v50, %v2646_v24  ;;  %v3257_v25 = vadd.f32 %v3256_v47, %v5395_v40  ;;  %v3376_v50 = vadd.f32 %v3375_v54, %v3320_v38  ;;  %v3322_v17 = vmul.f32 %v5401_v4, %v5401_v4 }
 0x23b   :  { %v3377_v51 = vadd.f32 %v3376_v50, %v3321_v56 }
 0x23c   :  { %v2650_v1 = vpop.f32.mrb[148].mxu0 }
 0x23d   :  { %v2651_v55 = vadd.f32 %v2650_v1, %v5054_v6  ;;  %v2914_v23 = vpop.f32.mrb[148].mxu1  ;;  %v2652_v37 = vpop.f32.mrb[149].mxu0  ;;  %v3258_v6 = vadd.f32 %v3257_v25, %v5398_v22 }
 0x23e   :  { %v2916_v62 = vpop.f32.mrb[149].mxu1  ;;  %v2653_v30 = vpop.f32.mrb[150].mxu0  ;;  %v3323_v37 = vmul.f32 %v5404_v19, %v5404_v19 }
 0x23f   :  { %v5446_v48 = vadd.f32 %v2914_v23, %v2651_v55  ;;  %v2654_v0 = vadd.f32 %v2653_v30, %v5056_v16  ;;  %v2917_v59 = vpop.f32.mrb[150].mxu1  ;;  %v2655_v8 = vpop.f32.mrb[151].mxu0  ;;  %v3259_v33 = vadd.f32 %v3258_v6, %v5401_v4  ;;  %v3378_v23 = vadd.f32 %v3377_v51, %v3322_v17 }
 0x240   :  { %v2919_v24 = vpop.f32.mrb[151].mxu1  ;;  %v3325_v17 = vmul.f32 %v5410_v36, %v5410_v36 }
 0x241   :  { %v5451_v45 = vadd.f32 %v2917_v59, %v2654_v0  ;;  %v3260_v0 = vadd.f32 %v3259_v33, %v5404_v19  ;;  %v3379_v50 = vadd.f32 %v3378_v23, %v3323_v37 }
 0x243   :  { %v3261_v24 = vadd.f32 %v3260_v0, %v5407_v27 }
 0x244   :  { %v2658_v5 = vpop.f32.mrb[152].mxu0 }
 0x245   :  { %v2659_v16 = vadd.f32 %v2658_v5, %v5070_v28  ;;  %v2922_v47 = vpop.f32.mrb[152].mxu1  ;;  %v2660_v1 = vpop.f32.mrb[153].mxu0  ;;  %v3324_v28 = vmul.f32 %v5407_v27, %v5407_v27  ;;  %v3262_v33 = vadd.f32 %v3261_v24, %v5410_v36 }
 0x246   :  { %v2924_v55 = vpop.f32.mrb[153].mxu1  ;;  %v2661_v38 = vpop.f32.mrb[154].mxu0  ;;  %v3326_v1 = vmul.f32 %v5413_v11, %v5413_v11 }
 0x247   :  { %v5460_v62 = vadd.f32 %v2922_v47, %v2659_v16  ;;  %v2662_v25 = vadd.f32 %v2661_v38, %v5072_v39  ;;  %v2925_v30 = vpop.f32.mrb[154].mxu1  ;;  %v2663_v54 = vpop.f32.mrb[155].mxu0  ;;  %v3380_v6 = vadd.f32 %v3379_v50, %v3324_v28  ;;  %v3328_v50 = vmul.f32 %v5419_v29, %v5419_v29 }
 0x248   :  { %v2927_v59 = vpop.f32.mrb[155].mxu1 }
 0x249   :  { %v5466_v8 = vadd.f32 %v2925_v30, %v2662_v25  ;;  %v3263_v25 = vadd.f32 %v3262_v33, %v5413_v11  ;;  %v3381_v54 = vadd.f32 %v3380_v6, %v3325_v17  ;;  %v3327_v59 = vmul.f32 %v5416_v57, %v5416_v57 }
 0x24b   :  { %v3382_v0 = vadd.f32 %v3381_v54, %v3326_v1  ;;  %v3264_v28 = vadd.f32 %v3263_v25, %v5416_v57 }
 0x24c   :  { %v2666_v56 = vpop.f32.mrb[156].mxu0 }
 0x24d   :  { %v2667_v39 = vadd.f32 %v2666_v56, %v5086_v52  ;;  %v2930_v5 = vpop.f32.mrb[156].mxu1  ;;  %v2668_v51 = vpop.f32.mrb[157].mxu0  ;;  %v3383_v17 = vadd.f32 %v3382_v0, %v3327_v59 }
 0x24e   :  { %v2932_v16 = vpop.f32.mrb[157].mxu1  ;;  %v2669_v47 = vpop.f32.mrb[158].mxu0 }
 0x24f   :  { %v5475_v55 = vadd.f32 %v2930_v5, %v2667_v39  ;;  %v2670_v38 = vadd.f32 %v2669_v47, %v5088_v63  ;;  %v2933_v23 = vpop.f32.mrb[158].mxu1  ;;  %v2671_v37 = vpop.f32.mrb[159].mxu0  ;;  %v3265_v5 = vadd.f32 %v3264_v28, %v5419_v29 }
 0x250   :  { %v2935_v30 = vpop.f32.mrb[159].mxu1  ;;  %v3329_v37 = vmul.f32 %v5422_v14, %v5422_v14 }
 0x251   :  { %v5479_v52 = vadd.f32 %v2933_v23, %v2670_v38  ;;  %v3384_v23 = vadd.f32 %v3383_v17, %v3328_v50  ;;  %v3330_v30 = vmul.f32 %v5433_v42, %v5433_v42 }
 0x253   :  { %v3385_v59 = vadd.f32 %v3384_v23, %v3329_v37 }
 0x254   :  { %v2674_v24 = vpop.f32.mrb[160].mxu0 }
 0x255   :  { %v2675_v63 = vadd.f32 %v2674_v24, %v5102_v15  ;;  %v2938_v56 = vpop.f32.mrb[160].mxu1  ;;  %v2676_v39 = vpop.f32.mrb[161].mxu0  ;;  %v3266_v15 = vadd.f32 %v3265_v5, %v5422_v14 }
 0x256   :  { %v2940_v51 = vpop.f32.mrb[161].mxu1  ;;  %v2677_v6 = vpop.f32.mrb[162].mxu0  ;;  %v3331_v39 = vmul.f32 %v5437_v13, %v5437_v13 }
 0x257   :  { %v5488_v33 = vadd.f32 %v2938_v56, %v2675_v63  ;;  %v2678_v16 = vadd.f32 %v2677_v6, %v5104_v26  ;;  %v2941_v47 = vpop.f32.mrb[162].mxu1  ;;  %v2679_v1 = vpop.f32.mrb[163].mxu0  ;;  %v3267_v54 = vadd.f32 %v3266_v15, %v5433_v42  ;;  %v3386_v56 = vadd.f32 %v3385_v59, %v3330_v30 }
 0x258   :  { %v2943_v38 = vpop.f32.mrb[163].mxu1  ;;  %v3333_v30 = vmul.f32 %v5451_v45, %v5451_v45 }
 0x259   :  { %v5493_v25 = vadd.f32 %v2941_v47, %v2678_v16  ;;  %v3268_v16 = vadd.f32 %v3267_v54, %v5437_v13  ;;  %v3387_v23 = vadd.f32 %v3386_v56, %v3331_v39 }
 0x25b   :  { %v3269_v38 = vadd.f32 %v3268_v16, %v5446_v48 }
 0x25c   :  { %v2682_v0 = vpop.f32.mrb[164].mxu0 }
 0x25d   :  { %v2683_v26 = vadd.f32 %v2682_v0, %v5118_v41  ;;  %v2946_v28 = vpop.f32.mrb[164].mxu1  ;;  %v2684_v24 = vpop.f32.mrb[165].mxu0  ;;  %v3332_v41 = vmul.f32 %v5446_v48, %v5446_v48  ;;  %v3270_v54 = vadd.f32 %v3269_v38, %v5451_v45 }
 0x25e   :  { %v2948_v63 = vpop.f32.mrb[165].mxu1  ;;  %v2685_v50 = vpop.f32.mrb[166].mxu0  ;;  %v3334_v24 = vmul.f32 %v5460_v62, %v5460_v62 }
 0x25f   :  { %v5502_v51 = vadd.f32 %v2946_v28, %v2683_v26  ;;  %v2686_v5 = vadd.f32 %v2685_v50, %v5120_v53  ;;  %v2949_v6 = vpop.f32.mrb[166].mxu1  ;;  %v2687_v17 = vpop.f32.mrb[167].mxu0  ;;  %v3388_v15 = vadd.f32 %v3387_v23, %v3332_v41  ;;  %v3336_v23 = vmul.f32 %v5475_v55, %v5475_v55 }
 0x260   :  { %v2951_v47 = vpop.f32.mrb[167].mxu1 }
 0x261   :  { %v5508_v1 = vadd.f32 %v2949_v6, %v2686_v5  ;;  %v3271_v5 = vadd.f32 %v3270_v54, %v5460_v62  ;;  %v3389_v17 = vadd.f32 %v3388_v15, %v3333_v30  ;;  %v3335_v47 = vmul.f32 %v5466_v8, %v5466_v8 }
 0x263   :  { %v3390_v16 = vadd.f32 %v3389_v17, %v3334_v24  ;;  %v3272_v41 = vadd.f32 %v3271_v5, %v5466_v8 }
 0x264   :  { %v2690_v37 = vpop.f32.mrb[168].mxu0 }
 0x265   :  { %v2691_v53 = vadd.f32 %v2690_v37, %v5134_v7  ;;  %v2954_v0 = vpop.f32.mrb[168].mxu1  ;;  %v2692_v59 = vpop.f32.mrb[169].mxu0  ;;  %v3391_v30 = vadd.f32 %v3390_v16, %v3335_v47 }
 0x266   :  { %v2956_v26 = vpop.f32.mrb[169].mxu1  ;;  %v2693_v28 = vpop.f32.mrb[170].mxu0 }
 0x267   :  { %v5517_v63 = vadd.f32 %v2954_v0, %v2691_v53  ;;  %v2694_v50 = vadd.f32 %v2693_v28, %v5136_v20  ;;  %v2957_v56 = vpop.f32.mrb[170].mxu1  ;;  %v2695_v39 = vpop.f32.mrb[171].mxu0  ;;  %v3273_v0 = vadd.f32 %v3272_v41, %v5475_v55 }
 0x268   :  { %v2959_v6 = vpop.f32.mrb[171].mxu1  ;;  %v3337_v39 = vmul.f32 %v5479_v52, %v5479_v52 }
 0x269   :  { %v5521_v7 = vadd.f32 %v2957_v56, %v2694_v50  ;;  %v3392_v56 = vadd.f32 %v3391_v30, %v3336_v23  ;;  %v3338_v6 = vmul.f32 %v5488_v33, %v5488_v33 }
 0x26b   :  { %v3393_v47 = vadd.f32 %v3392_v56, %v3337_v39 }
 0x26c   :  { %v2698_v38 = vpop.f32.mrb[172].mxu0 }
 0x26d   :  { %v2699_v20 = vadd.f32 %v2698_v38, %v5150_v34  ;;  %v2962_v37 = vpop.f32.mrb[172].mxu1  ;;  %v2700_v53 = vpop.f32.mrb[173].mxu0  ;;  %v3274_v34 = vadd.f32 %v3273_v0, %v5479_v52 }
 0x26e   :  { %v2964_v59 = vpop.f32.mrb[173].mxu1  ;;  %v2701_v15 = vpop.f32.mrb[174].mxu0  ;;  %v3339_v53 = vmul.f32 %v5493_v25, %v5493_v25 }
 0x26f   :  { %v5530_v54 = vadd.f32 %v2962_v37, %v2699_v20  ;;  %v2702_v26 = vadd.f32 %v2701_v15, %v5152_v49  ;;  %v2965_v28 = vpop.f32.mrb[174].mxu1  ;;  %v2703_v24 = vpop.f32.mrb[175].mxu0  ;;  %v3275_v17 = vadd.f32 %v3274_v34, %v5488_v33  ;;  %v3394_v37 = vadd.f32 %v3393_v47, %v3338_v6 }
 0x270   :  { %v2967_v50 = vpop.f32.mrb[175].mxu1  ;;  %v3341_v6 = vmul.f32 %v5508_v1, %v5508_v1 }
 0x271   :  { %v5535_v5 = vadd.f32 %v2965_v28, %v2702_v26  ;;  %v3276_v26 = vadd.f32 %v3275_v17, %v5493_v25  ;;  %v3395_v56 = vadd.f32 %v3394_v37, %v3339_v53 }
 0x273   :  { %v3277_v50 = vadd.f32 %v3276_v26, %v5502_v51 }
 0x274   :  { %v2706_v16 = vpop.f32.mrb[176].mxu0 }
 0x275   :  { %v2707_v49 = vadd.f32 %v2706_v16, %v5166_v3  ;;  %v2970_v41 = vpop.f32.mrb[176].mxu1  ;;  %v2708_v38 = vpop.f32.mrb[177].mxu0  ;;  %v3340_v3 = vmul.f32 %v5502_v51, %v5502_v51  ;;  %v3278_v17 = vadd.f32 %v3277_v50, %v5508_v1 }
 0x276   :  { %v2972_v20 = vpop.f32.mrb[177].mxu1  ;;  %v2709_v23 = vpop.f32.mrb[178].mxu0  ;;  %v3342_v38 = vmul.f32 %v5517_v63, %v5517_v63 }
 0x277   :  { %v5544_v59 = vadd.f32 %v2970_v41, %v2707_v49  ;;  %v2710_v0 = vadd.f32 %v2709_v23, %v5168_v18  ;;  %v2973_v15 = vpop.f32.mrb[178].mxu1  ;;  %v2711_v30 = vpop.f32.mrb[179].mxu0  ;;  %v3396_v34 = vadd.f32 %v3395_v56, %v3340_v3  ;;  %v3344_v56 = vmul.f32 %v5530_v54, %v5530_v54 }
 0x278   :  { %v2975_v28 = vpop.f32.mrb[179].mxu1 }
 0x279   :  { %v5550_v24 = vadd.f32 %v2973_v15, %v2710_v0  ;;  %v3279_v0 = vadd.f32 %v3278_v17, %v5517_v63  ;;  %v3397_v30 = vadd.f32 %v3396_v34, %v3341_v6  ;;  %v3343_v28 = vmul.f32 %v5521_v7, %v5521_v7 }
 0x27b   :  { %v3398_v26 = vadd.f32 %v3397_v30, %v3342_v38  ;;  %v3280_v3 = vadd.f32 %v3279_v0, %v5521_v7 }
 0x27c   :  { %v2714_v39 = vpop.f32.mrb[180].mxu0 }
 0x27d   :  { %v2715_v18 = vadd.f32 %v2714_v39, %v5182_v35  ;;  %v2978_v16 = vpop.f32.mrb[180].mxu1  ;;  %v2716_v47 = vpop.f32.mrb[181].mxu0  ;;  %v3399_v6 = vadd.f32 %v3398_v26, %v3343_v28 }
 0x27e   :  { %v2980_v49 = vpop.f32.mrb[181].mxu1  ;;  %v2717_v41 = vpop.f32.mrb[182].mxu0 }
 0x27f   :  { %v5559_v20 = vadd.f32 %v2978_v16, %v2715_v18  ;;  %v2718_v23 = vadd.f32 %v2717_v41, %v5184_v58  ;;  %v2981_v37 = vpop.f32.mrb[182].mxu1  ;;  %v2719_v53 = vpop.f32.mrb[183].mxu0  ;;  %v3281_v16 = vadd.f32 %v3280_v3, %v5530_v54 }
 0x280   :  { %v2983_v15 = vpop.f32.mrb[183].mxu1  ;;  %v3345_v53 = vmul.f32 %v5535_v5, %v5535_v5 }
 0x281   :  { %v5563_v35 = vadd.f32 %v2981_v37, %v2718_v23  ;;  %v3400_v37 = vadd.f32 %v3399_v6, %v3344_v56  ;;  %v3346_v15 = vmul.f32 %v5544_v59, %v5544_v59 }
 0x283   :  { %v3401_v28 = vadd.f32 %v3400_v37, %v3345_v53 }
 0x284   :  { %v2722_v50 = vpop.f32.mrb[184].mxu0 }
 0x285   :  { %v2723_v58 = vadd.f32 %v2722_v50, %v5198_v9  ;;  %v2986_v39 = vpop.f32.mrb[184].mxu1  ;;  %v2724_v18 = vpop.f32.mrb[185].mxu0  ;;  %v3282_v9 = vadd.f32 %v3281_v16, %v5535_v5 }
 0x286   :  { %v2988_v47 = vpop.f32.mrb[185].mxu1  ;;  %v2725_v34 = vpop.f32.mrb[186].mxu0  ;;  %v3347_v18 = vmul.f32 %v5550_v24, %v5550_v24 }
 0x287   :  { %v5572_v17 = vadd.f32 %v2986_v39, %v2723_v58  ;;  %v2726_v49 = vadd.f32 %v2725_v34, %v5200_v32  ;;  %v2989_v41 = vpop.f32.mrb[186].mxu1  ;;  %v2727_v38 = vpop.f32.mrb[187].mxu0  ;;  %v3283_v30 = vadd.f32 %v3282_v9, %v5544_v59  ;;  %v3402_v39 = vadd.f32 %v3401_v28, %v3346_v15 }
 0x288   :  { %v2991_v23 = vpop.f32.mrb[187].mxu1  ;;  %v3349_v15 = vmul.f32 %v5563_v35, %v5563_v35 }
 0x289   :  { %6726 = vst [vmem:[#allocation17_spill] sm:$0xff] %v5572_v17  ;;  %v5577_v0 = vadd.f32 %v2989_v41, %v2726_v49  ;;  %v3284_v49 = vadd.f32 %v3283_v30, %v5550_v24  ;;  %v3403_v37 = vadd.f32 %v3402_v39, %v3347_v18 }
 0x28b   :  { %6727 = vst [vmem:[#allocation18_spill] sm:$0xff] %v5577_v0  ;;  %v3285_v23 = vadd.f32 %v3284_v49, %v5559_v20 }
 0x28c   :  { %v2730_v26 = vpop.f32.mrb[188].mxu0 }
 0x28d   :  { %v2731_v32 = vadd.f32 %v2730_v26, %v5214_v44  ;;  %v2994_v3 = vpop.f32.mrb[188].mxu1  ;;  %v2732_v50 = vpop.f32.mrb[189].mxu0  ;;  %v3348_v44 = vmul.f32 %v5559_v20, %v5559_v20  ;;  %v3286_v30 = vadd.f32 %v3285_v23, %v5563_v35 }
 0x28e   :  { %v2996_v58 = vpop.f32.mrb[189].mxu1  ;;  %v2733_v56 = vpop.f32.mrb[190].mxu0  ;;  %v3350_v50 = vmul.f32 %v5572_v17, %v5572_v17 }
 0x28f   :  { %v5586_v47 = vadd.f32 %v2994_v3, %v2731_v32  ;;  %v2734_v16 = vadd.f32 %v2733_v56, %v5216_v10  ;;  %v2997_v34 = vpop.f32.mrb[190].mxu1  ;;  %v2735_v6 = vpop.f32.mrb[191].mxu0  ;;  %v3404_v9 = vadd.f32 %v3403_v37, %v3348_v44 }
 0x290   :  { %v2999_v41 = vpop.f32.mrb[191].mxu1 }
 0x291   :  { %6728 = vst [vmem:[#allocation19_spill] sm:$0xff] %v5586_v47  ;;  %v5592_v38 = vadd.f32 %v2997_v34, %v2734_v16  ;;  %v3287_v16 = vadd.f32 %v3286_v30, %v5572_v17  ;;  %v3405_v6 = vadd.f32 %v3404_v9, %v3349_v15  ;;  %v3351_v41 = vmul.f32 %v5577_v0, %v5577_v0 }
 0x292   :  { %v3352_v37 = vmul.f32 %v5586_v47, %v5586_v47 }
 0x293   :  { %6729 = vst [vmem:[#allocation20_spill] sm:$0xff] %v5592_v38  ;;  %v3406_v49 = vadd.f32 %v3405_v6, %v3350_v50  ;;  %v3288_v44 = vadd.f32 %v3287_v16, %v5577_v0 }
 0x294   :  { %v2738_v53 = vpop.f32.mrb[192].mxu0 }
 0x295   :  { %v2739_v10 = vadd.f32 %v2738_v53, %v5230_v31  ;;  %v3002_v26 = vpop.f32.mrb[192].mxu1  ;;  %v2740_v28 = vpop.f32.mrb[193].mxu0  ;;  %v3407_v15 = vadd.f32 %v3406_v49, %v3351_v41 }
 0x296   :  { %v3004_v32 = vpop.f32.mrb[193].mxu1  ;;  %v2741_v3 = vpop.f32.mrb[194].mxu0 }
 0x297   :  { %v5601_v58 = vadd.f32 %v3002_v26, %v2739_v10  ;;  %v2742_v56 = vadd.f32 %v2741_v3, %v5232_v61  ;;  %v3005_v39 = vpop.f32.mrb[194].mxu1  ;;  %v2743_v18 = vpop.f32.mrb[195].mxu0  ;;  %v3289_v26 = vadd.f32 %v3288_v44, %v5586_v47  ;;  %v6734_v44 = vld [vmem:[#allocation2_spill] sm:$0xff] }
 0x298   :  { %v3007_v34 = vpop.f32.mrb[195].mxu1  ;;  %v3353_v18 = vmul.f32 %v5592_v38, %v5592_v38 }
 0x299   :  { %6730 = vst [vmem:[#allocation21_spill] sm:$0xff] %v5601_v58  ;;  %v5605_v31 = vadd.f32 %v3005_v39, %v2742_v56  ;;  %v3408_v39 = vadd.f32 %v3407_v15, %v3352_v37  ;;  %v3354_v34 = vmul.f32 %v5601_v58, %v5601_v58 }
 0x29b   :  { %6731 = vst [vmem:[#allocation22_spill] sm:$0xff] %v5605_v31  ;;  %v3409_v41 = vadd.f32 %v3408_v39, %v3353_v18 }
 0x29c   :  { %v2746_v23 = vpop.f32.mrb[196].mxu0 }
 0x29d   :  { %v2747_v61 = vadd.f32 %v2746_v23, %v5246_v60  ;;  %v3010_v53 = vpop.f32.mrb[196].mxu1  ;;  %v2748_v10 = vpop.f32.mrb[197].mxu0  ;;  %v3290_v60 = vadd.f32 %v3289_v26, %v5592_v38  ;;  %v6736_v26 = vld [vmem:[#allocation3_spill] sm:$0xff] }
 0x29e   :  { %v3012_v28 = vpop.f32.mrb[197].mxu1  ;;  %v2749_v9 = vpop.f32.mrb[198].mxu0  ;;  %v3410_v10 = vadd.f32 %v3409_v41, %v3354_v34 }
 0x29f   :  { %v5614_v30 = vadd.f32 %v3010_v53, %v2747_v61  ;;  %v2750_v32 = vadd.f32 %v2749_v9, %v5248_v43  ;;  %v3013_v3 = vpop.f32.mrb[198].mxu1  ;;  %v2751_v50 = vpop.f32.mrb[199].mxu0  ;;  %v3291_v6 = vadd.f32 %v3290_v60, %v5601_v58  ;;  %v3355_v28 = vmul.f32 %v5605_v31, %v5605_v31 }
 0x2a0   :  { %v3015_v56 = vpop.f32.mrb[199].mxu1 }
 0x2a1   :  { %6732 = vst [vmem:[#allocation23_spill] sm:$0xff] %v5614_v30  ;;  %v5619_v16 = vadd.f32 %v3013_v3, %v2750_v32  ;;  %v3292_v50 = vadd.f32 %v3291_v6, %v5605_v31  ;;  %v3356_v39 = vmul.f32 %v5614_v30, %v5614_v30  ;;  %v3411_v34 = vadd.f32 %v3410_v10, %v3355_v28 }
 0x2a3   :  { %6733 = vst [vmem:[#allocation24_spill] sm:$0xff] %v5619_v16  ;;  %v3293_v60 = vadd.f32 %v3292_v50, %v5614_v30  ;;  %v3412_v41 = vadd.f32 %v3411_v34, %v3356_v39 }
 0x2a4   :  { %v2754_v49 = vpop.f32.mrb[200].mxu0 }
 0x2a5   :  { %v2755_v43 = vadd.f32 %v2754_v49, %v6734_v44  ;;  %v3018_v23 = vpop.f32.mrb[200].mxu1  ;;  %v2756_v61 = vpop.f32.mrb[201].mxu0  ;;  %v3357_v44 = vmul.f32 %v5619_v16, %v5619_v16  ;;  %v3294_v6 = vadd.f32 %v3293_v60, %v5619_v16 }
 0x2a6   :  { %v3020_v53 = vpop.f32.mrb[201].mxu1  ;;  %v2757_v37 = vpop.f32.mrb[202].mxu0 }
 0x2a7   :  { %v5628_v9 = vadd.f32 %v3018_v23, %v2755_v43  ;;  %v2758_v15 = vadd.f32 %v2757_v37, %v6736_v26  ;;  %v3021_v32 = vpop.f32.mrb[202].mxu1  ;;  %v2759_v3 = vpop.f32.mrb[203].mxu0  ;;  %v6738_v43 = vld [vmem:[#allocation4_spill] sm:$0xff]  ;;  %v3413_v39 = vadd.f32 %v3412_v41, %v3357_v44 }
 0x2a8   :  { %v3023_v56 = vpop.f32.mrb[203].mxu1  ;;  %v6740_v3 = vld [vmem:[#allocation5_spill] sm:$0xff] }
 0x2a9   :  { %6735 = vst [vmem:[#allocation2_spill] sm:$0xff] %v5628_v9  ;;  %v5634_v18 = vadd.f32 %v3021_v32, %v2758_v15  ;;  %v3358_v15 = vmul.f32 %v5628_v9, %v5628_v9  ;;  %v3295_v34 = vadd.f32 %v3294_v6, %v5628_v9 }
 0x2ab   :  { %6737 = vst [vmem:[#allocation3_spill] sm:$0xff] %v5634_v18  ;;  %v3359_v60 = vmul.f32 %v5634_v18, %v5634_v18 }
 0x2ac   :  { %v2762_v49 = vpop.f32.mrb[204].mxu0 }
 0x2ad   :  { %v2763_v23 = vadd.f32 %v2762_v49, %v6738_v43  ;;  %v3026_v61 = vpop.f32.mrb[204].mxu1  ;;  %v2764_v53 = vpop.f32.mrb[205].mxu0  ;;  %v3414_v43 = vadd.f32 %v3413_v39, %v3358_v15 }
 0x2ae   :  { %v3028_v37 = vpop.f32.mrb[205].mxu1  ;;  %v2765_v26 = vpop.f32.mrb[206].mxu0 }
 0x2af   :  { %v5643_v32 = vadd.f32 %v3026_v61, %v2763_v23  ;;  %v2766_v10 = vadd.f32 %v2765_v26, %v6740_v3  ;;  %v3029_v28 = vpop.f32.mrb[206].mxu1  ;;  %v2767_v50 = vpop.f32.mrb[207].mxu0  ;;  %v3296_v37 = vadd.f32 %v3295_v34, %v5634_v18  ;;  %v6742_v61 = vld [vmem:[#allocation6_spill] sm:$0xff]  ;;  %v3415_v44 = vadd.f32 %v3414_v43, %v3359_v60 }
 0x2b0   :  { %v3031_v56 = vpop.f32.mrb[207].mxu1 }
 0x2b1   :  { %6739 = vst [vmem:[#allocation4_spill] sm:$0xff] %v5643_v32  ;;  %v5647_v49 = vadd.f32 %v3029_v28, %v2766_v10  ;;  %v3360_v23 = vmul.f32 %v5643_v32, %v5643_v32  ;;  %v6744_v10 = vld [vmem:[#allocation7_spill] sm:$0xff]  ;;  %v3297_v9 = vadd.f32 %v3296_v37, %v5643_v32 }
 0x2b3   :  { %6741 = vst [vmem:[#allocation5_spill] sm:$0xff] %v5647_v49  ;;  %v3361_v34 = vmul.f32 %v5647_v49, %v5647_v49 }
 0x2b4   :  { %v2770_v53 = vpop.f32.mrb[208].mxu0 }
 0x2b5   :  { %v2771_v26 = vadd.f32 %v2770_v53, %v6742_v61  ;;  %v3034_v3 = vpop.f32.mrb[208].mxu1  ;;  %v2772_v50 = vpop.f32.mrb[209].mxu0  ;;  %v3416_v53 = vadd.f32 %v3415_v44, %v3360_v23  ;;  %v3298_v61 = vadd.f32 %v3297_v9, %v5647_v49 }
 0x2b6   :  { %v3036_v56 = vpop.f32.mrb[209].mxu1  ;;  %v2773_v41 = vpop.f32.mrb[210].mxu0 }
 0x2b7   :  { %v5655_v6 = vadd.f32 %v3034_v3, %v2771_v26  ;;  %v2774_v15 = vadd.f32 %v2773_v41, %v6744_v10  ;;  %v3037_v28 = vpop.f32.mrb[210].mxu1  ;;  %v2775_v39 = vpop.f32.mrb[211].mxu0  ;;  %v6746_v26 = vld [vmem:[#allocation8_spill] sm:$0xff]  ;;  %v3417_v37 = vadd.f32 %v3416_v53, %v3361_v34 }
 0x2b8   :  { %v3039_v16 = vpop.f32.mrb[211].mxu1 }
 0x2b9   :  { %6743 = vst [vmem:[#allocation6_spill] sm:$0xff] %v5655_v6  ;;  %v5661_v18 = vadd.f32 %v3037_v28, %v2774_v15  ;;  %v3362_v43 = vmul.f32 %v5655_v6, %v5655_v6  ;;  %v3299_v41 = vadd.f32 %v3298_v61, %v5655_v6  ;;  %v6748_v15 = vld [vmem:[#allocation9_spill] sm:$0xff] }
 0x2bb   :  { %6745 = vst [vmem:[#allocation7_spill] sm:$0xff] %v5661_v18  ;;  %v3363_v9 = vmul.f32 %v5661_v18, %v5661_v18  ;;  %v3418_v49 = vadd.f32 %v3417_v37, %v3362_v43 }
 0x2bc   :  { %v2778_v60 = vpop.f32.mrb[212].mxu0 }
 0x2bd   :  { %v2779_v3 = vadd.f32 %v2778_v60, %v6746_v26  ;;  %v3042_v50 = vpop.f32.mrb[212].mxu1  ;;  %v2780_v56 = vpop.f32.mrb[213].mxu0  ;;  %v3300_v60 = vadd.f32 %v3299_v41, %v5661_v18  ;;  %v3419_v53 = vadd.f32 %v3418_v49, %v3363_v9 }
 0x2be   :  { %v3044_v16 = vpop.f32.mrb[213].mxu1  ;;  %v2781_v10 = vpop.f32.mrb[214].mxu0 }
 0x2bf   :  { %v5668_v39 = vadd.f32 %v3042_v50, %v2779_v3  ;;  %v2782_v28 = vadd.f32 %v2781_v10, %v6748_v15  ;;  %v3045_v23 = vpop.f32.mrb[214].mxu1  ;;  %v2783_v44 = vpop.f32.mrb[215].mxu0  ;;  %v6750_v3 = vld [vmem:[#allocation10_spill] sm:$0xff] }
 0x2c0   :  { %v3047_v32 = vpop.f32.mrb[215].mxu1 }
 0x2c1   :  { %6747 = vst [vmem:[#allocation8_spill] sm:$0xff] %v5668_v39  ;;  %v5673_v30 = vadd.f32 %v3045_v23, %v2782_v28  ;;  %v3301_v61 = vadd.f32 %v3300_v60, %v5668_v39  ;;  %v3364_v34 = vmul.f32 %v5668_v39, %v5668_v39  ;;  %v6752_v28 = vld [vmem:[#allocation11_spill] sm:$0xff] }
 0x2c3   :  { %6749 = vst [vmem:[#allocation9_spill] sm:$0xff] %v5673_v30  ;;  %v3302_v10 = vadd.f32 %v3301_v61, %v5673_v30  ;;  %v3365_v32 = vmul.f32 %v5673_v30, %v5673_v30  ;;  %v3420_v43 = vadd.f32 %v3419_v53, %v3364_v34 }
 0x2c4   :  { %v2786_v26 = vpop.f32.mrb[216].mxu0 }
 0x2c5   :  { %v2787_v50 = vadd.f32 %v2786_v26, %v6750_v3  ;;  %v3050_v56 = vpop.f32.mrb[216].mxu1  ;;  %v2788_v16 = vpop.f32.mrb[217].mxu0  ;;  %v3421_v49 = vadd.f32 %v3420_v43, %v3365_v32 }
 0x2c6   :  { %v3052_v37 = vpop.f32.mrb[217].mxu1  ;;  %v2789_v15 = vpop.f32.mrb[218].mxu0  ;;  %v6754_v16 = vld [vmem:[#allocation12_spill] sm:$0xff] }
 0x2c7   :  { %v5683_v41 = vadd.f32 %v3050_v56, %v2787_v50  ;;  %v2790_v23 = vadd.f32 %v2789_v15, %v6752_v28  ;;  %v3053_v44 = vpop.f32.mrb[218].mxu1  ;;  %v2791_v60 = vpop.f32.mrb[219].mxu0 }
 0x2c8   :  { %v3055_v9 = vpop.f32.mrb[219].mxu1 }
 0x2c9   :  { %6751 = vst [vmem:[#allocation10_spill] sm:$0xff] %v5683_v41  ;;  %v5686_v18 = vadd.f32 %v3053_v44, %v2790_v23  ;;  %v3303_v26 = vadd.f32 %v3302_v10, %v5683_v41  ;;  %v3366_v61 = vmul.f32 %v5683_v41, %v5683_v41  ;;  %v6756_v23 = vld [vmem:[#allocation13_spill] sm:$0xff] }
 0x2cb   :  { %6753 = vst [vmem:[#allocation11_spill] sm:$0xff] %v5686_v18  ;;  %v3304_v50 = vadd.f32 %v3303_v26, %v5686_v18  ;;  %v3367_v56 = vmul.f32 %v5686_v18, %v5686_v18  ;;  %v3422_v15 = vadd.f32 %v3421_v49, %v3366_v61 }
 0x2cc   :  { %v2794_v3 = vpop.f32.mrb[220].mxu0 }
 0x2cd   :  { %v2795_v34 = vadd.f32 %v2794_v3, %v6754_v16  ;;  %v3058_v53 = vpop.f32.mrb[220].mxu1  ;;  %v2796_v37 = vpop.f32.mrb[221].mxu0  ;;  %v3423_v9 = vadd.f32 %v3422_v15, %v3367_v56 }
 0x2ce   :  { %v3060_v32 = vpop.f32.mrb[221].mxu1  ;;  %v2797_v43 = vpop.f32.mrb[222].mxu0  ;;  %v6758_v37 = vld [vmem:[#allocation14_spill] sm:$0xff] }
 0x2cf   :  { %v5695_v28 = vadd.f32 %v3058_v53, %v2795_v34  ;;  %v2798_v10 = vadd.f32 %v2797_v43, %v6756_v23  ;;  %v3061_v44 = vpop.f32.mrb[222].mxu1  ;;  %v2799_v60 = vpop.f32.mrb[223].mxu0  ;;  %v6760_v23 = vld [vmem:[#allocation15_spill] sm:$0xff] }
 0x2d0   :  { %v3063_v6 = vpop.f32.mrb[223].mxu1 }
 0x2d1   :  { %6755 = vst [vmem:[#allocation12_spill] sm:$0xff] %v5695_v28  ;;  %v5698_v31 = vadd.f32 %v3061_v44, %v2798_v10  ;;  %v3305_v3 = vadd.f32 %v3304_v50, %v5695_v28  ;;  %v3368_v26 = vmul.f32 %v5695_v28, %v5695_v28 }
 0x2d3   :  { %6757 = vst [vmem:[#allocation13_spill] sm:$0xff] %v5698_v31  ;;  %v3306_v34 = vadd.f32 %v3305_v3, %v5698_v31  ;;  %v3369_v53 = vmul.f32 %v5698_v31, %v5698_v31  ;;  %v3424_v43 = vadd.f32 %v3423_v9, %v3368_v26 }
 0x2d4   :  { %v2802_v16 = vpop.f32.mrb[224].mxu0 }
 0x2d5   :  { %v2803_v49 = vadd.f32 %v2802_v16, %v6758_v37  ;;  %v3066_v61 = vpop.f32.mrb[224].mxu1  ;;  %v2804_v32 = vpop.f32.mrb[225].mxu0  ;;  %v3425_v60 = vadd.f32 %v3424_v43, %v3369_v53 }
 0x2d6   :  { %v3068_v56 = vpop.f32.mrb[225].mxu1  ;;  %v2805_v6 = vpop.f32.mrb[226].mxu0  ;;  %v6762_v32 = vld [vmem:[#allocation16_spill] sm:$0xff] }
 0x2d7   :  { %v5707_v15 = vadd.f32 %v3066_v61, %v2803_v49  ;;  %v2806_v50 = vadd.f32 %v2805_v6, %v6760_v23  ;;  %v3069_v10 = vpop.f32.mrb[226].mxu1  ;;  %v2807_v44 = vpop.f32.mrb[227].mxu0 }
 0x2d8   :  { %v3071_v58 = vpop.f32.mrb[227].mxu1 }
 0x2d9   :  { %6759 = vst [vmem:[#allocation14_spill] sm:$0xff] %v5707_v15  ;;  %v5710_v38 = vadd.f32 %v3069_v10, %v2806_v50  ;;  %v3307_v16 = vadd.f32 %v3306_v34, %v5707_v15  ;;  %v3370_v3 = vmul.f32 %v5707_v15, %v5707_v15 }
 0x2db   :  { %6761 = vst [vmem:[#allocation15_spill] sm:$0xff] %v5710_v38  ;;  %v3308_v49 = vadd.f32 %v3307_v16, %v5710_v38  ;;  %v3371_v61 = vmul.f32 %v5710_v38, %v5710_v38  ;;  %v3426_v56 = vadd.f32 %v3425_v60, %v3370_v3 }
 0x2dc   :  { %v2810_v37 = vpop.f32.mrb[228].mxu0 }
 0x2dd   :  { %v2811_v9 = vadd.f32 %v2810_v37, %v6762_v32  ;;  %v3074_v26 = vpop.f32.mrb[228].mxu1  ;;  %v2812_v6 = vpop.f32.mrb[229].mxu0  ;;  %v3427_v23 = vadd.f32 %v3426_v56, %v3371_v61 }
 0x2de   :  { %v3076_v53 = vpop.f32.mrb[229].mxu1  ;;  %v2813_v58 = vpop.f32.mrb[230].mxu0 }
 0x2df   :  { %v5719_v43 = vadd.f32 %v3074_v26, %v2811_v9  ;;  %v3077_v34 = vpop.f32.mrb[230].mxu1  ;;  %v2814_v50 = vpop.f32.mrb[231].mxu0 }
 0x2e0   :  { %v3078_v10 = vpop.f32.mrb[231].mxu1 }
 0x2e1   :  { %6763 = vst [vmem:[#allocation16_spill] sm:$0xff] %v5719_v43  ;;  %v3309_v44 = vadd.f32 %v3308_v49, %v5719_v43  ;;  %v3372_v37 = vmul.f32 %v5719_v43, %v5719_v43 }
 0x2e3   :  { %v3310_v32 = vrot.slane %v3309_v44, 4  ;;  %v3428_v16 = vadd.f32 %v3427_v23, %v3372_v37 }
 0x2e5   :  { %v3311_v47 = vadd.f32 %v3310_v32, %v3309_v44  ;;  %v3429_v0 = vrot.slane %v3428_v16, 4 }
 0x2e7   :  { %v3312_v17 = vrot.slane %v3311_v47, 2  ;;  %v3430_v60 = vadd.f32 %v3429_v0, %v3428_v16 }
 0x2e9   :  { %v3313_v3 = vadd.f32 %v3312_v17, %v3311_v47  ;;  %v3431_v6 = vrot.slane %v3430_v60, 2 }
 0x2eb   :  { %v3314_v53 = vrot.slane %v3313_v3, 1  ;;  %v3432_v9 = vadd.f32 %v3431_v6, %v3430_v60 }
 0x2ed   :  { %v3315_v26 = vadd.f32 %v3314_v53, %v3313_v3  ;;  %v3433_v61 = vrot.slane %v3432_v9, 1 }
 0x2ef   :  { %v3434_v56 = vadd.f32 %v3433_v61, %v3432_v9  ;;  %v5724_v58 = vmul.f32 0.0022222223, %v3315_v26 }
 0x2f1   :  { %6764 = vst [vmem:[#allocation25_spill] sm:$0xff] %v5724_v58  ;;  %v3436_v34 = vmul.f32 0.0022222223, %v3434_v56  ;;  %v3437_v49 = vmul.f32 %v5724_v58, %v5724_v58  ;;  %v3440_v60 = vsub.f32 %v5383_v21, %v5724_v58  ;;  %v3441_v53 = vsub.f32 %v5386_v2, %v5724_v58 }
 0x2f2   :  { %v3442_v9 = vsub.f32 %v5389_v46, %v5724_v58  ;;  %v3443_v26 = vsub.f32 %v5392_v12, %v5724_v58  ;;  %v3444_v61 = vsub.f32 %v5395_v40, %v5724_v58  ;;  %v3445_v56 = vsub.f32 %v5398_v22, %v5724_v58 }
 0x2f3   :  { %v3438_v50 = vsub.f32 %v3436_v34, %v3437_v49  ;;  %v3446_v21 = vsub.f32 %v5401_v4, %v5724_v58  ;;  %v3447_v34 = vsub.f32 %v5404_v19, %v5724_v58  ;;  %v3448_v2 = vsub.f32 %v5407_v27, %v5724_v58 }
 0x2f4   :  { %v3449_v46 = vsub.f32 %v5410_v36, %v5724_v58  ;;  %v3450_v12 = vsub.f32 %v5413_v11, %v5724_v58  ;;  %v3451_v40 = vsub.f32 %v5416_v57, %v5724_v58  ;;  %v3452_v22 = vsub.f32 %v5419_v29, %v5724_v58 }
 0x2f5   :  { %v3439_v10 = vmax.f32 %v3438_v50, 0.0  ;;  %v3453_v4 = vsub.f32 %v5422_v14, %v5724_v58  ;;  %v3454_v19 = vsub.f32 %v5433_v42, %v5724_v58  ;;  %v3455_v27 = vsub.f32 %v5437_v13, %v5724_v58 }
 0x2f6   :  { %v3456_v36 = vsub.f32 %v5446_v48, %v5724_v58  ;;  %v3457_v11 = vsub.f32 %v5451_v45, %v5724_v58  ;;  %v3458_v57 = vsub.f32 %v5460_v62, %v5724_v58  ;;  %v3459_v29 = vsub.f32 %v5466_v8, %v5724_v58 }
 0x2f7   :  { %v3497_v6 = vadd.f32 1e-05, %v3439_v10  ;;  %v3460_v14 = vsub.f32 %v5475_v55, %v5724_v58  ;;  %v3461_v42 = vsub.f32 %v5479_v52, %v5724_v58  ;;  %v3462_v13 = vsub.f32 %v5488_v33, %v5724_v58 }
 0x2f8   :  { %v3463_v48 = vsub.f32 %v5493_v25, %v5724_v58  ;;  %v3464_v45 = vsub.f32 %v5502_v51, %v5724_v58  ;;  %v3465_v62 = vsub.f32 %v5508_v1, %v5724_v58  ;;  %v3466_v8 = vsub.f32 %v5517_v63, %v5724_v58 }
 0x2f9   :  { %4288 = vrsqrt.f32 %v3497_v6  ;;  %v3467_v55 = vsub.f32 %v5521_v7, %v5724_v58  ;;  %v3468_v52 = vsub.f32 %v5530_v54, %v5724_v58  ;;  %v3469_v33 = vsub.f32 %v5535_v5, %v5724_v58  ;;  %v6765_v7 = vld [vmem:[#allocation17_spill] sm:$0xff]  ;;  %v6766_v54 = vld [vmem:[#allocation18_spill] sm:$0xff]  ;;  %v6767_v5 = vld [vmem:[#allocation19_spill] sm:$0xff] }
 0x2fa   :  { %v3470_v25 = vsub.f32 %v5544_v59, %v5724_v58  ;;  %v3471_v51 = vsub.f32 %v5550_v24, %v5724_v58  ;;  %v3472_v1 = vsub.f32 %v5559_v20, %v5724_v58  ;;  %v3473_v63 = vsub.f32 %v5563_v35, %v5724_v58  ;;  %v6768_v59 = vld [vmem:[#allocation20_spill] sm:$0xff]  ;;  %v6769_v24 = vld [vmem:[#allocation21_spill] sm:$0xff]  ;;  %v6770_v20 = vld [vmem:[#allocation22_spill] sm:$0xff] }
 0x2fb   :  { %v3474_v49 = vsub.f32 %v6765_v7, %v5724_v58  ;;  %v3475_v50 = vsub.f32 %v6766_v54, %v5724_v58  ;;  %v3476_v10 = vsub.f32 %v6767_v5, %v5724_v58  ;;  %v3477_v6 = vsub.f32 %v6768_v59, %v5724_v58  ;;  %v6771_v35 = vld [vmem:[#allocation23_spill] sm:$0xff]  ;;  %v6772_v7 = vld [vmem:[#allocation24_spill] sm:$0xff]  ;;  %v6773_v54 = vld [vmem:[#allocation2_spill] sm:$0xff] }
 0x2fc   :  { %v3478_v3 = vsub.f32 %v6769_v24, %v5724_v58  ;;  %v3479_v16 = vsub.f32 %v6770_v20, %v5724_v58  ;;  %v3480_v32 = vsub.f32 %v6771_v35, %v5724_v58  ;;  %v3481_v37 = vsub.f32 %v6772_v7, %v5724_v58  ;;  %v6774_v5 = vld [vmem:[#allocation3_spill] sm:$0xff]  ;;  %v6775_v59 = vld [vmem:[#allocation4_spill] sm:$0xff]  ;;  %v6776_v24 = vld [vmem:[#allocation5_spill] sm:$0xff] }
 0x2fd   :  { %v3482_v44 = vsub.f32 %v6773_v54, %v5724_v58  ;;  %v3483_v47 = vsub.f32 %v6774_v5, %v5724_v58  ;;  %v3484_v17 = vsub.f32 %v6775_v59, %v5724_v58  ;;  %v3485_v23 = vsub.f32 %v6776_v24, %v5724_v58  ;;  %v6777_v20 = vld [vmem:[#allocation6_spill] sm:$0xff]  ;;  %v6778_v35 = vld [vmem:[#allocation7_spill] sm:$0xff] }
 0x2fe   :  { %v3486_v43 = vsub.f32 %v6777_v20, %v5724_v58  ;;  %v3487_v38 = vsub.f32 %v6778_v35, %v5724_v58 }
 0x303   :  { %v4289_v0 = vpop.eup %4288 }
 0x304   :  { %v3499_v7 = vmul.f32 %v4289_v0, %v3440_v60  ;;  %v3500_v15 = vmul.f32 %v4289_v0, %v3441_v53  ;;  %v3501_v31 = vmul.f32 %v4289_v0, %v3442_v9  ;;  %v3502_v54 = vmul.f32 %v4289_v0, %v3443_v26 }
 0x305   :  { %v3503_v28 = vmul.f32 %v4289_v0, %v3444_v61  ;;  %v3504_v18 = vmul.f32 %v4289_v0, %v3445_v56  ;;  %v3505_v5 = vmul.f32 %v4289_v0, %v3446_v21  ;;  %v3506_v41 = vmul.f32 %v4289_v0, %v3447_v34 }
 0x306   :  { %v3507_v30 = vmul.f32 %v4289_v0, %v3448_v2  ;;  %v3508_v39 = vmul.f32 %v4289_v0, %v3449_v46  ;;  %v3509_v59 = vmul.f32 %v4289_v0, %v3450_v12  ;;  %v3510_v24 = vmul.f32 %v4289_v0, %v3451_v40 }
 0x307   :  { %v3511_v20 = vmul.f32 %v4289_v0, %v3452_v22  ;;  %v3512_v35 = vmul.f32 %v4289_v0, %v3453_v4  ;;  %v3513_v58 = vmul.f32 %v4289_v0, %v3454_v19  ;;  %v3514_v60 = vmul.f32 %v4289_v0, %v3455_v27 }
 0x308   :  { %v3515_v53 = vmul.f32 %v4289_v0, %v3456_v36  ;;  %v3516_v9 = vmul.f32 %v4289_v0, %v3457_v11  ;;  %v3517_v26 = vmul.f32 %v4289_v0, %v3458_v57  ;;  %v3518_v61 = vmul.f32 %v4289_v0, %v3459_v29 }
 0x309   :  { %v3519_v56 = vmul.f32 %v4289_v0, %v3460_v14  ;;  %v3520_v21 = vmul.f32 %v4289_v0, %v3461_v42  ;;  %v3521_v34 = vmul.f32 %v4289_v0, %v3462_v13  ;;  %v3522_v2 = vmul.f32 %v4289_v0, %v3463_v48 }
 0x30a   :  { %v3523_v46 = vmul.f32 %v4289_v0, %v3464_v45  ;;  %v3524_v12 = vmul.f32 %v4289_v0, %v3465_v62  ;;  %v3525_v40 = vmul.f32 %v4289_v0, %v3466_v8  ;;  %v3526_v22 = vmul.f32 %v4289_v0, %v3467_v55 }
 0x30b   :  { %v3527_v4 = vmul.f32 %v4289_v0, %v3468_v52  ;;  %v3528_v19 = vmul.f32 %v4289_v0, %v3469_v33  ;;  %v3529_v27 = vmul.f32 %v4289_v0, %v3470_v25  ;;  %v3530_v36 = vmul.f32 %v4289_v0, %v3471_v51 }
 0x30c   :  { %v3531_v11 = vmul.f32 %v4289_v0, %v3472_v1  ;;  %v3532_v57 = vmul.f32 %v4289_v0, %v3473_v63  ;;  %v3533_v29 = vmul.f32 %v4289_v0, %v3474_v49  ;;  %v3534_v14 = vmul.f32 %v4289_v0, %v3475_v50  ;;  %v6779_v63 = vld [vmem:[#allocation8_spill] sm:$0xff]  ;;  %v6780_v49 = vld [vmem:[#allocation25_spill] sm:$0xff] }
 0x30d   :  { %v3535_v42 = vmul.f32 %v4289_v0, %v3476_v10  ;;  %v3536_v13 = vmul.f32 %v4289_v0, %v3477_v6  ;;  %v3537_v48 = vmul.f32 %v4289_v0, %v3478_v3  ;;  %v3538_v45 = vmul.f32 %v4289_v0, %v3479_v16  ;;  %v6782_v6 = vld [vmem:[#allocation9_spill] sm:$0xff] }
 0x30e   :  { %v3539_v62 = vmul.f32 %v4289_v0, %v3480_v32  ;;  %v3540_v8 = vmul.f32 %v4289_v0, %v3481_v37  ;;  %v3541_v55 = vmul.f32 %v4289_v0, %v3482_v44  ;;  %v3542_v52 = vmul.f32 %v4289_v0, %v3483_v47  ;;  %v6784_v32 = vld [vmem:[#allocation10_spill] sm:$0xff]  ;;  %v6786_v47 = vld [vmem:[#allocation11_spill] sm:$0xff] }
 0x30f   :  { %v3543_v33 = vmul.f32 %v4289_v0, %v3484_v17  ;;  %v3544_v25 = vmul.f32 %v4289_v0, %v3485_v23  ;;  %v3545_v51 = vmul.f32 %v4289_v0, %v3486_v43  ;;  %v3546_v1 = vmul.f32 %v4289_v0, %v3487_v38  ;;  %v6788_v43 = vld [vmem:[#allocation12_spill] sm:$0xff] }
 0x310   :  { %v6781_v50 = vsub.f32 %v6779_v63, %v6780_v49  ;;  %v6783_v3 = vsub.f32 %v6782_v6, %v6780_v49  ;;  %v6785_v37 = vsub.f32 %v6784_v32, %v6780_v49  ;;  %v6787_v17 = vsub.f32 %v6786_v47, %v6780_v49  ;;  %v6792_v32 = vld [vmem:[#allocation14_spill] sm:$0xff] }
 0x311   :  { %v6789_v38 = vsub.f32 %v6788_v43, %v6780_v49 }
 0x312   :  { %v3547_v10 = vmul.f32 %v4289_v0, %v6781_v50  ;;  %v3548_v16 = vmul.f32 %v4289_v0, %v6783_v3  ;;  %v3549_v44 = vmul.f32 %v4289_v0, %v6785_v37  ;;  %v3550_v23 = vmul.f32 %v4289_v0, %v6787_v17  ;;  %v6790_v50 = vld [vmem:[#allocation13_spill] sm:$0xff]  ;;  %v6794_v17 = vld [vmem:[#allocation15_spill] sm:$0xff] }
 0x313   :  { %v3551_v63 = vmul.f32 %v4289_v0, %v6789_v38  ;;  %v6791_v6 = vsub.f32 %v6790_v50, %v6780_v49  ;;  %v6793_v37 = vsub.f32 %v6792_v32, %v6780_v49  ;;  %v6795_v43 = vsub.f32 %v6794_v17, %v6780_v49  ;;  %v6796_v50 = vld [vmem:[#allocation16_spill] sm:$0xff] }
 0x315   :  { %v3552_v3 = vmul.f32 %v4289_v0, %v6791_v6  ;;  %v3553_v47 = vmul.f32 %v4289_v0, %v6793_v37  ;;  %v3554_v38 = vmul.f32 %v4289_v0, %v6795_v43  ;;  %v6797_v6 = vsub.f32 %v6796_v50, %v6780_v49  ;;  %v4212_v37 = vld [vmem:[%s6656_s2] ss:$0 sm:$0xff] }
 0x316   :  { %v3563_v17 = vmul.f32 %v4212_v37, %v3499_v7  ;;  %v3564_v43 = vmul.f32 %v4212_v37, %v3500_v15  ;;  %v3565_v49 = vmul.f32 %v4212_v37, %v3501_v31  ;;  %v3566_v50 = vmul.f32 %v4212_v37, %v3502_v54 }
 0x317   :  { %v3555_v32 = vmul.f32 %v4289_v0, %v6797_v6  ;;  %v3567_v0 = vmul.f32 %v4212_v37, %v3503_v28  ;;  %v3568_v6 = vmul.f32 %v4212_v37, %v3504_v18  ;;  %v3569_v7 = vmul.f32 %v4212_v37, %v3505_v5 }
 0x318   :  { %v3570_v15 = vmul.f32 %v4212_v37, %v3506_v41  ;;  %v3571_v31 = vmul.f32 %v4212_v37, %v3507_v30  ;;  %v3572_v54 = vmul.f32 %v4212_v37, %v3508_v39  ;;  %v3573_v28 = vmul.f32 %v4212_v37, %v3509_v59 }
 0x319   :  { %v3574_v18 = vmul.f32 %v4212_v37, %v3510_v24  ;;  %v3575_v5 = vmul.f32 %v4212_v37, %v3511_v20  ;;  %v3576_v41 = vmul.f32 %v4212_v37, %v3512_v35  ;;  %v3577_v30 = vmul.f32 %v4212_v37, %v3513_v58 }
 0x31a   :  { %v3578_v39 = vmul.f32 %v4212_v37, %v3514_v60  ;;  %v3579_v59 = vmul.f32 %v4212_v37, %v3515_v53  ;;  %v3580_v24 = vmul.f32 %v4212_v37, %v3516_v9  ;;  %v3581_v20 = vmul.f32 %v4212_v37, %v3517_v26 }
 0x31b   :  { %v3582_v35 = vmul.f32 %v4212_v37, %v3518_v61  ;;  %v3583_v58 = vmul.f32 %v4212_v37, %v3519_v56  ;;  %v3584_v60 = vmul.f32 %v4212_v37, %v3520_v21  ;;  %v3585_v53 = vmul.f32 %v4212_v37, %v3521_v34 }
 0x31c   :  { %v3586_v9 = vmul.f32 %v4212_v37, %v3522_v2  ;;  %v3587_v26 = vmul.f32 %v4212_v37, %v3523_v46  ;;  %v3588_v61 = vmul.f32 %v4212_v37, %v3524_v12  ;;  %v3589_v56 = vmul.f32 %v4212_v37, %v3525_v40 }
 0x31d   :  { %v3590_v21 = vmul.f32 %v4212_v37, %v3526_v22  ;;  %v3591_v34 = vmul.f32 %v4212_v37, %v3527_v4  ;;  %v3592_v2 = vmul.f32 %v4212_v37, %v3528_v19  ;;  %v3593_v46 = vmul.f32 %v4212_v37, %v3529_v27 }
 0x31e   :  { %v3594_v12 = vmul.f32 %v4212_v37, %v3530_v36  ;;  %v3595_v40 = vmul.f32 %v4212_v37, %v3531_v11  ;;  %v3596_v22 = vmul.f32 %v4212_v37, %v3532_v57  ;;  %v3597_v4 = vmul.f32 %v4212_v37, %v3533_v29 }
 0x31f   :  { %v3598_v19 = vmul.f32 %v4212_v37, %v3534_v14  ;;  %v3599_v27 = vmul.f32 %v4212_v37, %v3535_v42  ;;  %v3600_v36 = vmul.f32 %v4212_v37, %v3536_v13  ;;  %v3601_v11 = vmul.f32 %v4212_v37, %v3537_v48 }
 0x320   :  { %v3602_v57 = vmul.f32 %v4212_v37, %v3538_v45  ;;  %v3603_v29 = vmul.f32 %v4212_v37, %v3539_v62  ;;  %v3604_v14 = vmul.f32 %v4212_v37, %v3540_v8  ;;  %v3605_v42 = vmul.f32 %v4212_v37, %v3541_v55 }
 0x321   :  { %v3606_v13 = vmul.f32 %v4212_v37, %v3542_v52  ;;  %v3607_v48 = vmul.f32 %v4212_v37, %v3543_v33  ;;  %v3608_v45 = vmul.f32 %v4212_v37, %v3544_v25  ;;  %v3609_v62 = vmul.f32 %v4212_v37, %v3545_v51  ;;  %v5875_v52 = vld [vmem:[%s6657_s3] ss:$0 sm:$0xff] }
 0x322   :  { %v3610_v8 = vmul.f32 %v4212_v37, %v3546_v1  ;;  %v3611_v55 = vmul.f32 %v4212_v37, %v3547_v10  ;;  %6798 = vst [vmem:[#allocation17_spill] sm:$0xff] %v5875_v52  ;;  %v3612_v33 = vmul.f32 %v4212_v37, %v3548_v16  ;;  %v3613_v25 = vmul.f32 %v4212_v37, %v3549_v44 }
 0x323   :  { %v3614_v51 = vmul.f32 %v4212_v37, %v3550_v23  ;;  %v3615_v1 = vmul.f32 %v4212_v37, %v3551_v63  ;;  %v3616_v10 = vmul.f32 %v4212_v37, %v3552_v3  ;;  %v3617_v52 = vmul.f32 %v4212_v37, %v3553_v47 }
 0x324   :  { %v5877_v16 = vmul.f32 %v4212_v37, %v3554_v38  ;;  %v5879_v44 = vmul.f32 %v4212_v37, %v3555_v32 }
 0x326   :  { %6799 = vst [vmem:[#allocation18_spill] sm:$0xff] %v5877_v16 }
 0x329   :  { %v6800_v23 = vld [vmem:[#allocation17_spill] sm:$0xff] }
 0x32a   :  { %v5882_v63 = vadd.f32 %v6800_v23, %v3563_v17  ;;  %v5885_v3 = vadd.f32 %v6800_v23, %v3564_v43  ;;  %v5888_v47 = vadd.f32 %v6800_v23, %v3565_v49  ;;  %v5891_v38 = vadd.f32 %v6800_v23, %v3566_v50 }
 0x32b   :  { %v5894_v16 = vadd.f32 %v6800_v23, %v3567_v0  ;;  %v5897_v32 = vadd.f32 %v6800_v23, %v3568_v6  ;;  %v5900_v37 = vadd.f32 %v6800_v23, %v3569_v7  ;;  %v5903_v17 = vadd.f32 %v6800_v23, %v3570_v15 }
 0x32c   :  { %v5906_v43 = vadd.f32 %v6800_v23, %v3571_v31  ;;  %v5909_v49 = vadd.f32 %v6800_v23, %v3572_v54  ;;  %v5912_v50 = vadd.f32 %v6800_v23, %v3573_v28  ;;  %v5915_v0 = vadd.f32 %v6800_v23, %v3574_v18 }
 0x32d   :  { %v5918_v6 = vadd.f32 %v6800_v23, %v3575_v5  ;;  %v5921_v7 = vadd.f32 %v6800_v23, %v3576_v41  ;;  %v5924_v15 = vadd.f32 %v6800_v23, %v3577_v30  ;;  %v5927_v31 = vadd.f32 %v6800_v23, %v3578_v39 }
 0x32e   :  { %v5930_v54 = vadd.f32 %v6800_v23, %v3579_v59  ;;  %v5933_v28 = vadd.f32 %v6800_v23, %v3580_v24  ;;  %v5936_v18 = vadd.f32 %v6800_v23, %v3581_v20  ;;  %v5939_v5 = vadd.f32 %v6800_v23, %v3582_v35 }
 0x32f   :  { %v5942_v41 = vadd.f32 %v6800_v23, %v3583_v58  ;;  %v5945_v30 = vadd.f32 %v6800_v23, %v3584_v60  ;;  %v5948_v39 = vadd.f32 %v6800_v23, %v3585_v53  ;;  %v5951_v59 = vadd.f32 %v6800_v23, %v3586_v9 }
 0x330   :  { %v5954_v24 = vadd.f32 %v6800_v23, %v3587_v26  ;;  %v5957_v20 = vadd.f32 %v6800_v23, %v3588_v61  ;;  %v5960_v35 = vadd.f32 %v6800_v23, %v3589_v56  ;;  %v5963_v58 = vadd.f32 %v6800_v23, %v3590_v21 }
 0x331   :  { %v5966_v60 = vadd.f32 %v6800_v23, %v3591_v34  ;;  %v5969_v53 = vadd.f32 %v6800_v23, %v3592_v2  ;;  %v5972_v9 = vadd.f32 %v6800_v23, %v3593_v46  ;;  %v5975_v26 = vadd.f32 %v6800_v23, %v3594_v12 }
 0x332   :  { %v5978_v61 = vadd.f32 %v6800_v23, %v3595_v40  ;;  %v5981_v56 = vadd.f32 %v6800_v23, %v3596_v22  ;;  %v5984_v21 = vadd.f32 %v6800_v23, %v3597_v4  ;;  %v5987_v34 = vadd.f32 %v6800_v23, %v3598_v19 }
 0x333   :  { %v5990_v2 = vadd.f32 %v6800_v23, %v3599_v27  ;;  %v5993_v46 = vadd.f32 %v6800_v23, %v3600_v36  ;;  %v5996_v12 = vadd.f32 %v6800_v23, %v3601_v11  ;;  %v5999_v40 = vadd.f32 %v6800_v23, %v3602_v57 }
 0x334   :  { %v6002_v22 = vadd.f32 %v6800_v23, %v3603_v29  ;;  %v6005_v4 = vadd.f32 %v6800_v23, %v3604_v14  ;;  %v6008_v19 = vadd.f32 %v6800_v23, %v3605_v42  ;;  %v6011_v27 = vadd.f32 %v6800_v23, %v3606_v13 }
 0x335   :  { %v6014_v36 = vadd.f32 %v6800_v23, %v3607_v48  ;;  %v6017_v11 = vadd.f32 %v6800_v23, %v3608_v45  ;;  %v6020_v57 = vadd.f32 %v6800_v23, %v3609_v62  ;;  %v6023_v29 = vadd.f32 %v6800_v23, %v3610_v8 }
 0x336   :  { %6801 = vst [vmem:[#allocation19_spill] sm:$0xff] %v6011_v27  ;;  %v6026_v14 = vadd.f32 %v6800_v23, %v3611_v55  ;;  %v6029_v42 = vadd.f32 %v6800_v23, %v3612_v33  ;;  %v6032_v13 = vadd.f32 %v6800_v23, %v3613_v25  ;;  %v6035_v48 = vadd.f32 %v6800_v23, %v3614_v51  ;;  %v6813_v55 = vld [vmem:[#allocation18_spill] sm:$0xff] }
 0x337   :  { %6802 = vst [vmem:[#allocation20_spill] sm:$0xff] %v6014_v36  ;;  %6803 = vst [vmem:[#allocation21_spill] sm:$0xff] %v6017_v11  ;;  %v6038_v45 = vadd.f32 %v6800_v23, %v3615_v1  ;;  %v6041_v62 = vadd.f32 %v6800_v23, %v3616_v10  ;;  %v6044_v8 = vadd.f32 %v6800_v23, %v3617_v52  ;;  %vm3684_vm0 = vcmp.ge.f32.partialorder %v5882_v63, 0.0 }
 0x338   :  { %6804 = vst [vmem:[#allocation22_spill] sm:$0xff] %v6020_v57  ;;  %6805 = vst [vmem:[#allocation23_spill] sm:$0xff] %v6023_v29  ;;  %vm3685_vm1 = vcmp.ge.f32.partialorder %v5885_v3, 0.0  ;;  %vm3686_vm2 = vcmp.ge.f32.partialorder %v5888_v47, 0.0  ;;  %vm3687_vm3 = vcmp.ge.f32.partialorder %v5891_v38, 0.0  ;;  %vm3688_vm4 = vcmp.ge.f32.partialorder %v5894_v16, 0.0 }
 0x339   :  { %6806 = vst [vmem:[#allocation24_spill] sm:$0xff] %v6026_v14  ;;  %6807 = vst [vmem:[#allocation2_spill] sm:$0xff] %v6029_v42  ;;  %vm3689_vm5 = vcmp.ge.f32.partialorder %v5897_v32, 0.0  ;;  %vm3690_vm6 = vcmp.ge.f32.partialorder %v5900_v37, 0.0  ;;  %vm3691_vm7 = vcmp.ge.f32.partialorder %v5903_v17, 0.0  ;;  %vm3692_vm8 = vcmp.ge.f32.partialorder %v5906_v43, 0.0 }
 0x33a   :  { %6808 = vst [vmem:[#allocation3_spill] sm:$0xff] %v6032_v13  ;;  %6809 = vst [vmem:[#allocation4_spill] sm:$0xff] %v6035_v48  ;;  %v6057_v52 = vadd.f32 %v6800_v23, %v6813_v55  ;;  %vm3693_vm9 = vcmp.ge.f32.partialorder %v5909_v49, 0.0  ;;  %v3741_v33 = vmul.f32 0.2, %v5882_v63  ;;  %v6065_v1 = vadd.f32 %v6800_v23, %v5879_v44 }
 0x33b   :  { %6810 = vst [vmem:[#allocation5_spill] sm:$0xff] %v6038_v45  ;;  %6811 = vst [vmem:[#allocation6_spill] sm:$0xff] %v6041_v62  ;;  %v3742_v25 = vmul.f32 0.2, %v5885_v3  ;;  %v3743_v51 = vmul.f32 0.2, %v5888_v47 }
 0x33c   :  { %6812 = vst [vmem:[#allocation7_spill] sm:$0xff] %v6044_v8  ;;  %6814 = vst [vmem:[#allocation8_spill] sm:$0xff] %v6057_v52  ;;  %vm3694_vm10 = vcmp.ge.f32.partialorder %v5912_v50, 0.0  ;;  %v3744_v10 = vmul.f32 0.2, %v5891_v38  ;;  %vm3695_vm11 = vcmp.ge.f32.partialorder %v5915_v0, 0.0  ;;  %v3798_v44 = vsel %vm3684_vm0, %v5882_v63, %v3741_v33 }
 0x33d   :  { %6815 = vst [vmem:[#allocation25_spill] sm:$0xff] %v6065_v1  ;;  %v3745_v8 = vmul.f32 0.2, %v5894_v16  ;;  %v3746_v55 = vmul.f32 0.2, %v5897_v32  ;;  %vm3696_vm12 = vcmp.ge.f32.partialorder %v5918_v6, 0.0  ;;  %v3799_v13 = vsel %vm3685_vm1, %v5885_v3, %v3742_v25  ;;  %3855 = vst [vmem:[%s6658_s4] sm:$0xff] %v3798_v44 }
 0x33e   :  { %v3747_v52 = vmul.f32 0.2, %v5900_v37  ;;  %v3748_v62 = vmul.f32 0.2, %v5903_v17  ;;  %v3749_v45 = vmul.f32 0.2, %v5906_v43  ;;  %v3800_v14 = vsel %vm3686_vm2, %v5888_v47, %v3743_v51 }
 0x33f   :  { %v6080_v23 = vmul.f32 0.2, %v5909_v49  ;;  %v6083_v1 = vmul.f32 0.2, %v5912_v50  ;;  %v6086_v48 = vmul.f32 0.2, %v5915_v0 }
 0x340   :  { %vm3697_vm13 = vcmp.ge.f32.partialorder %v5921_v7, 0.0  ;;  %v6096_v63 = vmul.f32 0.2, %v5918_v6  ;;  %v6099_v33 = vmul.f32 0.2, %v5921_v7  ;;  %3856 = vst [vmem:[%s6658_s4 + $0x8] sm:$0xff] %v3799_v13 }
 0x341   :  { %v6102_v42 = vmul.f32 0.2, %v5924_v15  ;;  %vm3698_vm14 = vcmp.ge.f32.partialorder %v5924_v15, 0.0  ;;  %v6112_v3 = vmul.f32 0.2, %v5927_v31  ;;  %3857 = vst [vmem:[%s6658_s4 + $0x10] sm:$0xff] %v3800_v14 }
 0x342   :  { %v6115_v25 = vmul.f32 0.2, %v5930_v54  ;;  %v6118_v44 = vmul.f32 0.2, %v5933_v28  ;;  %vm3699_vm15 = vcmp.ge.f32.partialorder %v5927_v31, 0.0  ;;  %vm3700_vm0 = vcmp.ge.f32.partialorder %v5930_v54, 0.0 }
 0x343   :  { %6816 = vst [vmem:[#allocation9_spill] sm:$0xff] %v6102_v42  ;;  %v3801_v42 = vsel %vm3687_vm3, %v5891_v38, %v3744_v10  ;;  %v6128_v47 = vmul.f32 0.2, %v5936_v18  ;;  %v6131_v13 = vmul.f32 0.2, %v5939_v5  ;;  %vm3701_vm1 = vcmp.ge.f32.partialorder %v5933_v28, 0.0 }
 0x344   :  { %6817 = vst [vmem:[#allocation10_spill] sm:$0xff] %v6118_v44  ;;  %v6134_v51 = vmul.f32 0.2, %v5942_v41  ;;  %v3802_v44 = vsel %vm3688_vm4, %v5894_v16, %v3745_v8  ;;  %3858 = vst [vmem:[%s6658_s4 + $0x18] sm:$0xff] %v3801_v42  ;;  %v6144_v38 = vmul.f32 0.2, %v5945_v30  ;;  %v3804_v8 = vsel %vm3690_vm6, %v5900_v37, %v3747_v52 }
 0x345   :  { %v6147_v14 = vmul.f32 0.2, %v5948_v39  ;;  %v6150_v10 = vmul.f32 0.2, %v5951_v59  ;;  %3859 = vst [vmem:[%s6658_s4 + $0x20] sm:$0xff] %v3802_v44  ;;  %v3805_v52 = vsel %vm3691_vm7, %v5903_v17, %v3748_v62  ;;  %3861 = vst [vmem:[%s6658_s4 + $0x30] sm:$0xff] %v3804_v8  ;;  %v3806_v62 = vsel %vm3692_vm8, %v5906_v43, %v3749_v45 }
 0x346   :  { %6818 = vst [vmem:[#allocation11_spill] sm:$0xff] %v6134_v51  ;;  %v3803_v51 = vsel %vm3689_vm5, %v5897_v32, %v3746_v55  ;;  %v6163_v16 = vmul.f32 0.2, %v5954_v24  ;;  %v6166_v42 = vmul.f32 0.2, %v5957_v20  ;;  %vm3705_vm5 = vcmp.ge.f32.partialorder %v5945_v30, 0.0 }
 0x347   :  { %v6169_v32 = vmul.f32 0.2, %v5960_v35  ;;  %3860 = vst [vmem:[%s6658_s4 + $0x28] sm:$0xff] %v3803_v51  ;;  %v6182_v55 = vmul.f32 0.2, %v5963_v58  ;;  %vm3709_vm6 = vcmp.ge.f32.partialorder %v5957_v20, 0.0  ;;  %v3807_v45 = vsel %vm3693_vm9, %v5909_v49, %v6080_v23 }
 0x348   :  { %v6185_v44 = vmul.f32 0.2, %v5966_v60  ;;  %v6188_v37 = vmul.f32 0.2, %v5969_v53  ;;  %v6201_v51 = vmul.f32 0.2, %v5972_v9  ;;  %v3808_v23 = vsel %vm3694_vm10, %v5912_v50, %v6083_v1 }
 0x349   :  { %v6207_v17 = vmul.f32 0.2, %v5978_v61  ;;  %3862 = vst [vmem:[%s6658_s4 + $0x38] sm:$0xff] %v3805_v52  ;;  %vm3713_vm7 = vcmp.ge.f32.partialorder %v5969_v53, 0.0  ;;  %v6220_v8 = vmul.f32 0.2, %v5981_v56  ;;  %v3809_v1 = vsel %vm3695_vm11, %v5915_v0, %v6086_v48 }
 0x34a   :  { %6819 = vst [vmem:[#allocation12_spill] sm:$0xff] %v6188_v37  ;;  %v6204_v37 = vmul.f32 0.2, %v5975_v26  ;;  %v6226_v43 = vmul.f32 0.2, %v5987_v34  ;;  %3863 = vst [vmem:[%s6658_s4 + $0x40] sm:$0xff] %v3806_v62  ;;  %v3810_v48 = vsel %vm3696_vm12, %v5918_v6, %v6096_v63  ;;  %v3811_v63 = vsel %vm3697_vm13, %v5921_v7, %v6099_v33 }
 0x34b   :  { %6820 = vst [vmem:[#allocation13_spill] sm:$0xff] %v6207_v17  ;;  %v6223_v17 = vmul.f32 0.2, %v5984_v21  ;;  %vm3717_vm8 = vcmp.ge.f32.partialorder %v5981_v56, 0.0  ;;  %v6240_v52 = vmul.f32 0.2, %v5990_v2 }
 0x34c   :  { %6821 = vst [vmem:[#allocation14_spill] sm:$0xff] %v6226_v43  ;;  %v6243_v43 = vmul.f32 0.2, %v5993_v46  ;;  %v6246_v49 = vmul.f32 0.2, %v5996_v12  ;;  %3864 = vst [vmem:[%s6658_s4 + $0x48] sm:$0xff] %v3807_v45 }
 0x34d   :  { %vm3721_vm9 = vcmp.ge.f32.partialorder %v5993_v46, 0.0  ;;  %v6260_v62 = vmul.f32 0.2, %v5999_v40  ;;  %v6266_v50 = vmul.f32 0.2, %v6005_v4  ;;  %3865 = vst [vmem:[%s6658_s4 + $0x50] sm:$0xff] %v3808_v23 }
 0x34e   :  { %6822 = vst [vmem:[#allocation15_spill] sm:$0xff] %v6246_v49  ;;  %v6263_v49 = vmul.f32 0.2, %v6002_v22  ;;  %vm3725_vm10 = vcmp.ge.f32.partialorder %v6005_v4, 0.0  ;;  %v6280_v45 = vmul.f32 0.2, %v6008_v19 }
 0x34f   :  { %6823 = vst [vmem:[#allocation16_spill] sm:$0xff] %v6266_v50  ;;  %v6283_v50 = vmul.f32 0.2, %v6011_v27  ;;  %v6286_v0 = vmul.f32 0.2, %v6014_v36  ;;  %3866 = vst [vmem:[%s6658_s4 + $0x58] sm:$0xff] %v3809_v1 }
 0x350   :  { %vm3729_vm11 = vcmp.ge.f32.partialorder %v6017_v11, 0.0  ;;  %v6825_v23 = vld [vmem:[#allocation24_spill] sm:$0xff]  ;;  %v6300_v36 = vmul.f32 0.2, %v6017_v11  ;;  %v6306_v6 = vmul.f32 0.2, %v6023_v29 }
 0x351   :  { %6824 = vst [vmem:[#allocation17_spill] sm:$0xff] %v6286_v0  ;;  %v6303_v0 = vmul.f32 0.2, %v6020_v57  ;;  %3867 = vst [vmem:[%s6658_s4 + $0x60] sm:$0xff] %v3810_v48  ;;  %v6829_v1 = vld [vmem:[#allocation2_spill] sm:$0xff]  ;;  %v6830_v27 = vld [vmem:[#allocation3_spill] sm:$0xff] }
 0x352   :  { %6826 = vst [vmem:[#allocation18_spill] sm:$0xff] %v6300_v36  ;;  %6828 = vst [vmem:[#allocation27_spill] sm:$0xff] %v6306_v6  ;;  %vm3733_vm12 = vcmp.ge.f32.partialorder %v6829_v1, 0.0  ;;  %v6831_v11 = vld [vmem:[#allocation4_spill] sm:$0xff]  ;;  %v6832_v57 = vld [vmem:[#allocation5_spill] sm:$0xff] }
 0x353   :  { %6827 = vst [vmem:[#allocation26_spill] sm:$0xff] %v6303_v0  ;;  %v6320_v29 = vmul.f32 0.2, %v6825_v23  ;;  %v6323_v6 = vmul.f32 0.2, %v6829_v1  ;;  %v6834_v33 = vld [vmem:[#allocation9_spill] sm:$0xff] }
 0x354   :  { %v6326_v7 = vmul.f32 0.2, %v6830_v27  ;;  %v3812_v48 = vsel %vm3698_vm14, %v5924_v15, %v6834_v33  ;;  %3868 = vst [vmem:[%s6658_s4 + $0x68] sm:$0xff] %v3811_v63  ;;  %v6835_v0 = vld [vmem:[#allocation6_spill] sm:$0xff]  ;;  %v6836_v36 = vld [vmem:[#allocation7_spill] sm:$0xff]  ;;  %v6837_v23 = vld [vmem:[#allocation8_spill] sm:$0xff]  ;;  %v3813_v63 = vsel %vm3699_vm15, %v5927_v31, %v6112_v3 }
 0x355   :  { %vm3737_vm13 = vcmp.ge.f32.partialorder %v6835_v0, 0.0  ;;  %vm3738_vm4 = vcmp.ge.f32.partialorder %v6836_v36, 0.0  ;;  %vm3739_vm3 = vcmp.ge.f32.partialorder %v6837_v23, 0.0  ;;  %v6838_v1 = vld [vmem:[#allocation25_spill] sm:$0xff]  ;;  %v6340_v27 = vmul.f32 0.2, %v6831_v11 }
 0x356   :  { %6833 = vst [vmem:[#allocation28_spill] sm:$0xff] %v6326_v7  ;;  %vm3740_vm2 = vcmp.ge.f32.partialorder %v6838_v1, 0.0  ;;  %v6343_v7 = vmul.f32 0.2, %v6832_v57  ;;  %v6346_v15 = vmul.f32 0.2, %v6835_v0  ;;  %v3814_v0 = vsel %vm3700_vm0, %v5930_v54, %v6115_v25 }
 0x357   :  { %3869 = vst [vmem:[%s6658_s4 + $0x70] sm:$0xff] %v3812_v48  ;;  %v6356_v33 = vmul.f32 0.2, %v6836_v36  ;;  %v6359_v11 = vmul.f32 0.2, %v6837_v23  ;;  %3870 = vst [vmem:[%s6658_s4 + $0x78] sm:$0xff] %v3813_v63 }
 0x358   :  { %v6362_v57 = vmul.f32 0.2, %v6838_v1  ;;  %v6839_v31 = vld [vmem:[#allocation10_spill] sm:$0xff]  ;;  %vm6840_vm14 = vcmp.ge.f32.partialorder %v5936_v18, 0.0  ;;  %vm6841_vm15 = vcmp.ge.f32.partialorder %v5939_v5, 0.0  ;;  %v6842_v54 = vld [vmem:[#allocation11_spill] sm:$0xff] }
 0x359   :  { %v3815_v3 = vsel %vm3701_vm1, %v5933_v28, %v6839_v31  ;;  %v3816_v48 = vsel %vm6840_vm14, %v5936_v18, %v6128_v47  ;;  %v3817_v1 = vsel %vm6841_vm15, %v5939_v5, %v6131_v13  ;;  %vm6843_vm0 = vcmp.ge.f32.partialorder %v5942_v41, 0.0  ;;  %3871 = vst [vmem:[%s6658_s4 + $0x80] sm:$0xff] %v3814_v0  ;;  %v6853_v47 = vld [vmem:[#allocation13_spill] sm:$0xff] }
 0x35a   :  { %v3818_v25 = vsel %vm6843_vm0, %v5942_v41, %v6842_v54  ;;  %v3819_v28 = vsel %vm3705_vm5, %v5945_v30, %v6144_v38  ;;  %vm6844_vm1 = vcmp.ge.f32.partialorder %v5948_v39, 0.0  ;;  %vm6845_vm14 = vcmp.ge.f32.partialorder %v5951_v59, 0.0  ;;  %3872 = vst [vmem:[%s6658_s4 + $0x88] sm:$0xff] %v3815_v3  ;;  %3873 = vst [vmem:[%s6658_s4 + $0x90] sm:$0xff] %v3816_v48  ;;  %v6886_v31 = vld [vmem:[#allocation5_spill] sm:$0xff] }
 0x35b   :  { %v3820_v18 = vsel %vm6844_vm1, %v5948_v39, %v6147_v14  ;;  %v3821_v5 = vsel %vm6845_vm14, %v5951_v59, %v6150_v10  ;;  %vm6846_vm15 = vcmp.ge.f32.partialorder %v5954_v24, 0.0  ;;  %3874 = vst [vmem:[%s6658_s4 + $0x98] sm:$0xff] %v3817_v1  ;;  %3875 = vst [vmem:[%s6658_s4 + $0xa0] sm:$0xff] %v3818_v25  ;;  %v3823_v30 = vsel %vm3709_vm6, %v5957_v20, %v6166_v42  ;;  %v6850_v20 = vld [vmem:[#allocation12_spill] sm:$0xff]  ;;  %v6889_v54 = vld [vmem:[#allocation25_spill] sm:$0xff] }
 0x35c   :  { %v3822_v41 = vsel %vm6846_vm15, %v5954_v24, %v6163_v16  ;;  %vm6847_vm5 = vcmp.ge.f32.partialorder %v5960_v35, 0.0  ;;  %vm6848_vm0 = vcmp.ge.f32.partialorder %v5963_v58, 0.0  ;;  %vm6849_vm1 = vcmp.ge.f32.partialorder %v5966_v60, 0.0  ;;  %3876 = vst [vmem:[%s6658_s4 + $0xa8] sm:$0xff] %v3819_v28  ;;  %3877 = vst [vmem:[%s6658_s4 + $0xb0] sm:$0xff] %v3820_v18  ;;  %v6867_v16 = vld [vmem:[#allocation17_spill] sm:$0xff] }
 0x35d   :  { %v3824_v39 = vsel %vm6847_vm5, %v5960_v35, %v6169_v32  ;;  %v3825_v59 = vsel %vm6848_vm0, %v5963_v58, %v6182_v55  ;;  %v3826_v24 = vsel %vm6849_vm1, %v5966_v60, %v6185_v44  ;;  %3878 = vst [vmem:[%s6658_s4 + $0xb8] sm:$0xff] %v3821_v5  ;;  %3879 = vst [vmem:[%s6658_s4 + $0xc0] sm:$0xff] %v3822_v41  ;;  %vm6851_vm6 = vcmp.ge.f32.partialorder %v5972_v9, 0.0  ;;  %v6868_v42 = vld [vmem:[#allocation20_spill] sm:$0xff]  ;;  %v6872_v44 = vld [vmem:[#allocation26_spill] sm:$0xff] }
 0x35e   :  { %v3827_v35 = vsel %vm3713_vm7, %v5969_v53, %v6850_v20  ;;  %v3828_v58 = vsel %vm6851_vm6, %v5972_v9, %v6201_v51  ;;  %vm6852_vm14 = vcmp.ge.f32.partialorder %v5975_v26, 0.0  ;;  %vm6854_vm15 = vcmp.ge.f32.partialorder %v5978_v61, 0.0  ;;  %3880 = vst [vmem:[%s6658_s4 + $0xc8] sm:$0xff] %v3823_v30  ;;  %3881 = vst [vmem:[%s6658_s4 + $0xd0] sm:$0xff] %v3824_v39  ;;  %v6884_v1 = vld [vmem:[#allocation4_spill] sm:$0xff] }
 0x35f   :  { %v3829_v60 = vsel %vm6852_vm14, %v5975_v26, %v6204_v37  ;;  %v3830_v13 = vsel %vm6854_vm15, %v5978_v61, %v6853_v47  ;;  %3882 = vst [vmem:[%s6658_s4 + $0xd8] sm:$0xff] %v3825_v59  ;;  %3883 = vst [vmem:[%s6658_s4 + $0xe0] sm:$0xff] %v3826_v24  ;;  %v3831_v53 = vsel %vm3717_vm8, %v5981_v56, %v6220_v8  ;;  %vm6855_vm7 = vcmp.ge.f32.partialorder %v5984_v21, 0.0  ;;  %v6856_v26 = vld [vmem:[#allocation14_spill] sm:$0xff]  ;;  %v6876_v8 = vld [vmem:[#allocation23_spill] sm:$0xff] }
 0x360   :  { %v3832_v9 = vsel %vm6855_vm7, %v5984_v21, %v6223_v17  ;;  %vm6857_vm5 = vcmp.ge.f32.partialorder %v5987_v34, 0.0  ;;  %vm6858_vm0 = vcmp.ge.f32.partialorder %v5990_v2, 0.0  ;;  %3884 = vst [vmem:[%s6658_s4 + $0xe8] sm:$0xff] %v3827_v35  ;;  %3885 = vst [vmem:[%s6658_s4 + $0xf0] sm:$0xff] %v3828_v58  ;;  %v3835_v56 = vsel %vm3721_vm9, %v5993_v46, %v6243_v43  ;;  %v6859_v21 = vld [vmem:[#allocation15_spill] sm:$0xff]  ;;  %v6863_v46 = vld [vmem:[#allocation16_spill] sm:$0xff] }
 0x361   :  { %v3833_v61 = vsel %vm6857_vm5, %v5987_v34, %v6856_v26  ;;  %v3834_v38 = vsel %vm6858_vm0, %v5990_v2, %v6240_v52  ;;  %3886 = vst [vmem:[%s6658_s4 + $0xf8] sm:$0xff] %v3829_v60  ;;  %3887 = vst [vmem:[%s6658_s4 + $0x100] sm:$0xff] %v3830_v13  ;;  %vm6860_vm8 = vcmp.ge.f32.partialorder %v5996_v12, 0.0  ;;  %vm6861_vm1 = vcmp.ge.f32.partialorder %v5999_v40, 0.0  ;;  %v6873_v37 = vld [vmem:[#allocation22_spill] sm:$0xff]  ;;  %v6875_v17 = vld [vmem:[#allocation27_spill] sm:$0xff] }
 0x362   :  { %v3836_v34 = vsel %vm6860_vm8, %v5996_v12, %v6859_v21  ;;  %v3837_v2 = vsel %vm6861_vm1, %v5999_v40, %v6260_v62  ;;  %vm6862_vm6 = vcmp.ge.f32.partialorder %v6002_v22, 0.0  ;;  %3888 = vst [vmem:[%s6658_s4 + $0x108] sm:$0xff] %v3831_v53  ;;  %3889 = vst [vmem:[%s6658_s4 + $0x110] sm:$0xff] %v3832_v9  ;;  %v3839_v12 = vsel %vm3725_vm10, %v6005_v4, %v6863_v46  ;;  %v6870_v4 = vld [vmem:[#allocation18_spill] sm:$0xff]  ;;  %v6878_v52 = vld [vmem:[#allocation24_spill] sm:$0xff] }
 0x363   :  { %v3838_v14 = vsel %vm6862_vm6, %v6002_v22, %v6263_v49  ;;  %3890 = vst [vmem:[%s6658_s4 + $0x118] sm:$0xff] %v3833_v61  ;;  %3891 = vst [vmem:[%s6658_s4 + $0x120] sm:$0xff] %v3834_v38  ;;  %vm6864_vm9 = vcmp.ge.f32.partialorder %v6008_v19, 0.0  ;;  %v6865_v22 = vld [vmem:[#allocation19_spill] sm:$0xff]  ;;  %vm6869_vm15 = vcmp.ge.f32.partialorder %v6868_v42, 0.0  ;;  %vm6874_vm10 = vcmp.ge.f32.partialorder %v6873_v37, 0.0 }
 0x364   :  { %v3840_v40 = vsel %vm6864_vm9, %v6008_v19, %v6280_v45  ;;  %vm6866_vm14 = vcmp.ge.f32.partialorder %v6865_v22, 0.0  ;;  %v3842_v32 = vsel %vm6869_vm15, %v6868_v42, %v6867_v16  ;;  %3892 = vst [vmem:[%s6658_s4 + $0x128] sm:$0xff] %v3835_v56  ;;  %3893 = vst [vmem:[%s6658_s4 + $0x130] sm:$0xff] %v3836_v34  ;;  %v6871_v19 = vld [vmem:[#allocation21_spill] sm:$0xff]  ;;  %v3844_v51 = vsel %vm6874_vm10, %v6873_v37, %v6872_v44  ;;  %v6880_v62 = vld [vmem:[#allocation2_spill] sm:$0xff] }
 0x365   :  { %v3841_v10 = vsel %vm6866_vm14, %v6865_v22, %v6283_v50  ;;  %3894 = vst [vmem:[%s6658_s4 + $0x138] sm:$0xff] %v3837_v2  ;;  %3895 = vst [vmem:[%s6658_s4 + $0x140] sm:$0xff] %v3838_v14  ;;  %v3843_v55 = vsel %vm3729_vm11, %v6871_v19, %v6870_v4  ;;  %vm6877_vm7 = vcmp.ge.f32.partialorder %v6876_v8, 0.0  ;;  %vm6879_vm5 = vcmp.ge.f32.partialorder %v6878_v52, 0.0  ;;  %v6881_v50 = vld [vmem:[#allocation28_spill] sm:$0xff]  ;;  %v6882_v45 = vld [vmem:[#allocation3_spill] sm:$0xff] }
 0x366   :  { %v3845_v43 = vsel %vm6877_vm7, %v6876_v8, %v6875_v17  ;;  %v3846_v49 = vsel %vm6879_vm5, %v6878_v52, %v6320_v29  ;;  %3896 = vst [vmem:[%s6658_s4 + $0x148] sm:$0xff] %v3839_v12  ;;  %3897 = vst [vmem:[%s6658_s4 + $0x150] sm:$0xff] %v3840_v40  ;;  %v3847_v29 = vsel %vm3733_vm12, %v6880_v62, %v6323_v6  ;;  %vm6883_vm11 = vcmp.ge.f32.partialorder %v6882_v45, 0.0 }
 0x367   :  { %3898 = vst [vmem:[%s6658_s4 + $0x158] sm:$0xff] %v3841_v10  ;;  %3899 = vst [vmem:[%s6658_s4 + $0x160] sm:$0xff] %v3842_v32  ;;  %v3848_v0 = vsel %vm6883_vm11, %v6882_v45, %v6881_v50  ;;  %vm6885_vm0 = vcmp.ge.f32.partialorder %v6884_v1, 0.0  ;;  %vm6887_vm8 = vcmp.ge.f32.partialorder %v6886_v31, 0.0  ;;  %v3853_v48 = vsel %vm3739_vm3, %v6837_v23, %v6359_v11 }
 0x368   :  { %v3849_v63 = vsel %vm6885_vm0, %v6884_v1, %v6340_v27  ;;  %v3850_v3 = vsel %vm6887_vm8, %v6886_v31, %v6343_v7  ;;  %3900 = vst [vmem:[%s6658_s4 + $0x168] sm:$0xff] %v3843_v55  ;;  %3901 = vst [vmem:[%s6658_s4 + $0x170] sm:$0xff] %v3844_v51  ;;  %v6888_v27 = vld [vmem:[#allocation6_spill] sm:$0xff]  ;;  %v3852_v7 = vsel %vm3738_vm4, %v6836_v36, %v6356_v33 }
 0x369   :  { %3902 = vst [vmem:[%s6658_s4 + $0x178] sm:$0xff] %v3845_v43  ;;  %3903 = vst [vmem:[%s6658_s4 + $0x180] sm:$0xff] %v3846_v49  ;;  %v3851_v6 = vsel %vm3737_vm13, %v6888_v27, %v6346_v15  ;;  %v3854_v25 = vsel %vm3740_vm2, %v6889_v54, %v6362_v57 }
 0x36a   :  { %3904 = vst [vmem:[%s6658_s4 + $0x188] sm:$0xff] %v3847_v29  ;;  %3905 = vst [vmem:[%s6658_s4 + $0x190] sm:$0xff] %v3848_v0 }
 0x36b   :  { %3906 = vst [vmem:[%s6658_s4 + $0x198] sm:$0xff] %v3849_v63  ;;  %3907 = vst [vmem:[%s6658_s4 + $0x1a0] sm:$0xff] %v3850_v3 }
 0x36c   :  { %3908 = vst [vmem:[%s6658_s4 + $0x1a8] sm:$0xff] %v3851_v6  ;;  %3909 = vst [vmem:[%s6658_s4 + $0x1b0] sm:$0xff] %v3852_v7 }
 0x36d   :  { %3910 = vst [vmem:[%s6658_s4 + $0x1b8] sm:$0xff] %v3853_v48  ;;  %3911 = vst [vmem:[%s6658_s4 + $0x1c0] sm:$0xff] %v3854_v25 }

// kernel: discriminator_forward.7
= control target key start
LH: loop header
LB: loop body
LE: loop exit
PB: predicated region body
PF: predicated region fallthrough
CT: control target
= control target key end

     0   :  { %s5188_s1 = inlined_call_operand.vmem [shape: bf16[2048,256], index: 1, kind: input, shape index: {}]   ;;  %s5189_s0 = inlined_call_operand.vmem [shape: bf16[72,2048], index: 0, kind: input, shape index: {}]   ;;  %s5190_s2 = inlined_call_operand.vmem [shape: f32[1,256], index: 2, kind: input, shape index: {}]   ;;  %s5191_s3 = inlined_call_operand.vmem [shape: f32[1,256], index: 3, kind: input, shape index: {}]   ;;  %s5192_s4 = inlined_call_operand.vmem [shape: f32[72,256], index: 4, kind: output, shape index: {}]  }
   0x1   :  { %v3455_v0 = vld [vmem:[%s5188_s1 + $0x4] ss:$8 sps:$4 sm:$0xff]   ;;  %v3459_v2 = vld [vmem:[%s5188_s1] ss:$8 sps:$4 sm:$0xff]   ;;  %v3461_v4 = vld [vmem:[%s5188_s1 + $0x14] ss:$8 sps:$4 sm:$0xff]  }
   0x2   :  { %v3457_v1 = vld [vmem:[%s5188_s1 + $0x404] ss:$8 sps:$4 sm:$0xff]   ;;  %2041 = vmatprep.subr.bf16.mxu1 %v3455_v0  ;;  %v3460_v3 = vld [vmem:[%s5188_s1 + $0x400] ss:$8 sps:$4 sm:$0xff]   ;;  %v3463_v5 = vld [vmem:[%s5188_s1 + $0x414] ss:$8 sps:$4 sm:$0xff]  }
   0x3   :  { %2365 = vmatprep.subr.bf16.mxu0 %v3457_v1  ;;  %2042 = vmatpush1.bf16.msra.mxu1 %v3459_v2  ;;  %v3465_v6 = vld [vmem:[%s5188_s1 + $0x10] ss:$8 sps:$4 sm:$0xff]   ;;  %v3467_v8 = vld [vmem:[%s5188_s1 + $0x24] ss:$8 sps:$4 sm:$0xff]   ;;  %v3471_v10 = vld [vmem:[%s5188_s1 + $0x20] ss:$8 sps:$4 sm:$0xff]  }
   0x4   :  { %2366 = vmatpush1.bf16.msra.mxu0 %v3460_v3  ;;  %2043 = vmatprep.subr.bf16.mxu1 %v3461_v4  ;;  %v3466_v7 = vld [vmem:[%s5188_s1 + $0x410] ss:$8 sps:$4 sm:$0xff]   ;;  %v3469_v9 = vld [vmem:[%s5188_s1 + $0x424] ss:$8 sps:$4 sm:$0xff]   ;;  %v3472_v11 = vld [vmem:[%s5188_s1 + $0x420] ss:$8 sps:$4 sm:$0xff]  }
   0x5   :  { %2367 = vmatprep.subr.bf16.mxu0 %v3463_v5  ;;  %v3473_v12 = vld [vmem:[%s5188_s1 + $0x34] ss:$8 sps:$4 sm:$0xff]   ;;  %v3477_v14 = vld [vmem:[%s5188_s1 + $0x30] ss:$8 sps:$4 sm:$0xff]   ;;  %v3479_v16 = vld [vmem:[%s5188_s1 + $0x44] ss:$8 sps:$4 sm:$0xff]  }
   0x6   :  { %v3475_v13 = vld [vmem:[%s5188_s1 + $0x434] ss:$8 sps:$4 sm:$0xff]   ;;  %v3478_v15 = vld [vmem:[%s5188_s1 + $0x430] ss:$8 sps:$4 sm:$0xff]   ;;  %v3481_v17 = vld [vmem:[%s5188_s1 + $0x444] ss:$8 sps:$4 sm:$0xff]  }
   0x7   :  { %2044 = vmatpush1.bf16.msra.mxu1 %v3465_v6  ;;  %v3483_v18 = vld [vmem:[%s5188_s1 + $0x40] ss:$8 sps:$4 sm:$0xff]   ;;  %v3485_v20 = vld [vmem:[%s5188_s1 + $0x54] ss:$8 sps:$4 sm:$0xff]   ;;  %v3489_v22 = vld [vmem:[%s5188_s1 + $0x50] ss:$8 sps:$4 sm:$0xff]  }
   0x8   :  { %2368 = vmatpush1.bf16.msra.mxu0 %v3466_v7  ;;  %2045 = vmatprep.subr.bf16.mxu1 %v3467_v8  ;;  %v3484_v19 = vld [vmem:[%s5188_s1 + $0x440] ss:$8 sps:$4 sm:$0xff]   ;;  %v3487_v21 = vld [vmem:[%s5188_s1 + $0x454] ss:$8 sps:$4 sm:$0xff]   ;;  %v3490_v23 = vld [vmem:[%s5188_s1 + $0x450] ss:$8 sps:$4 sm:$0xff]  }
   0x9   :  { %2369 = vmatprep.subr.bf16.mxu0 %v3469_v9  ;;  %v3491_v24 = vld [vmem:[%s5188_s1 + $0x64] ss:$8 sps:$4 sm:$0xff]   ;;  %v3495_v26 = vld [vmem:[%s5188_s1 + $0x60] ss:$8 sps:$4 sm:$0xff]   ;;  %v3497_v28 = vld [vmem:[%s5188_s1 + $0x74] ss:$8 sps:$4 sm:$0xff]  }
   0xa   :  { %v3493_v25 = vld [vmem:[%s5188_s1 + $0x464] ss:$8 sps:$4 sm:$0xff]   ;;  %v3496_v27 = vld [vmem:[%s5188_s1 + $0x460] ss:$8 sps:$4 sm:$0xff]   ;;  %v3499_v29 = vld [vmem:[%s5188_s1 + $0x474] ss:$8 sps:$4 sm:$0xff]  }
   0xb   :  { %2046 = vmatpush1.bf16.msra.mxu1 %v3471_v10  ;;  %v3501_v30 = vld [vmem:[%s5188_s1 + $0x70] ss:$8 sps:$4 sm:$0xff]   ;;  %v3503_v32 = vld [vmem:[%s5188_s1 + $0x84] ss:$8 sps:$4 sm:$0xff]   ;;  %v3507_v34 = vld [vmem:[%s5188_s1 + $0x80] ss:$8 sps:$4 sm:$0xff]  }
   0xc   :  { %2370 = vmatpush1.bf16.msra.mxu0 %v3472_v11  ;;  %2047 = vmatprep.subr.bf16.mxu1 %v3473_v12  ;;  %v3502_v31 = vld [vmem:[%s5188_s1 + $0x470] ss:$8 sps:$4 sm:$0xff]   ;;  %v3505_v33 = vld [vmem:[%s5188_s1 + $0x484] ss:$8 sps:$4 sm:$0xff]   ;;  %v3508_v35 = vld [vmem:[%s5188_s1 + $0x480] ss:$8 sps:$4 sm:$0xff]  }
   0xd   :  { %2371 = vmatprep.subr.bf16.mxu0 %v3475_v13  ;;  %v3509_v36 = vld [vmem:[%s5188_s1 + $0x94] ss:$8 sps:$4 sm:$0xff]   ;;  %v3513_v38 = vld [vmem:[%s5188_s1 + $0x90] ss:$8 sps:$4 sm:$0xff]   ;;  %v3515_v40 = vld [vmem:[%s5188_s1 + $0xa4] ss:$8 sps:$4 sm:$0xff]  }
   0xe   :  { %v3511_v37 = vld [vmem:[%s5188_s1 + $0x494] ss:$8 sps:$4 sm:$0xff]   ;;  %v3514_v39 = vld [vmem:[%s5188_s1 + $0x490] ss:$8 sps:$4 sm:$0xff]   ;;  %v3517_v41 = vld [vmem:[%s5188_s1 + $0x4a4] ss:$8 sps:$4 sm:$0xff]  }
   0xf   :  { %2048 = vmatpush1.bf16.msra.mxu1 %v3477_v14  ;;  %v3519_v42 = vld [vmem:[%s5188_s1 + $0xa0] ss:$8 sps:$4 sm:$0xff]   ;;  %v3521_v44 = vld [vmem:[%s5188_s1 + $0xb4] ss:$8 sps:$4 sm:$0xff]   ;;  %v3525_v46 = vld [vmem:[%s5188_s1 + $0xb0] ss:$8 sps:$4 sm:$0xff]  }
  0x10   :  { %2372 = vmatpush1.bf16.msra.mxu0 %v3478_v15  ;;  %2049 = vmatprep.subr.bf16.mxu1 %v3479_v16  ;;  %v3520_v43 = vld [vmem:[%s5188_s1 + $0x4a0] ss:$8 sps:$4 sm:$0xff]   ;;  %v3523_v45 = vld [vmem:[%s5188_s1 + $0x4b4] ss:$8 sps:$4 sm:$0xff]   ;;  %v3526_v47 = vld [vmem:[%s5188_s1 + $0x4b0] ss:$8 sps:$4 sm:$0xff]  }
  0x11   :  { %2373 = vmatprep.subr.bf16.mxu0 %v3481_v17  ;;  %v57_v48 = vld [vmem:[%s5189_s0] sm:$0xff]  ;;  %v3533_v58 = vld [vmem:[%s5188_s1 + $0xd4] ss:$8 sps:$4 sm:$0xff]   ;;  %v3537_v60 = vld [vmem:[%s5188_s1 + $0xd0] ss:$8 sps:$4 sm:$0xff]  }
  0x12   :  { %v65_v49 = vld [vmem:[%s5189_s0 + $0x40] sm:$0xff]  ;;  %v3535_v59 = vld [vmem:[%s5188_s1 + $0x4d4] ss:$8 sps:$4 sm:$0xff]   ;;  %v3538_v61 = vld [vmem:[%s5188_s1 + $0x4d0] ss:$8 sps:$4 sm:$0xff]  }
  0x13   :  { %2050 = vmatpush1.bf16.msra.mxu1 %v3483_v18  ;;  %v3527_v50 = vld [vmem:[%s5188_s1 + $0xc4] ss:$8 sps:$4 sm:$0xff]   ;;  %v3007_v52 = vcombine.high %v57_v48, %v65_v49  ;;  %v3531_v56 = vld [vmem:[%s5188_s1 + $0xc0] ss:$8 sps:$4 sm:$0xff]   ;;  %v3545_v2 = vld [vmem:[%s5188_s1 + $0xf4] ss:$8 sps:$4 sm:$0xff]   ;;  %v3006_v8 = vcombine.low %v57_v48, %v65_v49 }
  0x14   :  { %2374 = vmatpush1.bf16.msra.mxu0 %v3484_v19  ;;  %2051 = vmatprep.subr.bf16.mxu1 %v3485_v20  ;;  %v3529_v51 = vld [vmem:[%s5188_s1 + $0x4c4] ss:$8 sps:$4 sm:$0xff]   ;;  %v3532_v57 = vld [vmem:[%s5188_s1 + $0x4c0] ss:$8 sps:$4 sm:$0xff]   ;;  %v3547_v3 = vld [vmem:[%s5188_s1 + $0x4f4] ss:$8 sps:$4 sm:$0xff]  }
  0x15   :  { %2375 = vmatprep.subr.bf16.mxu0 %v3487_v21  ;;  %v61_v53 = vld [vmem:[%s5189_s0 + $0x20] sm:$0xff]  ;;  %2073 = vmatprep.mubr.bf16.mxu1 %v3007_v52  ;;  %v3549_v4 = vld [vmem:[%s5188_s1 + $0xf0] ss:$8 sps:$4 sm:$0xff]   ;;  %v3559_v12 = vld [vmem:[%s5188_s1 + $0x114] ss:$8 sps:$4 sm:$0xff]  }
  0x16   :  { %v69_v54 = vld [vmem:[%s5189_s0 + $0x60] sm:$0xff]  ;;  %v3550_v5 = vld [vmem:[%s5188_s1 + $0x4f0] ss:$8 sps:$4 sm:$0xff]   ;;  %v3562_v13 = vld [vmem:[%s5188_s1 + $0x514] ss:$8 sps:$4 sm:$0xff]  }
  0x17   :  { %2052 = vmatpush1.bf16.msra.mxu1 %v3489_v22  ;;  %v3015_v55 = vcombine.high %v61_v53, %v69_v54  ;;  %v3539_v62 = vld [vmem:[%s5188_s1 + $0xe4] ss:$8 sps:$4 sm:$0xff]   ;;  %v3543_v0 = vld [vmem:[%s5188_s1 + $0xe0] ss:$8 sps:$4 sm:$0xff]   ;;  %v3014_v10 = vcombine.low %v61_v53, %v69_v54  ;;  %v3557_v16 = vld [vmem:[%s5188_s1 + $0x110] ss:$8 sps:$4 sm:$0xff]  }
  0x18   :  { %2376 = vmatpush1.bf16.msra.mxu0 %v3490_v23  ;;  %2053 = vmatprep.subr.bf16.mxu1 %v3491_v24  ;;  %v3541_v63 = vld [vmem:[%s5188_s1 + $0x4e4] ss:$8 sps:$4 sm:$0xff]   ;;  %v3544_v1 = vld [vmem:[%s5188_s1 + $0x4e0] ss:$8 sps:$4 sm:$0xff]   ;;  %v3560_v18 = vld [vmem:[%s5188_s1 + $0x510] ss:$8 sps:$4 sm:$0xff]  }
  0x19   :  { %2377 = vmatprep.subr.bf16.mxu0 %v3493_v25  ;;  %2397 = vmatprep.mubr.bf16.mxu0 %v3015_v55  ;;  %v3553_v6 = vld [vmem:[%s5188_s1 + $0x104] ss:$8 sps:$4 sm:$0xff]   ;;  %v3551_v9 = vld [vmem:[%s5188_s1 + $0x100] ss:$8 sps:$4 sm:$0xff]   ;;  %v3581_v52 = vld [vmem:[%s5188_s1 + $0x150] ss:$8 sps:$4 sm:$0xff]  }
  0x1a   :  { %v3556_v7 = vld [vmem:[%s5188_s1 + $0x504] ss:$8 sps:$4 sm:$0xff]   ;;  %v3554_v11 = vld [vmem:[%s5188_s1 + $0x500] ss:$8 sps:$4 sm:$0xff]   ;;  %v3584_v53 = vld [vmem:[%s5188_s1 + $0x550] ss:$8 sps:$4 sm:$0xff]  }
  0x1b   :  { %2054 = vmatpush1.bf16.msra.mxu1 %v3495_v26  ;;  %v73_v14 = vld [vmem:[%s5189_s0 + $0x80] sm:$0xff] }
  0x1c   :  { %2378 = vmatpush1.bf16.msra.mxu0 %v3496_v27  ;;  %2055 = vmatprep.subr.bf16.mxu1 %v3497_v28  ;;  %v81_v15 = vld [vmem:[%s5189_s0 + $0xc0] sm:$0xff] }
  0x1d   :  { %2379 = vmatprep.subr.bf16.mxu0 %v3499_v29  ;;  %v3023_v17 = vcombine.high %v73_v14, %v81_v15  ;;  %v77_v19 = vld [vmem:[%s5189_s0 + $0xa0] sm:$0xff]  ;;  %v3022_v26 = vcombine.low %v73_v14, %v81_v15  ;;  %v3607_v14 = vld [vmem:[%s5188_s1 + $0x194] ss:$8 sps:$4 sm:$0xff]  }
  0x1e   :  { %v85_v20 = vld [vmem:[%s5189_s0 + $0xe0] sm:$0xff]  ;;  %v3610_v15 = vld [vmem:[%s5188_s1 + $0x594] ss:$8 sps:$4 sm:$0xff]  }
  0x1f   :  { %2056 = vmatpush1.bf16.msra.mxu1 %v3501_v30  ;;  %v3565_v21 = vld [vmem:[%s5188_s1 + $0x124] ss:$8 sps:$4 sm:$0xff]   ;;  %v3031_v22 = vcombine.high %v77_v19, %v85_v20  ;;  %v3563_v24 = vld [vmem:[%s5188_s1 + $0x120] ss:$8 sps:$4 sm:$0xff]   ;;  %v3030_v27 = vcombine.low %v77_v19, %v85_v20  ;;  %v3571_v30 = vld [vmem:[%s5188_s1 + $0x134] ss:$8 sps:$4 sm:$0xff]  }
  0x20   :  { %2380 = vmatpush1.bf16.msra.mxu0 %v3502_v31  ;;  %2057 = vmatprep.subr.bf16.mxu1 %v3503_v32  ;;  %v3568_v23 = vld [vmem:[%s5188_s1 + $0x524] ss:$8 sps:$4 sm:$0xff]   ;;  %v3566_v25 = vld [vmem:[%s5188_s1 + $0x520] ss:$8 sps:$4 sm:$0xff]   ;;  %v3574_v31 = vld [vmem:[%s5188_s1 + $0x534] ss:$8 sps:$4 sm:$0xff]  }
  0x21   :  { %2381 = vmatprep.subr.bf16.mxu0 %v3505_v33  ;;  %v89_v28 = vld [vmem:[%s5189_s0 + $0x100] sm:$0xff]  ;;  %v3608_v19 = vld [vmem:[%s5188_s1 + $0x590] ss:$8 sps:$4 sm:$0xff]  }
  0x22   :  { %v97_v29 = vld [vmem:[%s5189_s0 + $0x140] sm:$0xff] }
  0x23   :  { %2058 = vmatpush1.bf16.msra.mxu1 %v3507_v34  ;;  %v3039_v32 = vcombine.high %v89_v28, %v97_v29  ;;  %v93_v33 = vld [vmem:[%s5189_s0 + $0x120] sm:$0xff] }
  0x24   :  { %2382 = vmatpush1.bf16.msra.mxu0 %v3508_v35  ;;  %2059 = vmatprep.subr.bf16.mxu1 %v3509_v36  ;;  %v101_v34 = vld [vmem:[%s5189_s0 + $0x160] sm:$0xff]  ;;  %v3569_v35 = vld [vmem:[%s5188_s1 + $0x130] ss:$8 sps:$4 sm:$0xff]  }
  0x25   :  { %2383 = vmatprep.subr.bf16.mxu0 %v3511_v37  ;;  %v3572_v36 = vld [vmem:[%s5188_s1 + $0x530] ss:$8 sps:$4 sm:$0xff]   ;;  %v3047_v37 = vcombine.high %v93_v33, %v101_v34  ;;  %v109_v48 = vld [vmem:[%s5189_s0 + $0x1a0] sm:$0xff] }
  0x26   :  { %v117_v49 = vld [vmem:[%s5189_s0 + $0x1e0] sm:$0xff] }
  0x27   :  { %2060 = vmatpush1.bf16.msra.mxu1 %v3513_v38  ;;  %v3577_v38 = vld [vmem:[%s5188_s1 + $0x144] ss:$8 sps:$4 sm:$0xff]  }
  0x28   :  { %2384 = vmatpush1.bf16.msra.mxu0 %v3514_v39  ;;  %2061 = vmatprep.subr.bf16.mxu1 %v3515_v40  ;;  %v3580_v39 = vld [vmem:[%s5188_s1 + $0x544] ss:$8 sps:$4 sm:$0xff]   ;;  %v3575_v40 = vld [vmem:[%s5188_s1 + $0x140] ss:$8 sps:$4 sm:$0xff]  }
  0x29   :  { %2385 = vmatprep.subr.bf16.mxu0 %v3517_v41  ;;  %v3578_v41 = vld [vmem:[%s5188_s1 + $0x540] ss:$8 sps:$4 sm:$0xff]   ;;  %v3589_v54 = vld [vmem:[%s5188_s1 + $0x164] ss:$8 sps:$4 sm:$0xff]  }
  0x2a   :  { %v3592_v55 = vld [vmem:[%s5188_s1 + $0x564] ss:$8 sps:$4 sm:$0xff]  }
  0x2b   :  { %2062 = vmatpush1.bf16.msra.mxu1 %v3519_v42  ;;  %v105_v42 = vld [vmem:[%s5189_s0 + $0x180] sm:$0xff] }
  0x2c   :  { %2386 = vmatpush1.bf16.msra.mxu0 %v3520_v43  ;;  %2063 = vmatprep.subr.bf16.mxu1 %v3521_v44  ;;  %v3038_v43 = vcombine.low %v89_v28, %v97_v29  ;;  %v3046_v44 = vcombine.low %v93_v33, %v101_v34  ;;  %v3613_v20 = vld [vmem:[%s5188_s1 + $0x1a4] ss:$8 sps:$4 sm:$0xff]   ;;  %v3634_v33 = vld [vmem:[%s5188_s1 + $0x5d4] ss:$8 sps:$4 sm:$0xff]   ;;  %v3629_v34 = vld [vmem:[%s5188_s1 + $0x1d0] ss:$8 sps:$4 sm:$0xff]  }
  0x2d   :  { %2387 = vmatprep.subr.bf16.mxu0 %v3523_v45  ;;  %v113_v45 = vld [vmem:[%s5189_s0 + $0x1c0] sm:$0xff] }
  0x2e   :  { %v3625_v28 = vld [vmem:[%s5188_s1 + $0x1c4] ss:$8 sps:$4 sm:$0xff]  }
  0x2f   :  { %2064 = vmatpush1.bf16.msra.mxu1 %v3525_v46  ;;  %v3583_v46 = vld [vmem:[%s5188_s1 + $0x154] ss:$8 sps:$4 sm:$0xff]   ;;  %v3628_v29 = vld [vmem:[%s5188_s1 + $0x5c4] ss:$8 sps:$4 sm:$0xff]  }
  0x30   :  { %2388 = vmatpush1.bf16.msra.mxu0 %v3526_v47  ;;  %2065 = vmatprep.subr.bf16.mxu1 %v3527_v50  ;;  %v3586_v47 = vld [vmem:[%s5188_s1 + $0x554] ss:$8 sps:$4 sm:$0xff]   ;;  %v3055_v50 = vcombine.high %v105_v42, %v113_v45 }
  0x31   :  { %2389 = vmatprep.subr.bf16.mxu0 %v3529_v51  ;;  %v3063_v51 = vcombine.high %v109_v48, %v117_v49 }
  0x33   :  { %2066 = vmatpush1.bf16.msra.mxu1 %v3531_v56  ;;  %v121_v56 = vld [vmem:[%s5189_s0 + $0x200] sm:$0xff] }
  0x34   :  { %2390 = vmatpush1.bf16.msra.mxu0 %v3532_v57  ;;  %2067 = vmatprep.subr.bf16.mxu1 %v3533_v58  ;;  %v3054_v57 = vcombine.low %v105_v42, %v113_v45  ;;  %v3062_v58 = vcombine.low %v109_v48, %v117_v49  ;;  %v3645_v42 = vld [vmem:[%s5188_s1 + $0x1f0] ss:$8 sps:$4 sm:$0xff]   ;;  %v3656_v45 = vld [vmem:[%s5188_s1 + $0x604] ss:$8 sps:$4 sm:$0xff]  }
  0x35   :  { %2391 = vmatprep.subr.bf16.mxu0 %v3535_v59  ;;  %v125_v59 = vld [vmem:[%s5189_s0 + $0x220] sm:$0xff]  ;;  %v82_v48 = vld [vmem:[%s5189_s0 + $0xc8] sm:$0xff] }
  0x36   :  { %v78_v49 = vld [vmem:[%s5189_s0 + $0xa8] sm:$0xff] }
  0x37   :  { %2068 = vmatpush1.bf16.msra.mxu1 %v3537_v60  ;;  %v3587_v60 = vld [vmem:[%s5188_s1 + $0x160] ss:$8 sps:$4 sm:$0xff]  }
  0x38   :  { %2392 = vmatpush1.bf16.msra.mxu0 %v3538_v61  ;;  %2069 = vmatprep.subr.bf16.mxu1 %v3539_v62  ;;  %v3590_v61 = vld [vmem:[%s5188_s1 + $0x560] ss:$8 sps:$4 sm:$0xff]   ;;  %v3595_v62 = vld [vmem:[%s5188_s1 + $0x174] ss:$8 sps:$4 sm:$0xff]  }
  0x39   :  { %2393 = vmatprep.subr.bf16.mxu0 %v3541_v63  ;;  %v3598_v63 = vld [vmem:[%s5188_s1 + $0x574] ss:$8 sps:$4 sm:$0xff]  }
  0x3b   :  { %2070 = vmatpush1.bf16.msra.mxu1 %v3543_v0  ;;  %v3071_v0 = vcombine.high %v121_v56, %v121_v56 }
  0x3c   :  { %2394 = vmatpush1.bf16.msra.mxu0 %v3544_v1  ;;  %2071 = vmatprep.subr.bf16.mxu1 %v3545_v2  ;;  %v3079_v1 = vcombine.high %v125_v59, %v125_v59  ;;  %v3593_v2 = vld [vmem:[%s5188_s1 + $0x170] ss:$8 sps:$4 sm:$0xff]  }
  0x3d   :  { %2395 = vmatprep.subr.bf16.mxu0 %v3547_v3  ;;  %v3596_v3 = vld [vmem:[%s5188_s1 + $0x570] ss:$8 sps:$4 sm:$0xff]  }
  0x3f   :  { %2072 = vmatpush1.bf16.msra.mxu1 %v3549_v4  ;;  %v3601_v4 = vld [vmem:[%s5188_s1 + $0x184] ss:$8 sps:$4 sm:$0xff]  }
  0x40   :  { %2396 = vmatpush1.bf16.msra.mxu0 %v3550_v5  ;;  %2122 = vmatprep.subr.bf16.mxu1 %v3553_v6  ;;  %v3604_v5 = vld [vmem:[%s5188_s1 + $0x584] ss:$8 sps:$4 sm:$0xff]  }
  0x41   :  { %2446 = vmatprep.subr.bf16.mxu0 %v3556_v7  ;;  %v4235_v6 = vld [vmem:[%s5189_s0 + $0x8] sm:$0xff] }
  0x42   :  { %2074 = vmatmul.mubr.bf16.vlgmr.msra.gmra.mrb[0].mxu1 %v3006_v8  ;;  %v4240_v7 = vld [vmem:[%s5189_s0 + $0x48] sm:$0xff] }
  0x43   :  { %2398 = vmatmul.mubr.bf16.vlgmr.msra.gmra.mrb[0].mxu0 %v3014_v10  ;;  %2123 = vmatpush1.bf16.msra.mxu1 %v3551_v9  ;;  %v4245_v8 = vld [vmem:[%s5189_s0 + $0x28] sm:$0xff]  ;;  %v3070_v9 = vcombine.low %v121_v56, %v121_v56  ;;  %v3078_v10 = vcombine.low %v125_v59, %v125_v59  ;;  %v3660_v59 = vld [vmem:[%s5188_s1 + $0x610] ss:$8 sps:$4 sm:$0xff]  }
  0x44   :  { %2447 = vmatpush1.bf16.msra.mxu0 %v3554_v11  ;;  %2124 = vmatprep.subr.bf16.mxu1 %v3559_v12  ;;  %v4250_v11 = vld [vmem:[%s5189_s0 + $0x68] sm:$0xff] }
  0x45   :  { %2448 = vmatprep.subr.bf16.mxu0 %v3562_v13  ;;  %2083 = vmatprep.mubr.bf16.mxu1 %v3023_v17  ;;  %v3599_v12 = vld [vmem:[%s5188_s1 + $0x180] ss:$8 sps:$4 sm:$0xff]   ;;  %v3017_v17 = vcombine.high %v4245_v8, %v4250_v11 }
  0x46   :  { %2407 = vmatprep.mubr.bf16.mxu0 %v3031_v22  ;;  %v3602_v13 = vld [vmem:[%s5188_s1 + $0x580] ss:$8 sps:$4 sm:$0xff]  }
  0x47   :  { %2125 = vmatpush1.bf16.msra.mxu1 %v3557_v16  ;;  %v3009_v16 = vcombine.high %v4235_v6, %v4240_v7  ;;  %v3611_v22 = vld [vmem:[%s5188_s1 + $0x1a0] ss:$8 sps:$4 sm:$0xff]  }
  0x48   :  { %2449 = vmatpush1.bf16.msra.mxu0 %v3560_v18  ;;  %2126 = vmatprep.subr.bf16.mxu1 %v3565_v21  ;;  %v3605_v18 = vld [vmem:[%s5188_s1 + $0x190] ss:$8 sps:$4 sm:$0xff]   ;;  %v3616_v21 = vld [vmem:[%s5188_s1 + $0x5a4] ss:$8 sps:$4 sm:$0xff]  }
  0x49   :  { %2450 = vmatprep.subr.bf16.mxu0 %v3568_v23  ;;  %v3614_v23 = vld [vmem:[%s5188_s1 + $0x5a0] ss:$8 sps:$4 sm:$0xff]  }
  0x4a   :  { %2084 = vmatmul.mubr.bf16.gmra.mrb[4].mxu1 %v3022_v26  ;;  %v3617_v26 = vld [vmem:[%s5188_s1 + $0x1b0] ss:$8 sps:$4 sm:$0xff]  }
  0x4b   :  { %2408 = vmatmul.mubr.bf16.gmra.mrb[4].mxu0 %v3030_v27  ;;  %2127 = vmatpush1.bf16.msra.mxu1 %v3563_v24  ;;  %v3619_v24 = vld [vmem:[%s5188_s1 + $0x1b4] ss:$8 sps:$4 sm:$0xff]   ;;  %v3620_v27 = vld [vmem:[%s5188_s1 + $0x5b0] ss:$8 sps:$4 sm:$0xff]  }
  0x4c   :  { %2451 = vmatpush1.bf16.msra.mxu0 %v3566_v25  ;;  %2128 = vmatprep.subr.bf16.mxu1 %v3571_v30  ;;  %v3622_v25 = vld [vmem:[%s5188_s1 + $0x5b4] ss:$8 sps:$4 sm:$0xff]   ;;  %v3623_v30 = vld [vmem:[%s5188_s1 + $0x1c0] ss:$8 sps:$4 sm:$0xff]  }
  0x4d   :  { %2452 = vmatprep.subr.bf16.mxu0 %v3574_v31  ;;  %2093 = vmatprep.mubr.bf16.mxu1 %v3039_v32  ;;  %v3626_v31 = vld [vmem:[%s5188_s1 + $0x5c0] ss:$8 sps:$4 sm:$0xff]   ;;  %v3631_v32 = vld [vmem:[%s5188_s1 + $0x1d4] ss:$8 sps:$4 sm:$0xff]  }
  0x4e   :  { %2417 = vmatprep.mubr.bf16.mxu0 %v3047_v37  ;;  %v3643_v37 = vld [vmem:[%s5188_s1 + $0x5e4] ss:$8 sps:$4 sm:$0xff]  }
  0x4f   :  { %2129 = vmatpush1.bf16.msra.mxu1 %v3569_v35  ;;  %v3632_v35 = vld [vmem:[%s5188_s1 + $0x5d0] ss:$8 sps:$4 sm:$0xff]  }
  0x50   :  { %2453 = vmatpush1.bf16.msra.mxu0 %v3572_v36  ;;  %2130 = vmatprep.subr.bf16.mxu1 %v3577_v38  ;;  %v3639_v36 = vld [vmem:[%s5188_s1 + $0x1e4] ss:$8 sps:$4 sm:$0xff]   ;;  %v3637_v38 = vld [vmem:[%s5188_s1 + $0x1e0] ss:$8 sps:$4 sm:$0xff]  }
  0x51   :  { %2454 = vmatprep.subr.bf16.mxu0 %v3580_v39  ;;  %v3641_v39 = vld [vmem:[%s5188_s1 + $0x5e0] ss:$8 sps:$4 sm:$0xff]  }
  0x52   :  { %2094 = vmatmul.mubr.bf16.gmra.mrb[8].mxu1 %v3038_v43  ;;  %v3648_v43 = vld [vmem:[%s5188_s1 + $0x5f0] ss:$8 sps:$4 sm:$0xff]  }
  0x53   :  { %2418 = vmatmul.mubr.bf16.gmra.mrb[8].mxu0 %v3046_v44  ;;  %2131 = vmatpush1.bf16.msra.mxu1 %v3575_v40  ;;  %v3647_v40 = vld [vmem:[%s5188_s1 + $0x1f4] ss:$8 sps:$4 sm:$0xff]   ;;  %v3653_v44 = vld [vmem:[%s5188_s1 + $0x204] ss:$8 sps:$4 sm:$0xff]  }
  0x54   :  { %2455 = vmatpush1.bf16.msra.mxu0 %v3578_v41  ;;  %2132 = vmatprep.subr.bf16.mxu1 %v3583_v46  ;;  %v3650_v41 = vld [vmem:[%s5188_s1 + $0x5f4] ss:$8 sps:$4 sm:$0xff]   ;;  %v74_v46 = vld [vmem:[%s5189_s0 + $0x88] sm:$0xff] }
  0x55   :  { %2456 = vmatprep.subr.bf16.mxu0 %v3586_v47  ;;  %2103 = vmatprep.mubr.bf16.mxu1 %v3055_v50  ;;  %v3651_v47 = vld [vmem:[%s5188_s1 + $0x200] ss:$8 sps:$4 sm:$0xff]   ;;  %v3008_v50 = vcombine.low %v4235_v6, %v4240_v7  ;;  %v3025_v56 = vcombine.high %v74_v46, %v82_v48  ;;  %v3671_v6 = vld [vmem:[%s5188_s1 + $0x234] ss:$8 sps:$4 sm:$0xff]  }
  0x56   :  { %2427 = vmatprep.mubr.bf16.mxu0 %v3063_v51  ;;  %v3016_v51 = vcombine.low %v4245_v8, %v4250_v11  ;;  %v3674_v7 = vld [vmem:[%s5188_s1 + $0x634] ss:$8 sps:$4 sm:$0xff]   ;;  %v3672_v11 = vld [vmem:[%s5188_s1 + $0x630] ss:$8 sps:$4 sm:$0xff]  }
  0x57   :  { %2133 = vmatpush1.bf16.msra.mxu1 %v3581_v52  ;;  %v86_v52 = vld [vmem:[%s5189_s0 + $0xe8] sm:$0xff] }
  0x58   :  { %2457 = vmatpush1.bf16.msra.mxu0 %v3584_v53  ;;  %2134 = vmatprep.subr.bf16.mxu1 %v3589_v54  ;;  %v3654_v53 = vld [vmem:[%s5188_s1 + $0x600] ss:$8 sps:$4 sm:$0xff]   ;;  %v3659_v54 = vld [vmem:[%s5188_s1 + $0x214] ss:$8 sps:$4 sm:$0xff]  }
  0x59   :  { %2458 = vmatprep.subr.bf16.mxu0 %v3592_v55  ;;  %v3662_v55 = vld [vmem:[%s5188_s1 + $0x614] ss:$8 sps:$4 sm:$0xff]  }
  0x5a   :  { %2104 = vmatmul.mubr.bf16.gmra.mrb[12].mxu1 %v3054_v57  ;;  %v3033_v57 = vcombine.high %v78_v49, %v86_v52 }
  0x5b   :  { %2428 = vmatmul.mubr.bf16.gmra.mrb[12].mxu0 %v3062_v58  ;;  %2135 = vmatpush1.bf16.msra.mxu1 %v3587_v60  ;;  %v3657_v58 = vld [vmem:[%s5188_s1 + $0x210] ss:$8 sps:$4 sm:$0xff]   ;;  %v3665_v60 = vld [vmem:[%s5188_s1 + $0x224] ss:$8 sps:$4 sm:$0xff]  }
  0x5c   :  { %2459 = vmatpush1.bf16.msra.mxu0 %v3590_v61  ;;  %2136 = vmatprep.subr.bf16.mxu1 %v3595_v62  ;;  %v3668_v61 = vld [vmem:[%s5188_s1 + $0x624] ss:$8 sps:$4 sm:$0xff]   ;;  %v3663_v62 = vld [vmem:[%s5188_s1 + $0x220] ss:$8 sps:$4 sm:$0xff]  }
  0x5d   :  { %2460 = vmatprep.subr.bf16.mxu0 %v3598_v63  ;;  %2113 = vmatprep.mubr.bf16.mxu1 %v3071_v0  ;;  %v3666_v63 = vld [vmem:[%s5188_s1 + $0x620] ss:$8 sps:$4 sm:$0xff]  }
  0x5e   :  { %2437 = vmatprep.mubr.bf16.mxu0 %v3079_v1  ;;  %v90_v0 = vld [vmem:[%s5189_s0 + $0x108] sm:$0xff]  ;;  %v3024_v1 = vcombine.low %v74_v46, %v82_v48  ;;  %v4507_v46 = vld [vmem:[%s5189_s0 + $0x30] sm:$0xff] }
  0x5f   :  { %2137 = vmatpush1.bf16.msra.mxu1 %v3593_v2  ;;  %v98_v2 = vld [vmem:[%s5189_s0 + $0x148] sm:$0xff] }
  0x60   :  { %2461 = vmatpush1.bf16.msra.mxu0 %v3596_v3  ;;  %2138 = vmatprep.subr.bf16.mxu1 %v3601_v4  ;;  %v3032_v3 = vcombine.low %v78_v49, %v86_v52  ;;  %v94_v4 = vld [vmem:[%s5189_s0 + $0x128] sm:$0xff]  ;;  %v3041_v8 = vcombine.high %v90_v0, %v98_v2  ;;  %v4512_v49 = vld [vmem:[%s5189_s0 + $0x70] sm:$0xff] }
  0x61   :  { %2462 = vmatprep.subr.bf16.mxu0 %v3604_v5  ;;  %v102_v5 = vld [vmem:[%s5189_s0 + $0x168] sm:$0xff]  ;;  %v3709_v52 = vld [vmem:[%s5188_s1 + $0x294] ss:$8 sps:$4 sm:$0xff]  }
  0x62   :  { %2114 = vmatmul.mubr.bf16.gmra.mrb[16].mxu1 %v3070_v9  ;;  %v3049_v9 = vcombine.high %v94_v4, %v102_v5 }
  0x63   :  { %2438 = vmatmul.mubr.bf16.gmra.mrb[16].mxu0 %v3078_v10  ;;  %2139 = vmatpush1.bf16.msra.mxu1 %v3599_v12  ;;  %v3669_v10 = vld [vmem:[%s5188_s1 + $0x230] ss:$8 sps:$4 sm:$0xff]   ;;  %v3677_v12 = vld [vmem:[%s5188_s1 + $0x244] ss:$8 sps:$4 sm:$0xff]  }
  0x64   :  { %2463 = vmatpush1.bf16.msra.mxu0 %v3602_v13  ;;  %2140 = vmatprep.subr.bf16.mxu1 %v3607_v14  ;;  %v3680_v13 = vld [vmem:[%s5188_s1 + $0x644] ss:$8 sps:$4 sm:$0xff]   ;;  %v3675_v14 = vld [vmem:[%s5188_s1 + $0x240] ss:$8 sps:$4 sm:$0xff]  }
  0x65   :  { %2464 = vmatprep.subr.bf16.mxu0 %v3610_v15  ;;  %2154 = vmatprep.mubr.bf16.mxu1 %v3009_v16  ;;  %v3678_v15 = vld [vmem:[%s5188_s1 + $0x640] ss:$8 sps:$4 sm:$0xff]  }
  0x66   :  { %2478 = vmatprep.mubr.bf16.mxu0 %v3017_v17  ;;  %v106_v16 = vld [vmem:[%s5189_s0 + $0x188] sm:$0xff] }
  0x67   :  { %2141 = vmatpush1.bf16.msra.mxu1 %v3605_v18  ;;  %v114_v17 = vld [vmem:[%s5189_s0 + $0x1c8] sm:$0xff]  ;;  %v3040_v18 = vcombine.low %v90_v0, %v98_v2  ;;  %v3719_v0 = vld [vmem:[%s5188_s1 + $0x2b0] ss:$8 sps:$4 sm:$0xff]  }
  0x68   :  { %2465 = vmatpush1.bf16.msra.mxu0 %v3608_v19  ;;  %2142 = vmatprep.subr.bf16.mxu1 %v3613_v20  ;;  %v3048_v19 = vcombine.low %v94_v4, %v102_v5  ;;  %v110_v20 = vld [vmem:[%s5189_s0 + $0x1a8] sm:$0xff] }
  0x69   :  { %2466 = vmatprep.subr.bf16.mxu0 %v3616_v21  ;;  %v118_v21 = vld [vmem:[%s5189_s0 + $0x1e8] sm:$0xff] }
  0x6a   :  { %v3727_v2 = vld [vmem:[%s5188_s1 + $0x2c4] ss:$8 sps:$4 sm:$0xff]   ;;  %v3725_v4 = vld [vmem:[%s5188_s1 + $0x2c0] ss:$8 sps:$4 sm:$0xff]  }
  0x6b   :  { %2143 = vmatpush1.bf16.msra.mxu1 %v3611_v22  ;;  %v3683_v22 = vld [vmem:[%s5188_s1 + $0x254] ss:$8 sps:$4 sm:$0xff]   ;;  %v3728_v5 = vld [vmem:[%s5188_s1 + $0x6c0] ss:$8 sps:$4 sm:$0xff]  }
  0x6c   :  { %2467 = vmatpush1.bf16.msra.mxu0 %v3614_v23  ;;  %2144 = vmatprep.subr.bf16.mxu1 %v3619_v24  ;;  %v3686_v23 = vld [vmem:[%s5188_s1 + $0x654] ss:$8 sps:$4 sm:$0xff]   ;;  %v3057_v24 = vcombine.high %v106_v16, %v114_v17 }
  0x6d   :  { %2468 = vmatprep.subr.bf16.mxu0 %v3622_v25  ;;  %v3065_v25 = vcombine.high %v110_v20, %v118_v21 }
  0x6f   :  { %2145 = vmatpush1.bf16.msra.mxu1 %v3617_v26  ;;  %v3681_v26 = vld [vmem:[%s5188_s1 + $0x250] ss:$8 sps:$4 sm:$0xff]  }
  0x70   :  { %2469 = vmatpush1.bf16.msra.mxu0 %v3620_v27  ;;  %2146 = vmatprep.subr.bf16.mxu1 %v3625_v28  ;;  %v3684_v27 = vld [vmem:[%s5188_s1 + $0x650] ss:$8 sps:$4 sm:$0xff]   ;;  %v3689_v28 = vld [vmem:[%s5188_s1 + $0x264] ss:$8 sps:$4 sm:$0xff]  }
  0x71   :  { %2470 = vmatprep.subr.bf16.mxu0 %v3628_v29  ;;  %v3692_v29 = vld [vmem:[%s5188_s1 + $0x664] ss:$8 sps:$4 sm:$0xff]  }
  0x73   :  { %2147 = vmatpush1.bf16.msra.mxu1 %v3623_v30  ;;  %v122_v30 = vld [vmem:[%s5189_s0 + $0x208] sm:$0xff] }
  0x74   :  { %2471 = vmatpush1.bf16.msra.mxu0 %v3626_v31  ;;  %2148 = vmatprep.subr.bf16.mxu1 %v3631_v32  ;;  %v3056_v31 = vcombine.low %v106_v16, %v114_v17  ;;  %v3064_v32 = vcombine.low %v110_v20, %v118_v21  ;;  %v3745_v16 = vld [vmem:[%s5188_s1 + $0x2f0] ss:$8 sps:$4 sm:$0xff]  }
  0x75   :  { %2472 = vmatprep.subr.bf16.mxu0 %v3634_v33  ;;  %v126_v33 = vld [vmem:[%s5189_s0 + $0x228] sm:$0xff]  ;;  %v3748_v17 = vld [vmem:[%s5188_s1 + $0x6f0] ss:$8 sps:$4 sm:$0xff]  }
  0x76   :  { %v3080_v48 = vcombine.low %v126_v33, %v126_v33  ;;  %v75_v20 = vld [vmem:[%s5189_s0 + $0x90] sm:$0xff] }
  0x77   :  { %2149 = vmatpush1.bf16.msra.mxu1 %v3629_v34  ;;  %v3687_v34 = vld [vmem:[%s5188_s1 + $0x260] ss:$8 sps:$4 sm:$0xff]  }
  0x78   :  { %2473 = vmatpush1.bf16.msra.mxu0 %v3632_v35  ;;  %2150 = vmatprep.subr.bf16.mxu1 %v3639_v36  ;;  %v3690_v35 = vld [vmem:[%s5188_s1 + $0x660] ss:$8 sps:$4 sm:$0xff]   ;;  %v3695_v36 = vld [vmem:[%s5188_s1 + $0x274] ss:$8 sps:$4 sm:$0xff]  }
  0x79   :  { %2474 = vmatprep.subr.bf16.mxu0 %v3643_v37  ;;  %v3698_v37 = vld [vmem:[%s5188_s1 + $0x674] ss:$8 sps:$4 sm:$0xff]  }
  0x7b   :  { %2151 = vmatpush1.bf16.msra.mxu1 %v3637_v38  ;;  %v3073_v38 = vcombine.high %v122_v30, %v122_v30 }
  0x7c   :  { %2475 = vmatpush1.bf16.msra.mxu0 %v3641_v39  ;;  %2152 = vmatprep.subr.bf16.mxu1 %v3647_v40  ;;  %v3081_v39 = vcombine.high %v126_v33, %v126_v33  ;;  %v3693_v40 = vld [vmem:[%s5188_s1 + $0x270] ss:$8 sps:$4 sm:$0xff]  }
  0x7d   :  { %2476 = vmatprep.subr.bf16.mxu0 %v3650_v41  ;;  %v3696_v41 = vld [vmem:[%s5188_s1 + $0x670] ss:$8 sps:$4 sm:$0xff]  }
  0x7e   :  { %v3760_v33 = vld [vmem:[%s5188_s1 + $0x710] ss:$8 sps:$4 sm:$0xff]  }
  0x7f   :  { %2153 = vmatpush1.bf16.msra.mxu1 %v3645_v42  ;;  %v3703_v42 = vld [vmem:[%s5188_s1 + $0x284] ss:$8 sps:$4 sm:$0xff]  }
  0x80   :  { %2477 = vmatpush1.bf16.msra.mxu0 %v3648_v43  ;;  %2203 = vmatprep.subr.bf16.mxu1 %v3653_v44  ;;  %v3706_v43 = vld [vmem:[%s5188_s1 + $0x684] ss:$8 sps:$4 sm:$0xff]   ;;  %v4497_v44 = vld [vmem:[%s5189_s0 + $0x10] sm:$0xff] }
  0x81   :  { %2527 = vmatprep.subr.bf16.mxu0 %v3656_v45  ;;  %v4502_v45 = vld [vmem:[%s5189_s0 + $0x50] sm:$0xff] }
  0x82   :  { %2155 = vmatmul.mubr.bf16.vlgmr.msra.gmra.mrb[0].mxu1 %v3008_v50  ;;  %v3701_v50 = vld [vmem:[%s5188_s1 + $0x280] ss:$8 sps:$4 sm:$0xff]   ;;  %v3010_v21 = vcombine.low %v4497_v44, %v4502_v45 }
  0x83   :  { %2479 = vmatmul.mubr.bf16.vlgmr.msra.gmra.mrb[0].mxu0 %v3016_v51  ;;  %2204 = vmatpush1.bf16.msra.mxu1 %v3651_v47  ;;  %v3072_v47 = vcombine.low %v122_v30, %v122_v30  ;;  %v3704_v51 = vld [vmem:[%s5188_s1 + $0x680] ss:$8 sps:$4 sm:$0xff]  }
  0x84   :  { %2528 = vmatpush1.bf16.msra.mxu0 %v3654_v53  ;;  %2205 = vmatprep.subr.bf16.mxu1 %v3659_v54  ;;  %v3712_v53 = vld [vmem:[%s5188_s1 + $0x694] ss:$8 sps:$4 sm:$0xff]   ;;  %v3011_v54 = vcombine.high %v4497_v44, %v4502_v45 }
  0x85   :  { %2529 = vmatprep.subr.bf16.mxu0 %v3662_v55  ;;  %2164 = vmatprep.mubr.bf16.mxu1 %v3025_v56  ;;  %v3019_v55 = vcombine.high %v4507_v46, %v4512_v49  ;;  %v3707_v56 = vld [vmem:[%s5188_s1 + $0x290] ss:$8 sps:$4 sm:$0xff]   ;;  %v3771_v44 = vld [vmem:[%s5188_s1 + $0x334] ss:$8 sps:$4 sm:$0xff]  }
  0x86   :  { %2488 = vmatprep.mubr.bf16.mxu0 %v3033_v57  ;;  %v3710_v57 = vld [vmem:[%s5188_s1 + $0x690] ss:$8 sps:$4 sm:$0xff]   ;;  %v3774_v45 = vld [vmem:[%s5188_s1 + $0x734] ss:$8 sps:$4 sm:$0xff]  }
  0x87   :  { %2206 = vmatpush1.bf16.msra.mxu1 %v3657_v58  ;;  %v3715_v58 = vld [vmem:[%s5188_s1 + $0x2a4] ss:$8 sps:$4 sm:$0xff]  }
  0x88   :  { %2530 = vmatpush1.bf16.msra.mxu0 %v3660_v59  ;;  %2207 = vmatprep.subr.bf16.mxu1 %v3665_v60  ;;  %v3718_v59 = vld [vmem:[%s5188_s1 + $0x6a4] ss:$8 sps:$4 sm:$0xff]   ;;  %v3713_v60 = vld [vmem:[%s5188_s1 + $0x2a0] ss:$8 sps:$4 sm:$0xff]  }
  0x89   :  { %2531 = vmatprep.subr.bf16.mxu0 %v3668_v61  ;;  %v3716_v61 = vld [vmem:[%s5188_s1 + $0x6a0] ss:$8 sps:$4 sm:$0xff]  }
  0x8a   :  { %2165 = vmatmul.mubr.bf16.gmra.mrb[4].mxu1 %v3024_v1  ;;  %v3722_v1 = vld [vmem:[%s5188_s1 + $0x6b0] ss:$8 sps:$4 sm:$0xff]  }
  0x8b   :  { %2489 = vmatmul.mubr.bf16.gmra.mrb[4].mxu0 %v3032_v3  ;;  %2208 = vmatpush1.bf16.msra.mxu1 %v3663_v62  ;;  %v3721_v62 = vld [vmem:[%s5188_s1 + $0x2b4] ss:$8 sps:$4 sm:$0xff]   ;;  %v3730_v3 = vld [vmem:[%s5188_s1 + $0x6c4] ss:$8 sps:$4 sm:$0xff]  }
  0x8c   :  { %2532 = vmatpush1.bf16.msra.mxu0 %v3666_v63  ;;  %2209 = vmatprep.subr.bf16.mxu1 %v3671_v6  ;;  %v3724_v63 = vld [vmem:[%s5188_s1 + $0x6b4] ss:$8 sps:$4 sm:$0xff]  }
  0x8d   :  { %2533 = vmatprep.subr.bf16.mxu0 %v3674_v7  ;;  %2174 = vmatprep.mubr.bf16.mxu1 %v3041_v8  ;;  %v3733_v6 = vld [vmem:[%s5188_s1 + $0x2d4] ss:$8 sps:$4 sm:$0xff]   ;;  %v3731_v8 = vld [vmem:[%s5188_s1 + $0x2d0] ss:$8 sps:$4 sm:$0xff]  }
  0x8e   :  { %2498 = vmatprep.mubr.bf16.mxu0 %v3049_v9  ;;  %v3736_v7 = vld [vmem:[%s5188_s1 + $0x6d4] ss:$8 sps:$4 sm:$0xff]   ;;  %v3734_v9 = vld [vmem:[%s5188_s1 + $0x6d0] ss:$8 sps:$4 sm:$0xff]  }
  0x8f   :  { %2210 = vmatpush1.bf16.msra.mxu1 %v3669_v10  ;;  %v3739_v10 = vld [vmem:[%s5188_s1 + $0x2e4] ss:$8 sps:$4 sm:$0xff]  }
  0x90   :  { %2534 = vmatpush1.bf16.msra.mxu0 %v3672_v11  ;;  %2211 = vmatprep.subr.bf16.mxu1 %v3677_v12  ;;  %v3743_v11 = vld [vmem:[%s5188_s1 + $0x6e4] ss:$8 sps:$4 sm:$0xff]   ;;  %v3737_v12 = vld [vmem:[%s5188_s1 + $0x2e0] ss:$8 sps:$4 sm:$0xff]  }
  0x91   :  { %2535 = vmatprep.subr.bf16.mxu0 %v3680_v13  ;;  %v3741_v13 = vld [vmem:[%s5188_s1 + $0x6e0] ss:$8 sps:$4 sm:$0xff]  }
  0x92   :  { %2175 = vmatmul.mubr.bf16.gmra.mrb[8].mxu1 %v3040_v18  ;;  %v3753_v18 = vld [vmem:[%s5188_s1 + $0x304] ss:$8 sps:$4 sm:$0xff]  }
  0x93   :  { %2499 = vmatmul.mubr.bf16.gmra.mrb[8].mxu0 %v3048_v19  ;;  %2212 = vmatpush1.bf16.msra.mxu1 %v3675_v14  ;;  %v3747_v14 = vld [vmem:[%s5188_s1 + $0x2f4] ss:$8 sps:$4 sm:$0xff]   ;;  %v3756_v19 = vld [vmem:[%s5188_s1 + $0x704] ss:$8 sps:$4 sm:$0xff]  }
  0x94   :  { %2536 = vmatpush1.bf16.msra.mxu0 %v3678_v15  ;;  %2213 = vmatprep.subr.bf16.mxu1 %v3683_v22  ;;  %v3750_v15 = vld [vmem:[%s5188_s1 + $0x6f4] ss:$8 sps:$4 sm:$0xff]   ;;  %v3018_v22 = vcombine.low %v4507_v46, %v4512_v49  ;;  %v3772_v49 = vld [vmem:[%s5188_s1 + $0x730] ss:$8 sps:$4 sm:$0xff]  }
  0x95   :  { %2537 = vmatprep.subr.bf16.mxu0 %v3686_v23  ;;  %2184 = vmatprep.mubr.bf16.mxu1 %v3057_v24  ;;  %v83_v23 = vld [vmem:[%s5189_s0 + $0xd0] sm:$0xff] }
  0x96   :  { %2508 = vmatprep.mubr.bf16.mxu0 %v3065_v25  ;;  %v79_v24 = vld [vmem:[%s5189_s0 + $0xb0] sm:$0xff]  ;;  %v3027_v30 = vcombine.high %v75_v20, %v83_v23 }
  0x97   :  { %2214 = vmatpush1.bf16.msra.mxu1 %v3681_v26  ;;  %v87_v25 = vld [vmem:[%s5189_s0 + $0xf0] sm:$0xff]  ;;  %v3751_v26 = vld [vmem:[%s5188_s1 + $0x300] ss:$8 sps:$4 sm:$0xff]  }
  0x98   :  { %2538 = vmatpush1.bf16.msra.mxu0 %v3684_v27  ;;  %2215 = vmatprep.subr.bf16.mxu1 %v3689_v28  ;;  %v3754_v27 = vld [vmem:[%s5188_s1 + $0x700] ss:$8 sps:$4 sm:$0xff]   ;;  %v3759_v28 = vld [vmem:[%s5188_s1 + $0x314] ss:$8 sps:$4 sm:$0xff]  }
  0x99   :  { %2539 = vmatprep.subr.bf16.mxu0 %v3692_v29  ;;  %v3762_v29 = vld [vmem:[%s5188_s1 + $0x714] ss:$8 sps:$4 sm:$0xff]  }
  0x9a   :  { %2185 = vmatmul.mubr.bf16.gmra.mrb[12].mxu1 %v3056_v31  ;;  %v3035_v31 = vcombine.high %v79_v24, %v87_v25 }
  0x9b   :  { %2509 = vmatmul.mubr.bf16.gmra.mrb[12].mxu0 %v3064_v32  ;;  %2216 = vmatpush1.bf16.msra.mxu1 %v3687_v34  ;;  %v3757_v32 = vld [vmem:[%s5188_s1 + $0x310] ss:$8 sps:$4 sm:$0xff]   ;;  %v3765_v34 = vld [vmem:[%s5188_s1 + $0x324] ss:$8 sps:$4 sm:$0xff]  }
  0x9c   :  { %2540 = vmatpush1.bf16.msra.mxu0 %v3690_v35  ;;  %2217 = vmatprep.subr.bf16.mxu1 %v3695_v36  ;;  %v3768_v35 = vld [vmem:[%s5188_s1 + $0x724] ss:$8 sps:$4 sm:$0xff]   ;;  %v91_v36 = vld [vmem:[%s5189_s0 + $0x110] sm:$0xff] }
  0x9d   :  { %2541 = vmatprep.subr.bf16.mxu0 %v3698_v37  ;;  %2194 = vmatprep.mubr.bf16.mxu1 %v3073_v38  ;;  %v3026_v37 = vcombine.low %v75_v20, %v83_v23  ;;  %v99_v38 = vld [vmem:[%s5189_s0 + $0x150] sm:$0xff]  ;;  %v4774_v23 = vld [vmem:[%s5189_s0 + $0x78] sm:$0xff] }
  0x9e   :  { %2518 = vmatprep.mubr.bf16.mxu0 %v3081_v39  ;;  %v3034_v39 = vcombine.low %v79_v24, %v87_v25  ;;  %v3043_v46 = vcombine.high %v91_v36, %v99_v38  ;;  %v3801_v24 = vld [vmem:[%s5188_s1 + $0x380] ss:$8 sps:$4 sm:$0xff]  }
  0x9f   :  { %2218 = vmatpush1.bf16.msra.mxu1 %v3693_v40  ;;  %v95_v40 = vld [vmem:[%s5189_s0 + $0x130] sm:$0xff]  ;;  %v3804_v25 = vld [vmem:[%s5188_s1 + $0x780] ss:$8 sps:$4 sm:$0xff]  }
  0xa0   :  { %2542 = vmatpush1.bf16.msra.mxu0 %v3696_v41  ;;  %2219 = vmatprep.subr.bf16.mxu1 %v3703_v42  ;;  %v103_v41 = vld [vmem:[%s5189_s0 + $0x170] sm:$0xff]  ;;  %v3763_v42 = vld [vmem:[%s5188_s1 + $0x320] ss:$8 sps:$4 sm:$0xff]  }
  0xa1   :  { %2543 = vmatprep.subr.bf16.mxu0 %v3706_v43  ;;  %v3766_v43 = vld [vmem:[%s5188_s1 + $0x720] ss:$8 sps:$4 sm:$0xff]  }
  0xa2   :  { %2195 = vmatmul.mubr.bf16.gmra.mrb[20].mxu1 %v3072_v47  ;;  %v3051_v47 = vcombine.high %v95_v40, %v103_v41 }
  0xa3   :  { %2519 = vmatmul.mubr.bf16.gmra.mrb[20].mxu0 %v3080_v48  ;;  %2220 = vmatpush1.bf16.msra.mxu1 %v3701_v50  ;;  %v3769_v48 = vld [vmem:[%s5188_s1 + $0x330] ss:$8 sps:$4 sm:$0xff]   ;;  %v3777_v50 = vld [vmem:[%s5188_s1 + $0x344] ss:$8 sps:$4 sm:$0xff]  }
  0xa4   :  { %2544 = vmatpush1.bf16.msra.mxu0 %v3704_v51  ;;  %2221 = vmatprep.subr.bf16.mxu1 %v3709_v52  ;;  %v3780_v51 = vld [vmem:[%s5188_s1 + $0x744] ss:$8 sps:$4 sm:$0xff]   ;;  %v107_v52 = vld [vmem:[%s5189_s0 + $0x190] sm:$0xff] }
  0xa5   :  { %2545 = vmatprep.subr.bf16.mxu0 %v3712_v53  ;;  %2235 = vmatprep.mubr.bf16.mxu1 %v3011_v54  ;;  %v3042_v53 = vcombine.low %v91_v36, %v99_v38  ;;  %v115_v54 = vld [vmem:[%s5189_s0 + $0x1d0] sm:$0xff] }
  0xa6   :  { %2559 = vmatprep.mubr.bf16.mxu0 %v3019_v55  ;;  %v3050_v55 = vcombine.low %v95_v40, %v103_v41  ;;  %v3821_v36 = vld [vmem:[%s5188_s1 + $0x3b4] ss:$8 sps:$4 sm:$0xff]   ;;  %v3819_v38 = vld [vmem:[%s5188_s1 + $0x3b0] ss:$8 sps:$4 sm:$0xff]   ;;  %v3827_v40 = vld [vmem:[%s5188_s1 + $0x3c4] ss:$8 sps:$4 sm:$0xff]  }
  0xa7   :  { %2222 = vmatpush1.bf16.msra.mxu1 %v3707_v56  ;;  %v111_v56 = vld [vmem:[%s5189_s0 + $0x1b0] sm:$0xff]  ;;  %v3830_v41 = vld [vmem:[%s5188_s1 + $0x7c4] ss:$8 sps:$4 sm:$0xff]  }
  0xa8   :  { %2546 = vmatpush1.bf16.msra.mxu0 %v3710_v57  ;;  %2223 = vmatprep.subr.bf16.mxu1 %v3715_v58  ;;  %v119_v57 = vld [vmem:[%s5189_s0 + $0x1f0] sm:$0xff]  ;;  %v3775_v58 = vld [vmem:[%s5188_s1 + $0x340] ss:$8 sps:$4 sm:$0xff]  }
  0xa9   :  { %2547 = vmatprep.subr.bf16.mxu0 %v3718_v59  ;;  %v3778_v59 = vld [vmem:[%s5188_s1 + $0x740] ss:$8 sps:$4 sm:$0xff]  }
  0xab   :  { %2224 = vmatpush1.bf16.msra.mxu1 %v3713_v60  ;;  %v3783_v60 = vld [vmem:[%s5188_s1 + $0x354] ss:$8 sps:$4 sm:$0xff]  }
  0xac   :  { %2548 = vmatpush1.bf16.msra.mxu0 %v3716_v61  ;;  %2225 = vmatprep.subr.bf16.mxu1 %v3721_v62  ;;  %v3786_v61 = vld [vmem:[%s5188_s1 + $0x754] ss:$8 sps:$4 sm:$0xff]   ;;  %v3059_v62 = vcombine.high %v107_v52, %v115_v54 }
  0xad   :  { %2549 = vmatprep.subr.bf16.mxu0 %v3724_v63  ;;  %v3067_v63 = vcombine.high %v111_v56, %v119_v57 }
  0xaf   :  { %2226 = vmatpush1.bf16.msra.mxu1 %v3719_v0  ;;  %v3781_v0 = vld [vmem:[%s5188_s1 + $0x350] ss:$8 sps:$4 sm:$0xff]  }
  0xb0   :  { %2550 = vmatpush1.bf16.msra.mxu0 %v3722_v1  ;;  %2227 = vmatprep.subr.bf16.mxu1 %v3727_v2  ;;  %v3784_v1 = vld [vmem:[%s5188_s1 + $0x750] ss:$8 sps:$4 sm:$0xff]   ;;  %v3789_v2 = vld [vmem:[%s5188_s1 + $0x364] ss:$8 sps:$4 sm:$0xff]  }
  0xb1   :  { %2551 = vmatprep.subr.bf16.mxu0 %v3730_v3  ;;  %v3792_v3 = vld [vmem:[%s5188_s1 + $0x764] ss:$8 sps:$4 sm:$0xff]  }
  0xb3   :  { %2228 = vmatpush1.bf16.msra.mxu1 %v3725_v4  ;;  %v3058_v4 = vcombine.low %v107_v52, %v115_v54  ;;  %v3847_v52 = vld [vmem:[%s5188_s1 + $0x3f4] ss:$8 sps:$4 sm:$0xff]   ;;  %v3845_v54 = vld [vmem:[%s5188_s1 + $0x3f0] ss:$8 sps:$4 sm:$0xff]  }
  0xb4   :  { %2552 = vmatpush1.bf16.msra.mxu0 %v3728_v5  ;;  %2229 = vmatprep.subr.bf16.mxu1 %v3733_v6  ;;  %v123_v5 = vld [vmem:[%s5189_s0 + $0x210] sm:$0xff]  ;;  %v3066_v6 = vcombine.low %v111_v56, %v119_v57  ;;  %v76_v56 = vld [vmem:[%s5189_s0 + $0x98] sm:$0xff] }
  0xb5   :  { %2553 = vmatprep.subr.bf16.mxu0 %v3736_v7  ;;  %v127_v7 = vld [vmem:[%s5189_s0 + $0x230] sm:$0xff]  ;;  %v84_v57 = vld [vmem:[%s5189_s0 + $0xd8] sm:$0xff] }
  0xb6   :  { %v3082_v20 = vcombine.low %v127_v7, %v127_v7 }
  0xb7   :  { %2230 = vmatpush1.bf16.msra.mxu1 %v3731_v8  ;;  %v3787_v8 = vld [vmem:[%s5188_s1 + $0x360] ss:$8 sps:$4 sm:$0xff]  }
  0xb8   :  { %2554 = vmatpush1.bf16.msra.mxu0 %v3734_v9  ;;  %2231 = vmatprep.subr.bf16.mxu1 %v3739_v10  ;;  %v3790_v9 = vld [vmem:[%s5188_s1 + $0x760] ss:$8 sps:$4 sm:$0xff]   ;;  %v3795_v10 = vld [vmem:[%s5188_s1 + $0x374] ss:$8 sps:$4 sm:$0xff]  }
  0xb9   :  { %2555 = vmatprep.subr.bf16.mxu0 %v3743_v11  ;;  %v3798_v11 = vld [vmem:[%s5188_s1 + $0x774] ss:$8 sps:$4 sm:$0xff]  }
  0xbb   :  { %2232 = vmatpush1.bf16.msra.mxu1 %v3737_v12  ;;  %v3075_v12 = vcombine.high %v123_v5, %v123_v5 }
  0xbc   :  { %2556 = vmatpush1.bf16.msra.mxu0 %v3741_v13  ;;  %2233 = vmatprep.subr.bf16.mxu1 %v3747_v14  ;;  %v3083_v13 = vcombine.high %v127_v7, %v127_v7  ;;  %v3793_v14 = vld [vmem:[%s5188_s1 + $0x370] ss:$8 sps:$4 sm:$0xff]  }
  0xbd   :  { %2557 = vmatprep.subr.bf16.mxu0 %v3750_v15  ;;  %v3796_v15 = vld [vmem:[%s5188_s1 + $0x770] ss:$8 sps:$4 sm:$0xff]  }
  0xbf   :  { %2234 = vmatpush1.bf16.msra.mxu1 %v3745_v16  ;;  %v3803_v16 = vld [vmem:[%s5188_s1 + $0x384] ss:$8 sps:$4 sm:$0xff]  }
  0xc0   :  { %2558 = vmatpush1.bf16.msra.mxu0 %v3748_v17  ;;  %2284 = vmatprep.subr.bf16.mxu1 %v3753_v18  ;;  %v3806_v17 = vld [vmem:[%s5188_s1 + $0x784] ss:$8 sps:$4 sm:$0xff]   ;;  %v4759_v18 = vld [vmem:[%s5189_s0 + $0x18] sm:$0xff] }
  0xc1   :  { %2608 = vmatprep.subr.bf16.mxu0 %v3756_v19  ;;  %v3074_v19 = vcombine.low %v123_v5, %v123_v5 }
  0xc2   :  { %2236 = vmatmul.mubr.bf16.vlgmr.msra.gmra.mrb[0].mxu1 %v3010_v21  ;;  %v4764_v21 = vld [vmem:[%s5189_s0 + $0x58] sm:$0xff] }
  0xc3   :  { %2560 = vmatmul.mubr.bf16.vlgmr.msra.gmra.mrb[0].mxu0 %v3018_v22  ;;  %2285 = vmatpush1.bf16.msra.mxu1 %v3751_v26  ;;  %v4769_v22 = vld [vmem:[%s5189_s0 + $0x38] sm:$0xff] }
  0xc4   :  { %2609 = vmatpush1.bf16.msra.mxu0 %v3754_v27  ;;  %2286 = vmatprep.subr.bf16.mxu1 %v3759_v28  ;;  %v3809_v26 = vld [vmem:[%s5188_s1 + $0x394] ss:$8 sps:$4 sm:$0xff]   ;;  %v3013_v28 = vcombine.high %v4759_v18, %v4764_v21 }
  0xc5   :  { %2610 = vmatprep.subr.bf16.mxu0 %v3762_v29  ;;  %2245 = vmatprep.mubr.bf16.mxu1 %v3027_v30  ;;  %v3812_v27 = vld [vmem:[%s5188_s1 + $0x794] ss:$8 sps:$4 sm:$0xff]   ;;  %v3021_v29 = vcombine.high %v4769_v22, %v4774_v23  ;;  %v3807_v30 = vld [vmem:[%s5188_s1 + $0x390] ss:$8 sps:$4 sm:$0xff]  }
  0xc6   :  { %2569 = vmatprep.mubr.bf16.mxu0 %v3035_v31  ;;  %v3810_v31 = vld [vmem:[%s5188_s1 + $0x790] ss:$8 sps:$4 sm:$0xff]  }
  0xc7   :  { %2287 = vmatpush1.bf16.msra.mxu1 %v3757_v32  ;;  %v3815_v32 = vld [vmem:[%s5188_s1 + $0x3a4] ss:$8 sps:$4 sm:$0xff]  }
  0xc8   :  { %2611 = vmatpush1.bf16.msra.mxu0 %v3760_v33  ;;  %2288 = vmatprep.subr.bf16.mxu1 %v3765_v34  ;;  %v3818_v33 = vld [vmem:[%s5188_s1 + $0x7a4] ss:$8 sps:$4 sm:$0xff]   ;;  %v3813_v34 = vld [vmem:[%s5188_s1 + $0x3a0] ss:$8 sps:$4 sm:$0xff]  }
  0xc9   :  { %2612 = vmatprep.subr.bf16.mxu0 %v3768_v35  ;;  %v3816_v35 = vld [vmem:[%s5188_s1 + $0x7a0] ss:$8 sps:$4 sm:$0xff]  }
  0xca   :  { %2246 = vmatmul.mubr.bf16.gmra.mrb[4].mxu1 %v3026_v37  ;;  %v3824_v37 = vld [vmem:[%s5188_s1 + $0x7b4] ss:$8 sps:$4 sm:$0xff]  }
  0xcb   :  { %2570 = vmatmul.mubr.bf16.gmra.mrb[4].mxu0 %v3034_v39  ;;  %2289 = vmatpush1.bf16.msra.mxu1 %v3763_v42  ;;  %v3822_v39 = vld [vmem:[%s5188_s1 + $0x7b0] ss:$8 sps:$4 sm:$0xff]   ;;  %v3825_v42 = vld [vmem:[%s5188_s1 + $0x3c0] ss:$8 sps:$4 sm:$0xff]  }
  0xcc   :  { %2613 = vmatpush1.bf16.msra.mxu0 %v3766_v43  ;;  %2290 = vmatprep.subr.bf16.mxu1 %v3771_v44  ;;  %v3828_v43 = vld [vmem:[%s5188_s1 + $0x7c0] ss:$8 sps:$4 sm:$0xff]   ;;  %v3833_v44 = vld [vmem:[%s5188_s1 + $0x3d4] ss:$8 sps:$4 sm:$0xff]  }
  0xcd   :  { %2614 = vmatprep.subr.bf16.mxu0 %v3774_v45  ;;  %2255 = vmatprep.mubr.bf16.mxu1 %v3043_v46  ;;  %v3836_v45 = vld [vmem:[%s5188_s1 + $0x7d4] ss:$8 sps:$4 sm:$0xff]   ;;  %v3831_v46 = vld [vmem:[%s5188_s1 + $0x3d0] ss:$8 sps:$4 sm:$0xff]  }
  0xce   :  { %2579 = vmatprep.mubr.bf16.mxu0 %v3051_v47  ;;  %v3834_v47 = vld [vmem:[%s5188_s1 + $0x7d0] ss:$8 sps:$4 sm:$0xff]  }
  0xcf   :  { %2291 = vmatpush1.bf16.msra.mxu1 %v3769_v48  ;;  %v3840_v48 = vld [vmem:[%s5188_s1 + $0x3e4] ss:$8 sps:$4 sm:$0xff]  }
  0xd0   :  { %2615 = vmatpush1.bf16.msra.mxu0 %v3772_v49  ;;  %2292 = vmatprep.subr.bf16.mxu1 %v3777_v50  ;;  %v3844_v49 = vld [vmem:[%s5188_s1 + $0x7e4] ss:$8 sps:$4 sm:$0xff]   ;;  %v3838_v50 = vld [vmem:[%s5188_s1 + $0x3e0] ss:$8 sps:$4 sm:$0xff]  }
  0xd1   :  { %2616 = vmatprep.subr.bf16.mxu0 %v3780_v51  ;;  %v3842_v51 = vld [vmem:[%s5188_s1 + $0x7e0] ss:$8 sps:$4 sm:$0xff]  }
  0xd2   :  { %2256 = vmatmul.mubr.bf16.gmra.mrb[8].mxu1 %v3042_v53  ;;  %v3850_v53 = vld [vmem:[%s5188_s1 + $0x7f4] ss:$8 sps:$4 sm:$0xff]  }
  0xd3   :  { %2580 = vmatmul.mubr.bf16.gmra.mrb[8].mxu0 %v3050_v55  ;;  %2293 = vmatpush1.bf16.msra.mxu1 %v3775_v58  ;;  %v3848_v55 = vld [vmem:[%s5188_s1 + $0x7f0] ss:$8 sps:$4 sm:$0xff]  }
  0xd4   :  { %2617 = vmatpush1.bf16.msra.mxu0 %v3778_v59  ;;  %2294 = vmatprep.subr.bf16.mxu1 %v3783_v60  ;;  %v80_v58 = vld [vmem:[%s5189_s0 + $0xb8] sm:$0xff]  ;;  %v3012_v60 = vcombine.low %v4759_v18, %v4764_v21 }
  0xd5   :  { %2618 = vmatprep.subr.bf16.mxu0 %v3786_v61  ;;  %2265 = vmatprep.mubr.bf16.mxu1 %v3059_v62  ;;  %v88_v59 = vld [vmem:[%s5189_s0 + $0xf8] sm:$0xff]  ;;  %v3020_v61 = vcombine.low %v4769_v22, %v4774_v23  ;;  %v3029_v62 = vcombine.high %v76_v56, %v84_v57 }
  0xd6   :  { %2589 = vmatprep.mubr.bf16.mxu0 %v3067_v63  ;;  %v3037_v63 = vcombine.high %v80_v58, %v88_v59  ;;  %v3036_v5 = vcombine.low %v80_v58, %v88_v59 }
  0xd7   :  { %2295 = vmatpush1.bf16.msra.mxu1 %v3781_v0  ;;  %v92_v0 = vld [vmem:[%s5189_s0 + $0x118] sm:$0xff] }
  0xd8   :  { %2619 = vmatpush1.bf16.msra.mxu0 %v3784_v1  ;;  %2296 = vmatprep.subr.bf16.mxu1 %v3789_v2  ;;  %v100_v1 = vld [vmem:[%s5189_s0 + $0x158] sm:$0xff] }
  0xd9   :  { %2620 = vmatprep.subr.bf16.mxu0 %v3792_v3  ;;  %v96_v2 = vld [vmem:[%s5189_s0 + $0x138] sm:$0xff] }
  0xda   :  { %2266 = vmatmul.mubr.bf16.gmra.mrb[12].mxu1 %v3058_v4  ;;  %v104_v3 = vld [vmem:[%s5189_s0 + $0x178] sm:$0xff]  ;;  %v3028_v4 = vcombine.low %v76_v56, %v84_v57 }
  0xdb   :  { %2590 = vmatmul.mubr.bf16.gmra.mrb[12].mxu0 %v3066_v6  ;;  %2297 = vmatpush1.bf16.msra.mxu1 %v3787_v8  ;;  %v3045_v6 = vcombine.high %v92_v0, %v100_v1  ;;  %v3053_v7 = vcombine.high %v96_v2, %v104_v3  ;;  %v108_v8 = vld [vmem:[%s5189_s0 + $0x198] sm:$0xff] }
  0xdc   :  { %2621 = vmatpush1.bf16.msra.mxu0 %v3790_v9  ;;  %2298 = vmatprep.subr.bf16.mxu1 %v3795_v10  ;;  %v116_v9 = vld [vmem:[%s5189_s0 + $0x1d8] sm:$0xff] }
  0xdd   :  { %2622 = vmatprep.subr.bf16.mxu0 %v3798_v11  ;;  %2275 = vmatprep.mubr.bf16.mxu1 %v3075_v12  ;;  %v112_v10 = vld [vmem:[%s5189_s0 + $0x1b8] sm:$0xff]  ;;  %v3044_v12 = vcombine.low %v92_v0, %v100_v1  ;;  %v3060_v18 = vcombine.low %v108_v8, %v116_v9 }
  0xde   :  { %2599 = vmatprep.mubr.bf16.mxu0 %v3083_v13  ;;  %v120_v11 = vld [vmem:[%s5189_s0 + $0x1f8] sm:$0xff]  ;;  %v3052_v13 = vcombine.low %v96_v2, %v104_v3 }
  0xdf   :  { %2299 = vmatpush1.bf16.msra.mxu1 %v3793_v14  ;;  %v3061_v14 = vcombine.high %v108_v8, %v116_v9 }
  0xe0   :  { %2623 = vmatpush1.bf16.msra.mxu0 %v3796_v15  ;;  %2300 = vmatprep.subr.bf16.mxu1 %v3803_v16  ;;  %v3069_v15 = vcombine.high %v112_v10, %v120_v11  ;;  %v124_v16 = vld [vmem:[%s5189_s0 + $0x218] sm:$0xff] }
  0xe1   :  { %2624 = vmatprep.subr.bf16.mxu0 %v3806_v17  ;;  %v128_v17 = vld [vmem:[%s5189_s0 + $0x238] sm:$0xff]  ;;  %v3076_v22 = vcombine.low %v124_v16, %v124_v16 }
  0xe2   :  { %2276 = vmatmul.mubr.bf16.gmra.mrb[24].mxu1 %v3074_v19  ;;  %v3068_v19 = vcombine.low %v112_v10, %v120_v11  ;;  %v3085_v21 = vcombine.high %v128_v17, %v128_v17  ;;  %v3084_v23 = vcombine.low %v128_v17, %v128_v17 }
  0xe3   :  { %2600 = vmatmul.mubr.bf16.gmra.mrb[24].mxu0 %v3082_v20  ;;  %2301 = vmatpush1.bf16.msra.mxu1 %v3801_v24  ;;  %v3077_v20 = vcombine.high %v124_v16, %v124_v16 }
  0xe4   :  { %2625 = vmatpush1.bf16.msra.mxu0 %v3804_v25  ;;  %2302 = vmatprep.subr.bf16.mxu1 %v3809_v26 }
  0xe5   :  { %2626 = vmatprep.subr.bf16.mxu0 %v3812_v27  ;;  %2316 = vmatprep.mubr.bf16.mxu1 %v3013_v28 }
  0xe6   :  { %2640 = vmatprep.mubr.bf16.mxu0 %v3021_v29 }
  0xe7   :  { %2303 = vmatpush1.bf16.msra.mxu1 %v3807_v30 }
  0xe8   :  { %2627 = vmatpush1.bf16.msra.mxu0 %v3810_v31  ;;  %2304 = vmatprep.subr.bf16.mxu1 %v3815_v32 }
  0xe9   :  { %2628 = vmatprep.subr.bf16.mxu0 %v3818_v33 }
  0xeb   :  { %2305 = vmatpush1.bf16.msra.mxu1 %v3813_v34 }
  0xec   :  { %2629 = vmatpush1.bf16.msra.mxu0 %v3816_v35  ;;  %2306 = vmatprep.subr.bf16.mxu1 %v3821_v36 }
  0xed   :  { %2630 = vmatprep.subr.bf16.mxu0 %v3824_v37 }
  0xef   :  { %2307 = vmatpush1.bf16.msra.mxu1 %v3819_v38 }
  0xf0   :  { %2631 = vmatpush1.bf16.msra.mxu0 %v3822_v39  ;;  %2308 = vmatprep.subr.bf16.mxu1 %v3827_v40 }
  0xf1   :  { %2632 = vmatprep.subr.bf16.mxu0 %v3830_v41 }
  0xf3   :  { %2309 = vmatpush1.bf16.msra.mxu1 %v3825_v42 }
  0xf4   :  { %2633 = vmatpush1.bf16.msra.mxu0 %v3828_v43  ;;  %2310 = vmatprep.subr.bf16.mxu1 %v3833_v44 }
  0xf5   :  { %2634 = vmatprep.subr.bf16.mxu0 %v3836_v45 }
  0xf7   :  { %2311 = vmatpush1.bf16.msra.mxu1 %v3831_v46 }
  0xf8   :  { %2635 = vmatpush1.bf16.msra.mxu0 %v3834_v47  ;;  %2312 = vmatprep.subr.bf16.mxu1 %v3840_v48 }
  0xf9   :  { %2636 = vmatprep.subr.bf16.mxu0 %v3844_v49 }
  0xfb   :  { %2313 = vmatpush1.bf16.msra.mxu1 %v3838_v50 }
  0xfc   :  { %2637 = vmatpush1.bf16.msra.mxu0 %v3842_v51  ;;  %2314 = vmatprep.subr.bf16.mxu1 %v3847_v52 }
  0xfd   :  { %2638 = vmatprep.subr.bf16.mxu0 %v3850_v53 }
  0xff   :  { %2315 = vmatpush1.bf16.msra.mxu1 %v3845_v54 }
 0x100   :  { %2639 = vmatpush1.bf16.msra.mxu0 %v3848_v55 }
 0x102   :  { %2317 = vmatmul.mubr.bf16.vlgmr.msra.gmra.mrb[0].mxu1 %v3012_v60 }
 0x103   :  { %2641 = vmatmul.mubr.bf16.vlgmr.msra.gmra.mrb[0].mxu0 %v3020_v61  ;;  %2326 = vmatprep.mubr.bf16.mxu1 %v3029_v62 }
 0x104   :  { %2650 = vmatprep.mubr.bf16.mxu0 %v3037_v63 }
 0x10a   :  { %2327 = vmatmul.mubr.bf16.gmra.mrb[4].mxu1 %v3028_v4 }
 0x10b   :  { %2651 = vmatmul.mubr.bf16.gmra.mrb[4].mxu0 %v3036_v5  ;;  %2336 = vmatprep.mubr.bf16.mxu1 %v3045_v6 }
 0x10c   :  { %2660 = vmatprep.mubr.bf16.mxu0 %v3053_v7 }
 0x112   :  { %2337 = vmatmul.mubr.bf16.gmra.mrb[8].mxu1 %v3044_v12 }
 0x113   :  { %2661 = vmatmul.mubr.bf16.gmra.mrb[8].mxu0 %v3052_v13  ;;  %2346 = vmatprep.mubr.bf16.mxu1 %v3061_v14 }
 0x114   :  { %2670 = vmatprep.mubr.bf16.mxu0 %v3069_v15 }
 0x11a   :  { %2347 = vmatmul.mubr.bf16.gmra.mrb[12].mxu1 %v3060_v18 }
 0x11b   :  { %2671 = vmatmul.mubr.bf16.gmra.mrb[12].mxu0 %v3068_v19  ;;  %2356 = vmatprep.mubr.bf16.mxu1 %v3077_v20 }
 0x11c   :  { %2680 = vmatprep.mubr.bf16.mxu0 %v3085_v21 }
 0x122   :  { %2357 = vmatmul.mubr.bf16.gmra.mrb[28].mxu1 %v3076_v22 }
 0x123   :  { %2681 = vmatmul.mubr.bf16.gmra.mrb[28].mxu0 %v3084_v23 }
 0x135   :  { %v2115_v24 = vpop.f32.mrb[16].mxu1 }
 0x136   :  { %v4916_v25 = vpop.f32.mrb[16].mxu0  ;;  %v2117_v26 = vpop.f32.mrb[17].mxu1 }
 0x137   :  { %v4918_v27 = vpop.f32.mrb[17].mxu0  ;;  %v2119_v28 = vpop.f32.mrb[18].mxu1 }
 0x138   :  { %v2443_v29 = vpop.f32.mrb[18].mxu0  ;;  %v2120_v30 = vpop.f32.mrb[19].mxu1 }
 0x139   :  { %v2444_v31 = vpop.f32.mrb[19].mxu0 }
 0x175   :  { %v2196_v32 = vpop.f32.mrb[20].mxu1 }
 0x176   :  { %v4920_v33 = vpop.f32.mrb[20].mxu0  ;;  %v2197_v34 = vadd.f32 %v2196_v32, %v2115_v24  ;;  %v2198_v35 = vpop.f32.mrb[21].mxu1 }
 0x177   :  { %v4922_v36 = vpop.f32.mrb[21].mxu0  ;;  %v2199_v37 = vadd.f32 %v2198_v35, %v2117_v26  ;;  %v2200_v38 = vpop.f32.mrb[22].mxu1 }
 0x178   :  { %v2524_v39 = vpop.f32.mrb[22].mxu0  ;;  %v2201_v40 = vpop.f32.mrb[23].mxu1 }
 0x179   :  { %v2525_v41 = vpop.f32.mrb[23].mxu0 }
 0x1b5   :  { %v2277_v42 = vpop.f32.mrb[24].mxu1 }
 0x1b6   :  { %v4924_v43 = vpop.f32.mrb[24].mxu0  ;;  %v4926_v44 = vadd.f32 %v2277_v42, %v2197_v34  ;;  %v2279_v45 = vpop.f32.mrb[25].mxu1 }
 0x1b7   :  { %v4928_v46 = vpop.f32.mrb[25].mxu0  ;;  %v4930_v47 = vadd.f32 %v2279_v45, %v2199_v37  ;;  %v2281_v48 = vpop.f32.mrb[26].mxu1 }
 0x1b8   :  { %v2605_v49 = vpop.f32.mrb[26].mxu0  ;;  %v2282_v50 = vpop.f32.mrb[27].mxu1 }
 0x1b9   :  { %v2606_v51 = vpop.f32.mrb[27].mxu0 }
 0x1d5   :  { %v2318_v52 = vpop.f32.mrb[0].mxu1 }
 0x1d6   :  { %v2642_v53 = vpop.f32.mrb[0].mxu0  ;;  %v2320_v55 = vpop.f32.mrb[1].mxu1 }
 0x1d7   :  { %v4932_v54 = vadd.f32 %v2642_v53, %v2318_v52  ;;  %v2644_v56 = vpop.f32.mrb[1].mxu0  ;;  %v2322_v58 = vpop.f32.mrb[2].mxu1 }
 0x1d8   :  { %v4934_v57 = vadd.f32 %v2644_v56, %v2320_v55  ;;  %v2646_v59 = vpop.f32.mrb[2].mxu0  ;;  %v2324_v61 = vpop.f32.mrb[3].mxu1 }
 0x1d9   :  { %v4936_v60 = vadd.f32 %v2646_v59, %v2322_v58  ;;  %v2648_v62 = vpop.f32.mrb[3].mxu0  ;;  %v2774_v1 = vmul.f32 %v4932_v54, %v4932_v54 }
 0x1da   :  { %v4938_v63 = vadd.f32 %v2648_v62, %v2324_v61  ;;  %v2775_v6 = vmul.f32 %v4934_v57, %v4934_v57 }
 0x1db   :  { %v2746_v0 = vadd.f32 %v4936_v60, %v4932_v54  ;;  %v2776_v2 = vmul.f32 %v4936_v60, %v4936_v60 }
 0x1dc   :  { %v2760_v5 = vadd.f32 %v4938_v63, %v4934_v57  ;;  %v2777_v7 = vmul.f32 %v4938_v63, %v4938_v63 }
 0x1dd   :  { %v2328_v3 = vpop.f32.mrb[4].mxu1  ;;  %v2792_v11 = vadd.f32 %v2776_v2, %v2774_v1 }
 0x1de   :  { %v2652_v4 = vpop.f32.mrb[4].mxu0  ;;  %v2330_v9 = vpop.f32.mrb[5].mxu1  ;;  %v2806_v15 = vadd.f32 %v2777_v7, %v2775_v6 }
 0x1df   :  { %v4952_v8 = vadd.f32 %v2652_v4, %v2328_v3  ;;  %v2654_v10 = vpop.f32.mrb[5].mxu0  ;;  %v2332_v13 = vpop.f32.mrb[6].mxu1 }
 0x1e0   :  { %v4954_v12 = vadd.f32 %v2654_v10, %v2330_v9  ;;  %v2656_v14 = vpop.f32.mrb[6].mxu0  ;;  %v2334_v17 = vpop.f32.mrb[7].mxu1 }
 0x1e1   :  { %v4956_v16 = vadd.f32 %v2656_v14, %v2332_v13  ;;  %v2658_v18 = vpop.f32.mrb[7].mxu0  ;;  %v2747_v20 = vadd.f32 %v4952_v8, %v2746_v0  ;;  %v2778_v21 = vmul.f32 %v4952_v8, %v4952_v8 }
 0x1e2   :  { %v4958_v19 = vadd.f32 %v2658_v18, %v2334_v17  ;;  %v2761_v22 = vadd.f32 %v4954_v12, %v2760_v5  ;;  %v2779_v23 = vmul.f32 %v4954_v12, %v4954_v12 }
 0x1e3   :  { %v2748_v24 = vadd.f32 %v4956_v16, %v2747_v20  ;;  %v2780_v26 = vmul.f32 %v4956_v16, %v4956_v16  ;;  %v2793_v28 = vadd.f32 %v2792_v11, %v2778_v21 }
 0x1e4   :  { %v2762_v31 = vadd.f32 %v4958_v19, %v2761_v22  ;;  %v2781_v32 = vmul.f32 %v4958_v19, %v4958_v19  ;;  %v2807_v34 = vadd.f32 %v2806_v15, %v2779_v23 }
 0x1e5   :  { %v2338_v29 = vpop.f32.mrb[8].mxu1  ;;  %v2794_v39 = vadd.f32 %v2793_v28, %v2780_v26 }
 0x1e6   :  { %v2662_v30 = vpop.f32.mrb[8].mxu0  ;;  %v2340_v37 = vpop.f32.mrb[9].mxu1  ;;  %v2808_v45 = vadd.f32 %v2807_v34, %v2781_v32 }
 0x1e7   :  { %v4972_v35 = vadd.f32 %v2662_v30, %v2338_v29  ;;  %v2664_v38 = vpop.f32.mrb[9].mxu0  ;;  %v2342_v41 = vpop.f32.mrb[10].mxu1 }
 0x1e8   :  { %v4974_v40 = vadd.f32 %v2664_v38, %v2340_v37  ;;  %v2666_v42 = vpop.f32.mrb[10].mxu0  ;;  %v2344_v49 = vpop.f32.mrb[11].mxu1 }
 0x1e9   :  { %v4976_v48 = vadd.f32 %v2666_v42, %v2342_v41  ;;  %v2668_v50 = vpop.f32.mrb[11].mxu0  ;;  %v2749_v52 = vadd.f32 %v4972_v35, %v2748_v24  ;;  %v2782_v53 = vmul.f32 %v4972_v35, %v4972_v35 }
 0x1ea   :  { %v4978_v51 = vadd.f32 %v2668_v50, %v2344_v49  ;;  %v2763_v55 = vadd.f32 %v4974_v40, %v2762_v31  ;;  %v2783_v56 = vmul.f32 %v4974_v40, %v4974_v40 }
 0x1eb   :  { %v2750_v58 = vadd.f32 %v4976_v48, %v2749_v52  ;;  %v2784_v59 = vmul.f32 %v4976_v48, %v4976_v48  ;;  %v2795_v61 = vadd.f32 %v2794_v39, %v2782_v53 }
 0x1ec   :  { %v2764_v1 = vadd.f32 %v4978_v51, %v2763_v55  ;;  %v2785_v2 = vmul.f32 %v4978_v51, %v4978_v51  ;;  %v2809_v3 = vadd.f32 %v2808_v45, %v2783_v56 }
 0x1ed   :  { %v2348_v62 = vpop.f32.mrb[12].mxu1  ;;  %v2796_v7 = vadd.f32 %v2795_v61, %v2784_v59 }
 0x1ee   :  { %v2672_v0 = vpop.f32.mrb[12].mxu0  ;;  %v2350_v5 = vpop.f32.mrb[13].mxu1  ;;  %v2810_v13 = vadd.f32 %v2809_v3, %v2785_v2 }
 0x1ef   :  { %v4992_v4 = vadd.f32 %v2672_v0, %v2348_v62  ;;  %v2674_v6 = vpop.f32.mrb[13].mxu0  ;;  %v2352_v10 = vpop.f32.mrb[14].mxu1 }
 0x1f0   :  { %v4994_v9 = vadd.f32 %v2674_v6, %v2350_v5  ;;  %v2676_v11 = vpop.f32.mrb[14].mxu0  ;;  %v2354_v15 = vpop.f32.mrb[15].mxu1 }
 0x1f1   :  { %v4996_v14 = vadd.f32 %v2676_v11, %v2352_v10  ;;  %v2678_v17 = vpop.f32.mrb[15].mxu0  ;;  %v2751_v20 = vadd.f32 %v4992_v4, %v2750_v58  ;;  %v2786_v21 = vmul.f32 %v4992_v4, %v4992_v4 }
 0x1f2   :  { %v4998_v18 = vadd.f32 %v2678_v17, %v2354_v15  ;;  %v2765_v22 = vadd.f32 %v4994_v9, %v2764_v1  ;;  %v2787_v23 = vmul.f32 %v4994_v9, %v4994_v9 }
 0x1f3   :  { %v2752_v24 = vadd.f32 %v4996_v14, %v2751_v20  ;;  %v2788_v26 = vmul.f32 %v4996_v14, %v4996_v14  ;;  %v2797_v28 = vadd.f32 %v2796_v7, %v2786_v21 }
 0x1f4   :  { %v2766_v31 = vadd.f32 %v4998_v18, %v2765_v22  ;;  %v2789_v32 = vmul.f32 %v4998_v18, %v4998_v18  ;;  %v2811_v34 = vadd.f32 %v2810_v13, %v2787_v23 }
 0x1f5   :  { %v2358_v29 = vpop.f32.mrb[28].mxu1  ;;  %v2798_v39 = vadd.f32 %v2797_v28, %v2788_v26 }
 0x1f6   :  { %v2682_v30 = vpop.f32.mrb[28].mxu0  ;;  %v2359_v37 = vadd.f32 %v2358_v29, %v4926_v44  ;;  %v2360_v38 = vpop.f32.mrb[29].mxu1  ;;  %v2812_v49 = vadd.f32 %v2811_v34, %v2789_v32 }
 0x1f7   :  { %v2684_v41 = vpop.f32.mrb[29].mxu0  ;;  %v2361_v42 = vadd.f32 %v2360_v38, %v4930_v47  ;;  %v2362_v45 = vpop.f32.mrb[30].mxu1 }
 0x1f8   :  { %v2686_v50 = vpop.f32.mrb[30].mxu0  ;;  %v2440_v52 = vadd.f32 %v4916_v25, %v2359_v37  ;;  %v2363_v53 = vpop.f32.mrb[31].mxu1  ;;  %v2872_v37 = vlaneseq }
 0x1f9   :  { %v2687_v55 = vpop.f32.mrb[31].mxu0  ;;  %v2442_v56 = vadd.f32 %v4918_v27, %v2361_v42 }
 0x1fa   :  { %v2521_v58 = vadd.f32 %v4920_v33, %v2440_v52 }
 0x1fb   :  { %v2523_v59 = vadd.f32 %v4922_v36, %v2442_v56 }
 0x1fc   :  { %v2602_v44 = vadd.f32 %v4924_v43, %v2521_v58 }
 0x1fd   :  { %v2604_v61 = vadd.f32 %v4928_v46, %v2523_v59 }
 0x1fe   :  { %v5020_v62 = vadd.f32 %v2682_v30, %v2602_v44 }
 0x1ff   :  { %v5022_v47 = vadd.f32 %v2684_v41, %v2604_v61 }
 0x200   :  { %v2753_v0 = vadd.f32 %v2752_v24, %v5020_v62  ;;  %v2790_v25 = vmul.f32 %v5020_v62, %v5020_v62 }
 0x201   :  { %v2767_v1 = vadd.f32 %v2766_v31, %v5022_v47  ;;  %v2791_v27 = vmul.f32 %v5022_v47, %v5022_v47 }
 0x202   :  { %v2754_v33 = vrot.slane %v2753_v0, 4  ;;  %v2799_v36 = vadd.f32 %v2798_v39, %v2790_v25 }
 0x203   :  { %v2768_v2 = vrot.slane %v2767_v1, 4  ;;  %v2813_v43 = vadd.f32 %v2812_v49, %v2791_v27 }
 0x204   :  { %v2755_v3 = vadd.f32 %v2754_v33, %v2753_v0  ;;  %v2800_v46 = vrot.slane %v2799_v36, 4 }
 0x205   :  { %v2769_v5 = vadd.f32 %v2768_v2, %v2767_v1  ;;  %v2814_v6 = vrot.slane %v2813_v43, 4 }
 0x206   :  { %v2756_v7 = vrot.slane %v2755_v3, 2  ;;  %v2801_v10 = vadd.f32 %v2800_v46, %v2799_v36  ;;  %v2873_v36 = vshrl.u32 %v2872_v37, 7 }
 0x207   :  { %v2770_v11 = vrot.slane %v2769_v5, 2  ;;  %v2815_v13 = vadd.f32 %v2814_v6, %v2813_v43 }
 0x208   :  { %v2757_v15 = vadd.f32 %v2756_v7, %v2755_v3  ;;  %v2802_v17 = vrot.slane %v2801_v10, 2  ;;  %v2874_v43 = vsub.s32 0, %v2873_v36  ;;  %v2870_v3 = vld [vmem:[%s5190_s2] sm:$0x3]  ;;  %v2878_v46 = vsub.s32 1, %v2873_v36 }
 0x209   :  { %v2771_v20 = vadd.f32 %v2770_v11, %v2769_v5  ;;  %v2816_v21 = vrot.slane %v2815_v13, 2  ;;  %v2900_v5 = vld [vmem:[%s5191_s3] sm:$0x3] }
 0x20a   :  { %v2758_v22 = vrot.slane %v2757_v15, 1  ;;  %v2803_v23 = vadd.f32 %v2802_v17, %v2801_v10  ;;  %v2875_v6 = vrot.slane %v2870_v3, %v2874_v43  ;;  %v2905_v10 = vrot.slane %v2900_v5, %v2874_v43 }
 0x20b   :  { %v2772_v24 = vrot.slane %v2771_v20, 1  ;;  %v2817_v26 = vadd.f32 %v2816_v21, %v2815_v13  ;;  %v5067_v11 = vrot.slane %v2870_v3, %v2878_v46  ;;  %v5069_v13 = vrot.slane %v2900_v5, %v2878_v46 }
 0x20c   :  { %v2759_v28 = vadd.f32 %v2758_v22, %v2757_v15  ;;  %v2804_v29 = vrot.slane %v2803_v23, 1 }
 0x20d   :  { %v2773_v30 = vadd.f32 %v2772_v24, %v2771_v20  ;;  %v2818_v31 = vrot.slane %v2817_v26, 1 }
 0x20e   :  { %v2805_v32 = vadd.f32 %v2804_v29, %v2803_v23  ;;  %v2820_v34 = vmul.f32 0.013888889, %v2759_v28 }
 0x20f   :  { %v2819_v38 = vadd.f32 %v2818_v31, %v2817_v26  ;;  %v5030_v39 = vmul.f32 0.013888889, %v2773_v30 }
 0x210   :  { %v2822_v41 = vmul.f32 0.013888889, %v2805_v32  ;;  %v2824_v42 = vmul.f32 %v2820_v34, %v2820_v34  ;;  %v2830_v45 = vsub.f32 %v4932_v54, %v2820_v34  ;;  %v2832_v49 = vsub.f32 %v4936_v60, %v2820_v34 }
 0x211   :  { %v2834_v50 = vsub.f32 %v4952_v8, %v2820_v34  ;;  %v2836_v52 = vsub.f32 %v4956_v16, %v2820_v34  ;;  %v2838_v53 = vsub.f32 %v4972_v35, %v2820_v34  ;;  %v2840_v55 = vsub.f32 %v4976_v48, %v2820_v34 }
 0x212   :  { %v2826_v56 = vsub.f32 %v2822_v41, %v2824_v42  ;;  %v2842_v58 = vsub.f32 %v4992_v4, %v2820_v34  ;;  %v2844_v59 = vsub.f32 %v4996_v14, %v2820_v34  ;;  %v2846_v44 = vsub.f32 %v5020_v62, %v2820_v34 }
 0x213   :  { %v2823_v61 = vmul.f32 0.013888889, %v2819_v38  ;;  %v2825_v54 = vmul.f32 %v5030_v39, %v5030_v39  ;;  %v2831_v60 = vsub.f32 %v4934_v57, %v5030_v39  ;;  %v2833_v8 = vsub.f32 %v4938_v63, %v5030_v39 }
 0x214   :  { %v2828_v16 = vmax.f32 %v2826_v56, 0.0  ;;  %v2835_v35 = vsub.f32 %v4954_v12, %v5030_v39  ;;  %v2837_v48 = vsub.f32 %v4958_v19, %v5030_v39  ;;  %v2839_v4 = vsub.f32 %v4974_v40, %v5030_v39 }
 0x215   :  { %v2827_v14 = vsub.f32 %v2823_v61, %v2825_v54  ;;  %v2841_v62 = vsub.f32 %v4978_v51, %v5030_v39  ;;  %v2843_v0 = vsub.f32 %v4994_v9, %v5030_v39  ;;  %v2845_v25 = vsub.f32 %v4998_v18, %v5030_v39 }
 0x216   :  { %v2848_v1 = vadd.f32 1e-05, %v2828_v16  ;;  %v2847_v27 = vsub.f32 %v5022_v47, %v5030_v39 }
 0x217   :  { %v2829_v33 = vmax.f32 %v2827_v14, 0.0 }
 0x218   :  { %3855 = vrsqrt.f32 %v2848_v1 }
 0x219   :  { %v2849_v2 = vadd.f32 1e-05, %v2829_v33 }
 0x21b   :  { %3857 = vrsqrt.f32 %v2849_v2 }
 0x222   :  { %v3856_v7 = vpop.eup %3855 }
 0x223   :  { %v2852_v15 = vmul.f32 %v3856_v7, %v2830_v45  ;;  %v2854_v17 = vmul.f32 %v3856_v7, %v2832_v49  ;;  %v2856_v20 = vmul.f32 %v3856_v7, %v2834_v50  ;;  %v2858_v21 = vmul.f32 %v3856_v7, %v2836_v52 }
 0x224   :  { %v2860_v22 = vmul.f32 %v3856_v7, %v2838_v53  ;;  %v2862_v23 = vmul.f32 %v3856_v7, %v2840_v55  ;;  %v2864_v24 = vmul.f32 %v3856_v7, %v2842_v58  ;;  %v2866_v26 = vmul.f32 %v3856_v7, %v2844_v59 }
 0x225   :  { %v2868_v28 = vmul.f32 %v3856_v7, %v2846_v44  ;;  %v2882_v29 = vmul.f32 %v2875_v6, %v2852_v15  ;;  %v2884_v30 = vmul.f32 %v2875_v6, %v2854_v17  ;;  %v2886_v31 = vmul.f32 %v2875_v6, %v2856_v20  ;;  %v3858_v53 = vpop.eup %3857 }
 0x226   :  { %v2888_v32 = vmul.f32 %v2875_v6, %v2858_v21  ;;  %v2890_v34 = vmul.f32 %v2875_v6, %v2860_v22  ;;  %v2892_v37 = vmul.f32 %v2875_v6, %v2862_v23  ;;  %v2894_v38 = vmul.f32 %v2875_v6, %v2864_v24 }
 0x227   :  { %v2896_v41 = vmul.f32 %v2875_v6, %v2866_v26  ;;  %v2898_v42 = vmul.f32 %v2875_v6, %v2868_v28  ;;  %v2912_v56 = vadd.f32 %v2905_v10, %v2882_v29  ;;  %v2914_v61 = vadd.f32 %v2905_v10, %v2884_v30 }
 0x228   :  { %v2916_v45 = vadd.f32 %v2905_v10, %v2886_v31  ;;  %v2918_v49 = vadd.f32 %v2905_v10, %v2888_v32  ;;  %v2920_v50 = vadd.f32 %v2905_v10, %v2890_v34  ;;  %v2922_v52 = vadd.f32 %v2905_v10, %v2892_v37 }
 0x229   :  { %v2924_v55 = vadd.f32 %v2905_v10, %v2894_v38  ;;  %v2926_v58 = vadd.f32 %v2905_v10, %v2896_v41  ;;  %v2928_v59 = vadd.f32 %v2905_v10, %v2898_v42  ;;  %vm2930_vm0 = vcmp.ge.f32.partialorder %v2912_v56, 0.0 }
 0x22a   :  { %vm2932_vm1 = vcmp.ge.f32.partialorder %v2914_v61, 0.0  ;;  %vm2934_vm2 = vcmp.ge.f32.partialorder %v2916_v45, 0.0  ;;  %vm2936_vm3 = vcmp.ge.f32.partialorder %v2918_v49, 0.0  ;;  %vm2938_vm4 = vcmp.ge.f32.partialorder %v2920_v50, 0.0 }
 0x22b   :  { %vm2940_vm5 = vcmp.ge.f32.partialorder %v2922_v52, 0.0  ;;  %vm2942_vm6 = vcmp.ge.f32.partialorder %v2924_v55, 0.0  ;;  %vm2944_vm7 = vcmp.ge.f32.partialorder %v2926_v58, 0.0  ;;  %vm2946_vm8 = vcmp.ge.f32.partialorder %v2928_v59, 0.0 }
 0x22c   :  { %v2948_v44 = vmul.f32 0.2, %v2912_v56  ;;  %v2950_v54 = vmul.f32 0.2, %v2914_v61  ;;  %v2952_v16 = vmul.f32 0.2, %v2916_v45  ;;  %v2853_v14 = vmul.f32 %v3858_v53, %v2831_v60 }
 0x22d   :  { %v2954_v1 = vmul.f32 0.2, %v2918_v49  ;;  %v2956_v33 = vmul.f32 0.2, %v2920_v50  ;;  %v2958_v36 = vmul.f32 0.2, %v2922_v52  ;;  %v2855_v2 = vmul.f32 %v3858_v53, %v2833_v8 }
 0x22e   :  { %v2960_v43 = vmul.f32 0.2, %v2924_v55  ;;  %v2962_v3 = vmul.f32 0.2, %v2926_v58  ;;  %v2964_v46 = vmul.f32 0.2, %v2928_v59  ;;  %v2966_v5 = vsel %vm2930_vm0, %v2912_v56, %v2948_v44 }
 0x22f   :  { %v2968_v6 = vsel %vm2932_vm1, %v2914_v61, %v2950_v54  ;;  %v2970_v7 = vsel %vm2934_vm2, %v2916_v45, %v2952_v16  ;;  %v2972_v10 = vsel %vm2936_vm3, %v2918_v49, %v2954_v1  ;;  %v2974_v57 = vsel %vm2938_vm4, %v2920_v50, %v2956_v33  ;;  %2984 = vst [vmem:[%s5192_s4] sm:$0xff] %v2966_v5 }
 0x230   :  { %v2976_v63 = vsel %vm2940_vm5, %v2922_v52, %v2958_v36  ;;  %v2978_v60 = vsel %vm2942_vm6, %v2924_v55, %v2960_v43  ;;  %v2980_v8 = vsel %vm2944_vm7, %v2926_v58, %v2962_v3  ;;  %v2982_v15 = vsel %vm2946_vm8, %v2928_v59, %v2964_v46  ;;  %2986 = vst [vmem:[%s5192_s4 + $0x10] sm:$0xff] %v2968_v6 }
 0x231   :  { %2988 = vst [vmem:[%s5192_s4 + $0x20] sm:$0xff] %v2970_v7  ;;  %2990 = vst [vmem:[%s5192_s4 + $0x30] sm:$0xff] %v2972_v10  ;;  %v2857_v17 = vmul.f32 %v3858_v53, %v2835_v35  ;;  %v2859_v20 = vmul.f32 %v3858_v53, %v2837_v48  ;;  %v2861_v21 = vmul.f32 %v3858_v53, %v2839_v4 }
 0x232   :  { %2992 = vst [vmem:[%s5192_s4 + $0x40] sm:$0xff] %v2974_v57  ;;  %2994 = vst [vmem:[%s5192_s4 + $0x50] sm:$0xff] %v2976_v63  ;;  %v2863_v22 = vmul.f32 %v3858_v53, %v2841_v62  ;;  %v2865_v23 = vmul.f32 %v3858_v53, %v2843_v0  ;;  %v2867_v12 = vmul.f32 %v3858_v53, %v2845_v25 }
 0x233   :  { %2996 = vst [vmem:[%s5192_s4 + $0x60] sm:$0xff] %v2978_v60  ;;  %2998 = vst [vmem:[%s5192_s4 + $0x70] sm:$0xff] %v2980_v8  ;;  %v2869_v19 = vmul.f32 %v3858_v53, %v2847_v27  ;;  %v2883_v35 = vmul.f32 %v5067_v11, %v2853_v14  ;;  %v2885_v40 = vmul.f32 %v5067_v11, %v2855_v2 }
 0x234   :  { %3000 = vst [vmem:[%s5192_s4 + $0x80] sm:$0xff] %v2982_v15  ;;  %v2887_v48 = vmul.f32 %v5067_v11, %v2857_v17  ;;  %v2889_v51 = vmul.f32 %v5067_v11, %v2859_v20  ;;  %v2891_v4 = vmul.f32 %v5067_v11, %v2861_v21  ;;  %v2893_v9 = vmul.f32 %v5067_v11, %v2863_v22 }
 0x235   :  { %v2895_v62 = vmul.f32 %v5067_v11, %v2865_v23  ;;  %v2897_v18 = vmul.f32 %v5067_v11, %v2867_v12  ;;  %v2899_v0 = vmul.f32 %v5067_v11, %v2869_v19  ;;  %v2913_v47 = vadd.f32 %v5069_v13, %v2883_v35 }
 0x236   :  { %v2915_v39 = vadd.f32 %v5069_v13, %v2885_v40  ;;  %v2917_v25 = vadd.f32 %v5069_v13, %v2887_v48  ;;  %v2919_v27 = vadd.f32 %v5069_v13, %v2889_v51  ;;  %v2921_v24 = vadd.f32 %v5069_v13, %v2891_v4 }
 0x237   :  { %v2923_v26 = vadd.f32 %v5069_v13, %v2893_v9  ;;  %v2925_v28 = vadd.f32 %v5069_v13, %v2895_v62  ;;  %v2927_v29 = vadd.f32 %v5069_v13, %v2897_v18  ;;  %v2929_v30 = vadd.f32 %v5069_v13, %v2899_v0 }
 0x238   :  { %vm2931_vm9 = vcmp.ge.f32.partialorder %v2913_v47, 0.0  ;;  %vm2933_vm10 = vcmp.ge.f32.partialorder %v2915_v39, 0.0  ;;  %vm2935_vm11 = vcmp.ge.f32.partialorder %v2917_v25, 0.0  ;;  %vm2937_vm12 = vcmp.ge.f32.partialorder %v2919_v27, 0.0 }
 0x239   :  { %vm2939_vm13 = vcmp.ge.f32.partialorder %v2921_v24, 0.0  ;;  %vm2941_vm14 = vcmp.ge.f32.partialorder %v2923_v26, 0.0  ;;  %vm2943_vm15 = vcmp.ge.f32.partialorder %v2925_v28, 0.0  ;;  %vm2945_vm0 = vcmp.ge.f32.partialorder %v2927_v29, 0.0 }
 0x23a   :  { %vm2947_vm1 = vcmp.ge.f32.partialorder %v2929_v30, 0.0  ;;  %v2949_v11 = vmul.f32 0.2, %v2913_v47  ;;  %v2951_v31 = vmul.f32 0.2, %v2915_v39 }
 0x23b   :  { %v2953_v32 = vmul.f32 0.2, %v2917_v25  ;;  %v2955_v34 = vmul.f32 0.2, %v2919_v27  ;;  %v2957_v37 = vmul.f32 0.2, %v2921_v24 }
 0x23c   :  { %v2959_v38 = vmul.f32 0.2, %v2923_v26  ;;  %v2961_v41 = vmul.f32 0.2, %v2925_v28  ;;  %v2963_v42 = vmul.f32 0.2, %v2927_v29  ;;  %v2967_v56 = vsel %vm2931_vm9, %v2913_v47, %v2949_v11 }
 0x23d   :  { %v2965_v13 = vmul.f32 0.2, %v2929_v30  ;;  %v2969_v61 = vsel %vm2933_vm10, %v2915_v39, %v2951_v31  ;;  %v2971_v45 = vsel %vm2935_vm11, %v2917_v25, %v2953_v32  ;;  %v2973_v49 = vsel %vm2937_vm12, %v2919_v27, %v2955_v34  ;;  %2985 = vst [vmem:[%s5192_s4 + $0x8] sm:$0xff] %v2967_v56 }
 0x23e   :  { %v2975_v50 = vsel %vm2939_vm13, %v2921_v24, %v2957_v37  ;;  %v2977_v52 = vsel %vm2941_vm14, %v2923_v26, %v2959_v38  ;;  %v2979_v53 = vsel %vm2943_vm15, %v2925_v28, %v2961_v41  ;;  %v2981_v55 = vsel %vm2945_vm0, %v2927_v29, %v2963_v42  ;;  %2987 = vst [vmem:[%s5192_s4 + $0x18] sm:$0xff] %v2969_v61 }
 0x23f   :  { %2989 = vst [vmem:[%s5192_s4 + $0x28] sm:$0xff] %v2971_v45  ;;  %2991 = vst [vmem:[%s5192_s4 + $0x38] sm:$0xff] %v2973_v49  ;;  %v2983_v58 = vsel %vm2947_vm1, %v2929_v30, %v2965_v13 }
 0x240   :  { %2993 = vst [vmem:[%s5192_s4 + $0x48] sm:$0xff] %v2975_v50  ;;  %2995 = vst [vmem:[%s5192_s4 + $0x58] sm:$0xff] %v2977_v52 }
 0x241   :  { %2997 = vst [vmem:[%s5192_s4 + $0x68] sm:$0xff] %v2979_v53  ;;  %2999 = vst [vmem:[%s5192_s4 + $0x78] sm:$0xff] %v2981_v55 }
 0x242   :  { %3001 = vst [vmem:[%s5192_s4 + $0x88] sm:$0xff] %v2983_v58 }

// kernel: discriminator_forward.8
= control target key start
LH: loop header
LB: loop body
LE: loop exit
PB: predicated region body
PF: predicated region fallthrough
CT: control target
= control target key end

     0   :  { %s6165_s15 = smov 0   ;;  %s6167_s16 = smov 0   ;;  %s7230_s0 = inlined_call_operand.vmem [shape: bf16[24,4096], index: 0, kind: input, shape index: {}]   ;;  %s7231_s1 = inlined_call_operand.vmem [shape: bf16[4096,512], index: 1, kind: input, shape index: {}]   ;;  %s7232_s2 = inlined_call_operand.vmem [shape: f32[1,512], index: 2, kind: input, shape index: {}]   ;;  %s7233_s3 = inlined_call_operand.vmem [shape: f32[1,512], index: 3, kind: input, shape index: {}]   ;;  %s7234_s4 = inlined_call_operand.vmem [shape: f32[24,512], index: 4, kind: output, shape index: {}]  }
   0x1   :  { %s6169_s17 = smov 0  }
   0x2 LB: > { %s6181_s18 = sadd.s32 4294967295, %s6137_s17   ;;  %s6184_s19 = sadd.s32 1, %s6137_s17   ;;  %s6137_s17 = sphi %s6169_s17, %s7237_s17   ;;  %s6133_s16 = sphi %s6167_s16, %s7236_s16   ;;  %s6129_s15 = sphi %s6165_s15, %s7235_s15  }
   0x3   : > { %s18_s20 = ssub.s32 %s6137_s17, %s6184_s19  ;;  %s21_s21 = sadd.s32 1, %s6133_s16 }
   0x4   : > { %p19_p0 = scmp.eq.s32.totalorder %s18_s20, 0  ;;  %p28_p1 = scmp.ne.s32.totalorder %s6133_s16, %s6129_s15 }
   0x5   : > { %p29_p2 = scmp.eq.s32.totalorder %s6137_s17, 0  ;;  %p4683_p4 = scmp.ge.s32.totalorder %s6137_s17, 2 }
   0x6   : > { %s6193_s22 = scalar_select %p19_p0, %s6133_s16, %s21_s21  }
   0x7   : > { %p30_p3 = por %p29_p2, %p28_p1  ;;  %149 = sbr.rel (%p4683_p4) target bundleno = 31 (0x1f), region = 24 }
   0xe   : > { %152 = sbr.rel (!%p30_p3) target bundleno = 31 (0x1f), region = 28  ;;  %s154_s23 = sand.u32 (%p30_p3), 1, %s6133_s16  }
   0xf   : > { %s5238_s24 = sshll.u32 (%p30_p3), %s6137_s17, 6  ;;  %s5296_s25 = smul.u32 (%p30_p3), 192, %s154_s23 }
  0x10   : > { %s6201_s28 = scalar_lea.vmem (%p30_p3), %s7230_s0, %s5238_s24 }
  0x11   : > { %v172_v0 = vld [vmem:[%s6201_s28] sm:$0xff] (%p30_p3)  ;;  %v174_v1 = vld [vmem:[%s6201_s28 + $0x8] sm:$0xff] (%p30_p3)  ;;  %v176_v2 = vld [vmem:[%s6201_s28 + $0x10] sm:$0xff] (%p30_p3)  ;;  %s6209_s29 = scalar_lea.vmem (%p30_p3), [#allocation2], %s5296_s25 }
  0x12   : > { %v178_v3 = vld [vmem:[%s6201_s28 + $0x18] sm:$0xff] (%p30_p3)  ;;  %v180_v4 = vld [vmem:[%s6201_s28 + $0x20] sm:$0xff] (%p30_p3)  ;;  %v182_v5 = vld [vmem:[%s6201_s28 + $0x28] sm:$0xff] (%p30_p3)  ;;  %173 = vst [vmem:[%s6209_s29] sm:$0xff] (%p30_p3), %v172_v0 }
  0x13   : > { %175 = vst [vmem:[%s6209_s29 + $0x8] sm:$0xff] (%p30_p3), %v174_v1  ;;  %177 = vst [vmem:[%s6209_s29 + $0x10] sm:$0xff] (%p30_p3), %v176_v2  ;;  %v184_v6 = vld [vmem:[%s6201_s28 + $0x30] sm:$0xff] (%p30_p3)  ;;  %v186_v7 = vld [vmem:[%s6201_s28 + $0x38] sm:$0xff] (%p30_p3) }
  0x14   : > { %179 = vst [vmem:[%s6209_s29 + $0x18] sm:$0xff] (%p30_p3), %v178_v3  ;;  %181 = vst [vmem:[%s6209_s29 + $0x20] sm:$0xff] (%p30_p3), %v180_v4  ;;  %v188_v8 = vld [vmem:[%s6201_s28 + $0x80] sm:$0xff] (%p30_p3)  ;;  %v190_v9 = vld [vmem:[%s6201_s28 + $0x88] sm:$0xff] (%p30_p3) }
  0x15   : > { %183 = vst [vmem:[%s6209_s29 + $0x28] sm:$0xff] %v182_v5  ;;  %185 = vst [vmem:[%s6209_s29 + $0x30] sm:$0xff] %v184_v6  ;;  %v192_v10 = vld [vmem:[%s6201_s28 + $0x90] sm:$0xff]  ;;  %v194_v11 = vld [vmem:[%s6201_s28 + $0x98] sm:$0xff] }
  0x16   : > { %187 = vst [vmem:[%s6209_s29 + $0x38] sm:$0xff] %v186_v7  ;;  %189 = vst [vmem:[%s6209_s29 + $0x40] sm:$0xff] %v188_v8  ;;  %v196_v12 = vld [vmem:[%s6201_s28 + $0xa0] sm:$0xff]  ;;  %v198_v13 = vld [vmem:[%s6201_s28 + $0xa8] sm:$0xff] }
  0x17   : > { %191 = vst [vmem:[%s6209_s29 + $0x48] sm:$0xff] %v190_v9  ;;  %193 = vst [vmem:[%s6209_s29 + $0x50] sm:$0xff] %v192_v10  ;;  %v200_v14 = vld [vmem:[%s6201_s28 + $0xb0] sm:$0xff]  ;;  %v202_v15 = vld [vmem:[%s6201_s28 + $0xb8] sm:$0xff] }
  0x18   : > { %195 = vst [vmem:[%s6209_s29 + $0x58] sm:$0xff] %v194_v11  ;;  %197 = vst [vmem:[%s6209_s29 + $0x60] sm:$0xff] %v196_v12  ;;  %v204_v16 = vld [vmem:[%s6201_s28 + $0x100] sm:$0xff]  ;;  %v206_v17 = vld [vmem:[%s6201_s28 + $0x108] sm:$0xff] }
  0x19   : > { %199 = vst [vmem:[%s6209_s29 + $0x68] sm:$0xff] %v198_v13  ;;  %201 = vst [vmem:[%s6209_s29 + $0x70] sm:$0xff] %v200_v14  ;;  %v208_v18 = vld [vmem:[%s6201_s28 + $0x110] sm:$0xff]  ;;  %v210_v19 = vld [vmem:[%s6201_s28 + $0x118] sm:$0xff] }
  0x1a   : > { %203 = vst [vmem:[%s6209_s29 + $0x78] sm:$0xff] %v202_v15  ;;  %205 = vst [vmem:[%s6209_s29 + $0x80] sm:$0xff] %v204_v16  ;;  %v212_v20 = vld [vmem:[%s6201_s28 + $0x120] sm:$0xff]  ;;  %v214_v21 = vld [vmem:[%s6201_s28 + $0x128] sm:$0xff] }
  0x1b   : > { %207 = vst [vmem:[%s6209_s29 + $0x88] sm:$0xff] %v206_v17  ;;  %209 = vst [vmem:[%s6209_s29 + $0x90] sm:$0xff] %v208_v18  ;;  %v216_v22 = vld [vmem:[%s6201_s28 + $0x130] sm:$0xff]  ;;  %v218_v23 = vld [vmem:[%s6201_s28 + $0x138] sm:$0xff] }
  0x1c   : > { %211 = vst [vmem:[%s6209_s29 + $0x98] sm:$0xff] %v210_v19  ;;  %213 = vst [vmem:[%s6209_s29 + $0xa0] sm:$0xff] %v212_v20 }
  0x1d   : > { %215 = vst [vmem:[%s6209_s29 + $0xa8] sm:$0xff] %v214_v21  ;;  %217 = vst [vmem:[%s6209_s29 + $0xb0] sm:$0xff] %v216_v22 }
  0x1e   : > { %219 = vst [vmem:[%s6209_s29 + $0xb8] sm:$0xff] %v218_v23 }
  0x1f PF: > { %p4686_p5 = scmp.ge.s32.totalorder %s6137_s17, 1  ;;  %p234_p6 = scmp.lt.s32.totalorder %s6137_s17, 3 }
  0x21   : > { %p235_p7 = pnand %p4686_p5, %p234_p6 }
  0x22   : > { %s241_s30 = sand.u32 (!%p235_p7), 1, %s6129_s15   ;;  %s4687_s5 = sshll.u32 (!%p235_p7), %s6181_s18, 8 }
  0x23   : > { %238 = sbr.rel (%p235_p7) target bundleno = 854 (0x356), region = 55  ;;  %p269_p8 = scmp.lt.s32.totalorder (!%p235_p7), %s4687_s5, 511 }
  0x24   : > { %s5297_s6 = smul.u32 (!%p235_p7), 192, %s241_s30  ;;  %p4690_p9 = scmp.ne.s32.totalorder (!%p235_p7), %s6181_s18, 0 }
  0x26   : > { %s6262_s11 = scalar_lea.vmem (!%p235_p7), [#allocation2], %s5297_s6 }
  0x2a   : > { %s7239_s5 = smov (!%p269_p8, %s4687_s5), 511  ;;  %278 = sbr.rel (%p4690_p9) target bundleno = 50 (0x32), region = 63 }
  0x2b   : > { %s5239_s7 = sshll.u32 %s7239_s5, 4  ;;  %v6139_v24 = vmov (!%p4690_p9), 0.0  }
  0x2c   : > { %s6260_s10 = scalar_lea.vmem %s7231_s1, %s5239_s7  ;;  %279 = vst [vmem:[%s7234_s4] sm:$0xff] (!%p4690_p9), %v6139_v24  ;;  %280 = vst [vmem:[%s7234_s4 + $0x8] sm:$0xff] (!%p4690_p9), %v6139_v24 }
  0x2d   : > { %281 = vst [vmem:[%s7234_s4 + $0x10] sm:$0xff] (!%p4690_p9), %v6139_v24  ;;  %282 = vst [vmem:[%s7234_s4 + $0x18] sm:$0xff] (!%p4690_p9), %v6139_v24 }
  0x2e   : > { %283 = vst [vmem:[%s7234_s4 + $0x20] sm:$0xff] (!%p4690_p9), %v6139_v24  ;;  %284 = vst [vmem:[%s7234_s4 + $0x28] sm:$0xff] (!%p4690_p9), %v6139_v24 }
  0x2f   : > { %285 = vst [vmem:[%s7234_s4 + $0x30] sm:$0xff] (!%p4690_p9), %v6139_v24  ;;  %286 = vst [vmem:[%s7234_s4 + $0x38] sm:$0xff] (!%p4690_p9), %v6139_v24 }
  0x30   : > { %287 = vst [vmem:[%s7234_s4 + $0x40] sm:$0xff] (!%p4690_p9), %v6139_v24  ;;  %288 = vst [vmem:[%s7234_s4 + $0x48] sm:$0xff] (!%p4690_p9), %v6139_v24 }
  0x31   : > { %289 = vst [vmem:[%s7234_s4 + $0x50] sm:$0xff] %v6139_v24  ;;  %290 = vst [vmem:[%s7234_s4 + $0x58] sm:$0xff] %v6139_v24 }
  0x32 PF: > { %v5323_v25 = vld [vmem:[%s6260_s10 + $0x4] ss:$16 sps:$4 sm:$0xff]   ;;  %v5325_v26 = vld [vmem:[%s6260_s10 + $0xc] ss:$16 sps:$4 sm:$0xff]   ;;  %v5327_v27 = vld [vmem:[%s6260_s10] ss:$16 sps:$4 sm:$0xff]  }
  0x33   : > { %3535 = vmatprep.subr.bf16.mxu0 %v5323_v25  ;;  %v5328_v28 = vld [vmem:[%s6260_s10 + $0x8] ss:$16 sps:$4 sm:$0xff]   ;;  %3943 = vmatprep.subr.bf16.mxu1 %v5325_v26  ;;  %v5329_v29 = vld [vmem:[%s6260_s10 + $0x24] ss:$16 sps:$4 sm:$0xff]   ;;  %v5331_v30 = vld [vmem:[%s6260_s10 + $0x2c] ss:$16 sps:$4 sm:$0xff]  }
  0x34   : > { %3536 = vmatpush1.bf16.msra.mxu0 %v5327_v27  ;;  %3944 = vmatpush1.bf16.msra.mxu1 %v5328_v28  ;;  %v5333_v31 = vld [vmem:[%s6260_s10 + $0x20] ss:$16 sps:$4 sm:$0xff]   ;;  %v5334_v32 = vld [vmem:[%s6260_s10 + $0x28] ss:$16 sps:$4 sm:$0xff]   ;;  %v5335_v33 = vld [vmem:[%s6260_s10 + $0x44] ss:$16 sps:$4 sm:$0xff]  }
  0x35   : > { %3537 = vmatprep.subr.bf16.mxu0 %v5329_v29  ;;  %3945 = vmatprep.subr.bf16.mxu1 %v5331_v30  ;;  %v5337_v34 = vld [vmem:[%s6260_s10 + $0x4c] ss:$16 sps:$4 sm:$0xff]   ;;  %v5339_v35 = vld [vmem:[%s6260_s10 + $0x40] ss:$16 sps:$4 sm:$0xff]   ;;  %v5340_v36 = vld [vmem:[%s6260_s10 + $0x48] ss:$16 sps:$4 sm:$0xff]  }
  0x36   : > { %v5341_v37 = vld [vmem:[%s6260_s10 + $0x64] ss:$16 sps:$4 sm:$0xff]   ;;  %v5343_v38 = vld [vmem:[%s6260_s10 + $0x6c] ss:$16 sps:$4 sm:$0xff]   ;;  %v5345_v39 = vld [vmem:[%s6260_s10 + $0x60] ss:$16 sps:$4 sm:$0xff]  }
  0x37   : > { %v5346_v40 = vld [vmem:[%s6260_s10 + $0x68] ss:$16 sps:$4 sm:$0xff]   ;;  %v5347_v41 = vld [vmem:[%s6260_s10 + $0x84] ss:$16 sps:$4 sm:$0xff]   ;;  %v5349_v42 = vld [vmem:[%s6260_s10 + $0x8c] ss:$16 sps:$4 sm:$0xff]  }
  0x38   : > { %3538 = vmatpush1.bf16.msra.mxu0 %v5333_v31  ;;  %3946 = vmatpush1.bf16.msra.mxu1 %v5334_v32  ;;  %v5351_v43 = vld [vmem:[%s6260_s10 + $0x80] ss:$16 sps:$4 sm:$0xff]   ;;  %v5352_v44 = vld [vmem:[%s6260_s10 + $0x88] ss:$16 sps:$4 sm:$0xff]   ;;  %v5353_v45 = vld [vmem:[%s6260_s10 + $0xa4] ss:$16 sps:$4 sm:$0xff]  }
  0x39   : > { %3539 = vmatprep.subr.bf16.mxu0 %v5335_v33  ;;  %3947 = vmatprep.subr.bf16.mxu1 %v5337_v34  ;;  %v5355_v46 = vld [vmem:[%s6260_s10 + $0xac] ss:$16 sps:$4 sm:$0xff]   ;;  %v5357_v47 = vld [vmem:[%s6260_s10 + $0xa0] ss:$16 sps:$4 sm:$0xff]   ;;  %v5358_v48 = vld [vmem:[%s6260_s10 + $0xa8] ss:$16 sps:$4 sm:$0xff]  }
  0x3a   : > { %v5359_v49 = vld [vmem:[%s6260_s10 + $0xc4] ss:$16 sps:$4 sm:$0xff]   ;;  %v5361_v50 = vld [vmem:[%s6260_s10 + $0xcc] ss:$16 sps:$4 sm:$0xff]   ;;  %v5363_v51 = vld [vmem:[%s6260_s10 + $0xc0] ss:$16 sps:$4 sm:$0xff]  }
  0x3b   : > { %v5364_v52 = vld [vmem:[%s6260_s10 + $0xc8] ss:$16 sps:$4 sm:$0xff]   ;;  %v5365_v53 = vld [vmem:[%s6260_s10 + $0xe4] ss:$16 sps:$4 sm:$0xff]   ;;  %v5367_v54 = vld [vmem:[%s6260_s10 + $0xec] ss:$16 sps:$4 sm:$0xff]  }
  0x3c   : > { %3540 = vmatpush1.bf16.msra.mxu0 %v5339_v35  ;;  %3948 = vmatpush1.bf16.msra.mxu1 %v5340_v36  ;;  %v5369_v55 = vld [vmem:[%s6260_s10 + $0xe0] ss:$16 sps:$4 sm:$0xff]   ;;  %v5370_v56 = vld [vmem:[%s6260_s10 + $0xe8] ss:$16 sps:$4 sm:$0xff]   ;;  %v5371_v57 = vld [vmem:[%s6260_s10 + $0x104] ss:$16 sps:$4 sm:$0xff]  }
  0x3d   : > { %3541 = vmatprep.subr.bf16.mxu0 %v5341_v37  ;;  %3949 = vmatprep.subr.bf16.mxu1 %v5343_v38  ;;  %v5373_v58 = vld [vmem:[%s6260_s10 + $0x10c] ss:$16 sps:$4 sm:$0xff]   ;;  %v5375_v59 = vld [vmem:[%s6260_s10 + $0x100] ss:$16 sps:$4 sm:$0xff]   ;;  %v5376_v60 = vld [vmem:[%s6260_s10 + $0x108] ss:$16 sps:$4 sm:$0xff]  }
  0x3e   : > { %v5377_v61 = vld [vmem:[%s6260_s10 + $0x124] ss:$16 sps:$4 sm:$0xff]   ;;  %v5379_v62 = vld [vmem:[%s6260_s10 + $0x12c] ss:$16 sps:$4 sm:$0xff]   ;;  %v5381_v63 = vld [vmem:[%s6260_s10 + $0x120] ss:$16 sps:$4 sm:$0xff]  }
  0x3f   : > { %v5382_v0 = vld [vmem:[%s6260_s10 + $0x128] ss:$16 sps:$4 sm:$0xff]   ;;  %v5383_v1 = vld [vmem:[%s6260_s10 + $0x144] ss:$16 sps:$4 sm:$0xff]   ;;  %v5385_v2 = vld [vmem:[%s6260_s10 + $0x14c] ss:$16 sps:$4 sm:$0xff]  }
  0x40   : > { %3542 = vmatpush1.bf16.msra.mxu0 %v5345_v39  ;;  %3950 = vmatpush1.bf16.msra.mxu1 %v5346_v40  ;;  %v5387_v3 = vld [vmem:[%s6260_s10 + $0x140] ss:$16 sps:$4 sm:$0xff]   ;;  %v5388_v4 = vld [vmem:[%s6260_s10 + $0x148] ss:$16 sps:$4 sm:$0xff]   ;;  %v5389_v5 = vld [vmem:[%s6260_s10 + $0x164] ss:$16 sps:$4 sm:$0xff]  }
  0x41   : > { %3543 = vmatprep.subr.bf16.mxu0 %v5347_v41  ;;  %3951 = vmatprep.subr.bf16.mxu1 %v5349_v42  ;;  %v5391_v6 = vld [vmem:[%s6260_s10 + $0x16c] ss:$16 sps:$4 sm:$0xff]   ;;  %v303_v7 = vld [vmem:[%s6262_s11] sm:$0xff]  ;;  %v5394_v10 = vld [vmem:[%s6260_s10 + $0x168] ss:$16 sps:$4 sm:$0xff]   ;;  %p5235_p10 = scmp.ne.s32.totalorder %s6181_s18, 1 }
  0x42   : > { %v311_v8 = vld [vmem:[%s6262_s11 + $0x40] sm:$0xff]  ;;  %v5397_v13 = vld [vmem:[%s6260_s10 + $0x18c] ss:$16 sps:$4 sm:$0xff]   ;;  %v5400_v15 = vld [vmem:[%s6260_s10 + $0x188] ss:$16 sps:$4 sm:$0xff]  }
  0x43   : > { %v5393_v9 = vld [vmem:[%s6260_s10 + $0x160] ss:$16 sps:$4 sm:$0xff]   ;;  %v4692_v11 = vcombine.high %v303_v7, %v311_v8  ;;  %v5395_v12 = vld [vmem:[%s6260_s10 + $0x184] ss:$16 sps:$4 sm:$0xff]   ;;  %v5403_v17 = vld [vmem:[%s6260_s10 + $0x1ac] ss:$16 sps:$4 sm:$0xff]   ;;  %v4691_v30 = vcombine.low %v303_v7, %v311_v8 }
  0x44   : > { %3544 = vmatpush1.bf16.msra.mxu0 %v5351_v43  ;;  %3952 = vmatpush1.bf16.msra.mxu1 %v5352_v44  ;;  %v5399_v14 = vld [vmem:[%s6260_s10 + $0x180] ss:$16 sps:$4 sm:$0xff]   ;;  %v5401_v16 = vld [vmem:[%s6260_s10 + $0x1a4] ss:$16 sps:$4 sm:$0xff]   ;;  %v5406_v19 = vld [vmem:[%s6260_s10 + $0x1a8] ss:$16 sps:$4 sm:$0xff]  }
  0x45   : > { %3545 = vmatprep.subr.bf16.mxu0 %v5353_v45  ;;  %3953 = vmatprep.subr.bf16.mxu1 %v5355_v46  ;;  %v5405_v18 = vld [vmem:[%s6260_s10 + $0x1a0] ss:$16 sps:$4 sm:$0xff]   ;;  %v5407_v20 = vld [vmem:[%s6260_s10 + $0x1c4] ss:$16 sps:$4 sm:$0xff]   ;;  %v5409_v21 = vld [vmem:[%s6260_s10 + $0x1cc] ss:$16 sps:$4 sm:$0xff]  }
  0x46   : > { %3567 = vmatprep.mubr.bf16.mxu0 %v4692_v11  ;;  %3975 = vmatprep.mubr.bf16.mxu1 %v4692_v11  ;;  %v5411_v22 = vld [vmem:[%s6260_s10 + $0x1c0] ss:$16 sps:$4 sm:$0xff]   ;;  %v5412_v23 = vld [vmem:[%s6260_s10 + $0x1c8] ss:$16 sps:$4 sm:$0xff]   ;;  %v5413_v24 = vld [vmem:[%s6260_s10 + $0x1e4] ss:$16 sps:$4 sm:$0xff]  }
  0x47   : > { %v5415_v25 = vld [vmem:[%s6260_s10 + $0x1ec] ss:$16 sps:$4 sm:$0xff]   ;;  %v5417_v26 = vld [vmem:[%s6260_s10 + $0x1e0] ss:$16 sps:$4 sm:$0xff]   ;;  %v5418_v27 = vld [vmem:[%s6260_s10 + $0x1e8] ss:$16 sps:$4 sm:$0xff]  }
  0x48   : > { %3546 = vmatpush1.bf16.msra.mxu0 %v5357_v47  ;;  %3954 = vmatpush1.bf16.msra.mxu1 %v5358_v48  ;;  %v5421_v28 = vld [vmem:[%s6260_s10 + $0x204] ss:$16 sps:$4 sm:$0xff]   ;;  %v5424_v29 = vld [vmem:[%s6260_s10 + $0x20c] ss:$16 sps:$4 sm:$0xff]   ;;  %v5419_v31 = vld [vmem:[%s6260_s10 + $0x200] ss:$16 sps:$4 sm:$0xff]  }
  0x49   : > { %3547 = vmatprep.subr.bf16.mxu0 %v5359_v49  ;;  %3955 = vmatprep.subr.bf16.mxu1 %v5361_v50  ;;  %v5422_v32 = vld [vmem:[%s6260_s10 + $0x208] ss:$16 sps:$4 sm:$0xff]   ;;  %v5427_v33 = vld [vmem:[%s6260_s10 + $0x224] ss:$16 sps:$4 sm:$0xff]   ;;  %v5430_v34 = vld [vmem:[%s6260_s10 + $0x22c] ss:$16 sps:$4 sm:$0xff]  }
  0x4a   : > { %v5425_v35 = vld [vmem:[%s6260_s10 + $0x220] ss:$16 sps:$4 sm:$0xff]   ;;  %v5428_v36 = vld [vmem:[%s6260_s10 + $0x228] ss:$16 sps:$4 sm:$0xff]   ;;  %v5433_v37 = vld [vmem:[%s6260_s10 + $0x244] ss:$16 sps:$4 sm:$0xff]  }
  0x4b   : > { %v5436_v38 = vld [vmem:[%s6260_s10 + $0x24c] ss:$16 sps:$4 sm:$0xff]   ;;  %v5431_v39 = vld [vmem:[%s6260_s10 + $0x240] ss:$16 sps:$4 sm:$0xff]   ;;  %v5434_v40 = vld [vmem:[%s6260_s10 + $0x248] ss:$16 sps:$4 sm:$0xff]  }
  0x4c   : > { %3548 = vmatpush1.bf16.msra.mxu0 %v5363_v51  ;;  %3956 = vmatpush1.bf16.msra.mxu1 %v5364_v52  ;;  %v5439_v41 = vld [vmem:[%s6260_s10 + $0x264] ss:$16 sps:$4 sm:$0xff]   ;;  %v5442_v42 = vld [vmem:[%s6260_s10 + $0x26c] ss:$16 sps:$4 sm:$0xff]   ;;  %v5437_v43 = vld [vmem:[%s6260_s10 + $0x260] ss:$16 sps:$4 sm:$0xff]  }
  0x4d   : > { %3549 = vmatprep.subr.bf16.mxu0 %v5365_v53  ;;  %3957 = vmatprep.subr.bf16.mxu1 %v5367_v54  ;;  %v5440_v44 = vld [vmem:[%s6260_s10 + $0x268] ss:$16 sps:$4 sm:$0xff]   ;;  %v5445_v45 = vld [vmem:[%s6260_s10 + $0x284] ss:$16 sps:$4 sm:$0xff]   ;;  %v5448_v46 = vld [vmem:[%s6260_s10 + $0x28c] ss:$16 sps:$4 sm:$0xff]  }
  0x4e   : > { %v5443_v47 = vld [vmem:[%s6260_s10 + $0x280] ss:$16 sps:$4 sm:$0xff]   ;;  %v5446_v48 = vld [vmem:[%s6260_s10 + $0x288] ss:$16 sps:$4 sm:$0xff]   ;;  %v5451_v49 = vld [vmem:[%s6260_s10 + $0x2a4] ss:$16 sps:$4 sm:$0xff]  }
  0x4f   : > { %v319_v50 = vld [vmem:[%s6262_s11 + $0x80] sm:$0xff]  ;;  %v5454_v51 = vld [vmem:[%s6260_s10 + $0x2ac] ss:$16 sps:$4 sm:$0xff]  }
  0x50   : > { %3550 = vmatpush1.bf16.msra.mxu0 %v5369_v55  ;;  %3958 = vmatpush1.bf16.msra.mxu1 %v5370_v56  ;;  %v4708_v52 = vcombine.high %v319_v50, %v319_v50  ;;  %v4707_v53 = vcombine.low %v319_v50, %v319_v50  ;;  %v5449_v54 = vld [vmem:[%s6260_s10 + $0x2a0] ss:$16 sps:$4 sm:$0xff]   ;;  %v5452_v55 = vld [vmem:[%s6260_s10 + $0x2a8] ss:$16 sps:$4 sm:$0xff]   ;;  %v5457_v56 = vld [vmem:[%s6260_s10 + $0x2c4] ss:$16 sps:$4 sm:$0xff]  }
  0x51   : > { %3551 = vmatprep.subr.bf16.mxu0 %v5371_v57  ;;  %3959 = vmatprep.subr.bf16.mxu1 %v5373_v58  ;;  %v5460_v57 = vld [vmem:[%s6260_s10 + $0x2cc] ss:$16 sps:$4 sm:$0xff]   ;;  %v5475_v7 = vld [vmem:[%s6260_s10 + $0x324] ss:$16 sps:$4 sm:$0xff]  }
  0x52   : > { %v6395_v58 = vld [vmem:[%s6262_s11 + $0x8] sm:$0xff]  ;;  %v5481_v11 = vld [vmem:[%s6260_s10 + $0x344] ss:$16 sps:$4 sm:$0xff]  }
  0x53   : > { %v5478_v8 = vld [vmem:[%s6260_s10 + $0x32c] ss:$16 sps:$4 sm:$0xff]   ;;  %v6455_v50 = vld [vmem:[%s6262_s11 + $0x10] sm:$0xff] }
  0x54   : > { %3552 = vmatpush1.bf16.msra.mxu0 %v5375_v59  ;;  %3960 = vmatpush1.bf16.msra.mxu1 %v5376_v60  ;;  %v6398_v59 = vld [vmem:[%s6262_s11 + $0x48] sm:$0xff]  ;;  %v5455_v60 = vld [vmem:[%s6260_s10 + $0x2c0] ss:$16 sps:$4 sm:$0xff]  }
  0x55   : > { %3553 = vmatprep.subr.bf16.mxu0 %v5377_v61  ;;  %3961 = vmatprep.subr.bf16.mxu1 %v5379_v62  ;;  %v4694_v61 = vcombine.high %v6395_v58, %v6398_v59  ;;  %v5458_v62 = vld [vmem:[%s6260_s10 + $0x2c8] ss:$16 sps:$4 sm:$0xff]  }
  0x58   : > { %3554 = vmatpush1.bf16.msra.mxu0 %v5381_v63  ;;  %3962 = vmatpush1.bf16.msra.mxu1 %v5382_v0  ;;  %v5463_v63 = vld [vmem:[%s6260_s10 + $0x2e4] ss:$16 sps:$4 sm:$0xff]   ;;  %v5466_v0 = vld [vmem:[%s6260_s10 + $0x2ec] ss:$16 sps:$4 sm:$0xff]  }
  0x59   : > { %3555 = vmatprep.subr.bf16.mxu0 %v5383_v1  ;;  %3963 = vmatprep.subr.bf16.mxu1 %v5385_v2  ;;  %v5461_v1 = vld [vmem:[%s6260_s10 + $0x2e0] ss:$16 sps:$4 sm:$0xff]   ;;  %v5464_v2 = vld [vmem:[%s6260_s10 + $0x2e8] ss:$16 sps:$4 sm:$0xff]  }
  0x5c   : > { %3556 = vmatpush1.bf16.msra.mxu0 %v5387_v3  ;;  %3964 = vmatpush1.bf16.msra.mxu1 %v5388_v4  ;;  %v5469_v3 = vld [vmem:[%s6260_s10 + $0x304] ss:$16 sps:$4 sm:$0xff]   ;;  %v5472_v4 = vld [vmem:[%s6260_s10 + $0x30c] ss:$16 sps:$4 sm:$0xff]  }
  0x5d   : > { %3557 = vmatprep.subr.bf16.mxu0 %v5389_v5  ;;  %3965 = vmatprep.subr.bf16.mxu1 %v5391_v6  ;;  %v5467_v5 = vld [vmem:[%s6260_s10 + $0x300] ss:$16 sps:$4 sm:$0xff]   ;;  %v5470_v6 = vld [vmem:[%s6260_s10 + $0x308] ss:$16 sps:$4 sm:$0xff]  }
  0x60   : > { %3558 = vmatpush1.bf16.msra.mxu0 %v5393_v9  ;;  %3966 = vmatpush1.bf16.msra.mxu1 %v5394_v10  ;;  %v5473_v9 = vld [vmem:[%s6260_s10 + $0x320] ss:$16 sps:$4 sm:$0xff]   ;;  %v5476_v10 = vld [vmem:[%s6260_s10 + $0x328] ss:$16 sps:$4 sm:$0xff]  }
  0x61   : > { %3559 = vmatprep.subr.bf16.mxu0 %v5395_v12  ;;  %3967 = vmatprep.subr.bf16.mxu1 %v5397_v13  ;;  %v5484_v12 = vld [vmem:[%s6260_s10 + $0x34c] ss:$16 sps:$4 sm:$0xff]   ;;  %v5479_v13 = vld [vmem:[%s6260_s10 + $0x340] ss:$16 sps:$4 sm:$0xff]  }
  0x64   : > { %3560 = vmatpush1.bf16.msra.mxu0 %v5399_v14  ;;  %3968 = vmatpush1.bf16.msra.mxu1 %v5400_v15  ;;  %v5482_v14 = vld [vmem:[%s6260_s10 + $0x348] ss:$16 sps:$4 sm:$0xff]   ;;  %v5487_v15 = vld [vmem:[%s6260_s10 + $0x364] ss:$16 sps:$4 sm:$0xff]  }
  0x65   : > { %3561 = vmatprep.subr.bf16.mxu0 %v5401_v16  ;;  %3969 = vmatprep.subr.bf16.mxu1 %v5403_v17  ;;  %v5490_v16 = vld [vmem:[%s6260_s10 + $0x36c] ss:$16 sps:$4 sm:$0xff]   ;;  %v5485_v17 = vld [vmem:[%s6260_s10 + $0x360] ss:$16 sps:$4 sm:$0xff]  }
  0x68   : > { %3562 = vmatpush1.bf16.msra.mxu0 %v5405_v18  ;;  %3970 = vmatpush1.bf16.msra.mxu1 %v5406_v19  ;;  %v5488_v18 = vld [vmem:[%s6260_s10 + $0x368] ss:$16 sps:$4 sm:$0xff]   ;;  %v5493_v19 = vld [vmem:[%s6260_s10 + $0x384] ss:$16 sps:$4 sm:$0xff]  }
  0x69   : > { %3563 = vmatprep.subr.bf16.mxu0 %v5407_v20  ;;  %3971 = vmatprep.subr.bf16.mxu1 %v5409_v21  ;;  %v5496_v20 = vld [vmem:[%s6260_s10 + $0x38c] ss:$16 sps:$4 sm:$0xff]   ;;  %v5491_v21 = vld [vmem:[%s6260_s10 + $0x380] ss:$16 sps:$4 sm:$0xff]  }
  0x6c   : > { %3564 = vmatpush1.bf16.msra.mxu0 %v5411_v22  ;;  %3972 = vmatpush1.bf16.msra.mxu1 %v5412_v23  ;;  %v5494_v22 = vld [vmem:[%s6260_s10 + $0x388] ss:$16 sps:$4 sm:$0xff]   ;;  %v5499_v23 = vld [vmem:[%s6260_s10 + $0x3a4] ss:$16 sps:$4 sm:$0xff]  }
  0x6d   : > { %3565 = vmatprep.subr.bf16.mxu0 %v5413_v24  ;;  %3973 = vmatprep.subr.bf16.mxu1 %v5415_v25  ;;  %v5502_v24 = vld [vmem:[%s6260_s10 + $0x3ac] ss:$16 sps:$4 sm:$0xff]   ;;  %v5497_v25 = vld [vmem:[%s6260_s10 + $0x3a0] ss:$16 sps:$4 sm:$0xff]  }
  0x70   : > { %3566 = vmatpush1.bf16.msra.mxu0 %v5417_v26  ;;  %3974 = vmatpush1.bf16.msra.mxu1 %v5418_v27  ;;  %v5500_v26 = vld [vmem:[%s6260_s10 + $0x3a8] ss:$16 sps:$4 sm:$0xff]   ;;  %v5507_v27 = vld [vmem:[%s6260_s10 + $0x3c4] ss:$16 sps:$4 sm:$0xff]  }
  0x71   : > { %3586 = vmatprep.subr.bf16.mxu0 %v5421_v28  ;;  %3994 = vmatprep.subr.bf16.mxu1 %v5424_v29  ;;  %v5510_v28 = vld [vmem:[%s6260_s10 + $0x3cc] ss:$16 sps:$4 sm:$0xff]   ;;  %v5505_v29 = vld [vmem:[%s6260_s10 + $0x3c0] ss:$16 sps:$4 sm:$0xff]  }
  0x73   : > { %3568 = vmatmul.mubr.bf16.vlgmr.msra.gmra.mrb[0].mxu0 %v4691_v30  ;;  %3976 = vmatmul.mubr.bf16.vlgmr.msra.gmra.mrb[0].mxu1 %v4691_v30  ;;  %v5508_v30 = vld [vmem:[%s6260_s10 + $0x3c8] ss:$16 sps:$4 sm:$0xff]  }
  0x74   : > { %3587 = vmatpush1.bf16.msra.mxu0 %v5419_v31  ;;  %3995 = vmatpush1.bf16.msra.mxu1 %v5422_v32  ;;  %v5513_v31 = vld [vmem:[%s6260_s10 + $0x3e4] ss:$16 sps:$4 sm:$0xff]   ;;  %v5516_v32 = vld [vmem:[%s6260_s10 + $0x3ec] ss:$16 sps:$4 sm:$0xff]  }
  0x75   : > { %3588 = vmatprep.subr.bf16.mxu0 %v5427_v33  ;;  %3996 = vmatprep.subr.bf16.mxu1 %v5430_v34  ;;  %v5511_v33 = vld [vmem:[%s6260_s10 + $0x3e0] ss:$16 sps:$4 sm:$0xff]   ;;  %v5514_v34 = vld [vmem:[%s6260_s10 + $0x3e8] ss:$16 sps:$4 sm:$0xff]  }
  0x76   : > { %3577 = vmatprep.mubr.bf16.mxu0 %v4708_v52  ;;  %3985 = vmatprep.mubr.bf16.mxu1 %v4708_v52  ;;  %v5534_v52 = vld [vmem:[%s6260_s10 + $0x448] ss:$16 sps:$4 sm:$0xff]  }
  0x78   : > { %3589 = vmatpush1.bf16.msra.mxu0 %v5425_v35  ;;  %3997 = vmatpush1.bf16.msra.mxu1 %v5428_v36  ;;  %v5519_v35 = vld [vmem:[%s6260_s10 + $0x404] ss:$16 sps:$4 sm:$0xff]   ;;  %v5522_v36 = vld [vmem:[%s6260_s10 + $0x40c] ss:$16 sps:$4 sm:$0xff]  }
  0x79   : > { %3590 = vmatprep.subr.bf16.mxu0 %v5433_v37  ;;  %3998 = vmatprep.subr.bf16.mxu1 %v5436_v38  ;;  %v4693_v37 = vcombine.low %v6395_v58, %v6398_v59  ;;  %v320_v38 = vld [vmem:[%s6262_s11 + $0x88] sm:$0xff]  ;;  %v5545_v58 = vld [vmem:[%s6260_s10 + $0x484] ss:$16 sps:$4 sm:$0xff]  }
  0x7a   : > { %v5548_v59 = vld [vmem:[%s6260_s10 + $0x48c] ss:$16 sps:$4 sm:$0xff]  }
  0x7b   : > { %3578 = vmatmul.mubr.bf16.gmra.mrb[4].mxu0 %v4707_v53  ;;  %3986 = vmatmul.mubr.bf16.gmra.mrb[4].mxu1 %v4707_v53  ;;  %v5539_v53 = vld [vmem:[%s6260_s10 + $0x464] ss:$16 sps:$4 sm:$0xff]  }
  0x7c   : > { %3591 = vmatpush1.bf16.msra.mxu0 %v5431_v39  ;;  %3999 = vmatpush1.bf16.msra.mxu1 %v5434_v40  ;;  %v5517_v39 = vld [vmem:[%s6260_s10 + $0x400] ss:$16 sps:$4 sm:$0xff]   ;;  %v5520_v40 = vld [vmem:[%s6260_s10 + $0x408] ss:$16 sps:$4 sm:$0xff]  }
  0x7d   : > { %3592 = vmatprep.subr.bf16.mxu0 %v5439_v41  ;;  %4000 = vmatprep.subr.bf16.mxu1 %v5442_v42  ;;  %v5525_v41 = vld [vmem:[%s6260_s10 + $0x424] ss:$16 sps:$4 sm:$0xff]   ;;  %v5528_v42 = vld [vmem:[%s6260_s10 + $0x42c] ss:$16 sps:$4 sm:$0xff]  }
  0x7e   : > { %3618 = vmatprep.mubr.bf16.mxu0 %v4694_v61  ;;  %4026 = vmatprep.mubr.bf16.mxu1 %v4694_v61  ;;  %v5546_v61 = vld [vmem:[%s6260_s10 + $0x488] ss:$16 sps:$4 sm:$0xff]  }
  0x80   : > { %3593 = vmatpush1.bf16.msra.mxu0 %v5437_v43  ;;  %4001 = vmatpush1.bf16.msra.mxu1 %v5440_v44  ;;  %v4710_v43 = vcombine.high %v320_v38, %v320_v38  ;;  %v5523_v44 = vld [vmem:[%s6260_s10 + $0x420] ss:$16 sps:$4 sm:$0xff]  }
  0x81   : > { %3594 = vmatprep.subr.bf16.mxu0 %v5445_v45  ;;  %4002 = vmatprep.subr.bf16.mxu1 %v5448_v46  ;;  %v5526_v45 = vld [vmem:[%s6260_s10 + $0x428] ss:$16 sps:$4 sm:$0xff]   ;;  %v5533_v46 = vld [vmem:[%s6260_s10 + $0x444] ss:$16 sps:$4 sm:$0xff]  }
  0x84   : > { %3595 = vmatpush1.bf16.msra.mxu0 %v5443_v47  ;;  %4003 = vmatpush1.bf16.msra.mxu1 %v5446_v48  ;;  %v5536_v47 = vld [vmem:[%s6260_s10 + $0x44c] ss:$16 sps:$4 sm:$0xff]   ;;  %v5531_v48 = vld [vmem:[%s6260_s10 + $0x440] ss:$16 sps:$4 sm:$0xff]  }
  0x85   : > { %3596 = vmatprep.subr.bf16.mxu0 %v5451_v49  ;;  %4004 = vmatprep.subr.bf16.mxu1 %v5454_v51  ;;  %v4709_v49 = vcombine.low %v320_v38, %v320_v38  ;;  %v6458_v51 = vld [vmem:[%s6262_s11 + $0x50] sm:$0xff] }
  0x86   : > { %v5611_v38 = vld [vmem:[%s6260_s10 + $0x5e4] ss:$16 sps:$4 sm:$0xff]  }
  0x88   : > { %3597 = vmatpush1.bf16.msra.mxu0 %v5449_v54  ;;  %4005 = vmatpush1.bf16.msra.mxu1 %v5452_v55  ;;  %v5542_v54 = vld [vmem:[%s6260_s10 + $0x46c] ss:$16 sps:$4 sm:$0xff]   ;;  %v4696_v55 = vcombine.high %v6455_v50, %v6458_v51 }
  0x89   : > { %3598 = vmatprep.subr.bf16.mxu0 %v5457_v56  ;;  %4006 = vmatprep.subr.bf16.mxu1 %v5460_v57  ;;  %v5537_v56 = vld [vmem:[%s6260_s10 + $0x460] ss:$16 sps:$4 sm:$0xff]   ;;  %v5540_v57 = vld [vmem:[%s6260_s10 + $0x468] ss:$16 sps:$4 sm:$0xff]  }
  0x8c   : > { %3599 = vmatpush1.bf16.msra.mxu0 %v5455_v60  ;;  %4007 = vmatpush1.bf16.msra.mxu1 %v5458_v62  ;;  %v5543_v60 = vld [vmem:[%s6260_s10 + $0x480] ss:$16 sps:$4 sm:$0xff]   ;;  %v5551_v62 = vld [vmem:[%s6260_s10 + $0x4a4] ss:$16 sps:$4 sm:$0xff]  }
  0x8d   : > { %3600 = vmatprep.subr.bf16.mxu0 %v5463_v63  ;;  %4008 = vmatprep.subr.bf16.mxu1 %v5466_v0  ;;  %v5554_v63 = vld [vmem:[%s6260_s10 + $0x4ac] ss:$16 sps:$4 sm:$0xff]   ;;  %v5549_v0 = vld [vmem:[%s6260_s10 + $0x4a0] ss:$16 sps:$4 sm:$0xff]  }
  0x90   : > { %3601 = vmatpush1.bf16.msra.mxu0 %v5461_v1  ;;  %4009 = vmatpush1.bf16.msra.mxu1 %v5464_v2  ;;  %v5552_v1 = vld [vmem:[%s6260_s10 + $0x4a8] ss:$16 sps:$4 sm:$0xff]   ;;  %v5557_v2 = vld [vmem:[%s6260_s10 + $0x4c4] ss:$16 sps:$4 sm:$0xff]  }
  0x91   : > { %3602 = vmatprep.subr.bf16.mxu0 %v5469_v3  ;;  %4010 = vmatprep.subr.bf16.mxu1 %v5472_v4  ;;  %v5560_v3 = vld [vmem:[%s6260_s10 + $0x4cc] ss:$16 sps:$4 sm:$0xff]   ;;  %v5555_v4 = vld [vmem:[%s6260_s10 + $0x4c0] ss:$16 sps:$4 sm:$0xff]  }
  0x94   : > { %3603 = vmatpush1.bf16.msra.mxu0 %v5467_v5  ;;  %4011 = vmatpush1.bf16.msra.mxu1 %v5470_v6  ;;  %v5558_v5 = vld [vmem:[%s6260_s10 + $0x4c8] ss:$16 sps:$4 sm:$0xff]   ;;  %v5563_v6 = vld [vmem:[%s6260_s10 + $0x4e4] ss:$16 sps:$4 sm:$0xff]  }
  0x95   : > { %3604 = vmatprep.subr.bf16.mxu0 %v5475_v7  ;;  %4012 = vmatprep.subr.bf16.mxu1 %v5478_v8  ;;  %v5566_v7 = vld [vmem:[%s6260_s10 + $0x4ec] ss:$16 sps:$4 sm:$0xff]   ;;  %v5561_v8 = vld [vmem:[%s6260_s10 + $0x4e0] ss:$16 sps:$4 sm:$0xff]  }
  0x98   : > { %3605 = vmatpush1.bf16.msra.mxu0 %v5473_v9  ;;  %4013 = vmatpush1.bf16.msra.mxu1 %v5476_v10  ;;  %v5564_v9 = vld [vmem:[%s6260_s10 + $0x4e8] ss:$16 sps:$4 sm:$0xff]   ;;  %v5569_v10 = vld [vmem:[%s6260_s10 + $0x504] ss:$16 sps:$4 sm:$0xff]  }
  0x99   : > { %3606 = vmatprep.subr.bf16.mxu0 %v5481_v11  ;;  %4014 = vmatprep.subr.bf16.mxu1 %v5484_v12  ;;  %v5572_v11 = vld [vmem:[%s6260_s10 + $0x50c] ss:$16 sps:$4 sm:$0xff]   ;;  %v5567_v12 = vld [vmem:[%s6260_s10 + $0x500] ss:$16 sps:$4 sm:$0xff]  }
  0x9c   : > { %3607 = vmatpush1.bf16.msra.mxu0 %v5479_v13  ;;  %4015 = vmatpush1.bf16.msra.mxu1 %v5482_v14  ;;  %v5570_v13 = vld [vmem:[%s6260_s10 + $0x508] ss:$16 sps:$4 sm:$0xff]   ;;  %v5575_v14 = vld [vmem:[%s6260_s10 + $0x524] ss:$16 sps:$4 sm:$0xff]  }
  0x9d   : > { %3608 = vmatprep.subr.bf16.mxu0 %v5487_v15  ;;  %4016 = vmatprep.subr.bf16.mxu1 %v5490_v16  ;;  %v5578_v15 = vld [vmem:[%s6260_s10 + $0x52c] ss:$16 sps:$4 sm:$0xff]   ;;  %v5573_v16 = vld [vmem:[%s6260_s10 + $0x520] ss:$16 sps:$4 sm:$0xff]  }
  0xa0   : > { %3609 = vmatpush1.bf16.msra.mxu0 %v5485_v17  ;;  %4017 = vmatpush1.bf16.msra.mxu1 %v5488_v18  ;;  %v5576_v17 = vld [vmem:[%s6260_s10 + $0x528] ss:$16 sps:$4 sm:$0xff]   ;;  %v5581_v18 = vld [vmem:[%s6260_s10 + $0x544] ss:$16 sps:$4 sm:$0xff]  }
  0xa1   : > { %3610 = vmatprep.subr.bf16.mxu0 %v5493_v19  ;;  %4018 = vmatprep.subr.bf16.mxu1 %v5496_v20  ;;  %v5584_v19 = vld [vmem:[%s6260_s10 + $0x54c] ss:$16 sps:$4 sm:$0xff]   ;;  %v5579_v20 = vld [vmem:[%s6260_s10 + $0x540] ss:$16 sps:$4 sm:$0xff]  }
  0xa4   : > { %3611 = vmatpush1.bf16.msra.mxu0 %v5491_v21  ;;  %4019 = vmatpush1.bf16.msra.mxu1 %v5494_v22  ;;  %v5582_v21 = vld [vmem:[%s6260_s10 + $0x548] ss:$16 sps:$4 sm:$0xff]   ;;  %v5587_v22 = vld [vmem:[%s6260_s10 + $0x564] ss:$16 sps:$4 sm:$0xff]  }
  0xa5   : > { %3612 = vmatprep.subr.bf16.mxu0 %v5499_v23  ;;  %4020 = vmatprep.subr.bf16.mxu1 %v5502_v24  ;;  %v5590_v23 = vld [vmem:[%s6260_s10 + $0x56c] ss:$16 sps:$4 sm:$0xff]   ;;  %v5585_v24 = vld [vmem:[%s6260_s10 + $0x560] ss:$16 sps:$4 sm:$0xff]  }
  0xa8   : > { %3613 = vmatpush1.bf16.msra.mxu0 %v5497_v25  ;;  %4021 = vmatpush1.bf16.msra.mxu1 %v5500_v26  ;;  %v5588_v25 = vld [vmem:[%s6260_s10 + $0x568] ss:$16 sps:$4 sm:$0xff]   ;;  %v5593_v26 = vld [vmem:[%s6260_s10 + $0x584] ss:$16 sps:$4 sm:$0xff]  }
  0xa9   : > { %3614 = vmatprep.subr.bf16.mxu0 %v5507_v27  ;;  %4022 = vmatprep.subr.bf16.mxu1 %v5510_v28  ;;  %v5596_v27 = vld [vmem:[%s6260_s10 + $0x58c] ss:$16 sps:$4 sm:$0xff]   ;;  %v5591_v28 = vld [vmem:[%s6260_s10 + $0x580] ss:$16 sps:$4 sm:$0xff]  }
  0xac   : > { %3615 = vmatpush1.bf16.msra.mxu0 %v5505_v29  ;;  %4023 = vmatpush1.bf16.msra.mxu1 %v5508_v30  ;;  %v5594_v29 = vld [vmem:[%s6260_s10 + $0x588] ss:$16 sps:$4 sm:$0xff]   ;;  %v5599_v30 = vld [vmem:[%s6260_s10 + $0x5a4] ss:$16 sps:$4 sm:$0xff]  }
  0xad   : > { %3616 = vmatprep.subr.bf16.mxu0 %v5513_v31  ;;  %4024 = vmatprep.subr.bf16.mxu1 %v5516_v32  ;;  %v5602_v31 = vld [vmem:[%s6260_s10 + $0x5ac] ss:$16 sps:$4 sm:$0xff]   ;;  %v5597_v32 = vld [vmem:[%s6260_s10 + $0x5a0] ss:$16 sps:$4 sm:$0xff]  }
  0xb0   : > { %3617 = vmatpush1.bf16.msra.mxu0 %v5511_v33  ;;  %4025 = vmatpush1.bf16.msra.mxu1 %v5514_v34  ;;  %v5600_v33 = vld [vmem:[%s6260_s10 + $0x5a8] ss:$16 sps:$4 sm:$0xff]   ;;  %v5605_v34 = vld [vmem:[%s6260_s10 + $0x5c4] ss:$16 sps:$4 sm:$0xff]  }
  0xb1   : > { %3637 = vmatprep.subr.bf16.mxu0 %v5519_v35  ;;  %4045 = vmatprep.subr.bf16.mxu1 %v5522_v36  ;;  %v5608_v35 = vld [vmem:[%s6260_s10 + $0x5cc] ss:$16 sps:$4 sm:$0xff]   ;;  %v5603_v36 = vld [vmem:[%s6260_s10 + $0x5c0] ss:$16 sps:$4 sm:$0xff]  }
  0xb3   : > { %3619 = vmatmul.mubr.bf16.vlgmr.msra.gmra.mrb[0].mxu0 %v4693_v37  ;;  %4027 = vmatmul.mubr.bf16.vlgmr.msra.gmra.mrb[0].mxu1 %v4693_v37  ;;  %v5606_v37 = vld [vmem:[%s6260_s10 + $0x5c8] ss:$16 sps:$4 sm:$0xff]  }
  0xb4   : > { %3638 = vmatpush1.bf16.msra.mxu0 %v5517_v39  ;;  %4046 = vmatpush1.bf16.msra.mxu1 %v5520_v40  ;;  %v5614_v39 = vld [vmem:[%s6260_s10 + $0x5ec] ss:$16 sps:$4 sm:$0xff]   ;;  %v5609_v40 = vld [vmem:[%s6260_s10 + $0x5e0] ss:$16 sps:$4 sm:$0xff]  }
  0xb5   : > { %3639 = vmatprep.subr.bf16.mxu0 %v5525_v41  ;;  %4047 = vmatprep.subr.bf16.mxu1 %v5528_v42  ;;  %v5612_v41 = vld [vmem:[%s6260_s10 + $0x5e8] ss:$16 sps:$4 sm:$0xff]   ;;  %v5617_v42 = vld [vmem:[%s6260_s10 + $0x604] ss:$16 sps:$4 sm:$0xff]  }
  0xb6   : > { %3628 = vmatprep.mubr.bf16.mxu0 %v4710_v43  ;;  %4036 = vmatprep.mubr.bf16.mxu1 %v4710_v43  ;;  %v5620_v43 = vld [vmem:[%s6260_s10 + $0x60c] ss:$16 sps:$4 sm:$0xff]  }
  0xb8   : > { %3640 = vmatpush1.bf16.msra.mxu0 %v5523_v44  ;;  %4048 = vmatpush1.bf16.msra.mxu1 %v5526_v45  ;;  %v5615_v44 = vld [vmem:[%s6260_s10 + $0x600] ss:$16 sps:$4 sm:$0xff]   ;;  %v4695_v45 = vcombine.low %v6455_v50, %v6458_v51  ;;  %v5631_v50 = vld [vmem:[%s6260_s10 + $0x644] ss:$16 sps:$4 sm:$0xff]   ;;  %v5634_v51 = vld [vmem:[%s6260_s10 + $0x64c] ss:$16 sps:$4 sm:$0xff]  }
  0xb9   : > { %3641 = vmatprep.subr.bf16.mxu0 %v5533_v46  ;;  %4049 = vmatprep.subr.bf16.mxu1 %v5536_v47  ;;  %v5618_v46 = vld [vmem:[%s6260_s10 + $0x608] ss:$16 sps:$4 sm:$0xff]   ;;  %v321_v47 = vld [vmem:[%s6262_s11 + $0x90] sm:$0xff] }
  0xbb   : > { %3629 = vmatmul.mubr.bf16.gmra.mrb[8].mxu0 %v4709_v49  ;;  %4037 = vmatmul.mubr.bf16.gmra.mrb[8].mxu1 %v4709_v49  ;;  %v5626_v49 = vld [vmem:[%s6260_s10 + $0x62c] ss:$16 sps:$4 sm:$0xff]  }
  0xbc   : > { %3642 = vmatpush1.bf16.msra.mxu0 %v5531_v48  ;;  %4050 = vmatpush1.bf16.msra.mxu1 %v5534_v52  ;;  %v5623_v48 = vld [vmem:[%s6260_s10 + $0x624] ss:$16 sps:$4 sm:$0xff]   ;;  %v4712_v52 = vcombine.high %v321_v47, %v321_v47 }
  0xbd   : > { %3643 = vmatprep.subr.bf16.mxu0 %v5539_v53  ;;  %4051 = vmatprep.subr.bf16.mxu1 %v5542_v54  ;;  %v5621_v53 = vld [vmem:[%s6260_s10 + $0x620] ss:$16 sps:$4 sm:$0xff]   ;;  %v5624_v54 = vld [vmem:[%s6260_s10 + $0x628] ss:$16 sps:$4 sm:$0xff]  }
  0xbe   : > { %3669 = vmatprep.mubr.bf16.mxu0 %v4696_v55  ;;  %4077 = vmatprep.mubr.bf16.mxu1 %v4696_v55  ;;  %v5629_v55 = vld [vmem:[%s6260_s10 + $0x640] ss:$16 sps:$4 sm:$0xff]  }
  0xc0   : > { %3644 = vmatpush1.bf16.msra.mxu0 %v5537_v56  ;;  %4052 = vmatpush1.bf16.msra.mxu1 %v5540_v57  ;;  %v5632_v56 = vld [vmem:[%s6260_s10 + $0x648] ss:$16 sps:$4 sm:$0xff]   ;;  %v4711_v57 = vcombine.low %v321_v47, %v321_v47  ;;  %v5707_v47 = vld [vmem:[%s6260_s10 + $0x7e0] ss:$16 sps:$4 sm:$0xff]  }
  0xc1   : > { %3645 = vmatprep.subr.bf16.mxu0 %v5545_v58  ;;  %4053 = vmatprep.subr.bf16.mxu1 %v5548_v59  ;;  %v6531_v58 = vld [vmem:[%s6262_s11 + $0x18] sm:$0xff] }
  0xc2   : > { %v6534_v59 = vld [vmem:[%s6262_s11 + $0x58] sm:$0xff] }
  0xc4   : > { %3646 = vmatpush1.bf16.msra.mxu0 %v5543_v60  ;;  %4054 = vmatpush1.bf16.msra.mxu1 %v5546_v61  ;;  %v5637_v60 = vld [vmem:[%s6260_s10 + $0x664] ss:$16 sps:$4 sm:$0xff]   ;;  %v5640_v61 = vld [vmem:[%s6260_s10 + $0x66c] ss:$16 sps:$4 sm:$0xff]  }
  0xc5   : > { %3647 = vmatprep.subr.bf16.mxu0 %v5551_v62  ;;  %4055 = vmatprep.subr.bf16.mxu1 %v5554_v63  ;;  %v4698_v62 = vcombine.high %v6531_v58, %v6534_v59  ;;  %v5635_v63 = vld [vmem:[%s6260_s10 + $0x660] ss:$16 sps:$4 sm:$0xff]  }
  0xc8   : > { %3648 = vmatpush1.bf16.msra.mxu0 %v5549_v0  ;;  %4056 = vmatpush1.bf16.msra.mxu1 %v5552_v1  ;;  %v5638_v0 = vld [vmem:[%s6260_s10 + $0x668] ss:$16 sps:$4 sm:$0xff]   ;;  %v5643_v1 = vld [vmem:[%s6260_s10 + $0x684] ss:$16 sps:$4 sm:$0xff]  }
  0xc9   : > { %3649 = vmatprep.subr.bf16.mxu0 %v5557_v2  ;;  %4057 = vmatprep.subr.bf16.mxu1 %v5560_v3  ;;  %v5646_v2 = vld [vmem:[%s6260_s10 + $0x68c] ss:$16 sps:$4 sm:$0xff]   ;;  %v5641_v3 = vld [vmem:[%s6260_s10 + $0x680] ss:$16 sps:$4 sm:$0xff]  }
  0xcc   : > { %3650 = vmatpush1.bf16.msra.mxu0 %v5555_v4  ;;  %4058 = vmatpush1.bf16.msra.mxu1 %v5558_v5  ;;  %v5644_v4 = vld [vmem:[%s6260_s10 + $0x688] ss:$16 sps:$4 sm:$0xff]   ;;  %v5649_v5 = vld [vmem:[%s6260_s10 + $0x6a4] ss:$16 sps:$4 sm:$0xff]  }
  0xcd   : > { %3651 = vmatprep.subr.bf16.mxu0 %v5563_v6  ;;  %4059 = vmatprep.subr.bf16.mxu1 %v5566_v7  ;;  %v5652_v6 = vld [vmem:[%s6260_s10 + $0x6ac] ss:$16 sps:$4 sm:$0xff]   ;;  %v5647_v7 = vld [vmem:[%s6260_s10 + $0x6a0] ss:$16 sps:$4 sm:$0xff]  }
  0xd0   : > { %3652 = vmatpush1.bf16.msra.mxu0 %v5561_v8  ;;  %4060 = vmatpush1.bf16.msra.mxu1 %v5564_v9  ;;  %v5650_v8 = vld [vmem:[%s6260_s10 + $0x6a8] ss:$16 sps:$4 sm:$0xff]   ;;  %v5655_v9 = vld [vmem:[%s6260_s10 + $0x6c4] ss:$16 sps:$4 sm:$0xff]  }
  0xd1   : > { %3653 = vmatprep.subr.bf16.mxu0 %v5569_v10  ;;  %4061 = vmatprep.subr.bf16.mxu1 %v5572_v11  ;;  %v5658_v10 = vld [vmem:[%s6260_s10 + $0x6cc] ss:$16 sps:$4 sm:$0xff]   ;;  %v5653_v11 = vld [vmem:[%s6260_s10 + $0x6c0] ss:$16 sps:$4 sm:$0xff]  }
  0xd4   : > { %3654 = vmatpush1.bf16.msra.mxu0 %v5567_v12  ;;  %4062 = vmatpush1.bf16.msra.mxu1 %v5570_v13  ;;  %v5656_v12 = vld [vmem:[%s6260_s10 + $0x6c8] ss:$16 sps:$4 sm:$0xff]   ;;  %v5661_v13 = vld [vmem:[%s6260_s10 + $0x6e4] ss:$16 sps:$4 sm:$0xff]  }
  0xd5   : > { %3655 = vmatprep.subr.bf16.mxu0 %v5575_v14  ;;  %4063 = vmatprep.subr.bf16.mxu1 %v5578_v15  ;;  %v5664_v14 = vld [vmem:[%s6260_s10 + $0x6ec] ss:$16 sps:$4 sm:$0xff]   ;;  %v5659_v15 = vld [vmem:[%s6260_s10 + $0x6e0] ss:$16 sps:$4 sm:$0xff]  }
  0xd8   : > { %3656 = vmatpush1.bf16.msra.mxu0 %v5573_v16  ;;  %4064 = vmatpush1.bf16.msra.mxu1 %v5576_v17  ;;  %v5662_v16 = vld [vmem:[%s6260_s10 + $0x6e8] ss:$16 sps:$4 sm:$0xff]   ;;  %v5667_v17 = vld [vmem:[%s6260_s10 + $0x704] ss:$16 sps:$4 sm:$0xff]  }
  0xd9   : > { %3657 = vmatprep.subr.bf16.mxu0 %v5581_v18  ;;  %4065 = vmatprep.subr.bf16.mxu1 %v5584_v19  ;;  %v5670_v18 = vld [vmem:[%s6260_s10 + $0x70c] ss:$16 sps:$4 sm:$0xff]   ;;  %v5665_v19 = vld [vmem:[%s6260_s10 + $0x700] ss:$16 sps:$4 sm:$0xff]  }
  0xdc   : > { %3658 = vmatpush1.bf16.msra.mxu0 %v5579_v20  ;;  %4066 = vmatpush1.bf16.msra.mxu1 %v5582_v21  ;;  %v5668_v20 = vld [vmem:[%s6260_s10 + $0x708] ss:$16 sps:$4 sm:$0xff]   ;;  %v5673_v21 = vld [vmem:[%s6260_s10 + $0x724] ss:$16 sps:$4 sm:$0xff]  }
  0xdd   : > { %3659 = vmatprep.subr.bf16.mxu0 %v5587_v22  ;;  %4067 = vmatprep.subr.bf16.mxu1 %v5590_v23  ;;  %v5676_v22 = vld [vmem:[%s6260_s10 + $0x72c] ss:$16 sps:$4 sm:$0xff]   ;;  %v5671_v23 = vld [vmem:[%s6260_s10 + $0x720] ss:$16 sps:$4 sm:$0xff]  }
  0xe0   : > { %3660 = vmatpush1.bf16.msra.mxu0 %v5585_v24  ;;  %4068 = vmatpush1.bf16.msra.mxu1 %v5588_v25  ;;  %v5674_v24 = vld [vmem:[%s6260_s10 + $0x728] ss:$16 sps:$4 sm:$0xff]   ;;  %v5679_v25 = vld [vmem:[%s6260_s10 + $0x744] ss:$16 sps:$4 sm:$0xff]  }
  0xe1   : > { %3661 = vmatprep.subr.bf16.mxu0 %v5593_v26  ;;  %4069 = vmatprep.subr.bf16.mxu1 %v5596_v27  ;;  %v5682_v26 = vld [vmem:[%s6260_s10 + $0x74c] ss:$16 sps:$4 sm:$0xff]   ;;  %v5677_v27 = vld [vmem:[%s6260_s10 + $0x740] ss:$16 sps:$4 sm:$0xff]  }
  0xe4   : > { %3662 = vmatpush1.bf16.msra.mxu0 %v5591_v28  ;;  %4070 = vmatpush1.bf16.msra.mxu1 %v5594_v29  ;;  %v5680_v28 = vld [vmem:[%s6260_s10 + $0x748] ss:$16 sps:$4 sm:$0xff]   ;;  %v5685_v29 = vld [vmem:[%s6260_s10 + $0x764] ss:$16 sps:$4 sm:$0xff]  }
  0xe5   : > { %3663 = vmatprep.subr.bf16.mxu0 %v5599_v30  ;;  %4071 = vmatprep.subr.bf16.mxu1 %v5602_v31  ;;  %v5688_v30 = vld [vmem:[%s6260_s10 + $0x76c] ss:$16 sps:$4 sm:$0xff]   ;;  %v5683_v31 = vld [vmem:[%s6260_s10 + $0x760] ss:$16 sps:$4 sm:$0xff]  }
  0xe8   : > { %3664 = vmatpush1.bf16.msra.mxu0 %v5597_v32  ;;  %4072 = vmatpush1.bf16.msra.mxu1 %v5600_v33  ;;  %v5686_v32 = vld [vmem:[%s6260_s10 + $0x768] ss:$16 sps:$4 sm:$0xff]   ;;  %v5691_v33 = vld [vmem:[%s6260_s10 + $0x784] ss:$16 sps:$4 sm:$0xff]  }
  0xe9   : > { %3665 = vmatprep.subr.bf16.mxu0 %v5605_v34  ;;  %4073 = vmatprep.subr.bf16.mxu1 %v5608_v35  ;;  %v5694_v34 = vld [vmem:[%s6260_s10 + $0x78c] ss:$16 sps:$4 sm:$0xff]   ;;  %v5689_v35 = vld [vmem:[%s6260_s10 + $0x780] ss:$16 sps:$4 sm:$0xff]  }
  0xec   : > { %3666 = vmatpush1.bf16.msra.mxu0 %v5603_v36  ;;  %4074 = vmatpush1.bf16.msra.mxu1 %v5606_v37  ;;  %v5692_v36 = vld [vmem:[%s6260_s10 + $0x788] ss:$16 sps:$4 sm:$0xff]   ;;  %v5697_v37 = vld [vmem:[%s6260_s10 + $0x7a4] ss:$16 sps:$4 sm:$0xff]  }
  0xed   : > { %3667 = vmatprep.subr.bf16.mxu0 %v5611_v38  ;;  %4075 = vmatprep.subr.bf16.mxu1 %v5614_v39  ;;  %v5700_v38 = vld [vmem:[%s6260_s10 + $0x7ac] ss:$16 sps:$4 sm:$0xff]   ;;  %v5695_v39 = vld [vmem:[%s6260_s10 + $0x7a0] ss:$16 sps:$4 sm:$0xff]  }
  0xf0   : > { %3668 = vmatpush1.bf16.msra.mxu0 %v5609_v40  ;;  %4076 = vmatpush1.bf16.msra.mxu1 %v5612_v41  ;;  %v5698_v40 = vld [vmem:[%s6260_s10 + $0x7a8] ss:$16 sps:$4 sm:$0xff]   ;;  %v5703_v41 = vld [vmem:[%s6260_s10 + $0x7c4] ss:$16 sps:$4 sm:$0xff]  }
  0xf1   : > { %3688 = vmatprep.subr.bf16.mxu0 %v5617_v42  ;;  %4096 = vmatprep.subr.bf16.mxu1 %v5620_v43  ;;  %v5706_v42 = vld [vmem:[%s6260_s10 + $0x7cc] ss:$16 sps:$4 sm:$0xff]   ;;  %v5701_v43 = vld [vmem:[%s6260_s10 + $0x7c0] ss:$16 sps:$4 sm:$0xff]  }
  0xf3   : > { %3670 = vmatmul.mubr.bf16.vlgmr.msra.gmra.mrb[0].mxu0 %v4695_v45  ;;  %4078 = vmatmul.mubr.bf16.vlgmr.msra.gmra.mrb[0].mxu1 %v4695_v45  ;;  %v5709_v45 = vld [vmem:[%s6260_s10 + $0x7e4] ss:$16 sps:$4 sm:$0xff]  }
  0xf4   : > { %3689 = vmatpush1.bf16.msra.mxu0 %v5615_v44  ;;  %4097 = vmatpush1.bf16.msra.mxu1 %v5618_v46  ;;  %v5704_v44 = vld [vmem:[%s6260_s10 + $0x7c8] ss:$16 sps:$4 sm:$0xff]   ;;  %v5712_v46 = vld [vmem:[%s6260_s10 + $0x7ec] ss:$16 sps:$4 sm:$0xff]  }
  0xf5   : > { %3690 = vmatprep.subr.bf16.mxu0 %v5623_v48  ;;  %4098 = vmatprep.subr.bf16.mxu1 %v5626_v49  ;;  %v5710_v48 = vld [vmem:[%s6260_s10 + $0x7e8] ss:$16 sps:$4 sm:$0xff]   ;;  %v5715_v49 = vld [vmem:[%s6260_s10 + $0x804] ss:$16 sps:$4 sm:$0xff]  }
  0xf6   : > { %3679 = vmatprep.mubr.bf16.mxu0 %v4712_v52  ;;  %4087 = vmatprep.mubr.bf16.mxu1 %v4712_v52  ;;  %v5718_v52 = vld [vmem:[%s6260_s10 + $0x80c] ss:$16 sps:$4 sm:$0xff]  }
  0xf8   : > { %3691 = vmatpush1.bf16.msra.mxu0 %v5621_v53  ;;  %4099 = vmatpush1.bf16.msra.mxu1 %v5624_v54  ;;  %v4697_v53 = vcombine.low %v6531_v58, %v6534_v59  ;;  %v5713_v54 = vld [vmem:[%s6260_s10 + $0x800] ss:$16 sps:$4 sm:$0xff]   ;;  %v5722_v59 = vld [vmem:[%s6260_s10 + $0x828] ss:$16 sps:$4 sm:$0xff]  }
  0xf9   : > { %3692 = vmatprep.subr.bf16.mxu0 %v5631_v50  ;;  %4100 = vmatprep.subr.bf16.mxu1 %v5634_v51  ;;  %v322_v50 = vld [vmem:[%s6262_s11 + $0x98] sm:$0xff]  ;;  %v5719_v58 = vld [vmem:[%s6260_s10 + $0x820] ss:$16 sps:$4 sm:$0xff]  }
  0xfa   : > { %v5716_v51 = vld [vmem:[%s6260_s10 + $0x808] ss:$16 sps:$4 sm:$0xff]  }
  0xfb   : > { %3680 = vmatmul.mubr.bf16.gmra.mrb[12].mxu0 %v4711_v57  ;;  %4088 = vmatmul.mubr.bf16.gmra.mrb[12].mxu1 %v4711_v57  ;;  %v4714_v57 = vcombine.high %v322_v50, %v322_v50 }
  0xfc   : > { %3693 = vmatpush1.bf16.msra.mxu0 %v5629_v55  ;;  %4101 = vmatpush1.bf16.msra.mxu1 %v5632_v56  ;;  %v5721_v55 = vld [vmem:[%s6260_s10 + $0x824] ss:$16 sps:$4 sm:$0xff]   ;;  %v5724_v56 = vld [vmem:[%s6260_s10 + $0x82c] ss:$16 sps:$4 sm:$0xff]  }
  0xfd   : > { %3694 = vmatprep.subr.bf16.mxu0 %v5637_v60  ;;  %4102 = vmatprep.subr.bf16.mxu1 %v5640_v61  ;;  %v5729_v60 = vld [vmem:[%s6260_s10 + $0x844] ss:$16 sps:$4 sm:$0xff]   ;;  %v5732_v61 = vld [vmem:[%s6260_s10 + $0x84c] ss:$16 sps:$4 sm:$0xff]  }
  0xfe   : > { %3720 = vmatprep.mubr.bf16.mxu0 %v4698_v62  ;;  %4128 = vmatprep.mubr.bf16.mxu1 %v4698_v62  ;;  %v5727_v62 = vld [vmem:[%s6260_s10 + $0x840] ss:$16 sps:$4 sm:$0xff]  }
 0x100   : > { %3695 = vmatpush1.bf16.msra.mxu0 %v5635_v63  ;;  %4103 = vmatpush1.bf16.msra.mxu1 %v5638_v0  ;;  %v6605_v63 = vld [vmem:[%s6262_s11 + $0x20] sm:$0xff]  ;;  %v4713_v0 = vcombine.low %v322_v50, %v322_v50  ;;  %v5798_v50 = vld [vmem:[%s6260_s10 + $0x9ac] ss:$16 sps:$4 sm:$0xff]  }
 0x101   : > { %3696 = vmatprep.subr.bf16.mxu0 %v5643_v1  ;;  %4104 = vmatprep.subr.bf16.mxu1 %v5646_v2  ;;  %v6608_v1 = vld [vmem:[%s6262_s11 + $0x60] sm:$0xff]  ;;  %v5730_v2 = vld [vmem:[%s6260_s10 + $0x848] ss:$16 sps:$4 sm:$0xff]  }
 0x104   : > { %3697 = vmatpush1.bf16.msra.mxu0 %v5641_v3  ;;  %4105 = vmatpush1.bf16.msra.mxu1 %v5644_v4  ;;  %v5735_v3 = vld [vmem:[%s6260_s10 + $0x864] ss:$16 sps:$4 sm:$0xff]   ;;  %v5738_v4 = vld [vmem:[%s6260_s10 + $0x86c] ss:$16 sps:$4 sm:$0xff]  }
 0x105   : > { %3698 = vmatprep.subr.bf16.mxu0 %v5649_v5  ;;  %4106 = vmatprep.subr.bf16.mxu1 %v5652_v6  ;;  %v4700_v5 = vcombine.high %v6605_v63, %v6608_v1  ;;  %v5733_v6 = vld [vmem:[%s6260_s10 + $0x860] ss:$16 sps:$4 sm:$0xff]  }
 0x108   : > { %3699 = vmatpush1.bf16.msra.mxu0 %v5647_v7  ;;  %4107 = vmatpush1.bf16.msra.mxu1 %v5650_v8  ;;  %v5736_v7 = vld [vmem:[%s6260_s10 + $0x868] ss:$16 sps:$4 sm:$0xff]   ;;  %v5741_v8 = vld [vmem:[%s6260_s10 + $0x884] ss:$16 sps:$4 sm:$0xff]  }
 0x109   : > { %3700 = vmatprep.subr.bf16.mxu0 %v5655_v9  ;;  %4108 = vmatprep.subr.bf16.mxu1 %v5658_v10  ;;  %v5744_v9 = vld [vmem:[%s6260_s10 + $0x88c] ss:$16 sps:$4 sm:$0xff]   ;;  %v5739_v10 = vld [vmem:[%s6260_s10 + $0x880] ss:$16 sps:$4 sm:$0xff]  }
 0x10c   : > { %3701 = vmatpush1.bf16.msra.mxu0 %v5653_v11  ;;  %4109 = vmatpush1.bf16.msra.mxu1 %v5656_v12  ;;  %v5742_v11 = vld [vmem:[%s6260_s10 + $0x888] ss:$16 sps:$4 sm:$0xff]   ;;  %v5747_v12 = vld [vmem:[%s6260_s10 + $0x8a4] ss:$16 sps:$4 sm:$0xff]  }
 0x10d   : > { %3702 = vmatprep.subr.bf16.mxu0 %v5661_v13  ;;  %4110 = vmatprep.subr.bf16.mxu1 %v5664_v14  ;;  %v5750_v13 = vld [vmem:[%s6260_s10 + $0x8ac] ss:$16 sps:$4 sm:$0xff]   ;;  %v5745_v14 = vld [vmem:[%s6260_s10 + $0x8a0] ss:$16 sps:$4 sm:$0xff]  }
 0x110   : > { %3703 = vmatpush1.bf16.msra.mxu0 %v5659_v15  ;;  %4111 = vmatpush1.bf16.msra.mxu1 %v5662_v16  ;;  %v5748_v15 = vld [vmem:[%s6260_s10 + $0x8a8] ss:$16 sps:$4 sm:$0xff]   ;;  %v5753_v16 = vld [vmem:[%s6260_s10 + $0x8c4] ss:$16 sps:$4 sm:$0xff]  }
 0x111   : > { %3704 = vmatprep.subr.bf16.mxu0 %v5667_v17  ;;  %4112 = vmatprep.subr.bf16.mxu1 %v5670_v18  ;;  %v5756_v17 = vld [vmem:[%s6260_s10 + $0x8cc] ss:$16 sps:$4 sm:$0xff]   ;;  %v5751_v18 = vld [vmem:[%s6260_s10 + $0x8c0] ss:$16 sps:$4 sm:$0xff]  }
 0x114   : > { %3705 = vmatpush1.bf16.msra.mxu0 %v5665_v19  ;;  %4113 = vmatpush1.bf16.msra.mxu1 %v5668_v20  ;;  %v5754_v19 = vld [vmem:[%s6260_s10 + $0x8c8] ss:$16 sps:$4 sm:$0xff]   ;;  %v5759_v20 = vld [vmem:[%s6260_s10 + $0x8e4] ss:$16 sps:$4 sm:$0xff]  }
 0x115   : > { %3706 = vmatprep.subr.bf16.mxu0 %v5673_v21  ;;  %4114 = vmatprep.subr.bf16.mxu1 %v5676_v22  ;;  %v5762_v21 = vld [vmem:[%s6260_s10 + $0x8ec] ss:$16 sps:$4 sm:$0xff]   ;;  %v5757_v22 = vld [vmem:[%s6260_s10 + $0x8e0] ss:$16 sps:$4 sm:$0xff]  }
 0x118   : > { %3707 = vmatpush1.bf16.msra.mxu0 %v5671_v23  ;;  %4115 = vmatpush1.bf16.msra.mxu1 %v5674_v24  ;;  %v5760_v23 = vld [vmem:[%s6260_s10 + $0x8e8] ss:$16 sps:$4 sm:$0xff]   ;;  %v5765_v24 = vld [vmem:[%s6260_s10 + $0x904] ss:$16 sps:$4 sm:$0xff]  }
 0x119   : > { %3708 = vmatprep.subr.bf16.mxu0 %v5679_v25  ;;  %4116 = vmatprep.subr.bf16.mxu1 %v5682_v26  ;;  %v5768_v25 = vld [vmem:[%s6260_s10 + $0x90c] ss:$16 sps:$4 sm:$0xff]   ;;  %v5763_v26 = vld [vmem:[%s6260_s10 + $0x900] ss:$16 sps:$4 sm:$0xff]  }
 0x11c   : > { %3709 = vmatpush1.bf16.msra.mxu0 %v5677_v27  ;;  %4117 = vmatpush1.bf16.msra.mxu1 %v5680_v28  ;;  %v5766_v27 = vld [vmem:[%s6260_s10 + $0x908] ss:$16 sps:$4 sm:$0xff]   ;;  %v5771_v28 = vld [vmem:[%s6260_s10 + $0x924] ss:$16 sps:$4 sm:$0xff]  }
 0x11d   : > { %3710 = vmatprep.subr.bf16.mxu0 %v5685_v29  ;;  %4118 = vmatprep.subr.bf16.mxu1 %v5688_v30  ;;  %v5774_v29 = vld [vmem:[%s6260_s10 + $0x92c] ss:$16 sps:$4 sm:$0xff]   ;;  %v5769_v30 = vld [vmem:[%s6260_s10 + $0x920] ss:$16 sps:$4 sm:$0xff]  }
 0x120   : > { %3711 = vmatpush1.bf16.msra.mxu0 %v5683_v31  ;;  %4119 = vmatpush1.bf16.msra.mxu1 %v5686_v32  ;;  %v5772_v31 = vld [vmem:[%s6260_s10 + $0x928] ss:$16 sps:$4 sm:$0xff]   ;;  %v5777_v32 = vld [vmem:[%s6260_s10 + $0x944] ss:$16 sps:$4 sm:$0xff]  }
 0x121   : > { %3712 = vmatprep.subr.bf16.mxu0 %v5691_v33  ;;  %4120 = vmatprep.subr.bf16.mxu1 %v5694_v34  ;;  %v5780_v33 = vld [vmem:[%s6260_s10 + $0x94c] ss:$16 sps:$4 sm:$0xff]   ;;  %v5775_v34 = vld [vmem:[%s6260_s10 + $0x940] ss:$16 sps:$4 sm:$0xff]  }
 0x124   : > { %3713 = vmatpush1.bf16.msra.mxu0 %v5689_v35  ;;  %4121 = vmatpush1.bf16.msra.mxu1 %v5692_v36  ;;  %v5778_v35 = vld [vmem:[%s6260_s10 + $0x948] ss:$16 sps:$4 sm:$0xff]   ;;  %v5783_v36 = vld [vmem:[%s6260_s10 + $0x964] ss:$16 sps:$4 sm:$0xff]  }
 0x125   : > { %3714 = vmatprep.subr.bf16.mxu0 %v5697_v37  ;;  %4122 = vmatprep.subr.bf16.mxu1 %v5700_v38  ;;  %v5786_v37 = vld [vmem:[%s6260_s10 + $0x96c] ss:$16 sps:$4 sm:$0xff]  }
 0x128   : > { %3715 = vmatpush1.bf16.msra.mxu0 %v5695_v39  ;;  %4123 = vmatpush1.bf16.msra.mxu1 %v5698_v40 }
 0x129   : > { %3716 = vmatprep.subr.bf16.mxu0 %v5703_v41  ;;  %4124 = vmatprep.subr.bf16.mxu1 %v5706_v42 }
 0x12c   : > { %3717 = vmatpush1.bf16.msra.mxu0 %v5701_v43  ;;  %4125 = vmatpush1.bf16.msra.mxu1 %v5704_v44  ;;  %v5781_v44 = vld [vmem:[%s6260_s10 + $0x960] ss:$16 sps:$4 sm:$0xff]  }
 0x12d   : > { %3718 = vmatprep.subr.bf16.mxu0 %v5709_v45  ;;  %4126 = vmatprep.subr.bf16.mxu1 %v5712_v46  ;;  %v5784_v45 = vld [vmem:[%s6260_s10 + $0x968] ss:$16 sps:$4 sm:$0xff]  }
 0x130   : > { %3719 = vmatpush1.bf16.msra.mxu0 %v5707_v47  ;;  %4127 = vmatpush1.bf16.msra.mxu1 %v5710_v48  ;;  %v5789_v48 = vld [vmem:[%s6260_s10 + $0x984] ss:$16 sps:$4 sm:$0xff]  }
 0x131   : > { %3739 = vmatprep.subr.bf16.mxu0 %v5715_v49  ;;  %4147 = vmatprep.subr.bf16.mxu1 %v5718_v52  ;;  %v5792_v49 = vld [vmem:[%s6260_s10 + $0x98c] ss:$16 sps:$4 sm:$0xff]   ;;  %v5787_v52 = vld [vmem:[%s6260_s10 + $0x980] ss:$16 sps:$4 sm:$0xff]  }
 0x133   : > { %3721 = vmatmul.mubr.bf16.vlgmr.msra.gmra.mrb[0].mxu0 %v4697_v53  ;;  %4129 = vmatmul.mubr.bf16.vlgmr.msra.gmra.mrb[0].mxu1 %v4697_v53  ;;  %v5790_v53 = vld [vmem:[%s6260_s10 + $0x988] ss:$16 sps:$4 sm:$0xff]  }
 0x134   : > { %3740 = vmatpush1.bf16.msra.mxu0 %v5713_v54  ;;  %4148 = vmatpush1.bf16.msra.mxu1 %v5716_v51  ;;  %v5795_v54 = vld [vmem:[%s6260_s10 + $0x9a4] ss:$16 sps:$4 sm:$0xff]   ;;  %v5793_v51 = vld [vmem:[%s6260_s10 + $0x9a0] ss:$16 sps:$4 sm:$0xff]  }
 0x135   : > { %3741 = vmatprep.subr.bf16.mxu0 %v5721_v55  ;;  %4149 = vmatprep.subr.bf16.mxu1 %v5724_v56  ;;  %v5796_v55 = vld [vmem:[%s6260_s10 + $0x9a8] ss:$16 sps:$4 sm:$0xff]   ;;  %v5801_v56 = vld [vmem:[%s6260_s10 + $0x9c4] ss:$16 sps:$4 sm:$0xff]  }
 0x136   : > { %3730 = vmatprep.mubr.bf16.mxu0 %v4714_v57  ;;  %4138 = vmatprep.mubr.bf16.mxu1 %v4714_v57  ;;  %v5804_v57 = vld [vmem:[%s6260_s10 + $0x9cc] ss:$16 sps:$4 sm:$0xff]  }
 0x138   : > { %3742 = vmatpush1.bf16.msra.mxu0 %v5719_v58  ;;  %4150 = vmatpush1.bf16.msra.mxu1 %v5722_v59  ;;  %v5799_v58 = vld [vmem:[%s6260_s10 + $0x9c0] ss:$16 sps:$4 sm:$0xff]   ;;  %v5802_v59 = vld [vmem:[%s6260_s10 + $0x9c8] ss:$16 sps:$4 sm:$0xff]  }
 0x139   : > { %3743 = vmatprep.subr.bf16.mxu0 %v5729_v60  ;;  %4151 = vmatprep.subr.bf16.mxu1 %v5732_v61  ;;  %v5807_v60 = vld [vmem:[%s6260_s10 + $0x9e4] ss:$16 sps:$4 sm:$0xff]   ;;  %v5810_v61 = vld [vmem:[%s6260_s10 + $0x9ec] ss:$16 sps:$4 sm:$0xff]  }
 0x13b   : > { %3731 = vmatmul.mubr.bf16.gmra.mrb[16].mxu0 %v4713_v0  ;;  %4139 = vmatmul.mubr.bf16.gmra.mrb[16].mxu1 %v4713_v0  ;;  %v5808_v0 = vld [vmem:[%s6260_s10 + $0x9e8] ss:$16 sps:$4 sm:$0xff]  }
 0x13c   : > { %3744 = vmatpush1.bf16.msra.mxu0 %v5727_v62  ;;  %4152 = vmatpush1.bf16.msra.mxu1 %v5730_v2  ;;  %v5805_v62 = vld [vmem:[%s6260_s10 + $0x9e0] ss:$16 sps:$4 sm:$0xff]   ;;  %v5813_v2 = vld [vmem:[%s6260_s10 + $0xa04] ss:$16 sps:$4 sm:$0xff]  }
 0x13d   : > { %3745 = vmatprep.subr.bf16.mxu0 %v5735_v3  ;;  %4153 = vmatprep.subr.bf16.mxu1 %v5738_v4  ;;  %v5816_v3 = vld [vmem:[%s6260_s10 + $0xa0c] ss:$16 sps:$4 sm:$0xff]   ;;  %v5811_v4 = vld [vmem:[%s6260_s10 + $0xa00] ss:$16 sps:$4 sm:$0xff]  }
 0x13e   : > { %3771 = vmatprep.mubr.bf16.mxu0 %v4700_v5  ;;  %4179 = vmatprep.mubr.bf16.mxu1 %v4700_v5  ;;  %v4699_v5 = vcombine.low %v6605_v63, %v6608_v1  ;;  %v5820_v63 = vld [vmem:[%s6260_s10 + $0xa28] ss:$16 sps:$4 sm:$0xff]   ;;  %v5827_v1 = vld [vmem:[%s6260_s10 + $0xa44] ss:$16 sps:$4 sm:$0xff]  }
 0x140   : > { %3746 = vmatpush1.bf16.msra.mxu0 %v5733_v6  ;;  %4154 = vmatpush1.bf16.msra.mxu1 %v5736_v7  ;;  %v5814_v6 = vld [vmem:[%s6260_s10 + $0xa08] ss:$16 sps:$4 sm:$0xff]   ;;  %v323_v7 = vld [vmem:[%s6262_s11 + $0xa0] sm:$0xff] }
 0x141   : > { %3747 = vmatprep.subr.bf16.mxu0 %v5741_v8  ;;  %4155 = vmatprep.subr.bf16.mxu1 %v5744_v9  ;;  %v5819_v8 = vld [vmem:[%s6260_s10 + $0xa24] ss:$16 sps:$4 sm:$0xff]   ;;  %v5822_v9 = vld [vmem:[%s6260_s10 + $0xa2c] ss:$16 sps:$4 sm:$0xff]  }
 0x144   : > { %3748 = vmatpush1.bf16.msra.mxu0 %v5739_v10  ;;  %4156 = vmatpush1.bf16.msra.mxu1 %v5742_v11  ;;  %v5817_v10 = vld [vmem:[%s6260_s10 + $0xa20] ss:$16 sps:$4 sm:$0xff]   ;;  %v4716_v11 = vcombine.high %v323_v7, %v323_v7 }
 0x145   : > { %3749 = vmatprep.subr.bf16.mxu0 %v5747_v12  ;;  %4157 = vmatprep.subr.bf16.mxu1 %v5750_v13  ;;  %v5830_v12 = vld [vmem:[%s6260_s10 + $0xa4c] ss:$16 sps:$4 sm:$0xff]  }
 0x146   : > { %v6687_v13 = vld [vmem:[%s6262_s11 + $0x28] sm:$0xff] }
 0x148   : > { %3750 = vmatpush1.bf16.msra.mxu0 %v5745_v14  ;;  %4158 = vmatpush1.bf16.msra.mxu1 %v5748_v15  ;;  %v5825_v14 = vld [vmem:[%s6260_s10 + $0xa40] ss:$16 sps:$4 sm:$0xff]   ;;  %v5828_v15 = vld [vmem:[%s6260_s10 + $0xa48] ss:$16 sps:$4 sm:$0xff]  }
 0x149   : > { %3751 = vmatprep.subr.bf16.mxu0 %v5753_v16  ;;  %4159 = vmatprep.subr.bf16.mxu1 %v5756_v17  ;;  %v4715_v16 = vcombine.low %v323_v7, %v323_v7  ;;  %v6692_v17 = vld [vmem:[%s6262_s11 + $0x68] sm:$0xff]  ;;  %v5885_v7 = vld [vmem:[%s6260_s10 + $0xb80] ss:$16 sps:$4 sm:$0xff]  }
 0x14c   : > { %3752 = vmatpush1.bf16.msra.mxu0 %v5751_v18  ;;  %4160 = vmatpush1.bf16.msra.mxu1 %v5754_v19  ;;  %v5833_v18 = vld [vmem:[%s6260_s10 + $0xa64] ss:$16 sps:$4 sm:$0xff]   ;;  %v5836_v19 = vld [vmem:[%s6260_s10 + $0xa6c] ss:$16 sps:$4 sm:$0xff]  }
 0x14d   : > { %3753 = vmatprep.subr.bf16.mxu0 %v5759_v20  ;;  %4161 = vmatprep.subr.bf16.mxu1 %v5762_v21  ;;  %v4702_v20 = vcombine.high %v6687_v13, %v6692_v17  ;;  %v5831_v21 = vld [vmem:[%s6260_s10 + $0xa60] ss:$16 sps:$4 sm:$0xff]  }
 0x14e   : > { %v6647_v38 = vpop.f32.mrb[4].mxu0  ;;  %v6649_v39 = vpop.f32.mrb[4].mxu1 }
 0x14f   : > { %v6651_v40 = vpop.f32.mrb[5].mxu0  ;;  %v6653_v41 = vpop.f32.mrb[5].mxu1 }
 0x150   : > { %3754 = vmatpush1.bf16.msra.mxu0 %v5757_v22  ;;  %4162 = vmatpush1.bf16.msra.mxu1 %v5760_v23  ;;  %v3583_v42 = vpop.f32.mrb[6].mxu0  ;;  %v3991_v43 = vpop.f32.mrb[6].mxu1  ;;  %v5834_v22 = vld [vmem:[%s6260_s10 + $0xa68] ss:$16 sps:$4 sm:$0xff]   ;;  %v5839_v23 = vld [vmem:[%s6260_s10 + $0xa84] ss:$16 sps:$4 sm:$0xff]  }
 0x151   : > { %3755 = vmatprep.subr.bf16.mxu0 %v5765_v24  ;;  %4163 = vmatprep.subr.bf16.mxu1 %v5768_v25  ;;  %v3584_v46 = vpop.f32.mrb[7].mxu0  ;;  %v3992_v47 = vpop.f32.mrb[7].mxu1  ;;  %v5842_v24 = vld [vmem:[%s6260_s10 + $0xa8c] ss:$16 sps:$4 sm:$0xff]   ;;  %v5837_v25 = vld [vmem:[%s6260_s10 + $0xa80] ss:$16 sps:$4 sm:$0xff]  }
 0x152   : > { %v5858_v42 = vld [vmem:[%s6260_s10 + $0xae8] ss:$16 sps:$4 sm:$0xff]   ;;  %v5863_v43 = vld [vmem:[%s6260_s10 + $0xb04] ss:$16 sps:$4 sm:$0xff]  }
 0x154   : > { %3756 = vmatpush1.bf16.msra.mxu0 %v5763_v26  ;;  %4164 = vmatpush1.bf16.msra.mxu1 %v5766_v27  ;;  %v5840_v26 = vld [vmem:[%s6260_s10 + $0xa88] ss:$16 sps:$4 sm:$0xff]   ;;  %v5845_v27 = vld [vmem:[%s6260_s10 + $0xaa4] ss:$16 sps:$4 sm:$0xff]  }
 0x155   : > { %3757 = vmatprep.subr.bf16.mxu0 %v5771_v28  ;;  %4165 = vmatprep.subr.bf16.mxu1 %v5774_v29  ;;  %v5848_v28 = vld [vmem:[%s6260_s10 + $0xaac] ss:$16 sps:$4 sm:$0xff]   ;;  %v5843_v29 = vld [vmem:[%s6260_s10 + $0xaa0] ss:$16 sps:$4 sm:$0xff]  }
 0x158   : > { %3758 = vmatpush1.bf16.msra.mxu0 %v5769_v30  ;;  %4166 = vmatpush1.bf16.msra.mxu1 %v5772_v31  ;;  %v5846_v30 = vld [vmem:[%s6260_s10 + $0xaa8] ss:$16 sps:$4 sm:$0xff]   ;;  %v5851_v31 = vld [vmem:[%s6260_s10 + $0xac4] ss:$16 sps:$4 sm:$0xff]  }
 0x159   : > { %3759 = vmatprep.subr.bf16.mxu0 %v5777_v32  ;;  %4167 = vmatprep.subr.bf16.mxu1 %v5780_v33  ;;  %v5854_v32 = vld [vmem:[%s6260_s10 + $0xacc] ss:$16 sps:$4 sm:$0xff]   ;;  %v5849_v33 = vld [vmem:[%s6260_s10 + $0xac0] ss:$16 sps:$4 sm:$0xff]  }
 0x15c   : > { %3760 = vmatpush1.bf16.msra.mxu0 %v5775_v34  ;;  %4168 = vmatpush1.bf16.msra.mxu1 %v5778_v35  ;;  %v5852_v34 = vld [vmem:[%s6260_s10 + $0xac8] ss:$16 sps:$4 sm:$0xff]   ;;  %v5857_v35 = vld [vmem:[%s6260_s10 + $0xae4] ss:$16 sps:$4 sm:$0xff]  }
 0x15d   : > { %3761 = vmatprep.subr.bf16.mxu0 %v5783_v36  ;;  %4169 = vmatprep.subr.bf16.mxu1 %v5786_v37  ;;  %v5860_v36 = vld [vmem:[%s6260_s10 + $0xaec] ss:$16 sps:$4 sm:$0xff]   ;;  %v5855_v37 = vld [vmem:[%s6260_s10 + $0xae0] ss:$16 sps:$4 sm:$0xff]  }
 0x160   : > { %3762 = vmatpush1.bf16.msra.mxu0 %v5781_v44  ;;  %4170 = vmatpush1.bf16.msra.mxu1 %v5784_v45  ;;  %v5866_v44 = vld [vmem:[%s6260_s10 + $0xb0c] ss:$16 sps:$4 sm:$0xff]  }
 0x161   : > { %3763 = vmatprep.subr.bf16.mxu0 %v5789_v48  ;;  %4171 = vmatprep.subr.bf16.mxu1 %v5792_v49 }
 0x164   : > { %3764 = vmatpush1.bf16.msra.mxu0 %v5787_v52  ;;  %4172 = vmatpush1.bf16.msra.mxu1 %v5790_v53 }
 0x165   : > { %3765 = vmatprep.subr.bf16.mxu0 %v5795_v54  ;;  %4173 = vmatprep.subr.bf16.mxu1 %v5798_v50  ;;  %v5861_v50 = vld [vmem:[%s6260_s10 + $0xb00] ss:$16 sps:$4 sm:$0xff]  }
 0x168   : > { %3766 = vmatpush1.bf16.msra.mxu0 %v5793_v51  ;;  %4174 = vmatpush1.bf16.msra.mxu1 %v5796_v55  ;;  %v5864_v51 = vld [vmem:[%s6260_s10 + $0xb08] ss:$16 sps:$4 sm:$0xff]  }
 0x169   : > { %3767 = vmatprep.subr.bf16.mxu0 %v5801_v56  ;;  %4175 = vmatprep.subr.bf16.mxu1 %v5804_v57 }
 0x16c   : > { %3768 = vmatpush1.bf16.msra.mxu0 %v5799_v58  ;;  %4176 = vmatpush1.bf16.msra.mxu1 %v5802_v59  ;;  %v5870_v58 = vld [vmem:[%s6260_s10 + $0xb28] ss:$16 sps:$4 sm:$0xff]   ;;  %v5875_v59 = vld [vmem:[%s6260_s10 + $0xb44] ss:$16 sps:$4 sm:$0xff]  }
 0x16d   : > { %3769 = vmatprep.subr.bf16.mxu0 %v5807_v60  ;;  %4177 = vmatprep.subr.bf16.mxu1 %v5810_v61  ;;  %v5878_v60 = vld [vmem:[%s6260_s10 + $0xb4c] ss:$16 sps:$4 sm:$0xff]   ;;  %v5873_v61 = vld [vmem:[%s6260_s10 + $0xb40] ss:$16 sps:$4 sm:$0xff]  }
 0x170   : > { %3770 = vmatpush1.bf16.msra.mxu0 %v5805_v62  ;;  %4178 = vmatpush1.bf16.msra.mxu1 %v5808_v0  ;;  %v5876_v62 = vld [vmem:[%s6260_s10 + $0xb48] ss:$16 sps:$4 sm:$0xff]   ;;  %v5881_v0 = vld [vmem:[%s6260_s10 + $0xb64] ss:$16 sps:$4 sm:$0xff]  }
 0x171   : > { %3790 = vmatprep.subr.bf16.mxu0 %v5813_v2  ;;  %4198 = vmatprep.subr.bf16.mxu1 %v5816_v3  ;;  %v5884_v2 = vld [vmem:[%s6260_s10 + $0xb6c] ss:$16 sps:$4 sm:$0xff]   ;;  %v5879_v3 = vld [vmem:[%s6260_s10 + $0xb60] ss:$16 sps:$4 sm:$0xff]  }
 0x173   : > { %3772 = vmatmul.mubr.bf16.vlgmr.msra.gmra.mrb[0].mxu0 %v4699_v5  ;;  %4180 = vmatmul.mubr.bf16.vlgmr.msra.gmra.mrb[0].mxu1 %v4699_v5  ;;  %v5887_v5 = vld [vmem:[%s6260_s10 + $0xb84] ss:$16 sps:$4 sm:$0xff]  }
 0x174   : > { %3791 = vmatpush1.bf16.msra.mxu0 %v5811_v4  ;;  %4199 = vmatpush1.bf16.msra.mxu1 %v5814_v6  ;;  %v5882_v4 = vld [vmem:[%s6260_s10 + $0xb68] ss:$16 sps:$4 sm:$0xff]   ;;  %v5890_v6 = vld [vmem:[%s6260_s10 + $0xb8c] ss:$16 sps:$4 sm:$0xff]  }
 0x175   : > { %3792 = vmatprep.subr.bf16.mxu0 %v5819_v8  ;;  %4200 = vmatprep.subr.bf16.mxu1 %v5822_v9  ;;  %v5888_v8 = vld [vmem:[%s6260_s10 + $0xb88] ss:$16 sps:$4 sm:$0xff]   ;;  %v5893_v9 = vld [vmem:[%s6260_s10 + $0xba4] ss:$16 sps:$4 sm:$0xff]  }
 0x176   : > { %3781 = vmatprep.mubr.bf16.mxu0 %v4716_v11  ;;  %4189 = vmatprep.mubr.bf16.mxu1 %v4716_v11  ;;  %v5891_v11 = vld [vmem:[%s6260_s10 + $0xba0] ss:$16 sps:$4 sm:$0xff]  }
 0x178   : > { %3793 = vmatpush1.bf16.msra.mxu0 %v5817_v10  ;;  %4201 = vmatpush1.bf16.msra.mxu1 %v5820_v63  ;;  %v5896_v10 = vld [vmem:[%s6260_s10 + $0xbac] ss:$16 sps:$4 sm:$0xff]   ;;  %v5894_v63 = vld [vmem:[%s6260_s10 + $0xba8] ss:$16 sps:$4 sm:$0xff]  }
 0x179   : > { %3794 = vmatprep.subr.bf16.mxu0 %v5827_v1  ;;  %4202 = vmatprep.subr.bf16.mxu1 %v5830_v12  ;;  %v5899_v1 = vld [vmem:[%s6260_s10 + $0xbc4] ss:$16 sps:$4 sm:$0xff]   ;;  %v5902_v12 = vld [vmem:[%s6260_s10 + $0xbcc] ss:$16 sps:$4 sm:$0xff]  }
 0x17b   : > { %3782 = vmatmul.mubr.bf16.gmra.mrb[20].mxu0 %v4715_v16  ;;  %4190 = vmatmul.mubr.bf16.gmra.mrb[20].mxu1 %v4715_v16  ;;  %v5905_v16 = vld [vmem:[%s6260_s10 + $0xbe4] ss:$16 sps:$4 sm:$0xff]  }
 0x17c   : > { %3795 = vmatpush1.bf16.msra.mxu0 %v5825_v14  ;;  %4203 = vmatpush1.bf16.msra.mxu1 %v5828_v15  ;;  %v5897_v14 = vld [vmem:[%s6260_s10 + $0xbc0] ss:$16 sps:$4 sm:$0xff]   ;;  %v5900_v15 = vld [vmem:[%s6260_s10 + $0xbc8] ss:$16 sps:$4 sm:$0xff]  }
 0x17d   : > { %3796 = vmatprep.subr.bf16.mxu0 %v5833_v18  ;;  %4204 = vmatprep.subr.bf16.mxu1 %v5836_v19  ;;  %v5908_v18 = vld [vmem:[%s6260_s10 + $0xbec] ss:$16 sps:$4 sm:$0xff]   ;;  %v5903_v19 = vld [vmem:[%s6260_s10 + $0xbe0] ss:$16 sps:$4 sm:$0xff]  }
 0x17e   : > { %3822 = vmatprep.mubr.bf16.mxu0 %v4702_v20  ;;  %4230 = vmatprep.mubr.bf16.mxu1 %v4702_v20  ;;  %v5906_v20 = vld [vmem:[%s6260_s10 + $0xbe8] ss:$16 sps:$4 sm:$0xff]  }
 0x180   : > { %3797 = vmatpush1.bf16.msra.mxu0 %v5831_v21  ;;  %4205 = vmatpush1.bf16.msra.mxu1 %v5834_v22  ;;  %v5911_v21 = vld [vmem:[%s6260_s10 + $0xc04] ss:$16 sps:$4 sm:$0xff]   ;;  %v5914_v22 = vld [vmem:[%s6260_s10 + $0xc0c] ss:$16 sps:$4 sm:$0xff]  }
 0x181   : > { %3798 = vmatprep.subr.bf16.mxu0 %v5839_v23  ;;  %4206 = vmatprep.subr.bf16.mxu1 %v5842_v24  ;;  %v4701_v23 = vcombine.low %v6687_v13, %v6692_v17  ;;  %v324_v24 = vld [vmem:[%s6262_s11 + $0xa8] sm:$0xff]  ;;  %v5915_v13 = vld [vmem:[%s6260_s10 + $0xc20] ss:$16 sps:$4 sm:$0xff]  }
 0x182   : > { %v5918_v17 = vld [vmem:[%s6260_s10 + $0xc28] ss:$16 sps:$4 sm:$0xff]  }
 0x184   : > { %3799 = vmatpush1.bf16.msra.mxu0 %v5837_v25  ;;  %4207 = vmatpush1.bf16.msra.mxu1 %v5840_v26  ;;  %v5909_v25 = vld [vmem:[%s6260_s10 + $0xc00] ss:$16 sps:$4 sm:$0xff]   ;;  %v5912_v26 = vld [vmem:[%s6260_s10 + $0xc08] ss:$16 sps:$4 sm:$0xff]  }
 0x185   : > { %3800 = vmatprep.subr.bf16.mxu0 %v5845_v27  ;;  %4208 = vmatprep.subr.bf16.mxu1 %v5848_v28  ;;  %v5917_v27 = vld [vmem:[%s6260_s10 + $0xc24] ss:$16 sps:$4 sm:$0xff]   ;;  %v5920_v28 = vld [vmem:[%s6260_s10 + $0xc2c] ss:$16 sps:$4 sm:$0xff]  }
 0x188   : > { %3801 = vmatpush1.bf16.msra.mxu0 %v5843_v29  ;;  %4209 = vmatpush1.bf16.msra.mxu1 %v5846_v30  ;;  %v4718_v29 = vcombine.high %v324_v24, %v324_v24  ;;  %v5925_v30 = vld [vmem:[%s6260_s10 + $0xc44] ss:$16 sps:$4 sm:$0xff]  }
 0x189   : > { %3802 = vmatprep.subr.bf16.mxu0 %v5851_v31  ;;  %4210 = vmatprep.subr.bf16.mxu1 %v5854_v32  ;;  %v5928_v31 = vld [vmem:[%s6260_s10 + $0xc4c] ss:$16 sps:$4 sm:$0xff]   ;;  %v4717_v32 = vcombine.low %v324_v24, %v324_v24  ;;  %v5985_v24 = vld [vmem:[%s6260_s10 + $0xd84] ss:$16 sps:$4 sm:$0xff]  }
 0x18c   : > { %3803 = vmatpush1.bf16.msra.mxu0 %v5849_v33  ;;  %4211 = vmatpush1.bf16.msra.mxu1 %v5852_v34  ;;  %v6774_v33 = vld [vmem:[%s6262_s11 + $0x30] sm:$0xff] }
 0x18d   : > { %3804 = vmatprep.subr.bf16.mxu0 %v5857_v35  ;;  %4212 = vmatprep.subr.bf16.mxu1 %v5860_v36  ;;  %v6777_v34 = vld [vmem:[%s6262_s11 + $0x70] sm:$0xff]  ;;  %v5926_v36 = vld [vmem:[%s6260_s10 + $0xc48] ss:$16 sps:$4 sm:$0xff]  }
 0x18e   : > { %v3630_v45 = vpop.f32.mrb[8].mxu0  ;;  %v4038_v46 = vpop.f32.mrb[8].mxu1  ;;  %v5923_v35 = vld [vmem:[%s6260_s10 + $0xc40] ss:$16 sps:$4 sm:$0xff]  }
 0x18f   : > { %v6719_v47 = vadd.f32 %v3630_v45, %v6647_v38  ;;  %v6722_v48 = vadd.f32 %v4038_v46, %v6649_v39  ;;  %v3632_v49 = vpop.f32.mrb[9].mxu0  ;;  %v4040_v52 = vpop.f32.mrb[9].mxu1  ;;  %v5869_v39 = vld [vmem:[%s6260_s10 + $0xb24] ss:$16 sps:$4 sm:$0xff]   ;;  %v5932_v45 = vld [vmem:[%s6260_s10 + $0xc68] ss:$16 sps:$4 sm:$0xff]  }
 0x190   : > { %v6725_v53 = vadd.f32 %v3632_v49, %v6651_v40  ;;  %v6728_v54 = vadd.f32 %v4040_v52, %v6653_v41  ;;  %3805 = vmatpush1.bf16.msra.mxu0 %v5855_v37  ;;  %4213 = vmatpush1.bf16.msra.mxu1 %v5858_v42  ;;  %v3634_v38 = vpop.f32.mrb[10].mxu0  ;;  %v4042_v55 = vpop.f32.mrb[10].mxu1  ;;  %v5872_v40 = vld [vmem:[%s6260_s10 + $0xb2c] ss:$16 sps:$4 sm:$0xff]   ;;  %v5867_v41 = vld [vmem:[%s6260_s10 + $0xb20] ss:$16 sps:$4 sm:$0xff]  }
 0x191   : > { %3806 = vmatprep.subr.bf16.mxu0 %v5863_v43  ;;  %4214 = vmatprep.subr.bf16.mxu1 %v5866_v44  ;;  %v3635_v56 = vpop.f32.mrb[11].mxu0  ;;  %v4043_v57 = vpop.f32.mrb[11].mxu1  ;;  %v5931_v37 = vld [vmem:[%s6260_s10 + $0xc64] ss:$16 sps:$4 sm:$0xff]   ;;  %v5934_v42 = vld [vmem:[%s6260_s10 + $0xc6c] ss:$16 sps:$4 sm:$0xff]   ;;  %v4704_v43 = vcombine.high %v6774_v33, %v6777_v34 }
 0x192   : > { %v5929_v44 = vld [vmem:[%s6260_s10 + $0xc60] ss:$16 sps:$4 sm:$0xff]   ;;  %v5937_v46 = vld [vmem:[%s6260_s10 + $0xc84] ss:$16 sps:$4 sm:$0xff]   ;;  %v5940_v49 = vld [vmem:[%s6260_s10 + $0xc8c] ss:$16 sps:$4 sm:$0xff]  }
 0x193   : > { %v5935_v52 = vld [vmem:[%s6260_s10 + $0xc80] ss:$16 sps:$4 sm:$0xff]   ;;  %v5946_v38 = vld [vmem:[%s6260_s10 + $0xcac] ss:$16 sps:$4 sm:$0xff]  }
 0x194   : > { %3807 = vmatpush1.bf16.msra.mxu0 %v5861_v50  ;;  %4215 = vmatpush1.bf16.msra.mxu1 %v5864_v51  ;;  %v5938_v50 = vld [vmem:[%s6260_s10 + $0xc88] ss:$16 sps:$4 sm:$0xff]   ;;  %v5943_v51 = vld [vmem:[%s6260_s10 + $0xca4] ss:$16 sps:$4 sm:$0xff]   ;;  %v5941_v55 = vld [vmem:[%s6260_s10 + $0xca0] ss:$16 sps:$4 sm:$0xff]  }
 0x195   : > { %3808 = vmatprep.subr.bf16.mxu0 %v5869_v39  ;;  %4216 = vmatprep.subr.bf16.mxu1 %v5872_v40  ;;  %v5944_v39 = vld [vmem:[%s6260_s10 + $0xca8] ss:$16 sps:$4 sm:$0xff]   ;;  %v5949_v40 = vld [vmem:[%s6260_s10 + $0xcc4] ss:$16 sps:$4 sm:$0xff]   ;;  %v5952_v56 = vld [vmem:[%s6260_s10 + $0xccc] ss:$16 sps:$4 sm:$0xff]  }
 0x196   : > { %v5947_v57 = vld [vmem:[%s6260_s10 + $0xcc0] ss:$16 sps:$4 sm:$0xff]  }
 0x198   : > { %3809 = vmatpush1.bf16.msra.mxu0 %v5867_v41  ;;  %4217 = vmatpush1.bf16.msra.mxu1 %v5870_v58  ;;  %v5950_v41 = vld [vmem:[%s6260_s10 + $0xcc8] ss:$16 sps:$4 sm:$0xff]   ;;  %v5955_v58 = vld [vmem:[%s6260_s10 + $0xce4] ss:$16 sps:$4 sm:$0xff]  }
 0x199   : > { %3810 = vmatprep.subr.bf16.mxu0 %v5875_v59  ;;  %4218 = vmatprep.subr.bf16.mxu1 %v5878_v60  ;;  %v5958_v59 = vld [vmem:[%s6260_s10 + $0xcec] ss:$16 sps:$4 sm:$0xff]   ;;  %v5953_v60 = vld [vmem:[%s6260_s10 + $0xce0] ss:$16 sps:$4 sm:$0xff]  }
 0x19c   : > { %3811 = vmatpush1.bf16.msra.mxu0 %v5873_v61  ;;  %4219 = vmatpush1.bf16.msra.mxu1 %v5876_v62  ;;  %v5956_v61 = vld [vmem:[%s6260_s10 + $0xce8] ss:$16 sps:$4 sm:$0xff]   ;;  %v5961_v62 = vld [vmem:[%s6260_s10 + $0xd04] ss:$16 sps:$4 sm:$0xff]  }
 0x19d   : > { %3812 = vmatprep.subr.bf16.mxu0 %v5881_v0  ;;  %4220 = vmatprep.subr.bf16.mxu1 %v5884_v2  ;;  %v5964_v0 = vld [vmem:[%s6260_s10 + $0xd0c] ss:$16 sps:$4 sm:$0xff]  }
 0x1a0   : > { %3813 = vmatpush1.bf16.msra.mxu0 %v5879_v3  ;;  %4221 = vmatpush1.bf16.msra.mxu1 %v5882_v4 }
 0x1a1   : > { %3814 = vmatprep.subr.bf16.mxu0 %v5887_v5  ;;  %4222 = vmatprep.subr.bf16.mxu1 %v5890_v6 }
 0x1a4   : > { %3815 = vmatpush1.bf16.msra.mxu0 %v5885_v7  ;;  %4223 = vmatpush1.bf16.msra.mxu1 %v5888_v8 }
 0x1a5   : > { %3816 = vmatprep.subr.bf16.mxu0 %v5893_v9  ;;  %4224 = vmatprep.subr.bf16.mxu1 %v5896_v10  ;;  %v5959_v10 = vld [vmem:[%s6260_s10 + $0xd00] ss:$16 sps:$4 sm:$0xff]  }
 0x1a8   : > { %3817 = vmatpush1.bf16.msra.mxu0 %v5891_v11  ;;  %4225 = vmatpush1.bf16.msra.mxu1 %v5894_v63  ;;  %v5962_v11 = vld [vmem:[%s6260_s10 + $0xd08] ss:$16 sps:$4 sm:$0xff]  }
 0x1a9   : > { %3818 = vmatprep.subr.bf16.mxu0 %v5899_v1  ;;  %4226 = vmatprep.subr.bf16.mxu1 %v5902_v12 }
 0x1ac   : > { %3819 = vmatpush1.bf16.msra.mxu0 %v5897_v14  ;;  %4227 = vmatpush1.bf16.msra.mxu1 %v5900_v15  ;;  %v5968_v14 = vld [vmem:[%s6260_s10 + $0xd28] ss:$16 sps:$4 sm:$0xff]   ;;  %v5973_v15 = vld [vmem:[%s6260_s10 + $0xd44] ss:$16 sps:$4 sm:$0xff]  }
 0x1ad   : > { %3820 = vmatprep.subr.bf16.mxu0 %v5905_v16  ;;  %4228 = vmatprep.subr.bf16.mxu1 %v5908_v18  ;;  %v5976_v16 = vld [vmem:[%s6260_s10 + $0xd4c] ss:$16 sps:$4 sm:$0xff]   ;;  %v5971_v18 = vld [vmem:[%s6260_s10 + $0xd40] ss:$16 sps:$4 sm:$0xff]  }
 0x1b0   : > { %3821 = vmatpush1.bf16.msra.mxu0 %v5903_v19  ;;  %4229 = vmatpush1.bf16.msra.mxu1 %v5906_v20  ;;  %v5974_v19 = vld [vmem:[%s6260_s10 + $0xd48] ss:$16 sps:$4 sm:$0xff]   ;;  %v5979_v20 = vld [vmem:[%s6260_s10 + $0xd64] ss:$16 sps:$4 sm:$0xff]  }
 0x1b1   : > { %3841 = vmatprep.subr.bf16.mxu0 %v5911_v21  ;;  %4249 = vmatprep.subr.bf16.mxu1 %v5914_v22  ;;  %v5982_v21 = vld [vmem:[%s6260_s10 + $0xd6c] ss:$16 sps:$4 sm:$0xff]   ;;  %v5977_v22 = vld [vmem:[%s6260_s10 + $0xd60] ss:$16 sps:$4 sm:$0xff]  }
 0x1b3   : > { %3823 = vmatmul.mubr.bf16.vlgmr.msra.gmra.mrb[0].mxu0 %v4701_v23  ;;  %4231 = vmatmul.mubr.bf16.vlgmr.msra.gmra.mrb[0].mxu1 %v4701_v23  ;;  %v5980_v23 = vld [vmem:[%s6260_s10 + $0xd68] ss:$16 sps:$4 sm:$0xff]  }
 0x1b4   : > { %3842 = vmatpush1.bf16.msra.mxu0 %v5909_v25  ;;  %4250 = vmatpush1.bf16.msra.mxu1 %v5912_v26  ;;  %v5988_v25 = vld [vmem:[%s6260_s10 + $0xd8c] ss:$16 sps:$4 sm:$0xff]   ;;  %v5983_v26 = vld [vmem:[%s6260_s10 + $0xd80] ss:$16 sps:$4 sm:$0xff]  }
 0x1b5   : > { %3843 = vmatprep.subr.bf16.mxu0 %v5917_v27  ;;  %4251 = vmatprep.subr.bf16.mxu1 %v5920_v28  ;;  %v5986_v27 = vld [vmem:[%s6260_s10 + $0xd88] ss:$16 sps:$4 sm:$0xff]   ;;  %v5991_v28 = vld [vmem:[%s6260_s10 + $0xda4] ss:$16 sps:$4 sm:$0xff]  }
 0x1b6   : > { %3832 = vmatprep.mubr.bf16.mxu0 %v4718_v29  ;;  %4240 = vmatprep.mubr.bf16.mxu1 %v4718_v29  ;;  %v5994_v29 = vld [vmem:[%s6260_s10 + $0xdac] ss:$16 sps:$4 sm:$0xff]  }
 0x1b8   : > { %3844 = vmatpush1.bf16.msra.mxu0 %v5915_v13  ;;  %4252 = vmatpush1.bf16.msra.mxu1 %v5918_v17  ;;  %v5989_v13 = vld [vmem:[%s6260_s10 + $0xda0] ss:$16 sps:$4 sm:$0xff]   ;;  %v5992_v17 = vld [vmem:[%s6260_s10 + $0xda8] ss:$16 sps:$4 sm:$0xff]  }
 0x1b9   : > { %3845 = vmatprep.subr.bf16.mxu0 %v5925_v30  ;;  %4253 = vmatprep.subr.bf16.mxu1 %v5928_v31  ;;  %v5997_v30 = vld [vmem:[%s6260_s10 + $0xdc4] ss:$16 sps:$4 sm:$0xff]   ;;  %v6000_v31 = vld [vmem:[%s6260_s10 + $0xdcc] ss:$16 sps:$4 sm:$0xff]  }
 0x1bb   : > { %3833 = vmatmul.mubr.bf16.gmra.mrb[24].mxu0 %v4717_v32  ;;  %4241 = vmatmul.mubr.bf16.gmra.mrb[24].mxu1 %v4717_v32  ;;  %v5995_v32 = vld [vmem:[%s6260_s10 + $0xdc0] ss:$16 sps:$4 sm:$0xff]  }
 0x1bc   : > { %3846 = vmatpush1.bf16.msra.mxu0 %v5923_v35  ;;  %4254 = vmatpush1.bf16.msra.mxu1 %v5926_v36  ;;  %v5998_v35 = vld [vmem:[%s6260_s10 + $0xdc8] ss:$16 sps:$4 sm:$0xff]   ;;  %v6003_v36 = vld [vmem:[%s6260_s10 + $0xde4] ss:$16 sps:$4 sm:$0xff]  }
 0x1bd   : > { %3847 = vmatprep.subr.bf16.mxu0 %v5931_v37  ;;  %4255 = vmatprep.subr.bf16.mxu1 %v5934_v42  ;;  %v6006_v37 = vld [vmem:[%s6260_s10 + $0xdec] ss:$16 sps:$4 sm:$0xff]   ;;  %v6001_v42 = vld [vmem:[%s6260_s10 + $0xde0] ss:$16 sps:$4 sm:$0xff]  }
 0x1be   : > { %3873 = vmatprep.mubr.bf16.mxu0 %v4704_v43  ;;  %4281 = vmatprep.mubr.bf16.mxu1 %v4704_v43  ;;  %v6004_v43 = vld [vmem:[%s6260_s10 + $0xde8] ss:$16 sps:$4 sm:$0xff]  }
 0x1c0   : > { %3848 = vmatpush1.bf16.msra.mxu0 %v5929_v44  ;;  %4256 = vmatpush1.bf16.msra.mxu1 %v5932_v45  ;;  %v6009_v44 = vld [vmem:[%s6260_s10 + $0xe04] ss:$16 sps:$4 sm:$0xff]   ;;  %v6012_v45 = vld [vmem:[%s6260_s10 + $0xe0c] ss:$16 sps:$4 sm:$0xff]  }
 0x1c1   : > { %3849 = vmatprep.subr.bf16.mxu0 %v5937_v46  ;;  %4257 = vmatprep.subr.bf16.mxu1 %v5940_v49  ;;  %v4703_v46 = vcombine.low %v6774_v33, %v6777_v34  ;;  %v325_v49 = vld [vmem:[%s6262_s11 + $0xb0] sm:$0xff]  ;;  %v6016_v34 = vld [vmem:[%s6260_s10 + $0xe28] ss:$16 sps:$4 sm:$0xff]  }
 0x1c2   : > { %v6013_v33 = vld [vmem:[%s6260_s10 + $0xe20] ss:$16 sps:$4 sm:$0xff]  }
 0x1c4   : > { %3850 = vmatpush1.bf16.msra.mxu0 %v5935_v52  ;;  %4258 = vmatpush1.bf16.msra.mxu1 %v5938_v50  ;;  %v6007_v52 = vld [vmem:[%s6260_s10 + $0xe00] ss:$16 sps:$4 sm:$0xff]   ;;  %v6010_v50 = vld [vmem:[%s6260_s10 + $0xe08] ss:$16 sps:$4 sm:$0xff]  }
 0x1c5   : > { %3851 = vmatprep.subr.bf16.mxu0 %v5943_v51  ;;  %4259 = vmatprep.subr.bf16.mxu1 %v5946_v38  ;;  %v6015_v51 = vld [vmem:[%s6260_s10 + $0xe24] ss:$16 sps:$4 sm:$0xff]   ;;  %v6018_v38 = vld [vmem:[%s6260_s10 + $0xe2c] ss:$16 sps:$4 sm:$0xff]  }
 0x1c8   : > { %3852 = vmatpush1.bf16.msra.mxu0 %v5941_v55  ;;  %4260 = vmatpush1.bf16.msra.mxu1 %v5944_v39  ;;  %v4720_v55 = vcombine.high %v325_v49, %v325_v49  ;;  %v6023_v39 = vld [vmem:[%s6260_s10 + $0xe44] ss:$16 sps:$4 sm:$0xff]  }
 0x1c9   : > { %3853 = vmatprep.subr.bf16.mxu0 %v5949_v40  ;;  %4261 = vmatprep.subr.bf16.mxu1 %v5952_v56  ;;  %v6026_v40 = vld [vmem:[%s6260_s10 + $0xe4c] ss:$16 sps:$4 sm:$0xff]   ;;  %v4719_v56 = vcombine.low %v325_v49, %v325_v49  ;;  %v6083_v49 = vld [vmem:[%s6260_s10 + $0xf84] ss:$16 sps:$4 sm:$0xff]  }
 0x1cc   : > { %3854 = vmatpush1.bf16.msra.mxu0 %v5947_v57  ;;  %4262 = vmatpush1.bf16.msra.mxu1 %v5950_v41  ;;  %v6861_v57 = vld [vmem:[%s6262_s11 + $0x38] sm:$0xff] }
 0x1cd   : > { %3855 = vmatprep.subr.bf16.mxu0 %v5955_v58  ;;  %4263 = vmatprep.subr.bf16.mxu1 %v5958_v59  ;;  %v6864_v41 = vld [vmem:[%s6262_s11 + $0x78] sm:$0xff]  ;;  %v6021_v58 = vld [vmem:[%s6260_s10 + $0xe40] ss:$16 sps:$4 sm:$0xff]  }
 0x1ce   : > { %v3681_v2 = vpop.f32.mrb[12].mxu0  ;;  %v4089_v3 = vpop.f32.mrb[12].mxu1  ;;  %v6024_v59 = vld [vmem:[%s6260_s10 + $0xe48] ss:$16 sps:$4 sm:$0xff]  }
 0x1cf   : > { %v6806_v4 = vadd.f32 %v3681_v2, %v6719_v47  ;;  %v6809_v5 = vadd.f32 %v4089_v3, %v6722_v48  ;;  %v3683_v6 = vpop.f32.mrb[13].mxu0  ;;  %v4091_v7 = vpop.f32.mrb[13].mxu1  ;;  %v5967_v48 = vld [vmem:[%s6260_s10 + $0xd24] ss:$16 sps:$4 sm:$0xff]   ;;  %v6030_v2 = vld [vmem:[%s6260_s10 + $0xe68] ss:$16 sps:$4 sm:$0xff]  }
 0x1d0   : > { %v6812_v8 = vadd.f32 %v3683_v6, %v6725_v53  ;;  %v6815_v9 = vadd.f32 %v4091_v7, %v6728_v54  ;;  %3856 = vmatpush1.bf16.msra.mxu0 %v5953_v60  ;;  %4264 = vmatpush1.bf16.msra.mxu1 %v5956_v61  ;;  %v3685_v47 = vpop.f32.mrb[14].mxu0  ;;  %v4093_v63 = vpop.f32.mrb[14].mxu1  ;;  %v5970_v53 = vld [vmem:[%s6260_s10 + $0xd2c] ss:$16 sps:$4 sm:$0xff]   ;;  %v5965_v54 = vld [vmem:[%s6260_s10 + $0xd20] ss:$16 sps:$4 sm:$0xff]  }
 0x1d1   : > { %3857 = vmatprep.subr.bf16.mxu0 %v5961_v62  ;;  %4265 = vmatprep.subr.bf16.mxu1 %v5964_v0  ;;  %v3686_v1 = vpop.f32.mrb[15].mxu0  ;;  %v4094_v12 = vpop.f32.mrb[15].mxu1  ;;  %v6029_v60 = vld [vmem:[%s6260_s10 + $0xe64] ss:$16 sps:$4 sm:$0xff]   ;;  %v6032_v61 = vld [vmem:[%s6260_s10 + $0xe6c] ss:$16 sps:$4 sm:$0xff]   ;;  %v4706_v62 = vcombine.high %v6861_v57, %v6864_v41 }
 0x1d2   : > { %v6027_v0 = vld [vmem:[%s6260_s10 + $0xe60] ss:$16 sps:$4 sm:$0xff]   ;;  %v6035_v3 = vld [vmem:[%s6260_s10 + $0xe84] ss:$16 sps:$4 sm:$0xff]   ;;  %v6038_v6 = vld [vmem:[%s6260_s10 + $0xe8c] ss:$16 sps:$4 sm:$0xff]  }
 0x1d3   : > { %v6033_v7 = vld [vmem:[%s6260_s10 + $0xe80] ss:$16 sps:$4 sm:$0xff]   ;;  %v6044_v47 = vld [vmem:[%s6260_s10 + $0xeac] ss:$16 sps:$4 sm:$0xff]  }
 0x1d4   : > { %3858 = vmatpush1.bf16.msra.mxu0 %v5959_v10  ;;  %4266 = vmatpush1.bf16.msra.mxu1 %v5962_v11  ;;  %v6036_v10 = vld [vmem:[%s6260_s10 + $0xe88] ss:$16 sps:$4 sm:$0xff]   ;;  %v6041_v11 = vld [vmem:[%s6260_s10 + $0xea4] ss:$16 sps:$4 sm:$0xff]   ;;  %v6039_v63 = vld [vmem:[%s6260_s10 + $0xea0] ss:$16 sps:$4 sm:$0xff]  }
 0x1d5   : > { %3859 = vmatprep.subr.bf16.mxu0 %v5967_v48  ;;  %4267 = vmatprep.subr.bf16.mxu1 %v5970_v53  ;;  %v6042_v48 = vld [vmem:[%s6260_s10 + $0xea8] ss:$16 sps:$4 sm:$0xff]   ;;  %v6047_v53 = vld [vmem:[%s6260_s10 + $0xec4] ss:$16 sps:$4 sm:$0xff]   ;;  %v6050_v1 = vld [vmem:[%s6260_s10 + $0xecc] ss:$16 sps:$4 sm:$0xff]  }
 0x1d6   : > { %v6045_v12 = vld [vmem:[%s6260_s10 + $0xec0] ss:$16 sps:$4 sm:$0xff]  }
 0x1d8   : > { %3860 = vmatpush1.bf16.msra.mxu0 %v5965_v54  ;;  %4268 = vmatpush1.bf16.msra.mxu1 %v5968_v14  ;;  %v6048_v54 = vld [vmem:[%s6260_s10 + $0xec8] ss:$16 sps:$4 sm:$0xff]   ;;  %v6053_v14 = vld [vmem:[%s6260_s10 + $0xee4] ss:$16 sps:$4 sm:$0xff]  }
 0x1d9   : > { %3861 = vmatprep.subr.bf16.mxu0 %v5973_v15  ;;  %4269 = vmatprep.subr.bf16.mxu1 %v5976_v16  ;;  %v6056_v15 = vld [vmem:[%s6260_s10 + $0xeec] ss:$16 sps:$4 sm:$0xff]   ;;  %v6051_v16 = vld [vmem:[%s6260_s10 + $0xee0] ss:$16 sps:$4 sm:$0xff]  }
 0x1dc   : > { %3862 = vmatpush1.bf16.msra.mxu0 %v5971_v18  ;;  %4270 = vmatpush1.bf16.msra.mxu1 %v5974_v19  ;;  %v6054_v18 = vld [vmem:[%s6260_s10 + $0xee8] ss:$16 sps:$4 sm:$0xff]   ;;  %v6059_v19 = vld [vmem:[%s6260_s10 + $0xf04] ss:$16 sps:$4 sm:$0xff]  }
 0x1dd   : > { %3863 = vmatprep.subr.bf16.mxu0 %v5979_v20  ;;  %4271 = vmatprep.subr.bf16.mxu1 %v5982_v21  ;;  %v6062_v20 = vld [vmem:[%s6260_s10 + $0xf0c] ss:$16 sps:$4 sm:$0xff]  }
 0x1e0   : > { %3864 = vmatpush1.bf16.msra.mxu0 %v5977_v22  ;;  %4272 = vmatpush1.bf16.msra.mxu1 %v5980_v23 }
 0x1e1   : > { %3865 = vmatprep.subr.bf16.mxu0 %v5985_v24  ;;  %4273 = vmatprep.subr.bf16.mxu1 %v5988_v25 }
 0x1e4   : > { %3866 = vmatpush1.bf16.msra.mxu0 %v5983_v26  ;;  %4274 = vmatpush1.bf16.msra.mxu1 %v5986_v27 }
 0x1e5   : > { %3867 = vmatprep.subr.bf16.mxu0 %v5991_v28  ;;  %4275 = vmatprep.subr.bf16.mxu1 %v5994_v29  ;;  %v6057_v29 = vld [vmem:[%s6260_s10 + $0xf00] ss:$16 sps:$4 sm:$0xff]  }
 0x1e8   : > { %3868 = vmatpush1.bf16.msra.mxu0 %v5989_v13  ;;  %4276 = vmatpush1.bf16.msra.mxu1 %v5992_v17  ;;  %v6060_v13 = vld [vmem:[%s6260_s10 + $0xf08] ss:$16 sps:$4 sm:$0xff]  }
 0x1e9   : > { %3869 = vmatprep.subr.bf16.mxu0 %v5997_v30  ;;  %4277 = vmatprep.subr.bf16.mxu1 %v6000_v31 }
 0x1ec   : > { %3870 = vmatpush1.bf16.msra.mxu0 %v5995_v32  ;;  %4278 = vmatpush1.bf16.msra.mxu1 %v5998_v35  ;;  %v6066_v32 = vld [vmem:[%s6260_s10 + $0xf28] ss:$16 sps:$4 sm:$0xff]   ;;  %v6071_v35 = vld [vmem:[%s6260_s10 + $0xf44] ss:$16 sps:$4 sm:$0xff]  }
 0x1ed   : > { %3871 = vmatprep.subr.bf16.mxu0 %v6003_v36  ;;  %4279 = vmatprep.subr.bf16.mxu1 %v6006_v37  ;;  %v6074_v36 = vld [vmem:[%s6260_s10 + $0xf4c] ss:$16 sps:$4 sm:$0xff]   ;;  %v6069_v37 = vld [vmem:[%s6260_s10 + $0xf40] ss:$16 sps:$4 sm:$0xff]  }
 0x1f0   : > { %3872 = vmatpush1.bf16.msra.mxu0 %v6001_v42  ;;  %4280 = vmatpush1.bf16.msra.mxu1 %v6004_v43  ;;  %v6072_v42 = vld [vmem:[%s6260_s10 + $0xf48] ss:$16 sps:$4 sm:$0xff]   ;;  %v6077_v43 = vld [vmem:[%s6260_s10 + $0xf64] ss:$16 sps:$4 sm:$0xff]  }
 0x1f1   : > { %3892 = vmatprep.subr.bf16.mxu0 %v6009_v44  ;;  %4300 = vmatprep.subr.bf16.mxu1 %v6012_v45  ;;  %v6080_v44 = vld [vmem:[%s6260_s10 + $0xf6c] ss:$16 sps:$4 sm:$0xff]   ;;  %v6075_v45 = vld [vmem:[%s6260_s10 + $0xf60] ss:$16 sps:$4 sm:$0xff]  }
 0x1f3   : > { %3874 = vmatmul.mubr.bf16.vlgmr.msra.gmra.mrb[0].mxu0 %v4703_v46  ;;  %4282 = vmatmul.mubr.bf16.vlgmr.msra.gmra.mrb[0].mxu1 %v4703_v46  ;;  %v6078_v46 = vld [vmem:[%s6260_s10 + $0xf68] ss:$16 sps:$4 sm:$0xff]  }
 0x1f4   : > { %3893 = vmatpush1.bf16.msra.mxu0 %v6007_v52  ;;  %4301 = vmatpush1.bf16.msra.mxu1 %v6010_v50  ;;  %v6086_v52 = vld [vmem:[%s6260_s10 + $0xf8c] ss:$16 sps:$4 sm:$0xff]   ;;  %v6081_v50 = vld [vmem:[%s6260_s10 + $0xf80] ss:$16 sps:$4 sm:$0xff]  }
 0x1f5   : > { %3894 = vmatprep.subr.bf16.mxu0 %v6015_v51  ;;  %4302 = vmatprep.subr.bf16.mxu1 %v6018_v38  ;;  %v6084_v51 = vld [vmem:[%s6260_s10 + $0xf88] ss:$16 sps:$4 sm:$0xff]   ;;  %v6089_v38 = vld [vmem:[%s6260_s10 + $0xfa4] ss:$16 sps:$4 sm:$0xff]  }
 0x1f6   : > { %3883 = vmatprep.mubr.bf16.mxu0 %v4720_v55  ;;  %4291 = vmatprep.mubr.bf16.mxu1 %v4720_v55  ;;  %v6092_v55 = vld [vmem:[%s6260_s10 + $0xfac] ss:$16 sps:$4 sm:$0xff]  }
 0x1f8   : > { %3895 = vmatpush1.bf16.msra.mxu0 %v6013_v33  ;;  %4303 = vmatpush1.bf16.msra.mxu1 %v6016_v34  ;;  %v6087_v33 = vld [vmem:[%s6260_s10 + $0xfa0] ss:$16 sps:$4 sm:$0xff]   ;;  %v6090_v34 = vld [vmem:[%s6260_s10 + $0xfa8] ss:$16 sps:$4 sm:$0xff]  }
 0x1f9   : > { %3896 = vmatprep.subr.bf16.mxu0 %v6023_v39  ;;  %4304 = vmatprep.subr.bf16.mxu1 %v6026_v40  ;;  %v6095_v39 = vld [vmem:[%s6260_s10 + $0xfc4] ss:$16 sps:$4 sm:$0xff]   ;;  %v6098_v40 = vld [vmem:[%s6260_s10 + $0xfcc] ss:$16 sps:$4 sm:$0xff]  }
 0x1fb   : > { %3884 = vmatmul.mubr.bf16.gmra.mrb[28].mxu0 %v4719_v56  ;;  %4292 = vmatmul.mubr.bf16.gmra.mrb[28].mxu1 %v4719_v56  ;;  %v6093_v56 = vld [vmem:[%s6260_s10 + $0xfc0] ss:$16 sps:$4 sm:$0xff]  }
 0x1fc   : > { %3897 = vmatpush1.bf16.msra.mxu0 %v6021_v58  ;;  %4305 = vmatpush1.bf16.msra.mxu1 %v6024_v59  ;;  %v6096_v58 = vld [vmem:[%s6260_s10 + $0xfc8] ss:$16 sps:$4 sm:$0xff]   ;;  %v6101_v59 = vld [vmem:[%s6260_s10 + $0xfe4] ss:$16 sps:$4 sm:$0xff]  }
 0x1fd   : > { %3898 = vmatprep.subr.bf16.mxu0 %v6029_v60  ;;  %4306 = vmatprep.subr.bf16.mxu1 %v6032_v61  ;;  %v6104_v60 = vld [vmem:[%s6260_s10 + $0xfec] ss:$16 sps:$4 sm:$0xff]   ;;  %v6099_v61 = vld [vmem:[%s6260_s10 + $0xfe0] ss:$16 sps:$4 sm:$0xff]  }
 0x1fe   : > { %3924 = vmatprep.mubr.bf16.mxu0 %v4706_v62  ;;  %4332 = vmatprep.mubr.bf16.mxu1 %v4706_v62  ;;  %v6102_v62 = vld [vmem:[%s6260_s10 + $0xfe8] ss:$16 sps:$4 sm:$0xff]  }
 0x200   : > { %3899 = vmatpush1.bf16.msra.mxu0 %v6027_v0  ;;  %4307 = vmatpush1.bf16.msra.mxu1 %v6030_v2  ;;  %v326_v0 = vld [vmem:[%s6262_s11 + $0xb8] sm:$0xff]  ;;  %v4705_v2 = vcombine.low %v6861_v57, %v6864_v41 }
 0x201   : > { %3900 = vmatprep.subr.bf16.mxu0 %v6035_v3  ;;  %4308 = vmatprep.subr.bf16.mxu1 %v6038_v6  ;;  %v4722_v3 = vcombine.high %v326_v0, %v326_v0  ;;  %v4721_v6 = vcombine.low %v326_v0, %v326_v0  ;;  %v299_v0 = vld [vmem:[%s7234_s4 + $0x40] sm:$0xff] }
 0x204   : > { %3901 = vmatpush1.bf16.msra.mxu0 %v6033_v7  ;;  %4309 = vmatpush1.bf16.msra.mxu1 %v6036_v10 }
 0x205   : > { %3902 = vmatprep.subr.bf16.mxu0 %v6041_v11  ;;  %4310 = vmatprep.subr.bf16.mxu1 %v6044_v47 }
 0x208   : > { %3903 = vmatpush1.bf16.msra.mxu0 %v6039_v63  ;;  %4311 = vmatpush1.bf16.msra.mxu1 %v6042_v48 }
 0x209   : > { %3904 = vmatprep.subr.bf16.mxu0 %v6047_v53  ;;  %4312 = vmatprep.subr.bf16.mxu1 %v6050_v1 }
 0x20c   : > { %3905 = vmatpush1.bf16.msra.mxu0 %v6045_v12  ;;  %4313 = vmatpush1.bf16.msra.mxu1 %v6048_v54 }
 0x20d   : > { %3906 = vmatprep.subr.bf16.mxu0 %v6053_v14  ;;  %4314 = vmatprep.subr.bf16.mxu1 %v6056_v15 }
 0x20e   : > { %v3732_v21 = vpop.f32.mrb[16].mxu0  ;;  %v4140_v22 = vpop.f32.mrb[16].mxu1 }
 0x20f   : > { %v6893_v23 = vadd.f32 %v3732_v21, %v6806_v4  ;;  %v6896_v24 = vadd.f32 %v4140_v22, %v6809_v5  ;;  %v3734_v25 = vpop.f32.mrb[17].mxu0  ;;  %v4142_v26 = vpop.f32.mrb[17].mxu1  ;;  %v6065_v5 = vld [vmem:[%s6260_s10 + $0xf24] ss:$16 sps:$4 sm:$0xff]  }
 0x210   : > { %v6899_v27 = vadd.f32 %v3734_v25, %v6812_v8  ;;  %v6902_v28 = vadd.f32 %v4142_v26, %v6815_v9  ;;  %3907 = vmatpush1.bf16.msra.mxu0 %v6051_v16  ;;  %4315 = vmatpush1.bf16.msra.mxu1 %v6054_v18  ;;  %v3736_v4 = vpop.f32.mrb[18].mxu0  ;;  %v4144_v17 = vpop.f32.mrb[18].mxu1  ;;  %v6068_v8 = vld [vmem:[%s6260_s10 + $0xf2c] ss:$16 sps:$4 sm:$0xff]   ;;  %v6063_v9 = vld [vmem:[%s6260_s10 + $0xf20] ss:$16 sps:$4 sm:$0xff]  }
 0x211   : > { %3908 = vmatprep.subr.bf16.mxu0 %v6059_v19  ;;  %4316 = vmatprep.subr.bf16.mxu1 %v6062_v20  ;;  %v3737_v30 = vpop.f32.mrb[19].mxu0  ;;  %v4145_v31 = vpop.f32.mrb[19].mxu1 }
 0x214   : > { %3909 = vmatpush1.bf16.msra.mxu0 %v6057_v29  ;;  %4317 = vmatpush1.bf16.msra.mxu1 %v6060_v13 }
 0x215   : > { %3910 = vmatprep.subr.bf16.mxu0 %v6065_v5  ;;  %4318 = vmatprep.subr.bf16.mxu1 %v6068_v8 }
 0x218   : > { %3911 = vmatpush1.bf16.msra.mxu0 %v6063_v9  ;;  %4319 = vmatpush1.bf16.msra.mxu1 %v6066_v32 }
 0x219   : > { %3912 = vmatprep.subr.bf16.mxu0 %v6071_v35  ;;  %4320 = vmatprep.subr.bf16.mxu1 %v6074_v36  ;;  %v291_v35 = vld [vmem:[%s7234_s4] sm:$0xff]  ;;  %v293_v36 = vld [vmem:[%s7234_s4 + $0x10] sm:$0xff] }
 0x21c   : > { %3913 = vmatpush1.bf16.msra.mxu0 %v6069_v37  ;;  %4321 = vmatpush1.bf16.msra.mxu1 %v6072_v42  ;;  %v292_v37 = vld [vmem:[%s7234_s4 + $0x8] sm:$0xff]  ;;  %v294_v42 = vld [vmem:[%s7234_s4 + $0x18] sm:$0xff] }
 0x21d   : > { %3914 = vmatprep.subr.bf16.mxu0 %v6077_v43  ;;  %4322 = vmatprep.subr.bf16.mxu1 %v6080_v44 }
 0x220   : > { %3915 = vmatpush1.bf16.msra.mxu0 %v6075_v45  ;;  %4323 = vmatpush1.bf16.msra.mxu1 %v6078_v46  ;;  %v295_v45 = vld [vmem:[%s7234_s4 + $0x20] sm:$0xff]  ;;  %v297_v46 = vld [vmem:[%s7234_s4 + $0x30] sm:$0xff] }
 0x221   : > { %3916 = vmatprep.subr.bf16.mxu0 %v6083_v49  ;;  %4324 = vmatprep.subr.bf16.mxu1 %v6086_v52 }
 0x224   : > { %3917 = vmatpush1.bf16.msra.mxu0 %v6081_v50  ;;  %4325 = vmatpush1.bf16.msra.mxu1 %v6084_v51 }
 0x225   : > { %3918 = vmatprep.subr.bf16.mxu0 %v6089_v38  ;;  %4326 = vmatprep.subr.bf16.mxu1 %v6092_v55  ;;  %v296_v38 = vld [vmem:[%s7234_s4 + $0x28] sm:$0xff]  ;;  %v298_v55 = vld [vmem:[%s7234_s4 + $0x38] sm:$0xff] }
 0x228   : > { %3919 = vmatpush1.bf16.msra.mxu0 %v6087_v33  ;;  %4327 = vmatpush1.bf16.msra.mxu1 %v6090_v34 }
 0x229   : > { %3920 = vmatprep.subr.bf16.mxu0 %v6095_v39  ;;  %4328 = vmatprep.subr.bf16.mxu1 %v6098_v40 }
 0x22c   : > { %3921 = vmatpush1.bf16.msra.mxu0 %v6093_v56  ;;  %4329 = vmatpush1.bf16.msra.mxu1 %v6096_v58 }
 0x22d   : > { %3922 = vmatprep.subr.bf16.mxu0 %v6101_v59  ;;  %4330 = vmatprep.subr.bf16.mxu1 %v6104_v60 }
 0x230   : > { %3923 = vmatpush1.bf16.msra.mxu0 %v6099_v61  ;;  %4331 = vmatpush1.bf16.msra.mxu1 %v6102_v62 }
 0x233   : > { %3925 = vmatmul.mubr.bf16.vlgmr.msra.gmra.mrb[0].mxu0 %v4705_v2  ;;  %4333 = vmatmul.mubr.bf16.vlgmr.msra.gmra.mrb[0].mxu1 %v4705_v2 }
 0x234   : > { %3934 = vmatprep.mubr.bf16.mxu0 %v4722_v3  ;;  %4342 = vmatprep.mubr.bf16.mxu1 %v4722_v3  ;;  %v301_v3 = vld [vmem:[%s7234_s4 + $0x50] sm:$0xff] }
 0x23b   : > { %3935 = vmatmul.mubr.bf16.gmra.mrb[32].mxu0 %v4721_v6  ;;  %4343 = vmatmul.mubr.bf16.gmra.mrb[32].mxu1 %v4721_v6 }
 0x24e   : > { %v3783_v7 = vpop.f32.mrb[20].mxu0  ;;  %v4191_v10 = vpop.f32.mrb[20].mxu1 }
 0x24f   : > { %v3784_v11 = vadd.f32 %v3783_v7, %v6893_v23  ;;  %v4192_v47 = vadd.f32 %v4191_v10, %v6896_v24  ;;  %v3785_v63 = vpop.f32.mrb[21].mxu0  ;;  %v4193_v48 = vpop.f32.mrb[21].mxu1 }
 0x250   : > { %v3786_v57 = vadd.f32 %v3785_v63, %v6899_v27  ;;  %v4194_v41 = vadd.f32 %v4193_v48, %v6902_v28  ;;  %v3787_v53 = vpop.f32.mrb[22].mxu0  ;;  %v4195_v1 = vpop.f32.mrb[22].mxu1  ;;  %v302_v63 = vld [vmem:[%s7234_s4 + $0x58] sm:$0xff] }
 0x251   : > { %v3788_v12 = vpop.f32.mrb[23].mxu0  ;;  %v4196_v54 = vpop.f32.mrb[23].mxu1 }
 0x28e   : > { %v3834_v14 = vpop.f32.mrb[24].mxu0  ;;  %v4242_v15 = vpop.f32.mrb[24].mxu1 }
 0x28f   : > { %v3835_v16 = vadd.f32 %v3834_v14, %v3784_v11  ;;  %v4243_v18 = vadd.f32 %v4242_v15, %v4192_v47  ;;  %v3836_v19 = vpop.f32.mrb[25].mxu0  ;;  %v4244_v20 = vpop.f32.mrb[25].mxu1  ;;  %v300_v11 = vld [vmem:[%s7234_s4 + $0x48] sm:$0xff] }
 0x290   : > { %v3837_v21 = vadd.f32 %v3836_v19, %v3786_v57  ;;  %v4245_v22 = vadd.f32 %v4244_v20, %v4194_v41  ;;  %v3838_v23 = vpop.f32.mrb[26].mxu0  ;;  %v4246_v24 = vpop.f32.mrb[26].mxu1 }
 0x291   : > { %v3839_v25 = vpop.f32.mrb[27].mxu0  ;;  %v4247_v26 = vpop.f32.mrb[27].mxu1 }
 0x2ce   : > { %v3885_v29 = vpop.f32.mrb[28].mxu0  ;;  %v4293_v27 = vpop.f32.mrb[28].mxu1 }
 0x2cf   : > { %v3886_v13 = vadd.f32 %v3885_v29, %v3835_v16  ;;  %v4294_v28 = vadd.f32 %v4293_v27, %v4243_v18  ;;  %v3887_v4 = vpop.f32.mrb[29].mxu0  ;;  %v4295_v17 = vpop.f32.mrb[29].mxu1 }
 0x2d0   : > { %v3888_v5 = vadd.f32 %v3887_v4, %v3837_v21  ;;  %v4296_v8 = vadd.f32 %v4295_v17, %v4245_v22  ;;  %v3889_v30 = vpop.f32.mrb[30].mxu0  ;;  %v4297_v31 = vpop.f32.mrb[30].mxu1 }
 0x2d1   : > { %v3890_v9 = vpop.f32.mrb[31].mxu0  ;;  %v4298_v32 = vpop.f32.mrb[31].mxu1 }
 0x306   : > { %v3926_v43 = vpop.f32.mrb[0].mxu0  ;;  %v4334_v44 = vpop.f32.mrb[0].mxu1 }
 0x307   : > { %v4351_v49 = vadd.f32 %v3926_v43, %v291_v35  ;;  %v4353_v52 = vadd.f32 %v4334_v44, %v293_v36  ;;  %v3928_v50 = vpop.f32.mrb[1].mxu0  ;;  %v4336_v51 = vpop.f32.mrb[1].mxu1 }
 0x308   : > { %v4352_v33 = vadd.f32 %v3928_v50, %v292_v37  ;;  %v4354_v34 = vadd.f32 %v4336_v51, %v294_v42  ;;  %v3930_v39 = vpop.f32.mrb[2].mxu0  ;;  %v4338_v40 = vpop.f32.mrb[2].mxu1 }
 0x309   : > { %4363 = vst [vmem:[%s7234_s4] sm:$0xff] %v4351_v49  ;;  %4365 = vst [vmem:[%s7234_s4 + $0x10] sm:$0xff] %v4353_v52  ;;  %v4355_v56 = vadd.f32 %v3930_v39, %v295_v45  ;;  %v4357_v58 = vadd.f32 %v4338_v40, %v297_v46  ;;  %v3932_v59 = vpop.f32.mrb[3].mxu0  ;;  %v4340_v60 = vpop.f32.mrb[3].mxu1 }
 0x30a   : > { %4364 = vst [vmem:[%s7234_s4 + $0x8] sm:$0xff] %v4352_v33  ;;  %4366 = vst [vmem:[%s7234_s4 + $0x18] sm:$0xff] %v4354_v34  ;;  %v4356_v61 = vadd.f32 %v3932_v59, %v296_v38  ;;  %v4358_v62 = vadd.f32 %v4340_v60, %v298_v55 }
 0x30b   : > { %4367 = vst [vmem:[%s7234_s4 + $0x20] sm:$0xff] %v4355_v56  ;;  %4369 = vst [vmem:[%s7234_s4 + $0x30] sm:$0xff] %v4357_v58 }
 0x30c   : > { %4368 = vst [vmem:[%s7234_s4 + $0x28] sm:$0xff] %v4356_v61  ;;  %4370 = vst [vmem:[%s7234_s4 + $0x38] sm:$0xff] %v4358_v62 }
 0x30e   : > { %v3936_v2 = vpop.f32.mrb[32].mxu0  ;;  %v4344_v6 = vpop.f32.mrb[32].mxu1  ;;  %4378 = sbr.rel (%p5235_p10) target bundleno = 854 (0x356), region = 67 }
 0x30f   : > { %v3937_v7 = vadd.f32 %v3936_v2, %v3886_v13  ;;  %v4345_v10 = vadd.f32 %v4344_v6, %v4294_v28  ;;  %v3938_v47 = vpop.f32.mrb[33].mxu0  ;;  %v4346_v48 = vpop.f32.mrb[33].mxu1 }
 0x310   : > { %v3939_v57 = vadd.f32 %v3938_v47, %v3888_v5  ;;  %v4347_v41 = vadd.f32 %v4346_v48, %v4296_v8  ;;  %v3940_v53 = vpop.f32.mrb[34].mxu0  ;;  %v4348_v1 = vpop.f32.mrb[34].mxu1  ;;  %v7017_v19 = vld [vmem:[%s7234_s4] sm:$0xff] (!%p5235_p10)  ;;  %v7057_v28 = vld [vmem:[%s7234_s4 + $0x10] sm:$0xff] (!%p5235_p10) }
 0x311   : > { %v4359_v12 = vadd.f32 %v3937_v7, %v299_v0  ;;  %v4361_v54 = vadd.f32 %v4345_v10, %v301_v3  ;;  %v3941_v14 = vpop.f32.mrb[35].mxu0  ;;  %v4349_v15 = vpop.f32.mrb[35].mxu1  ;;  %v4423_v23 = vmul.f32 (!%p5235_p10), %v7017_v19, %v7017_v19  ;;  %v7040_v26 = vld [vmem:[%s7234_s4 + $0x8] sm:$0xff] (!%p5235_p10)  ;;  %v7082_v49 = vld [vmem:[%s7234_s4 + $0x18] sm:$0xff] (!%p5235_p10)  ;;  %v4425_v51 = vmul.f32 (!%p5235_p10), %v7057_v28, %v7057_v28 }
 0x312   : > { %v4360_v16 = vadd.f32 %v3939_v57, %v300_v11  ;;  %v4362_v18 = vadd.f32 %v4347_v41, %v302_v63  ;;  %v7022_v20 = vld [vmem:[%s7234_s4 + $0x20] sm:$0xff] (!%p5235_p10)  ;;  %v4424_v13 = vmul.f32 (!%p5235_p10), %v7040_v26, %v7040_v26  ;;  %v7067_v30 = vld [vmem:[%s7234_s4 + $0x30] sm:$0xff] (!%p5235_p10)  ;;  %v4426_v41 = vmul.f32 (!%p5235_p10), %v7082_v49, %v7082_v49 }
 0x313   : > { %4371 = vst [vmem:[%s7234_s4 + $0x40] sm:$0xff] %v4359_v12  ;;  %4373 = vst [vmem:[%s7234_s4 + $0x50] sm:$0xff] %v4361_v54  ;;  %v4391_v22 = vadd.f32 (!%p5235_p10), %v7022_v20, %v7017_v19  ;;  %v4427_v24 = vmul.f32 (!%p5235_p10), %v7022_v20, %v7022_v20  ;;  %v7045_v29 = vld [vmem:[%s7234_s4 + $0x28] sm:$0xff] (!%p5235_p10)  ;;  %v4407_v9 = vadd.f32 (!%p5235_p10), %v7067_v30, %v7057_v28  ;;  %v7087_v52 = vld [vmem:[%s7234_s4 + $0x38] sm:$0xff] (!%p5235_p10) }
 0x314   : > { %4372 = vst [vmem:[%s7234_s4 + $0x48] sm:$0xff] %v4360_v16  ;;  %4374 = vst [vmem:[%s7234_s4 + $0x58] sm:$0xff] %v4362_v18  ;;  %v4399_v5 = vadd.f32 (!%p5235_p10), %v7045_v29, %v7040_v26  ;;  %v4428_v8 = vmul.f32 (!%p5235_p10), %v7045_v29, %v7045_v29  ;;  %v4429_v38 = vmul.f32 (!%p5235_p10), %v7067_v30, %v7067_v30 }
 0x315   : > { %v4435_v17 = vadd.f32 %v4427_v24, %v4423_v23  ;;  %v4415_v59 = vadd.f32 %v7087_v52, %v7082_v49  ;;  %v4430_v18 = vmul.f32 %v7087_v52, %v7087_v52 }
 0x316   : > { %v4443_v37 = vadd.f32 %v4428_v8, %v4424_v13  ;;  %v4451_v58 = vadd.f32 %v4429_v38, %v4425_v51 }
 0x31a   : > { %v7027_v21 = vld [vmem:[%s7234_s4 + $0x40] sm:$0xff]  ;;  %v7077_v42 = vld [vmem:[%s7234_s4 + $0x50] sm:$0xff] }
 0x31b   : > { %v4431_v25 = vmul.f32 %v7027_v21, %v7027_v21  ;;  %v7050_v27 = vld [vmem:[%s7234_s4 + $0x48] sm:$0xff]  ;;  %v4392_v4 = vadd.f32 %v4391_v22, %v7027_v21  ;;  %v4408_v50 = vadd.f32 %v4407_v9, %v7077_v42  ;;  %v4433_v55 = vmul.f32 %v7077_v42, %v7077_v42  ;;  %v7101_v2 = vld [vmem:[%s7234_s4 + $0x58] sm:$0xff] }
 0x31c   : > { %v4432_v31 = vmul.f32 %v7050_v27, %v7050_v27  ;;  %v4400_v36 = vadd.f32 %v4399_v5, %v7050_v27  ;;  %v4416_v57 = vadd.f32 %v4415_v59, %v7101_v2  ;;  %v4434_v9 = vmul.f32 %v7101_v2, %v7101_v2 }
 0x31d   : > { %v4393_v32 = vrot.slane %v4392_v4, 4  ;;  %v4436_v35 = vadd.f32 %v4435_v17, %v4431_v25  ;;  %v4409_v56 = vrot.slane %v4408_v50, 4  ;;  %v4452_v6 = vadd.f32 %v4451_v58, %v4433_v55 }
 0x31e   : > { %v4401_v45 = vrot.slane %v4400_v36, 4  ;;  %v4444_v46 = vadd.f32 %v4443_v37, %v4432_v31  ;;  %v4417_v16 = vrot.slane %v4416_v57, 4 }
 0x31f   : > { %v4394_v43 = vadd.f32 %v4393_v32, %v4392_v4  ;;  %v4437_v44 = vrot.slane %v4436_v35, 4  ;;  %v4410_v3 = vadd.f32 %v4409_v56, %v4408_v50  ;;  %v4453_v48 = vrot.slane %v4452_v6, 4 }
 0x320   : > { %v4402_v39 = vadd.f32 %v4401_v45, %v4400_v36  ;;  %v4445_v40 = vrot.slane %v4444_v46, 4  ;;  %v4418_v17 = vadd.f32 %v4417_v16, %v4416_v57  ;;  %v4459_v45 = vadd.f32 %v4430_v18, %v4426_v41 }
 0x321   : > { %v4395_v33 = vrot.slane %v4394_v43, 2  ;;  %v4438_v34 = vadd.f32 %v4437_v44, %v4436_v35  ;;  %v4411_v63 = vrot.slane %v4410_v3, 2  ;;  %v4454_v15 = vadd.f32 %v4453_v48, %v4452_v6 }
 0x322   : > { %v4403_v62 = vrot.slane %v4402_v39, 2  ;;  %v4446_v0 = vadd.f32 %v4445_v40, %v4444_v46  ;;  %v4419_v37 = vrot.slane %v4418_v17, 2 }
 0x323   : > { %v4396_v60 = vadd.f32 %v4395_v33, %v4394_v43  ;;  %v4439_v61 = vrot.slane %v4438_v34, 2  ;;  %v4412_v14 = vadd.f32 %v4411_v63, %v4410_v3  ;;  %v4455_v4 = vrot.slane %v4454_v15, 2 }
 0x324   : > { %v4404_v11 = vadd.f32 %v4403_v62, %v4402_v39  ;;  %v4447_v47 = vrot.slane %v4446_v0, 2  ;;  %v4420_v55 = vadd.f32 %v4419_v37, %v4418_v17  ;;  %v4460_v33 = vadd.f32 %v4459_v45, %v4434_v9 }
 0x325   : > { %v4397_v7 = vrot.slane %v4396_v60, 1  ;;  %v4440_v10 = vadd.f32 %v4439_v61, %v4438_v34  ;;  %v4413_v13 = vrot.slane %v4412_v14, 1  ;;  %v4456_v36 = vadd.f32 %v4455_v4, %v4454_v15 }
 0x326   : > { %v4405_v12 = vrot.slane %v4404_v11, 1  ;;  %v4448_v54 = vadd.f32 %v4447_v47, %v4446_v0  ;;  %v4521_v34 = vlaneseq  ;;  %v4421_v59 = vrot.slane %v4420_v55, 1 }
 0x327   : > { %v4398_v53 = vadd.f32 %v4397_v7, %v4396_v60  ;;  %v4441_v1 = vrot.slane %v4440_v10, 1  ;;  %v4414_v35 = vadd.f32 %v4413_v13, %v4412_v14  ;;  %v4457_v50 = vrot.slane %v4456_v36, 1 }
 0x328   : > { %v4406_v24 = vadd.f32 %v4405_v12, %v4404_v11  ;;  %v4449_v25 = vrot.slane %v4448_v54, 1  ;;  %v4461_v60 = vrot.slane %v4460_v33, 4  ;;  %v4422_v0 = vadd.f32 %v4421_v59, %v4420_v55  ;;  %v7136_v12 = vld [vmem:[%s7233_s3] sm:$0xf] }
 0x329   : > { %v4442_v22 = vadd.f32 %v4441_v1, %v4440_v10  ;;  %v7108_v23 = vmul.f32 0.055555556, %v4398_v53  ;;  %v7118_v51 = vmul.f32 0.055555556, %v4414_v35  ;;  %v4458_v40 = vadd.f32 %v4457_v50, %v4456_v36  ;;  %v7131_v1 = vld [vmem:[%s7232_s2] sm:$0xf] }
 0x32a   : > { %v4450_v31 = vadd.f32 %v4449_v25, %v4448_v54  ;;  %v7114_v32 = vmul.f32 0.055555556, %v4406_v24  ;;  %v4462_v3 = vadd.f32 %v4461_v60, %v4460_v33  ;;  %v7122_v6 = vshrl.u32 %v4521_v34, 7 }
 0x32b   : > { %v4471_v5 = vmul.f32 0.055555556, %v4442_v22  ;;  %v4475_v8 = vmul.f32 %v7108_v23, %v7108_v23  ;;  %v4477_v56 = vmul.f32 %v7118_v51, %v7118_v51  ;;  %v4473_v62 = vmul.f32 0.055555556, %v4458_v40 }
 0x32c   : > { %v4472_v44 = vmul.f32 0.055555556, %v4450_v31  ;;  %v4476_v46 = vmul.f32 %v7114_v32, %v7114_v32  ;;  %v4463_v11 = vrot.slane %v4462_v3, 2  ;;  %v7124_v48 = vmul.f32 0.055555556, %v4422_v0 }
 0x32d   : > { %v4479_v43 = vsub.f32 %v4471_v5, %v4475_v8  ;;  %v4481_v10 = vsub.f32 %v4473_v62, %v4477_v56  ;;  %v4523_v57 = vsub.s32 0, %v7122_v6  ;;  %v4527_v41 = vsub.s32 1, %v7122_v6 }
 0x32e   : > { %v4480_v39 = vsub.f32 %v4472_v44, %v4476_v46  ;;  %v4464_v63 = vadd.f32 %v4463_v11, %v4462_v3  ;;  %v4531_v54 = vsub.s32 2, %v7122_v6  ;;  %v4487_v15 = vsub.f32 %v7017_v19, %v7108_v23 }
 0x32f   : > { %v4483_v38 = vmax.f32 %v4479_v43, 0.0  ;;  %v4485_v47 = vmax.f32 %v4481_v10, 0.0  ;;  %v4491_v16 = vsub.f32 %v7022_v20, %v7108_v23  ;;  %v4495_v18 = vsub.f32 %v7027_v21, %v7108_v23 }
 0x330   : > { %v4484_v61 = vmax.f32 %v4480_v39, 0.0  ;;  %v4465_v14 = vrot.slane %v4464_v63, 1  ;;  %v4478_v24 = vmul.f32 %v7124_v48, %v7124_v48  ;;  %v4524_v25 = vrot.slane %v7131_v1, %v4523_v57 }
 0x331   : > { %v4499_v58 = vadd.f32 1e-05, %v4483_v38  ;;  %v4501_v53 = vadd.f32 1e-05, %v4485_v47  ;;  %v4558_v13 = vrot.slane %v7136_v12, %v4523_v57  ;;  %v4528_v4 = vrot.slane %v7131_v1, %v4527_v41 }
 0x332   : > { %v4500_v7 = vadd.f32 1e-05, %v4484_v61  ;;  %v4466_v22 = vadd.f32 %v4465_v14, %v4464_v63  ;;  %v4562_v17 = vrot.slane %v7136_v12, %v4527_v41  ;;  %v4488_v5 = vsub.f32 %v7040_v26, %v7114_v32 }
 0x333   : > { %6107 = vrsqrt.f32 %v4499_v58  ;;  %v4492_v21 = vsub.f32 %v7045_v29, %v7114_v32  ;;  %v4496_v23 = vsub.f32 %v7050_v27, %v7114_v32  ;;  %v4532_v31 = vrot.slane %v7131_v1, %v4531_v54 }
 0x334   : > { %6109 = vrsqrt.f32 %v4500_v7  ;;  %v4474_v20 = vmul.f32 0.055555556, %v4466_v22  ;;  %v4489_v36 = vsub.f32 %v7057_v28, %v7118_v51  ;;  %v7161_v37 = vrot.slane %v7136_v12, %v4531_v54 }
 0x335   : > { %6111 = vrsqrt.f32 %v4501_v53  ;;  %v4535_v26 = vsub.s32 3, %v7122_v6  ;;  %v4493_v27 = vsub.f32 %v7067_v30, %v7118_v51  ;;  %v4497_v39 = vsub.f32 %v7077_v42, %v7118_v51 }
 0x336   : > { %v4482_v43 = vsub.f32 %v4474_v20, %v4478_v24  ;;  %v4490_v14 = vsub.f32 %v7082_v49, %v7124_v48 }
 0x338   : > { %v4486_v50 = vmax.f32 %v4482_v43, 0.0 }
 0x33a   : > { %v4502_v56 = vadd.f32 1e-05, %v4486_v50 }
 0x33c   : > { %6113 = vrsqrt.f32 %v4502_v56 }
 0x33d   : > { %v6108_v19 = vpop.eup %6107 }
 0x33e   : > { %v4507_v8 = vmul.f32 %v6108_v19, %v4487_v15  ;;  %v4511_v9 = vmul.f32 %v6108_v19, %v4491_v16  ;;  %v4515_v35 = vmul.f32 %v6108_v19, %v4495_v18  ;;  %v6110_v44 = vpop.eup %6109 }
 0x33f   : > { %v4508_v46 = vmul.f32 %v6110_v44, %v4488_v5  ;;  %v4512_v38 = vmul.f32 %v6110_v44, %v4492_v21  ;;  %v4516_v55 = vmul.f32 %v6110_v44, %v4496_v23  ;;  %v6112_v60 = vpop.eup %6111  ;;  %v4536_v21 = vrot.slane %v7131_v1, %v4535_v26 }
 0x340   : > { %v4541_v45 = vmul.f32 %v4524_v25, %v4507_v8  ;;  %v4545_v29 = vmul.f32 %v4524_v25, %v4511_v9  ;;  %v4549_v32 = vmul.f32 %v4524_v25, %v4515_v35  ;;  %v4509_v0 = vmul.f32 %v6112_v60, %v4489_v36 }
 0x341   : > { %v4542_v40 = vmul.f32 %v4528_v4, %v4508_v46  ;;  %v4546_v58 = vmul.f32 %v4528_v4, %v4512_v38  ;;  %v4550_v59 = vmul.f32 %v4528_v4, %v4516_v55  ;;  %v4513_v11 = vmul.f32 %v6112_v60, %v4493_v27 }
 0x342   : > { %v4575_v33 = vadd.f32 %v4558_v13, %v4541_v45  ;;  %v4579_v34 = vadd.f32 %v4558_v13, %v4545_v29  ;;  %v4583_v28 = vadd.f32 %v4558_v13, %v4549_v32  ;;  %v4543_v51 = vmul.f32 %v4532_v31, %v4509_v0 }
 0x343   : > { %v4576_v62 = vadd.f32 %v4562_v17, %v4542_v40  ;;  %v4580_v3 = vadd.f32 %v4562_v17, %v4546_v58  ;;  %v4547_v63 = vmul.f32 %v4532_v31, %v4513_v11  ;;  %v4584_v41 = vadd.f32 %v4562_v17, %v4550_v59 }
 0x344   : > { %vm4587_vm0 = vcmp.ge.f32.partialorder %v4575_v33, 0.0  ;;  %v4599_v61 = vmul.f32 0.2, %v4575_v33  ;;  %vm4591_vm1 = vcmp.ge.f32.partialorder %v4579_v34, 0.0  ;;  %v4603_v30 = vmul.f32 0.2, %v4579_v34 }
 0x345   : > { %vm4595_vm2 = vcmp.ge.f32.partialorder %v4583_v28, 0.0  ;;  %vm4588_vm3 = vcmp.ge.f32.partialorder %v4576_v62, 0.0  ;;  %v4600_v42 = vmul.f32 0.2, %v4576_v62  ;;  %vm4592_vm4 = vcmp.ge.f32.partialorder %v4580_v3, 0.0 }
 0x346   : > { %v4611_v7 = vsel %vm4587_vm0, %v4575_v33, %v4599_v61  ;;  %v4615_v10 = vsel %vm4591_vm1, %v4579_v34, %v4603_v30  ;;  %v4604_v47 = vmul.f32 0.2, %v4580_v3  ;;  %v4607_v57 = vmul.f32 0.2, %v4583_v28 }
 0x347   : > { %4623 = vst [vmem:[%s7234_s4] sm:$0xff] %v4611_v7  ;;  %4627 = vst [vmem:[%s7234_s4 + $0x20] sm:$0xff] %v4615_v10  ;;  %v4612_v53 = vsel %vm4588_vm3, %v4576_v62, %v4600_v42  ;;  %v4577_v54 = vadd.f32 %v7161_v37, %v4543_v51  ;;  %v4517_v15 = vmul.f32 %v6112_v60, %v4497_v39  ;;  %vm4596_vm5 = vcmp.ge.f32.partialorder %v4584_v41, 0.0 }
 0x348   : > { %4624 = vst [vmem:[%s7234_s4 + $0x8] sm:$0xff] %v4612_v53  ;;  %v4616_v16 = vsel %vm4592_vm4, %v4580_v3, %v4604_v47  ;;  %v4581_v18 = vadd.f32 %v7161_v37, %v4547_v63  ;;  %v4619_v22 = vsel %vm4595_vm2, %v4583_v28, %v4607_v57  ;;  %v4608_v49 = vmul.f32 0.2, %v4584_v41 }
 0x349   : > { %vm4589_vm6 = vcmp.ge.f32.partialorder %v4577_v54, 0.0  ;;  %v4601_v24 = vmul.f32 0.2, %v4577_v54  ;;  %4628 = vst [vmem:[%s7234_s4 + $0x28] sm:$0xff] %v4616_v16  ;;  %4631 = vst [vmem:[%s7234_s4 + $0x40] sm:$0xff] %v4619_v22  ;;  %v4551_v25 = vmul.f32 %v4532_v31, %v4517_v15  ;;  %v4494_v4 = vsub.f32 %v7087_v52, %v7124_v48  ;;  %v6114_v52 = vpop.eup %6113 }
 0x34a   : > { %vm4593_vm7 = vcmp.ge.f32.partialorder %v4581_v18, 0.0  ;;  %v4605_v13 = vmul.f32 0.2, %v4581_v18  ;;  %v4498_v17 = vsub.f32 %v7101_v2, %v7124_v48  ;;  %v4620_v5 = vsel %vm4596_vm5, %v4584_v41, %v4608_v49 }
 0x34b   : > { %v4613_v19 = vsel %vm4589_vm6, %v4577_v54, %v4601_v24  ;;  %v4585_v20 = vadd.f32 %v7161_v37, %v4551_v25  ;;  %4632 = vst [vmem:[%s7234_s4 + $0x48] sm:$0xff] %v4620_v5  ;;  %v4510_v48 = vmul.f32 %v6114_v52, %v4490_v14  ;;  %v4570_v8 = vrot.slane %v7136_v12, %v4535_v26 }
 0x34c   : > { %4625 = vst [vmem:[%s7234_s4 + $0x10] sm:$0xff] %v4613_v19  ;;  %v4617_v23 = vsel %vm4593_vm7, %v4581_v18, %v4605_v13  ;;  %v4514_v31 = vmul.f32 %v6114_v52, %v4494_v4  ;;  %v4518_v9 = vmul.f32 %v6114_v52, %v4498_v17 }
 0x34d   : > { %4629 = vst [vmem:[%s7234_s4 + $0x30] sm:$0xff] %v4617_v23  ;;  %vm4597_vm8 = vcmp.ge.f32.partialorder %v4585_v20, 0.0  ;;  %v4609_v2 = vmul.f32 0.2, %v4585_v20  ;;  %v4544_v35 = vmul.f32 %v4536_v21, %v4510_v48 }
 0x34e   : > { %v4548_v36 = vmul.f32 %v4536_v21, %v4514_v31  ;;  %v4552_v37 = vmul.f32 %v4536_v21, %v4518_v9 }
 0x34f   : > { %v4621_v1 = vsel %vm4597_vm8, %v4585_v20, %v4609_v2  ;;  %v4578_v43 = vadd.f32 %v4570_v8, %v4544_v35 }
 0x350   : > { %4633 = vst [vmem:[%s7234_s4 + $0x50] sm:$0xff] %v4621_v1  ;;  %v4582_v44 = vadd.f32 %v4570_v8, %v4548_v36  ;;  %v4586_v45 = vadd.f32 %v4570_v8, %v4552_v37 }
 0x351   : > { %vm4590_vm9 = vcmp.ge.f32.partialorder %v4578_v43, 0.0  ;;  %v4602_v29 = vmul.f32 0.2, %v4578_v43 }
 0x352   : > { %vm4594_vm10 = vcmp.ge.f32.partialorder %v4582_v44, 0.0  ;;  %v4606_v27 = vmul.f32 0.2, %v4582_v44  ;;  %vm4598_vm11 = vcmp.ge.f32.partialorder %v4586_v45, 0.0  ;;  %v4610_v6 = vmul.f32 0.2, %v4586_v45 }
 0x353   : > { %v4614_v12 = vsel %vm4590_vm9, %v4578_v43, %v4602_v29 }
 0x354   : > { %v4618_v26 = vsel %vm4594_vm10, %v4582_v44, %v4606_v27  ;;  %4626 = vst [vmem:[%s7234_s4 + $0x18] sm:$0xff] %v4614_v12  ;;  %v4622_v32 = vsel %vm4598_vm11, %v4586_v45, %v4610_v6 }
 0x355   : > { %4630 = vst [vmem:[%s7234_s4 + $0x38] sm:$0xff] %v4618_v26  ;;  %4634 = vst [vmem:[%s7234_s4 + $0x58] sm:$0xff] %v4622_v32 }
 0x356 PF: > { %p11_p11 = scmp.ge.s32.totalorder %s6184_s19, 4   ;;  %s7235_s15 = smov %s6133_s16 }
 0x357   : > { %s7236_s16 = smov %s6193_s22  ;;  %s7237_s17 = smov %s6184_s19 }
 0x358   :  { %13 = sbr.rel (!%p11_p11) target bundleno = 2 (0x2), region = 101 }

// kernel: discriminator_forward.9
= control target key start
LH: loop header
LB: loop body
LE: loop exit
PB: predicated region body
PF: predicated region fallthrough
CT: control target
= control target key end

     0   :  { %v50_v6 = vlaneseq  ;;  %vm872_vm0 = vcmask 7168   ;;  %s1461_s0 = inlined_call_operand.vmem [shape: bf16[8,8192], index: 0, kind: input, shape index: {}]   ;;  %s1462_s1 = inlined_call_operand.vmem [shape: bf16[1,8192], index: 1, kind: input, shape index: {}]   ;;  %s1463_s2 = inlined_call_operand.<no memory space> [shape: f32[1,1], index: 2, kind: input, shape index: {}]   ;;  %s1464_s3 = inlined_call_operand.vmem [shape: f32[8,1], index: 3, kind: output, shape index: {}]  }
   0x1   :  { %v902_v0 = vld [vmem:[%s1461_s0] sm:$0xff]  ;;  %v907_v1 = vld [vmem:[%s1461_s0 + $0x8] sm:$0xff]  ;;  %v912_v2 = vld [vmem:[%s1461_s0 + $0x10] sm:$0xff] }
   0x2   :  { %v917_v3 = vld [vmem:[%s1461_s0 + $0x18] sm:$0xff]  ;;  %v922_v4 = vld [vmem:[%s1461_s0 + $0x20] sm:$0xff]  ;;  %v927_v5 = vld [vmem:[%s1461_s0 + $0x28] sm:$0xff]  ;;  %v24_v9 = vunpack.c.l.bf16 %v902_v0  ;;  %v25_v10 = vunpack.c.h.bf16 %v902_v0  ;;  %v26_v11 = vunpack.c.l.bf16 %v907_v1  ;;  %v27_v12 = vunpack.c.h.bf16 %v907_v1 }
   0x3   :  { %v932_v7 = vld [vmem:[%s1461_s0 + $0x30] sm:$0xff]  ;;  %v937_v8 = vld [vmem:[%s1461_s0 + $0x38] sm:$0xff]  ;;  %v28_v13 = vunpack.c.l.bf16 %v912_v2  ;;  %v29_v14 = vunpack.c.h.bf16 %v912_v2  ;;  %v30_v15 = vunpack.c.l.bf16 %v917_v3  ;;  %v31_v16 = vunpack.c.h.bf16 %v917_v3  ;;  %v40_v17 = vld [vmem:[%s1462_s1] sm:$0xff] }
   0x4   :  { %v41_v18 = vld [vmem:[%s1462_s1 + $0x8] sm:$0xff]  ;;  %v32_v19 = vunpack.c.l.bf16 %v922_v4  ;;  %v33_v20 = vunpack.c.h.bf16 %v922_v4  ;;  %v34_v21 = vunpack.c.l.bf16 %v927_v5  ;;  %v35_v22 = vunpack.c.h.bf16 %v927_v5  ;;  %v960_v23 = vld [vmem:[%s1461_s0 + $0x80] sm:$0xff]  ;;  %v974_v33 = vld [vmem:[%s1461_s0 + $0x90] sm:$0xff] }
   0x5   :  { %v965_v24 = vld [vmem:[%s1461_s0 + $0x88] sm:$0xff]  ;;  %v36_v25 = vunpack.c.l.bf16 %v932_v7  ;;  %v37_v26 = vunpack.c.h.bf16 %v932_v7  ;;  %v38_v27 = vunpack.c.l.bf16 %v937_v8  ;;  %v39_v28 = vunpack.c.h.bf16 %v937_v8  ;;  %v979_v34 = vld [vmem:[%s1461_s0 + $0x98] sm:$0xff]  ;;  %v984_v36 = vld [vmem:[%s1461_s0 + $0xa0] sm:$0xff] }
   0x6   :  { %v42_v29 = vunpack.c.l.bf16 %v40_v17  ;;  %v43_v30 = vunpack.c.h.bf16 %v40_v17  ;;  %v44_v31 = vunpack.c.l.bf16 %v41_v18  ;;  %v51_v32 = vshrl.u32 %v50_v6, 7 }
   0x7   :  { %v45_v35 = vunpack.c.h.bf16 %v41_v18  ;;  %v448_v37 = vunpack.c.l.bf16 %v960_v23  ;;  %v449_v38 = vunpack.c.h.bf16 %v960_v23  ;;  %v450_v39 = vunpack.c.l.bf16 %v965_v24 }
   0x8   :  { %v989_v40 = vsub.s32 0, %v51_v32  ;;  %v991_v41 = vsub.s32 2, %v51_v32  ;;  %v993_v42 = vsub.s32 4, %v51_v32  ;;  %v995_v43 = vsub.s32 6, %v51_v32 }
   0x9   :  { %v451_v44 = vunpack.c.h.bf16 %v965_v24  ;;  %v452_v45 = vunpack.c.l.bf16 %v974_v33  ;;  %v1465_v23 = vunpack.c.h.bf16 %v974_v33 }
   0xa   :  { %v53_v48 = vrot.slane %v42_v29, %v989_v40  ;;  %v57_v49 = vrot.slane %v42_v29, %v991_v41  ;;  %v61_v52 = vrot.slane %v42_v29, %v993_v42  ;;  %v65_v53 = vrot.slane %v42_v29, %v995_v43 }
   0xb   :  { %v69_v54 = vrot.slane %v43_v30, %v989_v40  ;;  %v73_v56 = vrot.slane %v43_v30, %v991_v41  ;;  %v77_v57 = vrot.slane %v43_v30, %v993_v42  ;;  %v81_v58 = vrot.slane %v43_v30, %v995_v43 }
   0xc   :  { %v85_v59 = vrot.slane %v44_v31, %v989_v40  ;;  %v89_v60 = vrot.slane %v44_v31, %v991_v41  ;;  %v93_v61 = vrot.slane %v44_v31, %v993_v42  ;;  %v97_v62 = vrot.slane %v44_v31, %v995_v43 }
   0xd   :  { %v101_v63 = vrot.slane %v45_v35, %v989_v40  ;;  %v105_v6 = vrot.slane %v45_v35, %v991_v41  ;;  %v109_v17 = vrot.slane %v45_v35, %v993_v42  ;;  %v133_v18 = vrot.slane %v53_v48, %v989_v40  ;;  %v1032_v48 = vld [vmem:[%s1461_s0 + $0xa8] sm:$0xff] }
   0xe   :  { %v137_v29 = vrot.slane %v57_v49, %v989_v40  ;;  %v113_v30 = vrot.slane %v45_v35, %v995_v43  ;;  %v141_v32 = vrot.slane %v61_v52, %v989_v40  ;;  %v145_v55 = vrot.slane %v65_v53, %v989_v40 }
   0xf   :  { %v149_v51 = vrot.slane %v69_v54, %v989_v40  ;;  %v153_v31 = vrot.slane %v73_v56, %v989_v40  ;;  %v157_v50 = vrot.slane %v77_v57, %v989_v40  ;;  %v161_v47 = vrot.slane %v81_v58, %v989_v40 }
  0x10   :  { %v165_v46 = vrot.slane %v85_v59, %v989_v40  ;;  %v169_v35 = vrot.slane %v89_v60, %v989_v40  ;;  %v173_v49 = vrot.slane %v93_v61, %v989_v40  ;;  %v177_v52 = vrot.slane %v97_v62, %v989_v40 }
  0x11   :  { %v181_v53 = vrot.slane %v101_v63, %v989_v40  ;;  %v185_v54 = vrot.slane %v105_v6, %v989_v40  ;;  %v189_v56 = vrot.slane %v109_v17, %v989_v40  ;;  %v194_v57 = vmul.f32 %v133_v18, %v24_v9 }
  0x12   :  { %v195_v58 = vmul.f32 %v137_v29, %v25_v10  ;;  %v193_v59 = vrot.slane %v113_v30, %v989_v40  ;;  %v196_v60 = vmul.f32 %v141_v32, %v26_v11  ;;  %v197_v61 = vmul.f32 %v145_v55, %v27_v12  ;;  %v464_v10 = vld [vmem:[%s1462_s1 + $0x20] sm:$0xff]  ;;  %v1080_v12 = vld [vmem:[%s1461_s0 + $0xb0] sm:$0xff] }
  0x13   :  { %v458_v62 = vunpack.c.l.bf16 %v1032_v48  ;;  %v198_v63 = vmul.f32 %v149_v51, %v28_v13  ;;  %v199_v6 = vmul.f32 %v153_v31, %v29_v14  ;;  %v200_v0 = vmul.f32 %v157_v50, %v30_v15  ;;  %v465_v13 = vld [vmem:[%s1462_s1 + $0x28] sm:$0xff] }
  0x14   :  { %v201_v9 = vmul.f32 %v161_v47, %v31_v16  ;;  %v1063_v1 = vmul.f32 %v165_v46, %v32_v19  ;;  %v1067_v11 = vmul.f32 %v169_v35, %v33_v20  ;;  %v1071_v2 = vmul.f32 %v173_v49, %v34_v21  ;;  %v1100_v16 = vld [vmem:[%s1461_s0 + $0xb8] sm:$0xff]  ;;  %v1105_v19 = vld [vmem:[%s1461_s0 + $0x40] sm:$0xff] }
  0x15   :  { %v1075_v3 = vmul.f32 %v177_v52, %v35_v22  ;;  %v1087_v4 = vmul.f32 %v181_v53, %v36_v25  ;;  %v1091_v14 = vmul.f32 %v185_v54, %v37_v26  ;;  %v1095_v5 = vmul.f32 %v189_v56, %v38_v27 }
  0x16   :  { %v210_v15 = vadd.f32 %v195_v58, %v194_v57  ;;  %v1109_v7 = vmul.f32 %v193_v59, %v39_v28  ;;  %v459_v20 = vunpack.c.h.bf16 %v1032_v48  ;;  %v466_v21 = vunpack.c.l.bf16 %v464_v10 }
  0x17   :  { %v467_v22 = vunpack.c.h.bf16 %v464_v10  ;;  %v460_v26 = vunpack.c.l.bf16 %v1080_v12  ;;  %v461_v27 = vunpack.c.h.bf16 %v1080_v12  ;;  %v468_v46 = vunpack.c.l.bf16 %v465_v13 }
  0x18   :  { %v211_v25 = vadd.f32 %v210_v15, %v196_v60  ;;  %v462_v47 = vunpack.c.l.bf16 %v1100_v16  ;;  %v463_v50 = vunpack.c.h.bf16 %v1100_v16  ;;  %v469_v51 = vunpack.c.h.bf16 %v465_v13 }
  0x19   :  { %v236_v55 = vunpack.c.l.bf16 %v1105_v19  ;;  %v477_v28 = vrot.slane %v466_v21, %v989_v40  ;;  %v481_v17 = vrot.slane %v466_v21, %v991_v41  ;;  %v485_v18 = vrot.slane %v466_v21, %v993_v42 }
  0x1a   :  { %v212_v8 = vadd.f32 %v211_v25, %v197_v61  ;;  %v489_v29 = vrot.slane %v466_v21, %v995_v43  ;;  %v493_v30 = vrot.slane %v467_v22, %v989_v40  ;;  %v497_v32 = vrot.slane %v467_v22, %v991_v41 }
  0x1b   :  { %v501_v31 = vrot.slane %v467_v22, %v993_v42  ;;  %v505_v49 = vrot.slane %v467_v22, %v995_v43  ;;  %v509_v52 = vrot.slane %v468_v46, %v989_v40  ;;  %v513_v53 = vrot.slane %v468_v46, %v991_v41 }
  0x1c   :  { %v213_v35 = vadd.f32 %v212_v8, %v198_v63  ;;  %v517_v54 = vrot.slane %v468_v46, %v993_v42  ;;  %v521_v56 = vrot.slane %v468_v46, %v995_v43  ;;  %v525_v57 = vrot.slane %v469_v51, %v989_v40 }
  0x1d   :  { %v529_v58 = vrot.slane %v469_v51, %v991_v41  ;;  %v533_v60 = vrot.slane %v469_v51, %v993_v42  ;;  %v557_v61 = vrot.slane %v477_v28, %v989_v40  ;;  %v561_v63 = vrot.slane %v481_v17, %v989_v40 }
  0x1e   :  { %v214_v59 = vadd.f32 %v213_v35, %v199_v6  ;;  %v537_v10 = vrot.slane %v469_v51, %v995_v43  ;;  %v565_v12 = vrot.slane %v485_v18, %v989_v40  ;;  %v569_v13 = vrot.slane %v489_v29, %v989_v40 }
  0x1f   :  { %v573_v15 = vrot.slane %v493_v30, %v989_v40  ;;  %v577_v21 = vrot.slane %v497_v32, %v989_v40  ;;  %v581_v22 = vrot.slane %v501_v31, %v989_v40  ;;  %v585_v6 = vrot.slane %v505_v49, %v989_v40 }
  0x20   :  { %v215_v16 = vadd.f32 %v214_v59, %v200_v0  ;;  %v589_v25 = vrot.slane %v509_v52, %v989_v40  ;;  %v593_v46 = vrot.slane %v513_v53, %v989_v40  ;;  %v597_v8 = vrot.slane %v517_v54, %v989_v40 }
  0x21   :  { %v601_v51 = vrot.slane %v521_v56, %v989_v40  ;;  %v605_v17 = vrot.slane %v525_v57, %v989_v40  ;;  %v618_v0 = vmul.f32 %v557_v61, %v448_v37  ;;  %v619_v18 = vmul.f32 %v561_v63, %v449_v38  ;;  %v1213_v63 = vld [vmem:[%s1461_s0 + $0x68] sm:$0xff] }
  0x22   :  { %v216_v28 = vadd.f32 %v215_v16, %v201_v9  ;;  %v609_v29 = vrot.slane %v529_v58, %v989_v40  ;;  %v613_v30 = vrot.slane %v533_v60, %v989_v40  ;;  %v617_v32 = vrot.slane %v537_v10, %v989_v40  ;;  %v1194_v58 = vld [vmem:[%s1461_s0 + $0x58] sm:$0xff] }
  0x23   :  { %v620_v31 = vmul.f32 %v565_v12, %v450_v39  ;;  %v621_v9 = vmul.f32 %v569_v13, %v451_v44  ;;  %v622_v37 = vmul.f32 %v573_v15, %v452_v45  ;;  %v623_v38 = vmul.f32 %v577_v21, %v1465_v23  ;;  %v1177_v44 = vld [vmem:[%s1461_s0 + $0x48] sm:$0xff]  ;;  %v1233_v21 = vld [vmem:[%s1461_s0 + $0x78] sm:$0xff] }
  0x24   :  { %v217_v35 = vadd.f32 %v216_v28, %v1063_v1  ;;  %v1466_v49 = vunpack.c.l.bf16 %v979_v34  ;;  %v1467_v53 = vunpack.c.h.bf16 %v979_v34  ;;  %v1468_v56 = vunpack.c.l.bf16 %v984_v36 }
  0x25   :  { %v1469_v1 = vunpack.c.h.bf16 %v984_v36  ;;  %v1182_v45 = vmul.f32 %v597_v8, %v458_v62  ;;  %v1184_v34 = vmul.f32 %v601_v51, %v459_v20  ;;  %v634_v57 = vadd.f32 %v619_v18, %v618_v0  ;;  %v1189_v36 = vld [vmem:[%s1461_s0 + $0x50] sm:$0xff]  ;;  %v1207_v20 = vld [vmem:[%s1461_s0 + $0x60] sm:$0xff] }
  0x26   :  { %v624_v52 = vmul.f32 %v581_v22, %v1466_v49  ;;  %v625_v54 = vmul.f32 %v585_v6, %v1467_v53  ;;  %v1168_v39 = vmul.f32 %v589_v25, %v1468_v56  ;;  %v218_v33 = vadd.f32 %v217_v35, %v1067_v11  ;;  %v253_v25 = vld [vmem:[%s1462_s1 + $0x18] sm:$0xff] }
  0x27   :  { %v1172_v24 = vmul.f32 %v593_v46, %v1469_v1  ;;  %v1196_v59 = vmul.f32 %v605_v17, %v460_v26  ;;  %v1198_v11 = vmul.f32 %v609_v29, %v461_v27  ;;  %v1200_v48 = vmul.f32 %v613_v30, %v462_v47  ;;  %v252_v47 = vld [vmem:[%s1462_s1 + $0x10] sm:$0xff] }
  0x28   :  { %v1202_v62 = vmul.f32 %v617_v32, %v463_v50  ;;  %v219_v60 = vadd.f32 %v218_v33, %v1071_v2  ;;  %v635_v61 = vadd.f32 %v634_v57, %v620_v31  ;;  %v237_v26 = vunpack.c.h.bf16 %v1105_v19  ;;  %v1223_v50 = vld [vmem:[%s1461_s0 + $0x70] sm:$0xff] }
  0x29   :  { %v238_v27 = vunpack.c.l.bf16 %v1177_v44  ;;  %v239_v2 = vunpack.c.h.bf16 %v1177_v44  ;;  %v240_v10 = vunpack.c.l.bf16 %v1189_v36  ;;  %v241_v12 = vunpack.c.h.bf16 %v1189_v36  ;;  %v1319_v36 = vld [vmem:[%s1461_s0 + $0xc8] sm:$0xff] }
  0x2a   :  { %v242_v13 = vunpack.c.l.bf16 %v1194_v58  ;;  %v220_v15 = vadd.f32 %v219_v60, %v1075_v3  ;;  %v636_v16 = vadd.f32 %v635_v61, %v621_v9  ;;  %v243_v22 = vunpack.c.h.bf16 %v1194_v58 }
  0x2b   :  { %v244_v6 = vunpack.c.l.bf16 %v1207_v20  ;;  %v245_v46 = vunpack.c.h.bf16 %v1207_v20  ;;  %v246_v8 = vunpack.c.l.bf16 %v1213_v63  ;;  %v247_v3 = vunpack.c.h.bf16 %v1213_v63  ;;  %v1341_v20 = vld [vmem:[%s1461_s0 + $0xd8] sm:$0xff] }
  0x2c   :  { %v254_v51 = vunpack.c.l.bf16 %v252_v47  ;;  %v221_v28 = vadd.f32 %v220_v15, %v1087_v4  ;;  %v637_v17 = vadd.f32 %v636_v16, %v622_v37  ;;  %v248_v0 = vunpack.c.l.bf16 %v1223_v50 }
  0x2d   :  { %v255_v18 = vunpack.c.h.bf16 %v252_v47  ;;  %v249_v29 = vunpack.c.h.bf16 %v1223_v50  ;;  %v250_v30 = vunpack.c.l.bf16 %v1233_v21  ;;  %v251_v32 = vunpack.c.h.bf16 %v1233_v21 }
  0x2e   :  { %v256_v31 = vunpack.c.l.bf16 %v253_v25  ;;  %v222_v35 = vadd.f32 %v221_v28, %v1091_v14  ;;  %v638_v9 = vadd.f32 %v637_v17, %v623_v38  ;;  %v257_v23 = vunpack.c.h.bf16 %v253_v25 }
  0x2f   :  { %v265_v49 = vrot.slane %v254_v51, %v989_v40  ;;  %v269_v53 = vrot.slane %v254_v51, %v991_v41  ;;  %v273_v4 = vrot.slane %v254_v51, %v993_v42  ;;  %v277_v37 = vrot.slane %v254_v51, %v995_v43 }
  0x30   :  { %v281_v56 = vrot.slane %v255_v18, %v989_v40  ;;  %v223_v1 = vadd.f32 %v222_v35, %v1095_v5  ;;  %v639_v33 = vadd.f32 %v638_v9, %v624_v52  ;;  %v285_v57 = vrot.slane %v255_v18, %v991_v41 }
  0x31   :  { %v289_v60 = vrot.slane %v255_v18, %v993_v42  ;;  %v293_v14 = vrot.slane %v255_v18, %v995_v43  ;;  %v297_v38 = vrot.slane %v256_v31, %v989_v40  ;;  %v301_v61 = vrot.slane %v256_v31, %v991_v41 }
  0x32   :  { %v305_v47 = vrot.slane %v256_v31, %v993_v42  ;;  %v224_v15 = vadd.f32 %v223_v1, %v1109_v7  ;;  %v640_v16 = vadd.f32 %v639_v33, %v625_v54  ;;  %v309_v25 = vrot.slane %v256_v31, %v995_v43 }
  0x33   :  { %v313_v5 = vrot.slane %v257_v23, %v989_v40  ;;  %v317_v52 = vrot.slane %v257_v23, %v991_v41  ;;  %v321_v51 = vrot.slane %v257_v23, %v993_v42  ;;  %v345_v28 = vrot.slane %v265_v49, %v989_v40 }
  0x34   :  { %v349_v17 = vrot.slane %v269_v53, %v989_v40  ;;  %225 = vadd.xlane.f32.xlu0 %v224_v15  ;;  %v641_v18 = vadd.f32 %v640_v16, %v1168_v39  ;;  %v325_v35 = vrot.slane %v257_v23, %v995_v43  ;;  %v353_v7 = vrot.slane %v273_v4, %v989_v40 }
  0x35   :  { %v357_v54 = vrot.slane %v277_v37, %v989_v40  ;;  %v361_v31 = vrot.slane %v281_v56, %v989_v40  ;;  %v365_v9 = vrot.slane %v285_v57, %v989_v40  ;;  %v369_v1 = vrot.slane %v289_v60, %v989_v40 }
  0x36   :  { %v373_v33 = vrot.slane %v293_v14, %v989_v40  ;;  %v642_v49 = vadd.f32 %v641_v18, %v1172_v24  ;;  %v377_v53 = vrot.slane %v297_v38, %v989_v40  ;;  %v381_v39 = vrot.slane %v301_v61, %v989_v40 }
  0x37   :  { %v385_v23 = vrot.slane %v305_v47, %v989_v40  ;;  %v389_v4 = vrot.slane %v309_v25, %v989_v40  ;;  %v393_v37 = vrot.slane %v313_v5, %v989_v40  ;;  %v406_v56 = vmul.f32 %v345_v28, %v236_v55 }
  0x38   :  { %v407_v57 = vmul.f32 %v349_v17, %v237_v26  ;;  %v643_v60 = vadd.f32 %v642_v49, %v1182_v45  ;;  %v397_v24 = vrot.slane %v317_v52, %v989_v40  ;;  %v1289_v14 = vrot.slane %v321_v51, %v989_v40  ;;  %v1305_v45 = vld [vmem:[%s1461_s0 + $0xc0] sm:$0xff]  ;;  %v676_v51 = vld [vmem:[%s1462_s1 + $0x30] sm:$0xff]  ;;  %v1381_v17 = vld [vmem:[%s1461_s0 + $0xf8] sm:$0xff] }
  0x39   :  { %v1292_v38 = vrot.slane %v325_v35, %v989_v40  ;;  %v408_v61 = vmul.f32 %v353_v7, %v238_v27  ;;  %v409_v47 = vmul.f32 %v357_v54, %v239_v2  ;;  %v410_v19 = vmul.f32 %v361_v31, %v240_v10  ;;  %v677_v7 = vld [vmem:[%s1462_s1 + $0x38] sm:$0xff] }
  0x3a   :  { %v411_v55 = vmul.f32 %v365_v9, %v241_v12  ;;  %v644_v26 = vadd.f32 %v643_v60, %v1184_v34  ;;  %v412_v15 = vmul.f32 %v369_v1, %v242_v13  ;;  %v413_v44 = vmul.f32 %v373_v33, %v243_v22  ;;  %v1336_v12 = vld [vmem:[%s1461_s0 + $0xd0] sm:$0xff] }
  0x3b   :  { %v1314_v27 = vmul.f32 %v377_v53, %v244_v6  ;;  %v1323_v2 = vmul.f32 %v381_v39, %v245_v46  ;;  %v1327_v34 = vmul.f32 %v385_v23, %v246_v8  ;;  %v1331_v58 = vmul.f32 %v389_v4, %v247_v3  ;;  %v1355_v6 = vld [vmem:[%s1461_s0 + $0xe0] sm:$0xff]  ;;  %v1366_v3 = vld [vmem:[%s1461_s0 + $0xf0] sm:$0xff] }
  0x3c   :  { %v422_v10 = vadd.f32 %v407_v57, %v406_v56  ;;  %v645_v13 = vadd.f32 %v644_v26, %v1196_v59  ;;  %v1346_v22 = vmul.f32 %v393_v37, %v248_v0  ;;  %v1350_v63 = vmul.f32 %v397_v24, %v249_v29  ;;  %v1361_v59 = vld [vmem:[%s1461_s0 + $0xe8] sm:$0xff] }
  0x3d   :  { %v660_v46 = vunpack.c.l.bf16 %v1305_v45  ;;  %v661_v50 = vunpack.c.h.bf16 %v1305_v45  ;;  %v662_v0 = vunpack.c.l.bf16 %v1319_v36  ;;  %v663_v29 = vunpack.c.h.bf16 %v1319_v36 }
  0x3e   :  { %v423_v8 = vadd.f32 %v422_v10, %v408_v61  ;;  %v646_v16 = vadd.f32 %v645_v13, %v1198_v11  ;;  %v664_v25 = vunpack.c.l.bf16 %v1336_v12  ;;  %v665_v5 = vunpack.c.h.bf16 %v1336_v12 }
  0x3f   :  { %v666_v52 = vunpack.c.l.bf16 %v1341_v20  ;;  %v667_v18 = vunpack.c.h.bf16 %v1341_v20  ;;  %v668_v11 = vunpack.c.l.bf16 %v1355_v6  ;;  %v669_v35 = vunpack.c.h.bf16 %v1355_v6 }
  0x40   :  { %v424_v28 = vadd.f32 %v423_v8, %v409_v47  ;;  %v647_v54 = vadd.f32 %v646_v16, %v1200_v48  ;;  %v670_v31 = vunpack.c.l.bf16 %v1361_v59  ;;  %v671_v9 = vunpack.c.h.bf16 %v1361_v59 }
  0x41   :  { %v672_v1 = vunpack.c.l.bf16 %v1366_v3  ;;  %v673_v49 = vunpack.c.h.bf16 %v1366_v3  ;;  %v678_v53 = vunpack.c.l.bf16 %v676_v51  ;;  %v679_v39 = vunpack.c.h.bf16 %v676_v51 }
  0x42   :  { %v425_v33 = vadd.f32 %v424_v28, %v410_v19  ;;  %v648_v23 = vadd.f32 %v647_v54, %v1202_v62  ;;  %v674_v4 = vunpack.c.l.bf16 %v1381_v17  ;;  %v675_v37 = vunpack.c.h.bf16 %v1381_v17 }
  0x43   :  { %v680_v56 = vunpack.c.l.bf16 %v677_v7  ;;  %v681_v48 = vunpack.c.h.bf16 %v677_v7  ;;  %v689_v60 = vrot.slane %v678_v53, %v989_v40  ;;  %v693_v24 = vrot.slane %v678_v53, %v991_v41 }
  0x44   :  { %v426_v57 = vadd.f32 %v425_v33, %v411_v55  ;;  %649 = vadd.xlane.f32.xlu1 %v648_v23  ;;  %v697_v61 = vrot.slane %v678_v53, %v993_v42  ;;  %v701_v47 = vrot.slane %v678_v53, %v995_v43  ;;  %v705_v19 = vrot.slane %v679_v39, %v989_v40 }
  0x45   :  { %v709_v62 = vrot.slane %v679_v39, %v991_v41  ;;  %v713_v10 = vrot.slane %v679_v39, %v993_v42  ;;  %v717_v13 = vrot.slane %v679_v39, %v995_v43  ;;  %v725_v55 = vrot.slane %v680_v56, %v991_v41 }
  0x46   :  { %v427_v26 = vadd.f32 %v426_v57, %v412_v15  ;;  %v721_v6 = vrot.slane %v680_v56, %v989_v40  ;;  %v729_v8 = vrot.slane %v680_v56, %v993_v42  ;;  %v733_v59 = vrot.slane %v680_v56, %v995_v43 }
  0x47   :  { %v741_v3 = vrot.slane %v681_v48, %v991_v41  ;;  %v737_v51 = vrot.slane %v681_v48, %v989_v40  ;;  %v745_v28 = vrot.slane %v681_v48, %v993_v42  ;;  %v749_v15 = vrot.slane %v681_v48, %v995_v43 }
  0x48   :  { %v428_v16 = vadd.f32 %v427_v26, %v413_v44  ;;  %v769_v17 = vrot.slane %v689_v60, %v989_v40  ;;  %v773_v7 = vrot.slane %v693_v24, %v989_v40  ;;  %v777_v54 = vrot.slane %v697_v61, %v989_v40 }
  0x49   :  { %v781_v33 = vrot.slane %v701_v47, %v989_v40  ;;  %v785_v39 = vrot.slane %v705_v19, %v989_v40  ;;  %v789_v41 = vrot.slane %v709_v62, %v989_v40  ;;  %v793_v44 = vrot.slane %v713_v10, %v989_v40 }
  0x4a   :  { %v429_v53 = vadd.f32 %v428_v16, %v1314_v27  ;;  %v797_v42 = vrot.slane %v717_v13, %v989_v40  ;;  %v801_v43 = vrot.slane %v721_v6, %v989_v40  ;;  %v805_v23 = vrot.slane %v725_v55, %v989_v40 }
  0x4b   :  { %v809_v56 = vrot.slane %v729_v8, %v989_v40  ;;  %v813_v48 = vrot.slane %v733_v59, %v989_v40  ;;  %v817_v27 = vrot.slane %v737_v51, %v989_v40  ;;  %v821_v60 = vrot.slane %v741_v3, %v989_v40 }
  0x4c   :  { %v430_v57 = vadd.f32 %v429_v53, %v1323_v2  ;;  %v825_v24 = vrot.slane %v745_v28, %v989_v40  ;;  %v829_v61 = vrot.slane %v749_v15, %v989_v40  ;;  %v830_v47 = vmul.f32 %v769_v17, %v660_v46 }
  0x4d   :  { %v831_v19 = vmul.f32 %v773_v7, %v661_v50  ;;  %v832_v2 = vmul.f32 %v777_v54, %v662_v0  ;;  %v833_v26 = vmul.f32 %v781_v33, %v663_v29  ;;  %v835_v10 = vmul.f32 %v789_v41, %v665_v5 }
  0x4e   :  { %v431_v62 = vadd.f32 %v430_v57, %v1327_v34  ;;  %v836_v40 = vmul.f32 %v793_v44, %v666_v52  ;;  %v837_v13 = vmul.f32 %v797_v42, %v667_v18  ;;  %v838_v55 = vmul.f32 %v801_v43, %v668_v11 }
  0x4f   :  { %v839_v46 = vmul.f32 %v805_v23, %v669_v35  ;;  %v840_v50 = vmul.f32 %v809_v56, %v670_v31  ;;  %v841_v6 = vmul.f32 %v813_v48, %v671_v9  ;;  %v842_v34 = vmul.f32 %v817_v27, %v672_v1 }
  0x50   :  { %v432_v45 = vadd.f32 %v431_v62, %v1331_v58  ;;  %v843_v8 = vmul.f32 %v821_v60, %v673_v49  ;;  %v844_v59 = vmul.f32 %v825_v24, %v674_v4  ;;  %v845_v0 = vmul.f32 %v829_v61, %v675_v37 }
  0x51   :  { %v846_v3 = vadd.f32 %v831_v19, %v830_v47  ;;  %v420_v36 = vmul.f32 %v1289_v14, %v250_v30  ;;  %v834_v20 = vmul.f32 %v785_v39, %v664_v25  ;;  %v421_v58 = vmul.f32 %v1292_v38, %v251_v32 }
  0x52   :  { %v433_v29 = vadd.f32 %v432_v45, %v1346_v22  ;;  %v8_v21 = vstv %s1463_s2 }
  0x53   :  { %v847_v5 = vadd.f32 %v846_v3, %v832_v2  ;;  %9 = vst [vmem:[#allocation2] sm:$0x1] %v8_v21 }
  0x54   :  { %v434_v52 = vadd.f32 %v433_v29, %v1350_v63 }
  0x55   :  { %v848_v18 = vadd.f32 %v847_v5, %v833_v26 }
  0x56   :  { %v435_v11 = vadd.f32 %v434_v52, %v420_v36 }
  0x57   :  { %v849_v35 = vadd.f32 %v848_v18, %v834_v20 }
  0x58   :  { %v436_v31 = vadd.f32 %v435_v11, %v421_v58 }
  0x59   :  { %v850_v9 = vadd.f32 %v849_v35, %v835_v10 }
  0x5a   :  { %437 = vadd.xlane.f32.xlu0 %v436_v31  ;;  %v878_v15 = vld [vmem:[#allocation2] ss:$0 sm:$0xff] }
  0x5b   :  { %v851_v1 = vadd.f32 %v850_v9, %v836_v40 }
  0x5d   :  { %v852_v30 = vadd.f32 %v851_v1, %v837_v13 }
  0x5f   :  { %v853_v14 = vadd.f32 %v852_v30, %v838_v55 }
  0x61   :  { %v854_v22 = vadd.f32 %v853_v14, %v839_v46 }
  0x63   :  { %v855_v49 = vadd.f32 %v854_v22, %v840_v50 }
  0x65   :  { %v856_v12 = vadd.f32 %v855_v49, %v841_v6 }
  0x67   :  { %v857_v25 = vadd.f32 %v856_v12, %v842_v34 }
  0x69   :  { %v858_v4 = vadd.f32 %v857_v25, %v843_v8 }
  0x6b   :  { %v859_v32 = vadd.f32 %v858_v4, %v844_v59 }
  0x6d   :  { %v860_v38 = vadd.f32 %v859_v32, %v845_v0 }
  0x6f   :  { %861 = vadd.xlane.f32.xlu1 %v860_v38 }
  0xc1   :  { %v226_v63 = vpop.xlane.xlu0 %225 }
  0xd1   :  { %v650_v51 = vpop.xlane.xlu1 %649 }
  0xe7   :  { %v438_v37 = vpop.xlane.xlu0 %437 }
  0xe8   :  { %v439_v16 = vadd.f32 %v438_v37, %v226_v63 }
  0xea   :  { %v651_v28 = vadd.f32 %v650_v51, %v439_v16 }
  0xfc   :  { %v862_v17 = vpop.xlane.xlu1 %861 }
  0xfd   :  { %v863_v7 = vadd.f32 %v862_v17, %v651_v28 }
  0xff   :  { %v871_v54 = vadd.f32 %v878_v15, %v863_v7 }
 0x101   :  { %873 = vst.msk [vmem:[%s1464_s3] sm:$0xff] %vm872_vm0, %v871_v54 }

</bundles_post_ra>
